<compile_context>
chip_gen: v7x
topology: tpu7x:2x2x1
jax: 0.10.0
libtpu: 0.0.40
codegen_flags: <defaults>
</compile_context>

<pallas_src>
import jax
import jax.numpy as jnp
from jax.experimental import pallas as pl
from jax.experimental.pallas import tpu as pltpu

IN_DIM = 1280
HID_DIM = 5120


def _default_num_splits():
    """2-way hidden-dim split only on v7x (2 TensorCores/chip); 1 elsewhere."""
    try:
        kind = jax.devices()[0].device_kind.lower()
    except Exception:
        return 1
    return 2 if ("v7" in kind or "7x" in kind) else 1


def make_mlp_kernel(num_splits):
    """Grid = (split c, hidden-tile k). Each split accumulates its (B, IN_DIM) partial of
    relu(x @ W1^T + b1) @ W2^T into its resident output block. With num_splits == 1 the
    bias + softmax epilogue is fused into the last hidden tile."""

    def kernel(x_ref, w1t_ref, b1_ref, w2t_ref, b2_ref, o_ref):
        k = pl.program_id(1)

        @pl.when(k == 0)
        def _():
            o_ref[...] = jnp.zeros_like(o_ref)

        # First linear (this hidden tile) + bias + ReLU.  bf16 inputs, f32 accumulation.
        h = jnp.dot(x_ref[...], w1t_ref[...], preferred_element_type=jnp.float32)
        h = jnp.maximum(h + b1_ref[...], 0.0)

        # Second linear: partial contribution of this hidden tile, accumulated in f32.
        o_ref[...] += jnp.dot(h.astype(jnp.bfloat16), w2t_ref[...],
                              preferred_element_type=jnp.float32)

        if num_splits == 1:
            # Fused epilogue on the last hidden tile: bias + exact softmax.
            @pl.when(k == pl.num_programs(1) - 1)
            def _():
                logits = o_ref[...] + b2_ref[...]
                m = jnp.max(logits, axis=-1, keepdims=True)
                e = jnp.exp(logits - m)
                o_ref[...] = (e / jnp.sum(e, axis=-1, keepdims=True)).astype(o_ref.dtype)

    return kernel


def softmax_epilogue_kernel(p_ref, b2_ref, o_ref):
    """Reduce the per-split partials, add b2, exact softmax over the feature axis."""
    logits = jnp.sum(p_ref[...], axis=0) + b2_ref[...]
    m = jnp.max(logits, axis=-1, keepdims=True)
    e = jnp.exp(logits - m)
    o_ref[...] = (e / jnp.sum(e, axis=-1, keepdims=True)).astype(o_ref.dtype)


def mlp_forward(x, w1t, b1, w2t, b2, *, tk=1280, num_splits=None):
    B, D = x.shape
    assert D == IN_DIM
    assert w1t.shape == (IN_DIM, HID_DIM) and w2t.shape == (HID_DIM, IN_DIM)
    if num_splits is None:
        num_splits = _default_num_splits()
    assert HID_DIM % (num_splits * tk) == 0
    kht = HID_DIM // (num_splits * tk)   # hidden tiles per split
    n_tiles = num_splits * kht

    x_bf16 = x.astype(jnp.bfloat16)
    # Pre-tile W1^T -> (n_tiles, IN_DIM, tk) so each grid step's W1 tile is one
    # contiguous HBM block (W2^T row-tiles are already contiguous).
    w1t_tiled = w1t.reshape(IN_DIM, n_tiles, tk).transpose(1, 0, 2)
    b1_2d = b1.reshape(1, HID_DIM).astype(jnp.float32)   # single row -> col slices contiguous
    b2_2d = b2.reshape(1, IN_DIM).astype(jnp.float32)

    if num_splits > 1:
        dims = (pltpu.CORE_PARALLEL, pltpu.ARBITRARY)     # v7x: one split per TensorCore
    else:
        dims = ("arbitrary", "arbitrary")

    cost = pl.CostEstimate(
        flops=2 * 2 * B * IN_DIM * HID_DIM,               # two matmuls
        transcendentals=B * IN_DIM,                       # softmax exp
        bytes_accessed=(2 * IN_DIM * HID_DIM) * 2         # bf16 W1 + W2 stream
        + B * IN_DIM * 2 + (HID_DIM + IN_DIM) * 4 + num_splits * B * IN_DIM * 4,
    )

    partials = pl.pallas_call(
        make_mlp_kernel(num_splits),
        out_shape=jax.ShapeDtypeStruct((num_splits, B, IN_DIM), jnp.float32),
        grid_spec=pltpu.PrefetchScalarGridSpec(
            num_scalar_prefetch=0,
            grid=(num_splits, kht),
            in_specs=[
                pl.BlockSpec((B, IN_DIM), lambda c, k: (0, 0)),                    # x (resident)
                pl.BlockSpec((None, IN_DIM, tk), lambda c, k: (c * kht + k, 0, 0)),  # W1^T tile
                pl.BlockSpec((1, tk), lambda c, k: (0, c * kht + k)),               # b1 tile
                pl.BlockSpec((tk, IN_DIM), lambda c, k: (c * kht + k, 0)),          # W2^T tile
                pl.BlockSpec((1, IN_DIM), lambda c, k: (0, 0)),                     # b2 (resident)
            ],
            # One resident f32 accumulator block per split.
            out_specs=pl.BlockSpec((None, B, IN_DIM), lambda c, k: (c, 0, 0)),
        ),
        compiler_params=pltpu.CompilerParams(
            dimension_semantics=dims,
            vmem_limit_bytes=32 * 1024 * 1024,  # ~13 MB double-buffered weight tiles + residents
        ),
        cost_estimate=cost,
    )(x_bf16, w1t_tiled, b1_2d, w2t, b2_2d)

    if num_splits == 1:
        # Epilogue already fused in-kernel; just drop the size-1 split axis.
        return partials[0]

    # v7x path: tiny epilogue reducing the per-core partials (80 KB) + bias + softmax.
    return pl.pallas_call(
        softmax_epilogue_kernel,
        out_shape=jax.ShapeDtypeStruct((B, IN_DIM), jnp.float32),
    )(partials, b2_2d)


def make_params(key):
    """Deterministic init mimicking nn.init.normal_(mean=0, std=2)."""
    k1, k2, k3, k4 = jax.random.split(key, 4)
    w1 = 2.0 * jax.random.normal(k1, (HID_DIM, IN_DIM), jnp.float32)   # torch [out, in]
    b1 = 2.0 * jax.random.normal(k2, (HID_DIM,), jnp.float32)
    w2 = 2.0 * jax.random.normal(k3, (IN_DIM, HID_DIM), jnp.float32)
    b2 = 2.0 * jax.random.normal(k4, (IN_DIM,), jnp.float32)
    # Pre-transpose for y = x @ W^T + b; store weights bf16 (halves the HBM stream).
    return w1.T.astype(jnp.bfloat16), b1, w2.T.astype(jnp.bfloat16), b2


def reference(x, w1t, b1, w2t, b2):
    """Pure-JAX reference using the same bf16 weights / f32 accumulation as the kernel."""
    xb = x.astype(jnp.bfloat16)
    h = jnp.dot(xb, w1t, preferred_element_type=jnp.float32) + b1
    h = jnp.maximum(h, 0.0)
    logits = jnp.dot(h.astype(jnp.bfloat16), w2t,
                     preferred_element_type=jnp.float32) + b2
    return jax.nn.softmax(logits, axis=-1)


if __name__ == "__main__":
    key = jax.random.PRNGKey(0)
    kx, kp = jax.random.split(key)

    B = 8  # small batch; feature dims (1280, 5120) are fixed by the module.
    x = jax.random.normal(kx, (B, IN_DIM), jnp.float32)
    w1t, b1, w2t, b2 = make_params(kp)

    out = mlp_forward(x, w1t, b1, w2t, b2)
    out = jax.block_until_ready(out)

    ref = reference(x, w1t, b1, w2t, b2)
    assert out.shape == (B, IN_DIM)
    # Tolerances account for tile-wise f32 accumulation order; bf16 weights are an
    # intentional precision trade-off vs. a float32 PyTorch MLP (documented).
    assert bool(jnp.allclose(out, ref, atol=1e-2, rtol=1e-2))
    assert bool(jnp.all(jnp.argmax(out, axis=-1) == jnp.argmax(ref, axis=-1)))
    assert bool(jnp.allclose(jnp.sum(out, axis=-1), 1.0, atol=1e-3))

    print("KERNEL_OK")
</pallas_src>

<mosaic_0001>
module attributes {stable_mosaic.version = 11 : i64} {
  func.func @kernel(%arg0: i32, %arg1: i32, %arg2: memref<8x1280xbf16, #tpu.memory_space<vmem>>, %arg3: memref<1x1280x1280xbf16, #tpu.memory_space<vmem>>, %arg4: memref<1x1280xf32, #tpu.memory_space<vmem>>, %arg5: memref<1280x1280xbf16, #tpu.memory_space<vmem>>, %arg6: memref<1x1280xf32, #tpu.memory_space<vmem>>, %arg7: memref<1x8x1280xf32, #tpu.memory_space<vmem>>) attributes {dimension_semantics = [#tpu.dimension_semantics<arbitrary>, #tpu.dimension_semantics<arbitrary>], iteration_bounds = array<i64: 1, 4>, scalar_prefetch = 0 : i64, scratch_operands = 0 : i64, tpu.core_type = #tpu.core_type<tc>, window_params = [{pipeline_mode = #tpu.pipeline_mode<synchronous>, transform_indices = @transform_0, window_bounds = array<i64: 8, 1280>}, {transform_indices = @transform_1, window_bounds = array<i64: 1, 1280, 1280>}, {transform_indices = @transform_2, window_bounds = array<i64: 1, 1280>}, {transform_indices = @transform_3, window_bounds = array<i64: 1280, 1280>}, {pipeline_mode = #tpu.pipeline_mode<synchronous>, transform_indices = @transform_4, window_bounds = array<i64: 1, 1280>}, {transform_indices = @transform_5, window_bounds = array<i64: 1, 8, 1280>}]} {
    %c0_i32 = arith.constant 0 : i32
    %0 = arith.cmpi eq, %arg1, %c0_i32 : i32
    %1 = arith.extui %0 : i1 to i32
    %c0_i32_0 = arith.constant 0 : i32
    %2 = arith.cmpi ne, %1, %c0_i32_0 : i32
    scf.if %2 {
      %cst_18 = arith.constant 0.000000e+00 : f32
      %24 = vector.broadcast %cst_18 : f32 to vector<8x1280xf32>
      %c0_19 = arith.constant 0 : index
      %c0_20 = arith.constant 0 : index
      %c0_21 = arith.constant 0 : index
      %25 = vector.load %arg7[%c0_19, %c0_20, %c0_21] : memref<1x8x1280xf32, #tpu.memory_space<vmem>>, vector<1x8x1280xf32>
      %26 = vector.shape_cast %25 : vector<1x8x1280xf32> to vector<8x1280xf32>
      %27 = vector.shape_cast %24 : vector<8x1280xf32> to vector<1x8x1280xf32>
      tpu.vector_store %arg7[%c0_19, %c0_20, %c0_21], %27 {strides = array<i32>} : memref<1x8x1280xf32, #tpu.memory_space<vmem>>, vector<1x8x1280xf32>,
    } else {
    }
    %c0 = arith.constant 0 : index
    %c0_1 = arith.constant 0 : index
    %3 = vector.load %arg2[%c0, %c0_1] : memref<8x1280xbf16, #tpu.memory_space<vmem>>, vector<8x1280xbf16>
    %c0_2 = arith.constant 0 : index
    %c0_3 = arith.constant 0 : index
    %c0_4 = arith.constant 0 : index
    %4 = vector.load %arg3[%c0_2, %c0_3, %c0_4] : memref<1x1280x1280xbf16, #tpu.memory_space<vmem>>, vector<1x1280x1280xbf16>
    %5 = vector.shape_cast %4 : vector<1x1280x1280xbf16> to vector<1280x1280xbf16>
    %cst = arith.constant dense<0.000000e+00> : vector<8x1280xf32>
    %6 = tpu.matmul %3, %5, %cst {dimension_numbers = #tpu.dot_dimension_numbers<[1], [0], [0], [1], [0, 0, 1, 1], [], []>} : vector<8x1280xbf16>, vector<1280x1280xbf16>, vector<8x1280xf32> -> vector<8x1280xf32>
    %c0_5 = arith.constant 0 : index
    %c0_6 = arith.constant 0 : index
    %7 = vector.load %arg4[%c0_5, %c0_6] : memref<1x1280xf32, #tpu.memory_space<vmem>>, vector<1x1280xf32>
    %8 = vector.broadcast %7 : vector<1x1280xf32> to vector<8x1280xf32>
    %9 = arith.addf %6, %8 : vector<8x1280xf32>
    %cst_7 = arith.constant 0.000000e+00 : f32
    %10 = vector.broadcast %cst_7 : f32 to vector<8x1280xf32>
    %11 = arith.maximumf %9, %10 : vector<8x1280xf32>
    %c0_8 = arith.constant 0 : index
    %c0_9 = arith.constant 0 : index
    %c0_10 = arith.constant 0 : index
    %12 = vector.load %arg7[%c0_8, %c0_9, %c0_10] : memref<1x8x1280xf32, #tpu.memory_space<vmem>>, vector<1x8x1280xf32>
    %13 = vector.shape_cast %12 : vector<1x8x1280xf32> to vector<8x1280xf32>
    %14 = arith.truncf %11 : vector<8x1280xf32> to vector<8x1280xbf16>
    %c0_11 = arith.constant 0 : index
    %c0_12 = arith.constant 0 : index
    %15 = vector.load %arg5[%c0_11, %c0_12] : memref<1280x1280xbf16, #tpu.memory_space<vmem>>, vector<1280x1280xbf16>
    %cst_13 = arith.constant dense<0.000000e+00> : vector<8x1280xf32>
    %16 = tpu.matmul %14, %15, %cst_13 {dimension_numbers = #tpu.dot_dimension_numbers<[1], [0], [0], [1], [0, 0, 1, 1], [], []>} : vector<8x1280xbf16>, vector<1280x1280xbf16>, vector<8x1280xf32> -> vector<8x1280xf32>
    %17 = arith.addf %13, %16 : vector<8x1280xf32>
    %c0_14 = arith.constant 0 : index
    %c0_15 = arith.constant 0 : index
    %c0_16 = arith.constant 0 : index
    %18 = vector.load %arg7[%c0_14, %c0_15, %c0_16] : memref<1x8x1280xf32, #tpu.memory_space<vmem>>, vector<1x8x1280xf32>
    %19 = vector.shape_cast %18 : vector<1x8x1280xf32> to vector<8x1280xf32>
    %20 = vector.shape_cast %17 : vector<8x1280xf32> to vector<1x8x1280xf32>
    tpu.vector_store %arg7[%c0_14, %c0_15, %c0_16], %20 {strides = array<i32>} : memref<1x8x1280xf32, #tpu.memory_space<vmem>>, vector<1x8x1280xf32>,
    %c3_i32 = arith.constant 3 : i32
    %21 = arith.cmpi eq, %arg1, %c3_i32 : i32
    %22 = arith.extui %21 : i1 to i32
    %c0_i32_17 = arith.constant 0 : i32
    %23 = arith.cmpi ne, %22, %c0_i32_17 : i32
    scf.if %23 {
      %c0_18 = arith.constant 0 : index
      %c0_19 = arith.constant 0 : index
      %c0_20 = arith.constant 0 : index
      %24 = vector.load %arg7[%c0_18, %c0_19, %c0_20] : memref<1x8x1280xf32, #tpu.memory_space<vmem>>, vector<1x8x1280xf32>
      %25 = vector.shape_cast %24 : vector<1x8x1280xf32> to vector<8x1280xf32>
      %c0_21 = arith.constant 0 : index
      %c0_22 = arith.constant 0 : index
      %26 = vector.load %arg6[%c0_21, %c0_22] : memref<1x1280xf32, #tpu.memory_space<vmem>>, vector<1x1280xf32>
      %27 = vector.broadcast %26 : vector<1x1280xf32> to vector<8x1280xf32>
      %28 = arith.addf %25, %27 : vector<8x1280xf32>
      %cst_23 = arith.constant dense<0xFF800000> : vector<8xf32>
      %29 = vector.multi_reduction <maximumf>, %28, %cst_23 [1] : vector<8x1280xf32> to vector<8xf32>
      %30 = vector.shape_cast %29 : vector<8xf32> to vector<8x1xf32>
      %31 = vector.broadcast %30 : vector<8x1xf32> to vector<8x1280xf32>
      %32 = arith.subf %28, %31 : vector<8x1280xf32>
      %33 = math.exp %32 : vector<8x1280xf32>
      %cst_24 = arith.constant dense<0.000000e+00> : vector<8xf32>
      %34 = vector.multi_reduction <add>, %33, %cst_24 [1] : vector<8x1280xf32> to vector<8xf32>
      %35 = vector.shape_cast %34 : vector<8xf32> to vector<8x1xf32>
      %36 = vector.broadcast %35 : vector<8x1xf32> to vector<8x1280xf32>
      %37 = arith.divf %33, %36 : vector<8x1280xf32>
      %c0_25 = arith.constant 0 : index
      %c0_26 = arith.constant 0 : index
      %c0_27 = arith.constant 0 : index
      %38 = vector.load %arg7[%c0_25, %c0_26, %c0_27] : memref<1x8x1280xf32, #tpu.memory_space<vmem>>, vector<1x8x1280xf32>
      %39 = vector.shape_cast %38 : vector<1x8x1280xf32> to vector<8x1280xf32>
      %40 = vector.shape_cast %37 : vector<8x1280xf32> to vector<1x8x1280xf32>
      tpu.vector_store %arg7[%c0_25, %c0_26, %c0_27], %40 {strides = array<i32>} : memref<1x8x1280xf32, #tpu.memory_space<vmem>>, vector<1x8x1280xf32>,
    } else {
    }
    return
  }
  func.func @transform_0(%arg0: i32, %arg1: i32) -> (i32, i32) {
    %c0_i32 = arith.constant 0 : i32
    %c0_i32_0 = arith.constant 0 : i32
    %c0_i32_1 = arith.constant 0 : i32
    return %c0_i32, %c0_i32_0 : i32, i32
  }
  func.func @transform_1(%arg0: i32, %arg1: i32) -> (i32, i32, i32) {
    %c4_i32 = arith.constant 4 : i32
    %0 = arith.muli %arg0, %c4_i32 : i32
    %1 = arith.addi %0, %arg1 : i32
    %c0_i32 = arith.constant 0 : i32
    %c0_i32_0 = arith.constant 0 : i32
    %c0_i32_1 = arith.constant 0 : i32
    return %1, %c0_i32, %c0_i32_0 : i32, i32, i32
  }
  func.func @transform_2(%arg0: i32, %arg1: i32) -> (i32, i32) {
    %c4_i32 = arith.constant 4 : i32
    %0 = arith.muli %arg0, %c4_i32 : i32
    %1 = arith.addi %0, %arg1 : i32
    %c0_i32 = arith.constant 0 : i32
    %c0_i32_0 = arith.constant 0 : i32
    return %c0_i32, %1 : i32, i32
  }
  func.func @transform_3(%arg0: i32, %arg1: i32) -> (i32, i32) {
    %c4_i32 = arith.constant 4 : i32
    %0 = arith.muli %arg0, %c4_i32 : i32
    %1 = arith.addi %0, %arg1 : i32
    %c0_i32 = arith.constant 0 : i32
    %c0_i32_0 = arith.constant 0 : i32
    return %1, %c0_i32 : i32, i32
  }
  func.func @transform_4(%arg0: i32, %arg1: i32) -> (i32, i32) {
    %c0_i32 = arith.constant 0 : i32
    %c0_i32_0 = arith.constant 0 : i32
    %c0_i32_1 = arith.constant 0 : i32
    return %c0_i32, %c0_i32_0 : i32, i32
  }
  func.func @transform_5(%arg0: i32, %arg1: i32) -> (i32, i32, i32) {
    %c0_i32 = arith.constant 0 : i32
    %c0_i32_0 = arith.constant 0 : i32
    %c0_i32_1 = arith.constant 0 : i32
    return %arg0, %c0_i32, %c0_i32_0 : i32, i32, i32
  }
}

</mosaic_0001>

<bundles_post_ra>
// kernel: tpu_custom_call.1
= control target key start
LH: loop header
LB: loop body
LE: loop exit
PB: predicated region body
PF: predicated region fallthrough
CT: control target
= control target key end

     0   :  { %s19239_s0 = inlined_call_operand.hbm [shape: bf16[8,1280], index: 0, kind: input, shape index: {}]   ;;  %s19240_s1 = inlined_call_operand.hbm [shape: bf16[4,1280,1280], index: 1, kind: input, shape index: {}]   ;;  %s19241_s2 = inlined_call_operand.hbm [shape: f32[1,5120], index: 2, kind: input, shape index: {}]   ;;  %s19242_s3 = inlined_call_operand.hbm [shape: bf16[5120,1280], index: 3, kind: input, shape index: {}]   ;;  %s19243_s4 = inlined_call_operand.hbm [shape: f32[1,1280], index: 4, kind: input, shape index: {}]   ;;  %s19244_s5 = inlined_call_operand.hbm [shape: f32[1,8,1280], index: 5, kind: output, shape index: {}]  }
   0x1   :  { %19259 = sst [smem:[#allocation19_spill]] %s19240_s1 }
   0x2   :  { %19260 = sst [smem:[#allocation20_spill]] %s19243_s4 }
   0x3   :  { %19261 = sst [smem:[#allocation21_spill]] %s19244_s5 }
   0x4   :  { %10 = vsyncpa [#allocation3], 0 }
   0x5   :  { %11 = vsyncpa [#allocation6], 0 }
   0x6   :  { %13 = vsyncpa [#allocation6 + $0x1], 0 }
   0x7   :  { %14 = vsyncpa [#allocation9], 0 }
   0x8   :  { %16 = vsyncpa [#allocation9 + $0x1], 0 }
   0x9   :  { %17 = vsyncpa [#allocation4], 0  ;;  %s17010_s18 = smov 0   ;;  %s17012_s19 = smov 0  }
   0xa   :  { %s17014_s20 = smov 0   ;;  %s17016_s21 = smov 0  }
   0xb   :  { %s17018_s22 = smov 0   ;;  %s17020_s23 = smov 0  }
   0xc LB: > { %s17039_s24 = sadd.s32 4294967295, %s16969_s23   ;;  %s67_s25 = sadd.s32 1, %s16957_s20  ;;  %s16969_s23 = sphi %s17020_s23, %s23_s23   ;;  %s16965_s22 = sphi %s17018_s22, %s19292_s22   ;;  %s16961_s21 = sphi %s17016_s21, %s19291_s21   ;;  %s16957_s20 = sphi %s17014_s20, %s19290_s20   ;;  %s16953_s19 = sphi %s17012_s19, %s19289_s19   ;;  %s16949_s18 = sphi %s17010_s18, %s19288_s18  }
   0xd   : > { %p74_p0 = scmp.ne.s32.totalorder %s16957_s20, %s16953_s19  ;;  %p75_p1 = scmp.eq.s32.totalorder %s16969_s23, 0 }
   0xe   : > { %p80_p2 = scmp.ne.s32.totalorder %s16953_s19, %s16949_s18  ;;  %p19245_p3 = scmp.eq.s32.totalorder %s17039_s24, 0 }
   0xf   : > { %p76_p4 = por %p75_p1, %p74_p0  ;;  %p12476_p5 = scmp.ge.s32.totalorder %s16969_s23, 1 }
  0x10   : > { %p17050_p6 = por %p19245_p3, %p80_p2  ;;  %p198_p7 = scmp.lt.s32.totalorder %s16969_s23, 5 }
  0x11   : > { %s16971_s28 = smov [#allocation10]   ;;  %p14237_p10 = scmp.lt.s32.totalorder %s16969_s23, 4 }
  0x12   : > { %s19262_s26 = scalar_select %p17050_p6, 1, 0 }
  0x13   : > { %p17055_p8 = pnand %p12476_p5, %p198_p7  ;;  %s222_s29 = sshll.u32 %s16971_s28, 4  ;;  %s223_s29 = int_to_ptr.vmem [resolvable:$true] %s222_s29 }
  0x14   : > { %s19250_s30 = sand.u32 1, %s16969_s23   ;;  %p17069_p12 = pnand %p14237_p10, %p76_p4 }
  0x15   : > { %s19263_s27 = scalar_select %p17055_p8, 1, 0 }
  0x16   : > { %p14218_p9 = pneg %p17055_p8  ;;  %s19266_s4 = sld [smem:[#allocation20_spill]] }
  0x17   : > { %s19265_s7 = scalar_select %p17069_p12, 1, 0 }
  0x18   : > { %p17065_p11 = pnand %p14218_p9, %p19245_p3 }
  0x1a   : > { %s19264_s6 = scalar_select %p17065_p11, 1, 0 }
  0x1b   : > { %p19251_p0 = pneg %p17065_p11 }
  0x1c   : > { %s16731_s10 = scalar_lea.hbm %s19266_s4, 160 }
  0x1d   : > { %p16732_p13 = scmp.ne.s32.totalorder %s19266_s4, %s16731_s10  ;;  %p16738_p4 = scmp.lt.u32.totalorder %s16731_s10, %s19266_s4 }
  0x1f   : > { %p16734_p1 = pnand %p19251_p0, %p16732_p13 }
  0x21   : > { %p16735_p2 = pneg %p16734_p1 }
  0x23   : > { %p16740_p5 = pnand %p16738_p4, %p16735_p2 }
  0x25   : > { %16743 = shalt.err (!%p16740_p5)
}
  0x26   : > { %s16744_s15 = scalar_lea.vmem %s223_s29, 160  ;;  %p16752_p3 = scmp.lt.s32.totalorder %s223_s29, %s223_s29 }
  0x27   : > { %p16745_p7 = scmp.ne.s32.totalorder %s223_s29, %s16744_s15  ;;  %p16753_p6 = scmp.lt.s32.totalorder %s16744_s15, %s16744_s15 }
  0x29   : > { %p16747_p9 = pnand %p16745_p7, %p19251_p0  ;;  %p16754_p8 = por %p16753_p6, %p16752_p3 }
  0x2b   : > { %p16748_p10 = pneg %p16747_p9 }
  0x2d   : > { %p16755_p12 = pnand %p16754_p8, %p16748_p10 }
  0x2f   : > { %16758 = shalt.err (!%p16755_p12)
}
  0x30   : > { %14224 = dma.hbm_to_vmem [thread:$0]  (!%p17065_p11), %s19266_s4, 160, %s223_s29, [#allocation9]  }
  0x31   : > { %s32_s18 = sadd.s32 1, %s16965_s22  ;;  %s235_s28 = sand.u32 1, %s16957_s20  }
  0x32   : > { %p33_p3 = scmp.ge.s32.totalorder %s32_s18, 4  ;;  %s17099_s8 = smul.u32 6400, %s235_s28 }
  0x33   : > { %s19249_s9 = smul.u32 102400, %s16965_s22  ;;  %s19268_s1 = sld [smem:[#allocation19_spill]] }
  0x34   : > { %s19294_s18 = smov (%p33_p3, %s32_s18), 0  ;;  %s237_s13 = scalar_lea.vmem [#allocation5], %s17099_s8 }
  0x35   : > { %19267 = sst [smem:[#allocation17_spill]] %s19294_s18  ;;  %s64_s29 = ssub.s32 %s16965_s22, %s19294_s18 }
  0x36   : > { %s246_s14 = sshll.u32 %s237_s13, 4  ;;  %p65_p6 = scmp.eq.s32.totalorder %s64_s29, 0  ;;  %s17114_s14 = int_to_ptr.vmem [resolvable:$true] %s246_s14 }
  0x37   : > { %s17123_s16 = scalar_lea.sflag [#allocation6], %s19250_s30  ;;  %p19270_p12 = scmp.ne.s32.totalorder %s19265_s7, 0 }
  0x38   : > { %s17119_s15 = scalar_select %p65_p6, %s16957_s20, %s67_s25  }
  0x39   : > { %s17109_s12 = scalar_lea.hbm %s19268_s1, %s19249_s9  ;;  %p17129_p13 = pneg %p19270_p12 }
  0x3a   : > { %19269 = sst [smem:[#allocation18_spill]] %s17119_s15  ;;  %s16759_s17 = scalar_lea.hbm %s17109_s12, 102400 }
  0x3b   : > { %p16760_p8 = scmp.ne.s32.totalorder %s17109_s12, %s16759_s17  ;;  %s16764_s13 = scalar_lea.hbm %s19268_s1, 409600 }
  0x3c   : > { %s19271_s10 = scalar_select %p17129_p13, 1, 0 }
  0x3d   : > { %p16762_p1 = pnand %p17129_p13, %p16760_p8  ;;  %p16765_p4 = scmp.lt.u32.totalorder %s17109_s12, %s19268_s1 }
  0x3e   : > { %p16766_p5 = scmp.lt.u32.totalorder %s16764_s13, %s16759_s17  ;;  %p16768_p9 = scmp.lt.u32.totalorder %s16759_s17, %s17109_s12 }
  0x3f   : > { %p16763_p2 = pneg %p16762_p1 }
  0x40   : > { %p16767_p7 = por %p16766_p5, %p16765_p4 }
  0x42   : > { %p16769_p10 = por %p16768_p9, %p16767_p7 }
  0x44   : > { %p16770_p3 = pnand %p16769_p10, %p16763_p2 }
  0x46   : > { %16773 = shalt.err (!%p16770_p3)
}
  0x47   : > { %s16774_s30 = scalar_lea.vmem %s17114_s14, 102400  ;;  %s16972_s11 = smov [#allocation5]  }
  0x48   : > { %p16775_p6 = scmp.ne.s32.totalorder %s17114_s14, %s16774_s30  ;;  %s16779_s29 = sshll.u32 %s16972_s11, 4  ;;  %s16780_s29 = int_to_ptr.vmem [resolvable:$false] %s16779_s29 }
  0x49   : > { %s16781_s9 = scalar_lea.vmem %s16780_s29, 204800  ;;  %p16782_p0 = scmp.lt.s32.totalorder %s17114_s14, %s16780_s29 }
  0x4a   : > { %p16777_p8 = pnand %p16775_p6, %p17129_p13  ;;  %p16783_p11 = scmp.lt.s32.totalorder %s16781_s9, %s16774_s30 }
  0x4c   : > { %p16778_p1 = pneg %p16777_p8  ;;  %p16784_p4 = por %p16783_p11, %p16782_p0 }
  0x4e   : > { %p16785_p5 = pnand %p16784_p4, %p16778_p1 }
  0x50   : > { %16788 = shalt.err (!%p16785_p5)
}
  0x51   : > { %s16973_s17 = smov 640   ;;  %s16974_s13 = smov 40  }
  0x52   : > { %14228 = dma.hbm_to_vmem [thread:$0]  (!%p19270_p12), %s17109_s12, 102400, %s17114_s14, %s17123_s16, %s16973_s17, %s16973_s17, %s16974_s13  }
  0x53   : > { %s16975_s25 = smov [#allocation2]   ;;  %s14195_s30 = smul.u32 10, %s235_s28 }
  0x54   : > { %s211_s11 = sshll.u32 %s16975_s25, 4  ;;  %s16789_s1 = scalar_lea.hbm %s19239_s0, 640  ;;  %s212_s11 = int_to_ptr.vmem [resolvable:$true] %s211_s11 }
  0x55   : > { %p16790_p11 = scmp.ne.s32.totalorder %s19239_s0, %s16789_s1  ;;  %p19272_p0 = scmp.ne.s32.totalorder %s19264_s6, 0 }
  0x56   : > { %p16796_p10 = scmp.lt.u32.totalorder %s16789_s1, %s19239_s0 }
  0x57   : > { %p19273_p2 = pneg %p19272_p0 }
  0x59   : > { %p16792_p7 = pnand %p16790_p11, %p19273_p2 }
  0x5b   : > { %p16793_p9 = pneg %p16792_p7 }
  0x5d   : > { %p16798_p3 = pnand %p16796_p10, %p16793_p9 }
  0x5f   : > { %16801 = shalt.err (!%p16798_p3)
}
  0x60   : > { %s16802_s12 = scalar_lea.vmem %s212_s11, 640  ;;  %p19274_p8 = pmov %p19273_p2 }
  0x61   : > { %p16803_p6 = scmp.ne.s32.totalorder %s212_s11, %s16802_s12  ;;  %p16810_p5 = scmp.lt.s32.totalorder %s212_s11, %s212_s11 }
  0x62   : > { %p16811_p12 = scmp.lt.s32.totalorder %s16802_s12, %s16802_s12 }
  0x63   : > { %p16805_p1 = pnand %p16803_p6, %p19274_p8 }
  0x64   : > { %p16812_p13 = por %p16811_p12, %p16810_p5 }
  0x65   : > { %p16806_p4 = pneg %p16805_p1 }
  0x67   : > { %p16813_p2 = pnand %p16812_p13, %p16806_p4 }
  0x69   : > { %16816 = shalt.err (!%p16813_p2)
}
  0x6a   : > { %14221 = dma.hbm_to_vmem [thread:$0]  (!%p19272_p0), %s19239_s0, 640, %s212_s11, [#allocation3]  }
  0x6b   : > { %s14102_s1 = smul.u32 160, %s16965_s22  ;;  %s260_s5 = scalar_lea.vmem [#allocation7], %s14195_s30 }
  0x6c   : > { %s270_s28 = sshll.u32 %s260_s5, 4  ;;  %p19275_p13 = scmp.ne.s32.totalorder %s19271_s10, 0  ;;  %s271_s28 = int_to_ptr.vmem [resolvable:$true] %s270_s28 }
  0x6d   : > { %s268_s25 = scalar_lea.hbm %s19241_s2, %s14102_s1  ;;  %s16822_s12 = scalar_lea.hbm %s19241_s2, 640 }
  0x6e   : > { %s16817_s29 = scalar_lea.hbm %s268_s25, 160  ;;  %p16823_p0 = scmp.lt.u32.totalorder %s268_s25, %s19241_s2 }
  0x6f   : > { %p16818_p12 = scmp.ne.s32.totalorder %s268_s25, %s16817_s29  ;;  %p16824_p9 = scmp.lt.u32.totalorder %s16822_s12, %s16817_s29 }
  0x70   : > { %p16826_p3 = scmp.lt.u32.totalorder %s16817_s29, %s268_s25 }
  0x71   : > { %p16820_p11 = pnand %p16818_p12, %p19275_p13  ;;  %p16825_p10 = por %p16824_p9, %p16823_p0 }
  0x73   : > { %p16821_p7 = pneg %p16820_p11  ;;  %p16827_p6 = por %p16826_p3, %p16825_p10 }
  0x75   : > { %p16828_p8 = pnand %p16827_p6, %p16821_p7 }
  0x77   : > { %16831 = shalt.err (!%p16828_p8)
}
  0x78   : > { %s16832_s11 = scalar_lea.vmem %s271_s28, 160  ;;  %s16976_s30 = smov [#allocation7]  }
  0x79   : > { %p16833_p1 = scmp.ne.s32.totalorder %s271_s28, %s16832_s11  ;;  %s16837_s1 = sshll.u32 %s16976_s30, 4  ;;  %s16838_s1 = int_to_ptr.vmem [resolvable:$false] %s16837_s1 }
  0x7a   : > { %s16839_s5 = scalar_lea.vmem %s16838_s1, 320  ;;  %p16840_p2 = scmp.lt.s32.totalorder %s271_s28, %s16838_s1 }
  0x7b   : > { %p16835_p4 = pnand %p16833_p1, %p19275_p13  ;;  %p16841_p12 = scmp.lt.s32.totalorder %s16839_s5, %s16832_s11 }
  0x7d   : > { %p16836_p5 = pneg %p16835_p4  ;;  %p16842_p11 = por %p16841_p12, %p16840_p2 }
  0x7f   : > { %p16843_p0 = pnand %p16842_p11, %p16836_p5 }
  0x81   : > { %16846 = shalt.err (!%p16843_p0)
}
  0x82   : > { %p19276_p9 = scmp.ne.s32.totalorder %s19265_s7, 0  ;;  %s19277_s14 = smul.u32 102400, %s16965_s22 }
  0x83   : > { %s281_s9 = scalar_lea.vmem [#allocation8], %s17099_s8  ;;  %s19278_s4 = sand.u32 1, %s16969_s23  }
  0x84   : > { %14231 = dma.hbm_to_vmem [thread:$0]  (!%p19276_p9), %s268_s25, 160, %s271_s28, %s17123_s16  }
  0x85   : > { %s17200_s6 = scalar_lea.hbm %s19242_s3, %s19277_s14  ;;  %s291_s12 = sshll.u32 %s281_s9, 4  ;;  %s17203_s12 = int_to_ptr.vmem [resolvable:$true] %s291_s12 }
  0x86   : > { %s17207_s18 = scalar_lea.sflag [#allocation9], %s19278_s4  ;;  %s16847_s11 = scalar_lea.hbm %s17200_s6, 102400 }
  0x87   : > { %p16848_p7 = scmp.ne.s32.totalorder %s17200_s6, %s16847_s11  ;;  %s16852_s25 = scalar_lea.hbm %s19242_s3, 409600 }
  0x88   : > { %p16853_p6 = scmp.lt.u32.totalorder %s17200_s6, %s19242_s3  ;;  %p16854_p8 = scmp.lt.u32.totalorder %s16852_s25, %s16847_s11 }
  0x89   : > { %p16850_p10 = pnand %p16848_p7, %p19275_p13  ;;  %p16856_p4 = scmp.lt.u32.totalorder %s16847_s11, %s17200_s6 }
  0x8a   : > { %p16855_p1 = por %p16854_p8, %p16853_p6 }
  0x8b   : > { %p16851_p3 = pneg %p16850_p10 }
  0x8c   : > { %p16857_p5 = por %p16856_p4, %p16855_p1 }
  0x8e   : > { %p16858_p2 = pnand %p16857_p5, %p16851_p3 }
  0x90   : > { %16861 = shalt.err (!%p16858_p2)
}
  0x91   : > { %s16862_s8 = scalar_lea.vmem %s17203_s12, 102400  ;;  %s16977_s5 = smov [#allocation8]  }
  0x92   : > { %p16863_p12 = scmp.ne.s32.totalorder %s17203_s12, %s16862_s8  ;;  %s16867_s14 = sshll.u32 %s16977_s5, 4  ;;  %s16868_s14 = int_to_ptr.vmem [resolvable:$false] %s16867_s14 }
  0x93   : > { %s16869_s15 = scalar_lea.vmem %s16868_s14, 204800  ;;  %p16870_p7 = scmp.lt.s32.totalorder %s17203_s12, %s16868_s14 }
  0x94   : > { %p16865_p11 = pnand %p16863_p12, %p19275_p13  ;;  %p16871_p10 = scmp.lt.s32.totalorder %s16869_s15, %s16862_s8 }
  0x96   : > { %p16866_p0 = pneg %p16865_p11  ;;  %p16872_p6 = por %p16871_p10, %p16870_p7 }
  0x98   : > { %p16873_p8 = pnand %p16872_p6, %p16866_p0 }
  0x9a   : > { %16876 = shalt.err (!%p16873_p8)
}
  0x9b   : > { %14234 = dma.hbm_to_vmem [thread:$0]  (!%p19276_p9), %s17200_s6, 102400, %s17203_s12, %s17207_s18, %s16973_s17, %s16973_s17, %s16974_s13  }
  0x9c   : > { %p19279_p13 = scmp.ne.s32.totalorder %s19263_s27, 0 }
  0x9d   : > { %p19280_p3 = scmp.eq.s32.totalorder (!%p19279_p13), %s17039_s24, 0 }
  0x9e   : > { %303 = sbr.rel (%p19279_p13) target bundleno = 2608 (0xa30), region = 40 }
  0xa5   : > { %16928 = dma.done.wait (%p19280_p3), [#allocation3], 640   ;;  %p19281_p1 = pmov %p19280_p3 }
  0xa6   : > { %s309_s7 = sand.u32 1, %s17039_s24   ;;  %s311_s10 = sand.u32 1, %s16953_s19  }
  0xa7   : > { %16930 = vsyncadd (%p19281_p1), [#allocation3], 4294966656  ;;  %s14198_s29 = smul.u32 6400, %s311_s10  ;;  %s310_s9 = scalar_lea.sflag [#allocation6], %s309_s7 }
  0xa8   : > { %p19282_p4 = scmp.ne.s32.totalorder %s19262_s26, 0 }
  0xa9   : > { %s17242_s4 = scalar_lea.vmem [#allocation5], %s14198_s29 }
  0xaa   : > { %16932 = dma.done.wait (%p19282_p4), %s310_s9, 102560  }
  0xab   : > { %16934 = vsyncadd (%p19282_p4), %s310_s9, 4294864736  ;;  %s14199_s27 = smul.u32 10, %s311_s10  ;;  %s328_s13 = scalar_lea.sflag [#allocation9], %s309_s7 }
  0xac   : > { %s17250_s6 = scalar_lea.vmem [#allocation8], %s14198_s29 }
  0xad   : > { %s17248_s17 = scalar_lea.vmem [#allocation7], %s14199_s27 }
  0xae   : > { %16936 = dma.done.wait (%p19282_p4), %s328_s13, 102400  }
  0xaf   : > { %16938 = vsyncadd (%p19282_p4), %s328_s13, 4294864896  ;;  %p19283_p9 = pmov %p19281_p1 }
  0xb0   : > { %p19284_p5 = pmov %p19281_p1 }
  0xb1   : > { %16940 = dma.done.wait (%p19283_p9), [#allocation9], 160  }
  0xb2   : > { %16942 = vsyncadd (%p19284_p5), [#allocation9], 4294967136  ;;  %p12486_p2 = scmp.ne.s32.totalorder %s16961_s21, 0 }
  0xb3   : > { %v16978_v0 = vmov (!%p12486_p2), 0.0  }
  0xb4   : > { %378 = sbr.rel (%p12486_p2) target bundleno = 187 (0xbb), region = 64  ;;  %379 = vst [vmem:[#allocation11] sm:$0xff] (!%p12486_p2), %v16978_v0  ;;  %380 = vst [vmem:[#allocation11 + $0x8] sm:$0xff] (!%p12486_p2), %v16978_v0 }
  0xb5   : > { %381 = vst [vmem:[#allocation11 + $0x10] sm:$0xff] (!%p12486_p2), %v16978_v0  ;;  %382 = vst [vmem:[#allocation11 + $0x18] sm:$0xff] (!%p12486_p2), %v16978_v0 }
  0xb6   : > { %383 = vst [vmem:[#allocation11 + $0x20] sm:$0xff] (!%p12486_p2), %v16978_v0  ;;  %384 = vst [vmem:[#allocation11 + $0x28] sm:$0xff] (!%p12486_p2), %v16978_v0 }
  0xb7   : > { %385 = vst [vmem:[#allocation11 + $0x30] sm:$0xff] (!%p12486_p2), %v16978_v0  ;;  %386 = vst [vmem:[#allocation11 + $0x38] sm:$0xff] (!%p12486_p2), %v16978_v0 }
  0xb8   : > { %387 = vst [vmem:[#allocation11 + $0x40] sm:$0xff] (!%p12486_p2), %v16978_v0  ;;  %388 = vst [vmem:[#allocation11 + $0x48] sm:$0xff] (!%p12486_p2), %v16978_v0 }
  0xbb PF: > { %v14297_v1 = vld [vmem:[%s17242_s4 + $0x4] ss:$40 sps:$4 sm:$0xff]   ;;  %v14301_v3 = vld [vmem:[%s17242_s4] ss:$40 sps:$4 sm:$0xff]   ;;  %v14303_v5 = vld [vmem:[%s17242_s4 + $0x54] ss:$40 sps:$4 sm:$0xff]  }
  0xbc   : > { %v14299_v2 = vld [vmem:[%s17242_s4 + $0xc] ss:$40 sps:$4 sm:$0xff]   ;;  %5283 = vmatprep.subr.bf16.mxu0 %v14297_v1  ;;  %v14302_v4 = vld [vmem:[%s17242_s4 + $0x8] ss:$40 sps:$4 sm:$0xff]   ;;  %v14305_v6 = vld [vmem:[%s17242_s4 + $0x5c] ss:$40 sps:$4 sm:$0xff]  }
  0xbd   : > { %5488 = vmatprep.subr.bf16.mxu1 %v14299_v2  ;;  %5284 = vmatpush1.bf16.msra.mxu0 %v14301_v3  ;;  %v14307_v7 = vld [vmem:[%s17242_s4 + $0x50] ss:$40 sps:$4 sm:$0xff]   ;;  %v14309_v9 = vld [vmem:[%s17242_s4 + $0xa4] ss:$40 sps:$4 sm:$0xff]   ;;  %v14313_v11 = vld [vmem:[%s17242_s4 + $0xa0] ss:$40 sps:$4 sm:$0xff]  }
  0xbe   : > { %5489 = vmatpush1.bf16.msra.mxu1 %v14302_v4  ;;  %5285 = vmatprep.subr.bf16.mxu0 %v14303_v5  ;;  %v14308_v8 = vld [vmem:[%s17242_s4 + $0x58] ss:$40 sps:$4 sm:$0xff]   ;;  %v14311_v10 = vld [vmem:[%s17242_s4 + $0xac] ss:$40 sps:$4 sm:$0xff]   ;;  %v14314_v12 = vld [vmem:[%s17242_s4 + $0xa8] ss:$40 sps:$4 sm:$0xff]  }
  0xbf   : > { %5490 = vmatprep.subr.bf16.mxu1 %v14305_v6  ;;  %v14315_v13 = vld [vmem:[%s17242_s4 + $0xf4] ss:$40 sps:$4 sm:$0xff]   ;;  %v14319_v15 = vld [vmem:[%s17242_s4 + $0xf0] ss:$40 sps:$4 sm:$0xff]   ;;  %v14321_v17 = vld [vmem:[%s17242_s4 + $0x144] ss:$40 sps:$4 sm:$0xff]  }
  0xc0   : > { %v14317_v14 = vld [vmem:[%s17242_s4 + $0xfc] ss:$40 sps:$4 sm:$0xff]   ;;  %v14320_v16 = vld [vmem:[%s17242_s4 + $0xf8] ss:$40 sps:$4 sm:$0xff]   ;;  %v14323_v18 = vld [vmem:[%s17242_s4 + $0x14c] ss:$40 sps:$4 sm:$0xff]  }
  0xc1   : > { %5286 = vmatpush1.bf16.msra.mxu0 %v14307_v7  ;;  %v14325_v19 = vld [vmem:[%s17242_s4 + $0x140] ss:$40 sps:$4 sm:$0xff]   ;;  %v14327_v21 = vld [vmem:[%s17242_s4 + $0x194] ss:$40 sps:$4 sm:$0xff]   ;;  %v14331_v23 = vld [vmem:[%s17242_s4 + $0x190] ss:$40 sps:$4 sm:$0xff]  }
  0xc2   : > { %5491 = vmatpush1.bf16.msra.mxu1 %v14308_v8  ;;  %5287 = vmatprep.subr.bf16.mxu0 %v14309_v9  ;;  %v14326_v20 = vld [vmem:[%s17242_s4 + $0x148] ss:$40 sps:$4 sm:$0xff]   ;;  %v14329_v22 = vld [vmem:[%s17242_s4 + $0x19c] ss:$40 sps:$4 sm:$0xff]   ;;  %v14332_v24 = vld [vmem:[%s17242_s4 + $0x198] ss:$40 sps:$4 sm:$0xff]  }
  0xc3   : > { %5492 = vmatprep.subr.bf16.mxu1 %v14311_v10  ;;  %v14333_v25 = vld [vmem:[%s17242_s4 + $0x1e4] ss:$40 sps:$4 sm:$0xff]   ;;  %v14337_v27 = vld [vmem:[%s17242_s4 + $0x1e0] ss:$40 sps:$4 sm:$0xff]   ;;  %v14339_v29 = vld [vmem:[%s17242_s4 + $0x234] ss:$40 sps:$4 sm:$0xff]  }
  0xc4   : > { %v14335_v26 = vld [vmem:[%s17242_s4 + $0x1ec] ss:$40 sps:$4 sm:$0xff]   ;;  %v14338_v28 = vld [vmem:[%s17242_s4 + $0x1e8] ss:$40 sps:$4 sm:$0xff]   ;;  %v14341_v30 = vld [vmem:[%s17242_s4 + $0x23c] ss:$40 sps:$4 sm:$0xff]  }
  0xc5   : > { %5288 = vmatpush1.bf16.msra.mxu0 %v14313_v11  ;;  %v14343_v31 = vld [vmem:[%s17242_s4 + $0x230] ss:$40 sps:$4 sm:$0xff]   ;;  %v14345_v33 = vld [vmem:[%s17242_s4 + $0x284] ss:$40 sps:$4 sm:$0xff]   ;;  %v14349_v35 = vld [vmem:[%s17242_s4 + $0x280] ss:$40 sps:$4 sm:$0xff]  }
  0xc6   : > { %5493 = vmatpush1.bf16.msra.mxu1 %v14314_v12  ;;  %5289 = vmatprep.subr.bf16.mxu0 %v14315_v13  ;;  %v14344_v32 = vld [vmem:[%s17242_s4 + $0x238] ss:$40 sps:$4 sm:$0xff]   ;;  %v14347_v34 = vld [vmem:[%s17242_s4 + $0x28c] ss:$40 sps:$4 sm:$0xff]   ;;  %v14350_v36 = vld [vmem:[%s17242_s4 + $0x288] ss:$40 sps:$4 sm:$0xff]  }
  0xc7   : > { %5494 = vmatprep.subr.bf16.mxu1 %v14317_v14  ;;  %v14351_v37 = vld [vmem:[%s17242_s4 + $0x2d4] ss:$40 sps:$4 sm:$0xff]   ;;  %v14355_v39 = vld [vmem:[%s17242_s4 + $0x2d0] ss:$40 sps:$4 sm:$0xff]   ;;  %v14357_v41 = vld [vmem:[%s17242_s4 + $0x324] ss:$40 sps:$4 sm:$0xff]  }
  0xc8   : > { %v14353_v38 = vld [vmem:[%s17242_s4 + $0x2dc] ss:$40 sps:$4 sm:$0xff]   ;;  %v14356_v40 = vld [vmem:[%s17242_s4 + $0x2d8] ss:$40 sps:$4 sm:$0xff]   ;;  %v14359_v42 = vld [vmem:[%s17242_s4 + $0x32c] ss:$40 sps:$4 sm:$0xff]  }
  0xc9   : > { %5290 = vmatpush1.bf16.msra.mxu0 %v14319_v15  ;;  %v14361_v43 = vld [vmem:[%s17242_s4 + $0x320] ss:$40 sps:$4 sm:$0xff]   ;;  %v14363_v45 = vld [vmem:[%s17242_s4 + $0x374] ss:$40 sps:$4 sm:$0xff]   ;;  %v14367_v48 = vld [vmem:[%s17242_s4 + $0x370] ss:$40 sps:$4 sm:$0xff]  }
  0xca   : > { %5495 = vmatpush1.bf16.msra.mxu1 %v14320_v16  ;;  %5291 = vmatprep.subr.bf16.mxu0 %v14321_v17  ;;  %v14362_v44 = vld [vmem:[%s17242_s4 + $0x328] ss:$40 sps:$4 sm:$0xff]   ;;  %v14365_v46 = vld [vmem:[%s17242_s4 + $0x37c] ss:$40 sps:$4 sm:$0xff]   ;;  %v14368_v50 = vld [vmem:[%s17242_s4 + $0x378] ss:$40 sps:$4 sm:$0xff]  }
  0xcb   : > { %5496 = vmatprep.subr.bf16.mxu1 %v14323_v18  ;;  %v389_v47 = vld [vmem:[#allocation2] sm:$0xff]  ;;  %v14369_v51 = vld [vmem:[%s17242_s4 + $0x3c4] ss:$40 sps:$4 sm:$0xff]   ;;  %v14373_v53 = vld [vmem:[%s17242_s4 + $0x3c0] ss:$40 sps:$4 sm:$0xff]   ;;  %p14097_p12 = scmp.ne.s32.totalorder %s16961_s21, 3 }
  0xcc   : > { %v17308_v49 = vcombine.high %v389_v47, %v389_v47  ;;  %v14371_v52 = vld [vmem:[%s17242_s4 + $0x3cc] ss:$40 sps:$4 sm:$0xff]   ;;  %v14374_v54 = vld [vmem:[%s17242_s4 + $0x3c8] ss:$40 sps:$4 sm:$0xff]   ;;  %v14377_v56 = vld [vmem:[%s17242_s4 + $0x41c] ss:$40 sps:$4 sm:$0xff]   ;;  %v17332_v6 = vcombine.low %v389_v47, %v389_v47 }
  0xcd   : > { %5292 = vmatpush1.bf16.msra.mxu0 %v14325_v19  ;;  %v14375_v55 = vld [vmem:[%s17242_s4 + $0x414] ss:$40 sps:$4 sm:$0xff]   ;;  %v14379_v57 = vld [vmem:[%s17242_s4 + $0x410] ss:$40 sps:$4 sm:$0xff]   ;;  %v14381_v59 = vld [vmem:[%s17242_s4 + $0x464] ss:$40 sps:$4 sm:$0xff]  }
  0xce   : > { %5497 = vmatpush1.bf16.msra.mxu1 %v14326_v20  ;;  %5293 = vmatprep.subr.bf16.mxu0 %v14327_v21  ;;  %v14380_v58 = vld [vmem:[%s17242_s4 + $0x418] ss:$40 sps:$4 sm:$0xff]   ;;  %v14383_v60 = vld [vmem:[%s17242_s4 + $0x46c] ss:$40 sps:$4 sm:$0xff]   ;;  %v14386_v62 = vld [vmem:[%s17242_s4 + $0x468] ss:$40 sps:$4 sm:$0xff]  }
  0xcf   : > { %5498 = vmatprep.subr.bf16.mxu1 %v14329_v22  ;;  %5315 = vmatprep.mubr.bf16.mxu0 %v17308_v49  ;;  %v14385_v61 = vld [vmem:[%s17242_s4 + $0x460] ss:$40 sps:$4 sm:$0xff]   ;;  %v14387_v63 = vld [vmem:[%s17242_s4 + $0x4b4] ss:$40 sps:$4 sm:$0xff]   ;;  %v14391_v1 = vld [vmem:[%s17242_s4 + $0x4b0] ss:$40 sps:$4 sm:$0xff]  }
  0xd0   : > { %5520 = vmatprep.mubr.bf16.mxu1 %v17308_v49  ;;  %v14389_v0 = vld [vmem:[%s17242_s4 + $0x4bc] ss:$40 sps:$4 sm:$0xff]   ;;  %v14392_v2 = vld [vmem:[%s17242_s4 + $0x4b8] ss:$40 sps:$4 sm:$0xff]   ;;  %v14399_v4 = vld [vmem:[%s17242_s4 + $0x50c] ss:$40 sps:$4 sm:$0xff]  }
  0xd1   : > { %5294 = vmatpush1.bf16.msra.mxu0 %v14331_v23  ;;  %v14396_v3 = vld [vmem:[%s17242_s4 + $0x504] ss:$40 sps:$4 sm:$0xff]   ;;  %v14394_v5 = vld [vmem:[%s17242_s4 + $0x500] ss:$40 sps:$4 sm:$0xff]   ;;  %v14403_v8 = vld [vmem:[%s17242_s4 + $0x554] ss:$40 sps:$4 sm:$0xff]  }
  0xd2   : > { %5499 = vmatpush1.bf16.msra.mxu1 %v14332_v24  ;;  %5295 = vmatprep.subr.bf16.mxu0 %v14333_v25  ;;  %v14397_v7 = vld [vmem:[%s17242_s4 + $0x508] ss:$40 sps:$4 sm:$0xff]   ;;  %v14406_v9 = vld [vmem:[%s17242_s4 + $0x55c] ss:$40 sps:$4 sm:$0xff]   ;;  %v14404_v11 = vld [vmem:[%s17242_s4 + $0x558] ss:$40 sps:$4 sm:$0xff]  }
  0xd3   : > { %5500 = vmatprep.subr.bf16.mxu1 %v14335_v26  ;;  %v14401_v10 = vld [vmem:[%s17242_s4 + $0x550] ss:$40 sps:$4 sm:$0xff]   ;;  %v14409_v12 = vld [vmem:[%s17242_s4 + $0x5a4] ss:$40 sps:$4 sm:$0xff]   ;;  %v14407_v14 = vld [vmem:[%s17242_s4 + $0x5a0] ss:$40 sps:$4 sm:$0xff]  }
  0xd4   : > { %v14412_v13 = vld [vmem:[%s17242_s4 + $0x5ac] ss:$40 sps:$4 sm:$0xff]   ;;  %v14410_v15 = vld [vmem:[%s17242_s4 + $0x5a8] ss:$40 sps:$4 sm:$0xff]   ;;  %v14418_v17 = vld [vmem:[%s17242_s4 + $0x5fc] ss:$40 sps:$4 sm:$0xff]  }
  0xd5   : > { %5296 = vmatpush1.bf16.msra.mxu0 %v14337_v27  ;;  %v14415_v16 = vld [vmem:[%s17242_s4 + $0x5f4] ss:$40 sps:$4 sm:$0xff]   ;;  %v14413_v18 = vld [vmem:[%s17242_s4 + $0x5f0] ss:$40 sps:$4 sm:$0xff]   ;;  %v14421_v20 = vld [vmem:[%s17242_s4 + $0x644] ss:$40 sps:$4 sm:$0xff]  }
  0xd6   : > { %5501 = vmatpush1.bf16.msra.mxu1 %v14338_v28  ;;  %5297 = vmatprep.subr.bf16.mxu0 %v14339_v29  ;;  %v14416_v19 = vld [vmem:[%s17242_s4 + $0x5f8] ss:$40 sps:$4 sm:$0xff]   ;;  %v14424_v21 = vld [vmem:[%s17242_s4 + $0x64c] ss:$40 sps:$4 sm:$0xff]   ;;  %v14422_v23 = vld [vmem:[%s17242_s4 + $0x648] ss:$40 sps:$4 sm:$0xff]  }
  0xd7   : > { %5502 = vmatprep.subr.bf16.mxu1 %v14341_v30  ;;  %v14419_v22 = vld [vmem:[%s17242_s4 + $0x640] ss:$40 sps:$4 sm:$0xff]   ;;  %v14427_v24 = vld [vmem:[%s17242_s4 + $0x694] ss:$40 sps:$4 sm:$0xff]   ;;  %v14425_v26 = vld [vmem:[%s17242_s4 + $0x690] ss:$40 sps:$4 sm:$0xff]  }
  0xd8   : > { %v14430_v25 = vld [vmem:[%s17242_s4 + $0x69c] ss:$40 sps:$4 sm:$0xff]   ;;  %v14428_v27 = vld [vmem:[%s17242_s4 + $0x698] ss:$40 sps:$4 sm:$0xff]   ;;  %v14436_v29 = vld [vmem:[%s17242_s4 + $0x6ec] ss:$40 sps:$4 sm:$0xff]  }
  0xd9   : > { %5298 = vmatpush1.bf16.msra.mxu0 %v14343_v31  ;;  %v14433_v28 = vld [vmem:[%s17242_s4 + $0x6e4] ss:$40 sps:$4 sm:$0xff]  }
  0xda   : > { %5503 = vmatpush1.bf16.msra.mxu1 %v14344_v32  ;;  %5299 = vmatprep.subr.bf16.mxu0 %v14345_v33  ;;  %v17359_v30 = vld [vmem:[#allocation2 + $0x8] sm:$0xff]  ;;  %v14434_v33 = vld [vmem:[%s17242_s4 + $0x6e8] ss:$40 sps:$4 sm:$0xff]   ;;  %v14460_v47 = vld [vmem:[%s17242_s4 + $0x82c] ss:$40 sps:$4 sm:$0xff]  }
  0xdb   : > { %5504 = vmatprep.subr.bf16.mxu1 %v14347_v34  ;;  %v17363_v31 = vcombine.high %v17359_v30, %v17359_v30  ;;  %v14431_v32 = vld [vmem:[%s17242_s4 + $0x6e0] ss:$40 sps:$4 sm:$0xff]   ;;  %v14439_v34 = vld [vmem:[%s17242_s4 + $0x734] ss:$40 sps:$4 sm:$0xff]  }
  0xdd   : > { %5300 = vmatpush1.bf16.msra.mxu0 %v14349_v35  ;;  %v14442_v35 = vld [vmem:[%s17242_s4 + $0x73c] ss:$40 sps:$4 sm:$0xff]  }
  0xde   : > { %5505 = vmatpush1.bf16.msra.mxu1 %v14350_v36  ;;  %5301 = vmatprep.subr.bf16.mxu0 %v14351_v37  ;;  %v14437_v36 = vld [vmem:[%s17242_s4 + $0x730] ss:$40 sps:$4 sm:$0xff]  }
  0xdf   : > { %5506 = vmatprep.subr.bf16.mxu1 %v14353_v38  ;;  %v14440_v37 = vld [vmem:[%s17242_s4 + $0x738] ss:$40 sps:$4 sm:$0xff]   ;;  %v14445_v38 = vld [vmem:[%s17242_s4 + $0x784] ss:$40 sps:$4 sm:$0xff]  }
  0xe1   : > { %5302 = vmatpush1.bf16.msra.mxu0 %v14355_v39  ;;  %v14448_v39 = vld [vmem:[%s17242_s4 + $0x78c] ss:$40 sps:$4 sm:$0xff]  }
  0xe2   : > { %5507 = vmatpush1.bf16.msra.mxu1 %v14356_v40  ;;  %5303 = vmatprep.subr.bf16.mxu0 %v14357_v41  ;;  %v14443_v40 = vld [vmem:[%s17242_s4 + $0x780] ss:$40 sps:$4 sm:$0xff]  }
  0xe3   : > { %5508 = vmatprep.subr.bf16.mxu1 %v14359_v42  ;;  %v14446_v41 = vld [vmem:[%s17242_s4 + $0x788] ss:$40 sps:$4 sm:$0xff]   ;;  %v14451_v42 = vld [vmem:[%s17242_s4 + $0x7d4] ss:$40 sps:$4 sm:$0xff]  }
  0xe5   : > { %5304 = vmatpush1.bf16.msra.mxu0 %v14361_v43  ;;  %v14454_v43 = vld [vmem:[%s17242_s4 + $0x7dc] ss:$40 sps:$4 sm:$0xff]  }
  0xe6   : > { %5509 = vmatpush1.bf16.msra.mxu1 %v14362_v44  ;;  %5305 = vmatprep.subr.bf16.mxu0 %v14363_v45  ;;  %v14449_v44 = vld [vmem:[%s17242_s4 + $0x7d0] ss:$40 sps:$4 sm:$0xff]  }
  0xe7   : > { %5510 = vmatprep.subr.bf16.mxu1 %v14365_v46  ;;  %v14452_v45 = vld [vmem:[%s17242_s4 + $0x7d8] ss:$40 sps:$4 sm:$0xff]   ;;  %v14457_v46 = vld [vmem:[%s17242_s4 + $0x824] ss:$40 sps:$4 sm:$0xff]  }
  0xe9   : > { %5306 = vmatpush1.bf16.msra.mxu0 %v14367_v48  ;;  %v14455_v48 = vld [vmem:[%s17242_s4 + $0x820] ss:$40 sps:$4 sm:$0xff]  }
  0xea   : > { %5511 = vmatpush1.bf16.msra.mxu1 %v14368_v50  ;;  %5307 = vmatprep.subr.bf16.mxu0 %v14369_v51  ;;  %v14458_v50 = vld [vmem:[%s17242_s4 + $0x828] ss:$40 sps:$4 sm:$0xff]   ;;  %v14463_v51 = vld [vmem:[%s17242_s4 + $0x874] ss:$40 sps:$4 sm:$0xff]  }
  0xeb   : > { %5512 = vmatprep.subr.bf16.mxu1 %v14371_v52  ;;  %v14466_v52 = vld [vmem:[%s17242_s4 + $0x87c] ss:$40 sps:$4 sm:$0xff]  }
  0xed   : > { %5308 = vmatpush1.bf16.msra.mxu0 %v14373_v53  ;;  %v14461_v53 = vld [vmem:[%s17242_s4 + $0x870] ss:$40 sps:$4 sm:$0xff]  }
  0xee   : > { %5513 = vmatpush1.bf16.msra.mxu1 %v14374_v54  ;;  %5309 = vmatprep.subr.bf16.mxu0 %v14375_v55  ;;  %v14464_v54 = vld [vmem:[%s17242_s4 + $0x878] ss:$40 sps:$4 sm:$0xff]   ;;  %v14469_v55 = vld [vmem:[%s17242_s4 + $0x8c4] ss:$40 sps:$4 sm:$0xff]  }
  0xef   : > { %5514 = vmatprep.subr.bf16.mxu1 %v14377_v56  ;;  %v14472_v56 = vld [vmem:[%s17242_s4 + $0x8cc] ss:$40 sps:$4 sm:$0xff]  }
  0xf1   : > { %5310 = vmatpush1.bf16.msra.mxu0 %v14379_v57  ;;  %v14467_v57 = vld [vmem:[%s17242_s4 + $0x8c0] ss:$40 sps:$4 sm:$0xff]  }
  0xf2   : > { %5515 = vmatpush1.bf16.msra.mxu1 %v14380_v58  ;;  %5311 = vmatprep.subr.bf16.mxu0 %v14381_v59  ;;  %v14470_v58 = vld [vmem:[%s17242_s4 + $0x8c8] ss:$40 sps:$4 sm:$0xff]   ;;  %v14475_v59 = vld [vmem:[%s17242_s4 + $0x914] ss:$40 sps:$4 sm:$0xff]  }
  0xf3   : > { %5516 = vmatprep.subr.bf16.mxu1 %v14383_v60  ;;  %v14478_v60 = vld [vmem:[%s17242_s4 + $0x91c] ss:$40 sps:$4 sm:$0xff]  }
  0xf5   : > { %5312 = vmatpush1.bf16.msra.mxu0 %v14385_v61  ;;  %v14473_v61 = vld [vmem:[%s17242_s4 + $0x910] ss:$40 sps:$4 sm:$0xff]  }
  0xf6   : > { %5517 = vmatpush1.bf16.msra.mxu1 %v14386_v62  ;;  %5313 = vmatprep.subr.bf16.mxu0 %v14387_v63  ;;  %v14476_v62 = vld [vmem:[%s17242_s4 + $0x918] ss:$40 sps:$4 sm:$0xff]   ;;  %v14481_v63 = vld [vmem:[%s17242_s4 + $0x964] ss:$40 sps:$4 sm:$0xff]  }
  0xf7   : > { %5518 = vmatprep.subr.bf16.mxu1 %v14389_v0  ;;  %v14484_v0 = vld [vmem:[%s17242_s4 + $0x96c] ss:$40 sps:$4 sm:$0xff]  }
  0xf9   : > { %5314 = vmatpush1.bf16.msra.mxu0 %v14391_v1  ;;  %v14479_v1 = vld [vmem:[%s17242_s4 + $0x960] ss:$40 sps:$4 sm:$0xff]  }
  0xfa   : > { %5519 = vmatpush1.bf16.msra.mxu1 %v14392_v2  ;;  %5324 = vmatprep.subr.bf16.mxu0 %v14396_v3  ;;  %v14482_v2 = vld [vmem:[%s17242_s4 + $0x968] ss:$40 sps:$4 sm:$0xff]   ;;  %v14487_v3 = vld [vmem:[%s17242_s4 + $0x9b4] ss:$40 sps:$4 sm:$0xff]  }
  0xfb   : > { %5529 = vmatprep.subr.bf16.mxu1 %v14399_v4  ;;  %v14490_v4 = vld [vmem:[%s17242_s4 + $0x9bc] ss:$40 sps:$4 sm:$0xff]  }
  0xfc   : > { %5316 = vmatmul.mubr.bf16.vlgmr.msra.gmra.mrb[0].mxu0 %v17332_v6 }
  0xfd   : > { %5521 = vmatmul.mubr.bf16.vlgmr.msra.gmra.mrb[0].mxu1 %v17332_v6  ;;  %5325 = vmatpush1.bf16.msra.mxu0 %v14394_v5  ;;  %v14485_v5 = vld [vmem:[%s17242_s4 + $0x9b0] ss:$40 sps:$4 sm:$0xff]  }
  0xfe   : > { %5530 = vmatpush1.bf16.msra.mxu1 %v14397_v7  ;;  %5326 = vmatprep.subr.bf16.mxu0 %v14403_v8  ;;  %v14488_v7 = vld [vmem:[%s17242_s4 + $0x9b8] ss:$40 sps:$4 sm:$0xff]   ;;  %v14494_v8 = vld [vmem:[%s17242_s4 + $0xa04] ss:$40 sps:$4 sm:$0xff]  }
  0xff   : > { %5531 = vmatprep.subr.bf16.mxu1 %v14406_v9  ;;  %5356 = vmatprep.mubr.bf16.mxu0 %v17363_v31  ;;  %v14497_v9 = vld [vmem:[%s17242_s4 + $0xa0c] ss:$40 sps:$4 sm:$0xff]  }
 0x100   : > { %5561 = vmatprep.mubr.bf16.mxu1 %v17363_v31 }
 0x101   : > { %5327 = vmatpush1.bf16.msra.mxu0 %v14401_v10  ;;  %v14492_v10 = vld [vmem:[%s17242_s4 + $0xa00] ss:$40 sps:$4 sm:$0xff]  }
 0x102   : > { %5532 = vmatpush1.bf16.msra.mxu1 %v14404_v11  ;;  %5328 = vmatprep.subr.bf16.mxu0 %v14409_v12  ;;  %v17410_v11 = vcombine.low %v17359_v30, %v17359_v30  ;;  %v14495_v12 = vld [vmem:[%s17242_s4 + $0xa08] ss:$40 sps:$4 sm:$0xff]  }
 0x103   : > { %5533 = vmatprep.subr.bf16.mxu1 %v14412_v13  ;;  %v14501_v13 = vld [vmem:[%s17242_s4 + $0xa54] ss:$40 sps:$4 sm:$0xff]   ;;  %v14520_v30 = vld [vmem:[%s17242_s4 + $0xb48] ss:$40 sps:$4 sm:$0xff]  }
 0x105   : > { %5329 = vmatpush1.bf16.msra.mxu0 %v14407_v14  ;;  %v17414_v14 = vld [vmem:[#allocation2 + $0x10] sm:$0xff] }
 0x106   : > { %5534 = vmatpush1.bf16.msra.mxu1 %v14410_v15  ;;  %5330 = vmatprep.subr.bf16.mxu0 %v14415_v16  ;;  %v14504_v15 = vld [vmem:[%s17242_s4 + $0xa5c] ss:$40 sps:$4 sm:$0xff]   ;;  %v17419_v16 = vcombine.high %v17414_v14, %v17414_v14 }
 0x107   : > { %5535 = vmatprep.subr.bf16.mxu1 %v14418_v17  ;;  %v14499_v17 = vld [vmem:[%s17242_s4 + $0xa50] ss:$40 sps:$4 sm:$0xff]  }
 0x109   : > { %5331 = vmatpush1.bf16.msra.mxu0 %v14413_v18  ;;  %v14502_v18 = vld [vmem:[%s17242_s4 + $0xa58] ss:$40 sps:$4 sm:$0xff]  }
 0x10a   : > { %5536 = vmatpush1.bf16.msra.mxu1 %v14416_v19  ;;  %5332 = vmatprep.subr.bf16.mxu0 %v14421_v20  ;;  %v14507_v19 = vld [vmem:[%s17242_s4 + $0xaa4] ss:$40 sps:$4 sm:$0xff]  }
 0x10b   : > { %5537 = vmatprep.subr.bf16.mxu1 %v14424_v21  ;;  %v14510_v20 = vld [vmem:[%s17242_s4 + $0xaac] ss:$40 sps:$4 sm:$0xff]   ;;  %v14505_v21 = vld [vmem:[%s17242_s4 + $0xaa0] ss:$40 sps:$4 sm:$0xff]  }
 0x10d   : > { %5333 = vmatpush1.bf16.msra.mxu0 %v14419_v22  ;;  %v14508_v22 = vld [vmem:[%s17242_s4 + $0xaa8] ss:$40 sps:$4 sm:$0xff]  }
 0x10e   : > { %5538 = vmatpush1.bf16.msra.mxu1 %v14422_v23  ;;  %5334 = vmatprep.subr.bf16.mxu0 %v14427_v24  ;;  %v14513_v23 = vld [vmem:[%s17242_s4 + $0xaf4] ss:$40 sps:$4 sm:$0xff]  }
 0x10f   : > { %5539 = vmatprep.subr.bf16.mxu1 %v14430_v25  ;;  %v14516_v24 = vld [vmem:[%s17242_s4 + $0xafc] ss:$40 sps:$4 sm:$0xff]   ;;  %v14511_v25 = vld [vmem:[%s17242_s4 + $0xaf0] ss:$40 sps:$4 sm:$0xff]  }
 0x111   : > { %5335 = vmatpush1.bf16.msra.mxu0 %v14425_v26  ;;  %v14514_v26 = vld [vmem:[%s17242_s4 + $0xaf8] ss:$40 sps:$4 sm:$0xff]  }
 0x112   : > { %5540 = vmatpush1.bf16.msra.mxu1 %v14428_v27  ;;  %5336 = vmatprep.subr.bf16.mxu0 %v14433_v28  ;;  %v14519_v27 = vld [vmem:[%s17242_s4 + $0xb44] ss:$40 sps:$4 sm:$0xff]  }
 0x113   : > { %5541 = vmatprep.subr.bf16.mxu1 %v14436_v29  ;;  %v14522_v28 = vld [vmem:[%s17242_s4 + $0xb4c] ss:$40 sps:$4 sm:$0xff]   ;;  %v14517_v29 = vld [vmem:[%s17242_s4 + $0xb40] ss:$40 sps:$4 sm:$0xff]  }
 0x115   : > { %5337 = vmatpush1.bf16.msra.mxu0 %v14431_v32  ;;  %v14525_v32 = vld [vmem:[%s17242_s4 + $0xb94] ss:$40 sps:$4 sm:$0xff]  }
 0x116   : > { %5542 = vmatpush1.bf16.msra.mxu1 %v14434_v33  ;;  %5338 = vmatprep.subr.bf16.mxu0 %v14439_v34  ;;  %v14528_v33 = vld [vmem:[%s17242_s4 + $0xb9c] ss:$40 sps:$4 sm:$0xff]   ;;  %v14523_v34 = vld [vmem:[%s17242_s4 + $0xb90] ss:$40 sps:$4 sm:$0xff]  }
 0x117   : > { %5543 = vmatprep.subr.bf16.mxu1 %v14442_v35  ;;  %v14526_v35 = vld [vmem:[%s17242_s4 + $0xb98] ss:$40 sps:$4 sm:$0xff]  }
 0x119   : > { %5339 = vmatpush1.bf16.msra.mxu0 %v14437_v36  ;;  %v14531_v36 = vld [vmem:[%s17242_s4 + $0xbe4] ss:$40 sps:$4 sm:$0xff]  }
 0x11a   : > { %5544 = vmatpush1.bf16.msra.mxu1 %v14440_v37  ;;  %5340 = vmatprep.subr.bf16.mxu0 %v14445_v38  ;;  %v14534_v37 = vld [vmem:[%s17242_s4 + $0xbec] ss:$40 sps:$4 sm:$0xff]   ;;  %v14529_v38 = vld [vmem:[%s17242_s4 + $0xbe0] ss:$40 sps:$4 sm:$0xff]  }
 0x11b   : > { %5545 = vmatprep.subr.bf16.mxu1 %v14448_v39  ;;  %v14532_v39 = vld [vmem:[%s17242_s4 + $0xbe8] ss:$40 sps:$4 sm:$0xff]  }
 0x11d   : > { %5341 = vmatpush1.bf16.msra.mxu0 %v14443_v40  ;;  %v14537_v40 = vld [vmem:[%s17242_s4 + $0xc34] ss:$40 sps:$4 sm:$0xff]  }
 0x11e   : > { %5546 = vmatpush1.bf16.msra.mxu1 %v14446_v41  ;;  %5342 = vmatprep.subr.bf16.mxu0 %v14451_v42  ;;  %v14540_v41 = vld [vmem:[%s17242_s4 + $0xc3c] ss:$40 sps:$4 sm:$0xff]   ;;  %v14535_v42 = vld [vmem:[%s17242_s4 + $0xc30] ss:$40 sps:$4 sm:$0xff]  }
 0x11f   : > { %5547 = vmatprep.subr.bf16.mxu1 %v14454_v43  ;;  %v14538_v43 = vld [vmem:[%s17242_s4 + $0xc38] ss:$40 sps:$4 sm:$0xff]  }
 0x121   : > { %5343 = vmatpush1.bf16.msra.mxu0 %v14449_v44  ;;  %v14543_v44 = vld [vmem:[%s17242_s4 + $0xc84] ss:$40 sps:$4 sm:$0xff]  }
 0x122   : > { %5548 = vmatpush1.bf16.msra.mxu1 %v14452_v45  ;;  %5344 = vmatprep.subr.bf16.mxu0 %v14457_v46  ;;  %v14546_v45 = vld [vmem:[%s17242_s4 + $0xc8c] ss:$40 sps:$4 sm:$0xff]   ;;  %v14541_v46 = vld [vmem:[%s17242_s4 + $0xc80] ss:$40 sps:$4 sm:$0xff]  }
 0x123   : > { %5549 = vmatprep.subr.bf16.mxu1 %v14460_v47  ;;  %v14544_v47 = vld [vmem:[%s17242_s4 + $0xc88] ss:$40 sps:$4 sm:$0xff]  }
 0x125   : > { %5345 = vmatpush1.bf16.msra.mxu0 %v14455_v48  ;;  %v14549_v48 = vld [vmem:[%s17242_s4 + $0xcd4] ss:$40 sps:$4 sm:$0xff]  }
 0x126   : > { %5550 = vmatpush1.bf16.msra.mxu1 %v14458_v50  ;;  %5346 = vmatprep.subr.bf16.mxu0 %v14463_v51  ;;  %v14552_v50 = vld [vmem:[%s17242_s4 + $0xcdc] ss:$40 sps:$4 sm:$0xff]   ;;  %v14547_v51 = vld [vmem:[%s17242_s4 + $0xcd0] ss:$40 sps:$4 sm:$0xff]  }
 0x127   : > { %5551 = vmatprep.subr.bf16.mxu1 %v14466_v52  ;;  %v14550_v52 = vld [vmem:[%s17242_s4 + $0xcd8] ss:$40 sps:$4 sm:$0xff]  }
 0x129   : > { %5347 = vmatpush1.bf16.msra.mxu0 %v14461_v53  ;;  %v14555_v53 = vld [vmem:[%s17242_s4 + $0xd24] ss:$40 sps:$4 sm:$0xff]  }
 0x12a   : > { %5552 = vmatpush1.bf16.msra.mxu1 %v14464_v54  ;;  %5348 = vmatprep.subr.bf16.mxu0 %v14469_v55  ;;  %v14558_v54 = vld [vmem:[%s17242_s4 + $0xd2c] ss:$40 sps:$4 sm:$0xff]   ;;  %v14553_v55 = vld [vmem:[%s17242_s4 + $0xd20] ss:$40 sps:$4 sm:$0xff]  }
 0x12b   : > { %5553 = vmatprep.subr.bf16.mxu1 %v14472_v56  ;;  %v14556_v56 = vld [vmem:[%s17242_s4 + $0xd28] ss:$40 sps:$4 sm:$0xff]  }
 0x12d   : > { %5349 = vmatpush1.bf16.msra.mxu0 %v14467_v57  ;;  %v14561_v57 = vld [vmem:[%s17242_s4 + $0xd74] ss:$40 sps:$4 sm:$0xff]  }
 0x12e   : > { %5554 = vmatpush1.bf16.msra.mxu1 %v14470_v58  ;;  %5350 = vmatprep.subr.bf16.mxu0 %v14475_v59  ;;  %v14564_v58 = vld [vmem:[%s17242_s4 + $0xd7c] ss:$40 sps:$4 sm:$0xff]   ;;  %v14559_v59 = vld [vmem:[%s17242_s4 + $0xd70] ss:$40 sps:$4 sm:$0xff]  }
 0x12f   : > { %5555 = vmatprep.subr.bf16.mxu1 %v14478_v60  ;;  %v14562_v60 = vld [vmem:[%s17242_s4 + $0xd78] ss:$40 sps:$4 sm:$0xff]  }
 0x131   : > { %5351 = vmatpush1.bf16.msra.mxu0 %v14473_v61  ;;  %v14567_v61 = vld [vmem:[%s17242_s4 + $0xdc4] ss:$40 sps:$4 sm:$0xff]  }
 0x132   : > { %5556 = vmatpush1.bf16.msra.mxu1 %v14476_v62  ;;  %5352 = vmatprep.subr.bf16.mxu0 %v14481_v63  ;;  %v14570_v62 = vld [vmem:[%s17242_s4 + $0xdcc] ss:$40 sps:$4 sm:$0xff]   ;;  %v14565_v63 = vld [vmem:[%s17242_s4 + $0xdc0] ss:$40 sps:$4 sm:$0xff]  }
 0x133   : > { %5557 = vmatprep.subr.bf16.mxu1 %v14484_v0  ;;  %v14568_v0 = vld [vmem:[%s17242_s4 + $0xdc8] ss:$40 sps:$4 sm:$0xff]  }
 0x135   : > { %5353 = vmatpush1.bf16.msra.mxu0 %v14479_v1  ;;  %v14573_v1 = vld [vmem:[%s17242_s4 + $0xe14] ss:$40 sps:$4 sm:$0xff]  }
 0x136   : > { %5558 = vmatpush1.bf16.msra.mxu1 %v14482_v2  ;;  %5354 = vmatprep.subr.bf16.mxu0 %v14487_v3  ;;  %v14576_v2 = vld [vmem:[%s17242_s4 + $0xe1c] ss:$40 sps:$4 sm:$0xff]   ;;  %v14571_v3 = vld [vmem:[%s17242_s4 + $0xe10] ss:$40 sps:$4 sm:$0xff]  }
 0x137   : > { %5559 = vmatprep.subr.bf16.mxu1 %v14490_v4  ;;  %v14574_v4 = vld [vmem:[%s17242_s4 + $0xe18] ss:$40 sps:$4 sm:$0xff]  }
 0x139   : > { %5355 = vmatpush1.bf16.msra.mxu0 %v14485_v5  ;;  %v14579_v5 = vld [vmem:[%s17242_s4 + $0xe64] ss:$40 sps:$4 sm:$0xff]  }
 0x13a   : > { %5560 = vmatpush1.bf16.msra.mxu1 %v14488_v7  ;;  %5365 = vmatprep.subr.bf16.mxu0 %v14494_v8  ;;  %v14582_v7 = vld [vmem:[%s17242_s4 + $0xe6c] ss:$40 sps:$4 sm:$0xff]   ;;  %v14577_v8 = vld [vmem:[%s17242_s4 + $0xe60] ss:$40 sps:$4 sm:$0xff]  }
 0x13b   : > { %5570 = vmatprep.subr.bf16.mxu1 %v14497_v9  ;;  %v14580_v9 = vld [vmem:[%s17242_s4 + $0xe68] ss:$40 sps:$4 sm:$0xff]  }
 0x13c   : > { %5357 = vmatmul.mubr.bf16.vlgmr.msra.gmra.mrb[0].mxu0 %v17410_v11 }
 0x13d   : > { %5562 = vmatmul.mubr.bf16.vlgmr.msra.gmra.mrb[0].mxu1 %v17410_v11  ;;  %5366 = vmatpush1.bf16.msra.mxu0 %v14492_v10  ;;  %v14585_v10 = vld [vmem:[%s17242_s4 + $0xeb4] ss:$40 sps:$4 sm:$0xff]  }
 0x13e   : > { %5571 = vmatpush1.bf16.msra.mxu1 %v14495_v12  ;;  %5367 = vmatprep.subr.bf16.mxu0 %v14501_v13  ;;  %v14588_v12 = vld [vmem:[%s17242_s4 + $0xebc] ss:$40 sps:$4 sm:$0xff]   ;;  %v14583_v13 = vld [vmem:[%s17242_s4 + $0xeb0] ss:$40 sps:$4 sm:$0xff]  }
 0x13f   : > { %5572 = vmatprep.subr.bf16.mxu1 %v14504_v15  ;;  %5397 = vmatprep.mubr.bf16.mxu0 %v17419_v16  ;;  %v14586_v15 = vld [vmem:[%s17242_s4 + $0xeb8] ss:$40 sps:$4 sm:$0xff]  }
 0x140   : > { %5602 = vmatprep.mubr.bf16.mxu1 %v17419_v16 }
 0x141   : > { %5368 = vmatpush1.bf16.msra.mxu0 %v14499_v17  ;;  %v14592_v17 = vld [vmem:[%s17242_s4 + $0xf04] ss:$40 sps:$4 sm:$0xff]  }
 0x142   : > { %5573 = vmatpush1.bf16.msra.mxu1 %v14502_v18  ;;  %5369 = vmatprep.subr.bf16.mxu0 %v14507_v19  ;;  %v14595_v18 = vld [vmem:[%s17242_s4 + $0xf0c] ss:$40 sps:$4 sm:$0xff]   ;;  %v14590_v19 = vld [vmem:[%s17242_s4 + $0xf00] ss:$40 sps:$4 sm:$0xff]  }
 0x143   : > { %5574 = vmatprep.subr.bf16.mxu1 %v14510_v20  ;;  %v14593_v20 = vld [vmem:[%s17242_s4 + $0xf08] ss:$40 sps:$4 sm:$0xff]  }
 0x145   : > { %5370 = vmatpush1.bf16.msra.mxu0 %v14505_v21  ;;  %v17489_v21 = vcombine.low %v17414_v14, %v17414_v14  ;;  %v14597_v14 = vld [vmem:[%s17242_s4 + $0xf50] ss:$40 sps:$4 sm:$0xff]  }
 0x146   : > { %5575 = vmatpush1.bf16.msra.mxu1 %v14508_v22  ;;  %5371 = vmatprep.subr.bf16.mxu0 %v14513_v23  ;;  %v17491_v22 = vld [vmem:[#allocation2 + $0x18] sm:$0xff] }
 0x147   : > { %5576 = vmatprep.subr.bf16.mxu1 %v14516_v24  ;;  %v14599_v23 = vld [vmem:[%s17242_s4 + $0xf54] ss:$40 sps:$4 sm:$0xff]  }
 0x148   : > { %v14602_v24 = vld [vmem:[%s17242_s4 + $0xf5c] ss:$40 sps:$4 sm:$0xff]  }
 0x149   : > { %5372 = vmatpush1.bf16.msra.mxu0 %v14511_v25  ;;  %v17497_v25 = vcombine.high %v17491_v22, %v17491_v22 }
 0x14a   : > { %5577 = vmatpush1.bf16.msra.mxu1 %v14514_v26  ;;  %5373 = vmatprep.subr.bf16.mxu0 %v14519_v27  ;;  %v14600_v26 = vld [vmem:[%s17242_s4 + $0xf58] ss:$40 sps:$4 sm:$0xff]   ;;  %v14605_v27 = vld [vmem:[%s17242_s4 + $0xfa4] ss:$40 sps:$4 sm:$0xff]  }
 0x14b   : > { %5578 = vmatprep.subr.bf16.mxu1 %v14522_v28  ;;  %v14608_v28 = vld [vmem:[%s17242_s4 + $0xfac] ss:$40 sps:$4 sm:$0xff]  }
 0x14d   : > { %5374 = vmatpush1.bf16.msra.mxu0 %v14517_v29  ;;  %v14603_v29 = vld [vmem:[%s17242_s4 + $0xfa0] ss:$40 sps:$4 sm:$0xff]  }
 0x14e   : > { %5579 = vmatpush1.bf16.msra.mxu1 %v14520_v30  ;;  %5375 = vmatprep.subr.bf16.mxu0 %v14525_v32  ;;  %v14606_v30 = vld [vmem:[%s17242_s4 + $0xfa8] ss:$40 sps:$4 sm:$0xff]   ;;  %v14611_v32 = vld [vmem:[%s17242_s4 + $0xff4] ss:$40 sps:$4 sm:$0xff]  }
 0x14f   : > { %5580 = vmatprep.subr.bf16.mxu1 %v14528_v33  ;;  %v14614_v33 = vld [vmem:[%s17242_s4 + $0xffc] ss:$40 sps:$4 sm:$0xff]  }
 0x151   : > { %5376 = vmatpush1.bf16.msra.mxu0 %v14523_v34  ;;  %v14609_v34 = vld [vmem:[%s17242_s4 + $0xff0] ss:$40 sps:$4 sm:$0xff]  }
 0x152   : > { %5581 = vmatpush1.bf16.msra.mxu1 %v14526_v35  ;;  %5377 = vmatprep.subr.bf16.mxu0 %v14531_v36  ;;  %v14612_v35 = vld [vmem:[%s17242_s4 + $0xff8] ss:$40 sps:$4 sm:$0xff]   ;;  %v14617_v36 = vld [vmem:[%s17242_s4 + $0x1044] ss:$40 sps:$4 sm:$0xff]  }
 0x153   : > { %5582 = vmatprep.subr.bf16.mxu1 %v14534_v37  ;;  %v14620_v37 = vld [vmem:[%s17242_s4 + $0x104c] ss:$40 sps:$4 sm:$0xff]  }
 0x155   : > { %5378 = vmatpush1.bf16.msra.mxu0 %v14529_v38  ;;  %v14615_v38 = vld [vmem:[%s17242_s4 + $0x1040] ss:$40 sps:$4 sm:$0xff]  }
 0x156   : > { %5583 = vmatpush1.bf16.msra.mxu1 %v14532_v39  ;;  %5379 = vmatprep.subr.bf16.mxu0 %v14537_v40  ;;  %v14618_v39 = vld [vmem:[%s17242_s4 + $0x1048] ss:$40 sps:$4 sm:$0xff]   ;;  %v14623_v40 = vld [vmem:[%s17242_s4 + $0x1094] ss:$40 sps:$4 sm:$0xff]  }
 0x157   : > { %5584 = vmatprep.subr.bf16.mxu1 %v14540_v41  ;;  %v14626_v41 = vld [vmem:[%s17242_s4 + $0x109c] ss:$40 sps:$4 sm:$0xff]  }
 0x159   : > { %5380 = vmatpush1.bf16.msra.mxu0 %v14535_v42  ;;  %v14621_v42 = vld [vmem:[%s17242_s4 + $0x1090] ss:$40 sps:$4 sm:$0xff]  }
 0x15a   : > { %5585 = vmatpush1.bf16.msra.mxu1 %v14538_v43  ;;  %5381 = vmatprep.subr.bf16.mxu0 %v14543_v44  ;;  %v14624_v43 = vld [vmem:[%s17242_s4 + $0x1098] ss:$40 sps:$4 sm:$0xff]   ;;  %v14629_v44 = vld [vmem:[%s17242_s4 + $0x10e4] ss:$40 sps:$4 sm:$0xff]  }
 0x15b   : > { %5586 = vmatprep.subr.bf16.mxu1 %v14546_v45  ;;  %v14632_v45 = vld [vmem:[%s17242_s4 + $0x10ec] ss:$40 sps:$4 sm:$0xff]  }
 0x15d   : > { %5382 = vmatpush1.bf16.msra.mxu0 %v14541_v46  ;;  %v14627_v46 = vld [vmem:[%s17242_s4 + $0x10e0] ss:$40 sps:$4 sm:$0xff]  }
 0x15e   : > { %5587 = vmatpush1.bf16.msra.mxu1 %v14544_v47  ;;  %5383 = vmatprep.subr.bf16.mxu0 %v14549_v48  ;;  %v14630_v47 = vld [vmem:[%s17242_s4 + $0x10e8] ss:$40 sps:$4 sm:$0xff]   ;;  %v14635_v48 = vld [vmem:[%s17242_s4 + $0x1134] ss:$40 sps:$4 sm:$0xff]  }
 0x15f   : > { %5588 = vmatprep.subr.bf16.mxu1 %v14552_v50  ;;  %v14638_v50 = vld [vmem:[%s17242_s4 + $0x113c] ss:$40 sps:$4 sm:$0xff]  }
 0x161   : > { %5384 = vmatpush1.bf16.msra.mxu0 %v14547_v51  ;;  %v14633_v51 = vld [vmem:[%s17242_s4 + $0x1130] ss:$40 sps:$4 sm:$0xff]  }
 0x162   : > { %5589 = vmatpush1.bf16.msra.mxu1 %v14550_v52  ;;  %5385 = vmatprep.subr.bf16.mxu0 %v14555_v53  ;;  %v14636_v52 = vld [vmem:[%s17242_s4 + $0x1138] ss:$40 sps:$4 sm:$0xff]   ;;  %v14641_v53 = vld [vmem:[%s17242_s4 + $0x1184] ss:$40 sps:$4 sm:$0xff]  }
 0x163   : > { %5590 = vmatprep.subr.bf16.mxu1 %v14558_v54  ;;  %v14644_v54 = vld [vmem:[%s17242_s4 + $0x118c] ss:$40 sps:$4 sm:$0xff]  }
 0x165   : > { %5386 = vmatpush1.bf16.msra.mxu0 %v14553_v55  ;;  %v14639_v55 = vld [vmem:[%s17242_s4 + $0x1180] ss:$40 sps:$4 sm:$0xff]  }
 0x166   : > { %5591 = vmatpush1.bf16.msra.mxu1 %v14556_v56  ;;  %5387 = vmatprep.subr.bf16.mxu0 %v14561_v57  ;;  %v14642_v56 = vld [vmem:[%s17242_s4 + $0x1188] ss:$40 sps:$4 sm:$0xff]   ;;  %v14647_v57 = vld [vmem:[%s17242_s4 + $0x11d4] ss:$40 sps:$4 sm:$0xff]  }
 0x167   : > { %5592 = vmatprep.subr.bf16.mxu1 %v14564_v58  ;;  %v14650_v58 = vld [vmem:[%s17242_s4 + $0x11dc] ss:$40 sps:$4 sm:$0xff]  }
 0x169   : > { %5388 = vmatpush1.bf16.msra.mxu0 %v14559_v59  ;;  %v14645_v59 = vld [vmem:[%s17242_s4 + $0x11d0] ss:$40 sps:$4 sm:$0xff]  }
 0x16a   : > { %5593 = vmatpush1.bf16.msra.mxu1 %v14562_v60  ;;  %5389 = vmatprep.subr.bf16.mxu0 %v14567_v61  ;;  %v14648_v60 = vld [vmem:[%s17242_s4 + $0x11d8] ss:$40 sps:$4 sm:$0xff]   ;;  %v14653_v61 = vld [vmem:[%s17242_s4 + $0x1224] ss:$40 sps:$4 sm:$0xff]  }
 0x16b   : > { %5594 = vmatprep.subr.bf16.mxu1 %v14570_v62  ;;  %v14656_v62 = vld [vmem:[%s17242_s4 + $0x122c] ss:$40 sps:$4 sm:$0xff]  }
 0x16d   : > { %5390 = vmatpush1.bf16.msra.mxu0 %v14565_v63  ;;  %v14651_v63 = vld [vmem:[%s17242_s4 + $0x1220] ss:$40 sps:$4 sm:$0xff]  }
 0x16e   : > { %5595 = vmatpush1.bf16.msra.mxu1 %v14568_v0  ;;  %5391 = vmatprep.subr.bf16.mxu0 %v14573_v1  ;;  %v14654_v0 = vld [vmem:[%s17242_s4 + $0x1228] ss:$40 sps:$4 sm:$0xff]   ;;  %v14659_v1 = vld [vmem:[%s17242_s4 + $0x1274] ss:$40 sps:$4 sm:$0xff]  }
 0x16f   : > { %5596 = vmatprep.subr.bf16.mxu1 %v14576_v2  ;;  %v14662_v2 = vld [vmem:[%s17242_s4 + $0x127c] ss:$40 sps:$4 sm:$0xff]  }
 0x171   : > { %5392 = vmatpush1.bf16.msra.mxu0 %v14571_v3  ;;  %v14657_v3 = vld [vmem:[%s17242_s4 + $0x1270] ss:$40 sps:$4 sm:$0xff]  }
 0x172   : > { %5597 = vmatpush1.bf16.msra.mxu1 %v14574_v4  ;;  %5393 = vmatprep.subr.bf16.mxu0 %v14579_v5  ;;  %v14660_v4 = vld [vmem:[%s17242_s4 + $0x1278] ss:$40 sps:$4 sm:$0xff]   ;;  %v14665_v5 = vld [vmem:[%s17242_s4 + $0x12c4] ss:$40 sps:$4 sm:$0xff]  }
 0x173   : > { %5598 = vmatprep.subr.bf16.mxu1 %v14582_v7  ;;  %v14668_v7 = vld [vmem:[%s17242_s4 + $0x12cc] ss:$40 sps:$4 sm:$0xff]  }
 0x175   : > { %5394 = vmatpush1.bf16.msra.mxu0 %v14577_v8  ;;  %v14663_v8 = vld [vmem:[%s17242_s4 + $0x12c0] ss:$40 sps:$4 sm:$0xff]  }
 0x176   : > { %5599 = vmatpush1.bf16.msra.mxu1 %v14580_v9  ;;  %5395 = vmatprep.subr.bf16.mxu0 %v14585_v10  ;;  %v14666_v9 = vld [vmem:[%s17242_s4 + $0x12c8] ss:$40 sps:$4 sm:$0xff]   ;;  %v14671_v10 = vld [vmem:[%s17242_s4 + $0x1314] ss:$40 sps:$4 sm:$0xff]  }
 0x177   : > { %5600 = vmatprep.subr.bf16.mxu1 %v14588_v12  ;;  %v14674_v12 = vld [vmem:[%s17242_s4 + $0x131c] ss:$40 sps:$4 sm:$0xff]  }
 0x179   : > { %5396 = vmatpush1.bf16.msra.mxu0 %v14583_v13  ;;  %v14669_v13 = vld [vmem:[%s17242_s4 + $0x1310] ss:$40 sps:$4 sm:$0xff]  }
 0x17a   : > { %5601 = vmatpush1.bf16.msra.mxu1 %v14586_v15  ;;  %5406 = vmatprep.subr.bf16.mxu0 %v14592_v17  ;;  %v14672_v15 = vld [vmem:[%s17242_s4 + $0x1318] ss:$40 sps:$4 sm:$0xff]   ;;  %v14677_v17 = vld [vmem:[%s17242_s4 + $0x1364] ss:$40 sps:$4 sm:$0xff]  }
 0x17b   : > { %5611 = vmatprep.subr.bf16.mxu1 %v14595_v18  ;;  %v14680_v18 = vld [vmem:[%s17242_s4 + $0x136c] ss:$40 sps:$4 sm:$0xff]  }
 0x17c   : > { %5398 = vmatmul.mubr.bf16.vlgmr.msra.gmra.mrb[0].mxu0 %v17489_v21 }
 0x17d   : > { %5603 = vmatmul.mubr.bf16.vlgmr.msra.gmra.mrb[0].mxu1 %v17489_v21  ;;  %5407 = vmatpush1.bf16.msra.mxu0 %v14590_v19  ;;  %v14675_v19 = vld [vmem:[%s17242_s4 + $0x1360] ss:$40 sps:$4 sm:$0xff]  }
 0x17e   : > { %5612 = vmatpush1.bf16.msra.mxu1 %v14593_v20  ;;  %5408 = vmatprep.subr.bf16.mxu0 %v14599_v23  ;;  %v14678_v20 = vld [vmem:[%s17242_s4 + $0x1368] ss:$40 sps:$4 sm:$0xff]   ;;  %v14683_v23 = vld [vmem:[%s17242_s4 + $0x13b4] ss:$40 sps:$4 sm:$0xff]  }
 0x17f   : > { %5613 = vmatprep.subr.bf16.mxu1 %v14602_v24  ;;  %5438 = vmatprep.mubr.bf16.mxu0 %v17497_v25  ;;  %v14686_v24 = vld [vmem:[%s17242_s4 + $0x13bc] ss:$40 sps:$4 sm:$0xff]  }
 0x180   : > { %5643 = vmatprep.mubr.bf16.mxu1 %v17497_v25 }
 0x181   : > { %5409 = vmatpush1.bf16.msra.mxu0 %v14597_v14  ;;  %v14681_v14 = vld [vmem:[%s17242_s4 + $0x13b0] ss:$40 sps:$4 sm:$0xff]  }
 0x182   : > { %5614 = vmatpush1.bf16.msra.mxu1 %v14600_v26  ;;  %5410 = vmatprep.subr.bf16.mxu0 %v14605_v27  ;;  %v14684_v26 = vld [vmem:[%s17242_s4 + $0x13b8] ss:$40 sps:$4 sm:$0xff]   ;;  %v14690_v27 = vld [vmem:[%s17242_s4 + $0x1404] ss:$40 sps:$4 sm:$0xff]  }
 0x183   : > { %5615 = vmatprep.subr.bf16.mxu1 %v14608_v28  ;;  %v14693_v28 = vld [vmem:[%s17242_s4 + $0x140c] ss:$40 sps:$4 sm:$0xff]  }
 0x185   : > { %5411 = vmatpush1.bf16.msra.mxu0 %v14603_v29  ;;  %v14688_v29 = vld [vmem:[%s17242_s4 + $0x1400] ss:$40 sps:$4 sm:$0xff]  }
 0x186   : > { %5616 = vmatpush1.bf16.msra.mxu1 %v14606_v30  ;;  %5412 = vmatprep.subr.bf16.mxu0 %v14611_v32  ;;  %v17566_v30 = vcombine.low %v17491_v22, %v17491_v22  ;;  %v17568_v32 = vld [vmem:[#allocation2 + $0x20] sm:$0xff] }
 0x187   : > { %5617 = vmatprep.subr.bf16.mxu1 %v14614_v33  ;;  %v14691_v33 = vld [vmem:[%s17242_s4 + $0x1408] ss:$40 sps:$4 sm:$0xff]  }
 0x188   : > { %v14695_v22 = vld [vmem:[%s17242_s4 + $0x1450] ss:$40 sps:$4 sm:$0xff]  }
 0x189   : > { %5413 = vmatpush1.bf16.msra.mxu0 %v14609_v34  ;;  %v14697_v34 = vld [vmem:[%s17242_s4 + $0x1454] ss:$40 sps:$4 sm:$0xff]  }
 0x18a   : > { %5618 = vmatpush1.bf16.msra.mxu1 %v14612_v35  ;;  %5414 = vmatprep.subr.bf16.mxu0 %v14617_v36  ;;  %v14700_v35 = vld [vmem:[%s17242_s4 + $0x145c] ss:$40 sps:$4 sm:$0xff]   ;;  %v17575_v36 = vcombine.high %v17568_v32, %v17568_v32 }
 0x18b   : > { %5619 = vmatprep.subr.bf16.mxu1 %v14620_v37  ;;  %v14698_v37 = vld [vmem:[%s17242_s4 + $0x1458] ss:$40 sps:$4 sm:$0xff]  }
 0x18d   : > { %5415 = vmatpush1.bf16.msra.mxu0 %v14615_v38  ;;  %v14703_v38 = vld [vmem:[%s17242_s4 + $0x14a4] ss:$40 sps:$4 sm:$0xff]  }
 0x18e   : > { %5620 = vmatpush1.bf16.msra.mxu1 %v14618_v39  ;;  %5416 = vmatprep.subr.bf16.mxu0 %v14623_v40  ;;  %v14706_v39 = vld [vmem:[%s17242_s4 + $0x14ac] ss:$40 sps:$4 sm:$0xff]   ;;  %v14701_v40 = vld [vmem:[%s17242_s4 + $0x14a0] ss:$40 sps:$4 sm:$0xff]  }
 0x18f   : > { %5621 = vmatprep.subr.bf16.mxu1 %v14626_v41  ;;  %v14704_v41 = vld [vmem:[%s17242_s4 + $0x14a8] ss:$40 sps:$4 sm:$0xff]  }
 0x191   : > { %5417 = vmatpush1.bf16.msra.mxu0 %v14621_v42  ;;  %v14709_v42 = vld [vmem:[%s17242_s4 + $0x14f4] ss:$40 sps:$4 sm:$0xff]  }
 0x192   : > { %5622 = vmatpush1.bf16.msra.mxu1 %v14624_v43  ;;  %5418 = vmatprep.subr.bf16.mxu0 %v14629_v44  ;;  %v14712_v43 = vld [vmem:[%s17242_s4 + $0x14fc] ss:$40 sps:$4 sm:$0xff]   ;;  %v14707_v44 = vld [vmem:[%s17242_s4 + $0x14f0] ss:$40 sps:$4 sm:$0xff]  }
 0x193   : > { %5623 = vmatprep.subr.bf16.mxu1 %v14632_v45  ;;  %v14710_v45 = vld [vmem:[%s17242_s4 + $0x14f8] ss:$40 sps:$4 sm:$0xff]  }
 0x195   : > { %5419 = vmatpush1.bf16.msra.mxu0 %v14627_v46  ;;  %v14715_v46 = vld [vmem:[%s17242_s4 + $0x1544] ss:$40 sps:$4 sm:$0xff]  }
 0x196   : > { %5624 = vmatpush1.bf16.msra.mxu1 %v14630_v47  ;;  %5420 = vmatprep.subr.bf16.mxu0 %v14635_v48  ;;  %v14718_v47 = vld [vmem:[%s17242_s4 + $0x154c] ss:$40 sps:$4 sm:$0xff]   ;;  %v14713_v48 = vld [vmem:[%s17242_s4 + $0x1540] ss:$40 sps:$4 sm:$0xff]  }
 0x197   : > { %5625 = vmatprep.subr.bf16.mxu1 %v14638_v50  ;;  %v14716_v50 = vld [vmem:[%s17242_s4 + $0x1548] ss:$40 sps:$4 sm:$0xff]  }
 0x199   : > { %5421 = vmatpush1.bf16.msra.mxu0 %v14633_v51  ;;  %v14721_v51 = vld [vmem:[%s17242_s4 + $0x1594] ss:$40 sps:$4 sm:$0xff]  }
 0x19a   : > { %5626 = vmatpush1.bf16.msra.mxu1 %v14636_v52  ;;  %5422 = vmatprep.subr.bf16.mxu0 %v14641_v53  ;;  %v14724_v52 = vld [vmem:[%s17242_s4 + $0x159c] ss:$40 sps:$4 sm:$0xff]   ;;  %v14719_v53 = vld [vmem:[%s17242_s4 + $0x1590] ss:$40 sps:$4 sm:$0xff]  }
 0x19b   : > { %5627 = vmatprep.subr.bf16.mxu1 %v14644_v54  ;;  %v14722_v54 = vld [vmem:[%s17242_s4 + $0x1598] ss:$40 sps:$4 sm:$0xff]  }
 0x19d   : > { %5423 = vmatpush1.bf16.msra.mxu0 %v14639_v55  ;;  %v14727_v55 = vld [vmem:[%s17242_s4 + $0x15e4] ss:$40 sps:$4 sm:$0xff]  }
 0x19e   : > { %5628 = vmatpush1.bf16.msra.mxu1 %v14642_v56  ;;  %5424 = vmatprep.subr.bf16.mxu0 %v14647_v57  ;;  %v14730_v56 = vld [vmem:[%s17242_s4 + $0x15ec] ss:$40 sps:$4 sm:$0xff]   ;;  %v14725_v57 = vld [vmem:[%s17242_s4 + $0x15e0] ss:$40 sps:$4 sm:$0xff]  }
 0x19f   : > { %5629 = vmatprep.subr.bf16.mxu1 %v14650_v58  ;;  %v14728_v58 = vld [vmem:[%s17242_s4 + $0x15e8] ss:$40 sps:$4 sm:$0xff]  }
 0x1a1   : > { %5425 = vmatpush1.bf16.msra.mxu0 %v14645_v59  ;;  %v14733_v59 = vld [vmem:[%s17242_s4 + $0x1634] ss:$40 sps:$4 sm:$0xff]  }
 0x1a2   : > { %5630 = vmatpush1.bf16.msra.mxu1 %v14648_v60  ;;  %5426 = vmatprep.subr.bf16.mxu0 %v14653_v61  ;;  %v14736_v60 = vld [vmem:[%s17242_s4 + $0x163c] ss:$40 sps:$4 sm:$0xff]   ;;  %v14731_v61 = vld [vmem:[%s17242_s4 + $0x1630] ss:$40 sps:$4 sm:$0xff]  }
 0x1a3   : > { %5631 = vmatprep.subr.bf16.mxu1 %v14656_v62  ;;  %v14734_v62 = vld [vmem:[%s17242_s4 + $0x1638] ss:$40 sps:$4 sm:$0xff]  }
 0x1a5   : > { %5427 = vmatpush1.bf16.msra.mxu0 %v14651_v63  ;;  %v14739_v63 = vld [vmem:[%s17242_s4 + $0x1684] ss:$40 sps:$4 sm:$0xff]  }
 0x1a6   : > { %5632 = vmatpush1.bf16.msra.mxu1 %v14654_v0  ;;  %5428 = vmatprep.subr.bf16.mxu0 %v14659_v1  ;;  %v14742_v0 = vld [vmem:[%s17242_s4 + $0x168c] ss:$40 sps:$4 sm:$0xff]   ;;  %v14737_v1 = vld [vmem:[%s17242_s4 + $0x1680] ss:$40 sps:$4 sm:$0xff]  }
 0x1a7   : > { %5633 = vmatprep.subr.bf16.mxu1 %v14662_v2  ;;  %v14740_v2 = vld [vmem:[%s17242_s4 + $0x1688] ss:$40 sps:$4 sm:$0xff]  }
 0x1a9   : > { %5429 = vmatpush1.bf16.msra.mxu0 %v14657_v3  ;;  %v14745_v3 = vld [vmem:[%s17242_s4 + $0x16d4] ss:$40 sps:$4 sm:$0xff]  }
 0x1aa   : > { %5634 = vmatpush1.bf16.msra.mxu1 %v14660_v4  ;;  %5430 = vmatprep.subr.bf16.mxu0 %v14665_v5  ;;  %v14748_v4 = vld [vmem:[%s17242_s4 + $0x16dc] ss:$40 sps:$4 sm:$0xff]   ;;  %v14743_v5 = vld [vmem:[%s17242_s4 + $0x16d0] ss:$40 sps:$4 sm:$0xff]  }
 0x1ab   : > { %5635 = vmatprep.subr.bf16.mxu1 %v14668_v7  ;;  %v14746_v7 = vld [vmem:[%s17242_s4 + $0x16d8] ss:$40 sps:$4 sm:$0xff]  }
 0x1ad   : > { %5431 = vmatpush1.bf16.msra.mxu0 %v14663_v8  ;;  %v14751_v8 = vld [vmem:[%s17242_s4 + $0x1724] ss:$40 sps:$4 sm:$0xff]  }
 0x1ae   : > { %5636 = vmatpush1.bf16.msra.mxu1 %v14666_v9  ;;  %5432 = vmatprep.subr.bf16.mxu0 %v14671_v10  ;;  %v14754_v9 = vld [vmem:[%s17242_s4 + $0x172c] ss:$40 sps:$4 sm:$0xff]   ;;  %v14749_v10 = vld [vmem:[%s17242_s4 + $0x1720] ss:$40 sps:$4 sm:$0xff]  }
 0x1af   : > { %5637 = vmatprep.subr.bf16.mxu1 %v14674_v12  ;;  %v14752_v12 = vld [vmem:[%s17242_s4 + $0x1728] ss:$40 sps:$4 sm:$0xff]  }
 0x1b1   : > { %5433 = vmatpush1.bf16.msra.mxu0 %v14669_v13  ;;  %v14757_v13 = vld [vmem:[%s17242_s4 + $0x1774] ss:$40 sps:$4 sm:$0xff]  }
 0x1b2   : > { %5638 = vmatpush1.bf16.msra.mxu1 %v14672_v15  ;;  %5434 = vmatprep.subr.bf16.mxu0 %v14677_v17  ;;  %v14760_v15 = vld [vmem:[%s17242_s4 + $0x177c] ss:$40 sps:$4 sm:$0xff]   ;;  %v14755_v17 = vld [vmem:[%s17242_s4 + $0x1770] ss:$40 sps:$4 sm:$0xff]  }
 0x1b3   : > { %5639 = vmatprep.subr.bf16.mxu1 %v14680_v18  ;;  %v14758_v18 = vld [vmem:[%s17242_s4 + $0x1778] ss:$40 sps:$4 sm:$0xff]  }
 0x1b5   : > { %5435 = vmatpush1.bf16.msra.mxu0 %v14675_v19  ;;  %v14763_v19 = vld [vmem:[%s17242_s4 + $0x17c4] ss:$40 sps:$4 sm:$0xff]  }
 0x1b6   : > { %5640 = vmatpush1.bf16.msra.mxu1 %v14678_v20  ;;  %5436 = vmatprep.subr.bf16.mxu0 %v14683_v23  ;;  %v14766_v20 = vld [vmem:[%s17242_s4 + $0x17cc] ss:$40 sps:$4 sm:$0xff]   ;;  %v14761_v23 = vld [vmem:[%s17242_s4 + $0x17c0] ss:$40 sps:$4 sm:$0xff]  }
 0x1b7   : > { %5641 = vmatprep.subr.bf16.mxu1 %v14686_v24  ;;  %v14764_v24 = vld [vmem:[%s17242_s4 + $0x17c8] ss:$40 sps:$4 sm:$0xff]  }
 0x1b9   : > { %5437 = vmatpush1.bf16.msra.mxu0 %v14681_v14  ;;  %v14769_v14 = vld [vmem:[%s17242_s4 + $0x1814] ss:$40 sps:$4 sm:$0xff]  }
 0x1ba   : > { %5642 = vmatpush1.bf16.msra.mxu1 %v14684_v26  ;;  %5447 = vmatprep.subr.bf16.mxu0 %v14690_v27  ;;  %v14772_v26 = vld [vmem:[%s17242_s4 + $0x181c] ss:$40 sps:$4 sm:$0xff]   ;;  %v14767_v27 = vld [vmem:[%s17242_s4 + $0x1810] ss:$40 sps:$4 sm:$0xff]  }
 0x1bb   : > { %5652 = vmatprep.subr.bf16.mxu1 %v14693_v28  ;;  %v14770_v28 = vld [vmem:[%s17242_s4 + $0x1818] ss:$40 sps:$4 sm:$0xff]  }
 0x1bc   : > { %5439 = vmatmul.mubr.bf16.vlgmr.msra.gmra.mrb[0].mxu0 %v17566_v30 }
 0x1bd   : > { %5644 = vmatmul.mubr.bf16.vlgmr.msra.gmra.mrb[0].mxu1 %v17566_v30  ;;  %5448 = vmatpush1.bf16.msra.mxu0 %v14688_v29  ;;  %v14775_v29 = vld [vmem:[%s17242_s4 + $0x1864] ss:$40 sps:$4 sm:$0xff]  }
 0x1be   : > { %5653 = vmatpush1.bf16.msra.mxu1 %v14691_v33  ;;  %5449 = vmatprep.subr.bf16.mxu0 %v14697_v34  ;;  %v14778_v33 = vld [vmem:[%s17242_s4 + $0x186c] ss:$40 sps:$4 sm:$0xff]   ;;  %v14773_v34 = vld [vmem:[%s17242_s4 + $0x1860] ss:$40 sps:$4 sm:$0xff]  }
 0x1bf   : > { %5654 = vmatprep.subr.bf16.mxu1 %v14700_v35  ;;  %5479 = vmatprep.mubr.bf16.mxu0 %v17575_v36  ;;  %v14776_v35 = vld [vmem:[%s17242_s4 + $0x1868] ss:$40 sps:$4 sm:$0xff]  }
 0x1c0   : > { %5684 = vmatprep.mubr.bf16.mxu1 %v17575_v36 }
 0x1c1   : > { %5450 = vmatpush1.bf16.msra.mxu0 %v14695_v22  ;;  %v14781_v22 = vld [vmem:[%s17242_s4 + $0x18b4] ss:$40 sps:$4 sm:$0xff]  }
 0x1c2   : > { %5655 = vmatpush1.bf16.msra.mxu1 %v14698_v37  ;;  %5451 = vmatprep.subr.bf16.mxu0 %v14703_v38  ;;  %v14784_v37 = vld [vmem:[%s17242_s4 + $0x18bc] ss:$40 sps:$4 sm:$0xff]   ;;  %v14779_v38 = vld [vmem:[%s17242_s4 + $0x18b0] ss:$40 sps:$4 sm:$0xff]  }
 0x1c3   : > { %5656 = vmatprep.subr.bf16.mxu1 %v14706_v39  ;;  %v14782_v39 = vld [vmem:[%s17242_s4 + $0x18b8] ss:$40 sps:$4 sm:$0xff]  }
 0x1c5   : > { %5452 = vmatpush1.bf16.msra.mxu0 %v14701_v40  ;;  %v14789_v40 = vld [vmem:[%s17242_s4 + $0x14] ss:$40 sps:$4 sm:$0xff]  }
 0x1c6   : > { %5657 = vmatpush1.bf16.msra.mxu1 %v14704_v41  ;;  %5453 = vmatprep.subr.bf16.mxu0 %v14709_v42  ;;  %v14792_v41 = vld [vmem:[%s17242_s4 + $0x1c] ss:$40 sps:$4 sm:$0xff]   ;;  %v17643_v42 = vcombine.low %v17568_v32, %v17568_v32  ;;  %v14793_v32 = vld [vmem:[%s17242_s4 + $0x60] ss:$40 sps:$4 sm:$0xff]  }
 0x1c7   : > { %5658 = vmatprep.subr.bf16.mxu1 %v14712_v43  ;;  %v14787_v43 = vld [vmem:[%s17242_s4 + $0x10] ss:$40 sps:$4 sm:$0xff]  }
 0x1c9   : > { %5454 = vmatpush1.bf16.msra.mxu0 %v14707_v44  ;;  %v14790_v44 = vld [vmem:[%s17242_s4 + $0x18] ss:$40 sps:$4 sm:$0xff]  }
 0x1ca   : > { %5659 = vmatpush1.bf16.msra.mxu1 %v14710_v45  ;;  %5455 = vmatprep.subr.bf16.mxu0 %v14715_v46  ;;  %v14795_v45 = vld [vmem:[%s17242_s4 + $0x64] ss:$40 sps:$4 sm:$0xff]  }
 0x1cb   : > { %5660 = vmatprep.subr.bf16.mxu1 %v14718_v47  ;;  %v14798_v46 = vld [vmem:[%s17242_s4 + $0x6c] ss:$40 sps:$4 sm:$0xff]   ;;  %v14796_v47 = vld [vmem:[%s17242_s4 + $0x68] ss:$40 sps:$4 sm:$0xff]  }
 0x1cd   : > { %5456 = vmatpush1.bf16.msra.mxu0 %v14713_v48  ;;  %v14801_v48 = vld [vmem:[%s17242_s4 + $0xb4] ss:$40 sps:$4 sm:$0xff]  }
 0x1ce   : > { %5661 = vmatpush1.bf16.msra.mxu1 %v14716_v50  ;;  %5457 = vmatprep.subr.bf16.mxu0 %v14721_v51  ;;  %v14804_v50 = vld [vmem:[%s17242_s4 + $0xbc] ss:$40 sps:$4 sm:$0xff]   ;;  %v14799_v51 = vld [vmem:[%s17242_s4 + $0xb0] ss:$40 sps:$4 sm:$0xff]  }
 0x1cf   : > { %5662 = vmatprep.subr.bf16.mxu1 %v14724_v52  ;;  %v14802_v52 = vld [vmem:[%s17242_s4 + $0xb8] ss:$40 sps:$4 sm:$0xff]  }
 0x1d1   : > { %5458 = vmatpush1.bf16.msra.mxu0 %v14719_v53  ;;  %v14807_v53 = vld [vmem:[%s17242_s4 + $0x104] ss:$40 sps:$4 sm:$0xff]  }
 0x1d2   : > { %5663 = vmatpush1.bf16.msra.mxu1 %v14722_v54  ;;  %5459 = vmatprep.subr.bf16.mxu0 %v14727_v55  ;;  %v14810_v54 = vld [vmem:[%s17242_s4 + $0x10c] ss:$40 sps:$4 sm:$0xff]   ;;  %v14805_v55 = vld [vmem:[%s17242_s4 + $0x100] ss:$40 sps:$4 sm:$0xff]  }
 0x1d3   : > { %5664 = vmatprep.subr.bf16.mxu1 %v14730_v56  ;;  %v14808_v56 = vld [vmem:[%s17242_s4 + $0x108] ss:$40 sps:$4 sm:$0xff]  }
 0x1d5   : > { %5460 = vmatpush1.bf16.msra.mxu0 %v14725_v57  ;;  %v14813_v57 = vld [vmem:[%s17242_s4 + $0x154] ss:$40 sps:$4 sm:$0xff]  }
 0x1d6   : > { %5665 = vmatpush1.bf16.msra.mxu1 %v14728_v58  ;;  %5461 = vmatprep.subr.bf16.mxu0 %v14733_v59  ;;  %v14816_v58 = vld [vmem:[%s17242_s4 + $0x15c] ss:$40 sps:$4 sm:$0xff]   ;;  %v14811_v59 = vld [vmem:[%s17242_s4 + $0x150] ss:$40 sps:$4 sm:$0xff]  }
 0x1d7   : > { %5666 = vmatprep.subr.bf16.mxu1 %v14736_v60  ;;  %v14814_v60 = vld [vmem:[%s17242_s4 + $0x158] ss:$40 sps:$4 sm:$0xff]  }
 0x1d9   : > { %5462 = vmatpush1.bf16.msra.mxu0 %v14731_v61  ;;  %v14819_v61 = vld [vmem:[%s17242_s4 + $0x1a4] ss:$40 sps:$4 sm:$0xff]  }
 0x1da   : > { %5667 = vmatpush1.bf16.msra.mxu1 %v14734_v62  ;;  %5463 = vmatprep.subr.bf16.mxu0 %v14739_v63  ;;  %v14822_v62 = vld [vmem:[%s17242_s4 + $0x1ac] ss:$40 sps:$4 sm:$0xff]   ;;  %v14817_v63 = vld [vmem:[%s17242_s4 + $0x1a0] ss:$40 sps:$4 sm:$0xff]  }
 0x1db   : > { %5668 = vmatprep.subr.bf16.mxu1 %v14742_v0  ;;  %v14820_v0 = vld [vmem:[%s17242_s4 + $0x1a8] ss:$40 sps:$4 sm:$0xff]  }
 0x1dd   : > { %5464 = vmatpush1.bf16.msra.mxu0 %v14737_v1  ;;  %v14825_v1 = vld [vmem:[%s17242_s4 + $0x1f4] ss:$40 sps:$4 sm:$0xff]  }
 0x1de   : > { %5669 = vmatpush1.bf16.msra.mxu1 %v14740_v2  ;;  %5465 = vmatprep.subr.bf16.mxu0 %v14745_v3  ;;  %v14828_v2 = vld [vmem:[%s17242_s4 + $0x1fc] ss:$40 sps:$4 sm:$0xff]   ;;  %v14823_v3 = vld [vmem:[%s17242_s4 + $0x1f0] ss:$40 sps:$4 sm:$0xff]  }
 0x1df   : > { %5670 = vmatprep.subr.bf16.mxu1 %v14748_v4  ;;  %v14826_v4 = vld [vmem:[%s17242_s4 + $0x1f8] ss:$40 sps:$4 sm:$0xff]  }
 0x1e1   : > { %5466 = vmatpush1.bf16.msra.mxu0 %v14743_v5  ;;  %v14831_v5 = vld [vmem:[%s17242_s4 + $0x244] ss:$40 sps:$4 sm:$0xff]  }
 0x1e2   : > { %5671 = vmatpush1.bf16.msra.mxu1 %v14746_v7  ;;  %5467 = vmatprep.subr.bf16.mxu0 %v14751_v8  ;;  %v14834_v7 = vld [vmem:[%s17242_s4 + $0x24c] ss:$40 sps:$4 sm:$0xff]   ;;  %v14829_v8 = vld [vmem:[%s17242_s4 + $0x240] ss:$40 sps:$4 sm:$0xff]  }
 0x1e3   : > { %5672 = vmatprep.subr.bf16.mxu1 %v14754_v9  ;;  %v14832_v9 = vld [vmem:[%s17242_s4 + $0x248] ss:$40 sps:$4 sm:$0xff]  }
 0x1e5   : > { %5468 = vmatpush1.bf16.msra.mxu0 %v14749_v10  ;;  %v14837_v10 = vld [vmem:[%s17242_s4 + $0x294] ss:$40 sps:$4 sm:$0xff]  }
 0x1e6   : > { %5673 = vmatpush1.bf16.msra.mxu1 %v14752_v12  ;;  %5469 = vmatprep.subr.bf16.mxu0 %v14757_v13  ;;  %v14840_v12 = vld [vmem:[%s17242_s4 + $0x29c] ss:$40 sps:$4 sm:$0xff]   ;;  %v14835_v13 = vld [vmem:[%s17242_s4 + $0x290] ss:$40 sps:$4 sm:$0xff]  }
 0x1e7   : > { %5674 = vmatprep.subr.bf16.mxu1 %v14760_v15  ;;  %v14838_v15 = vld [vmem:[%s17242_s4 + $0x298] ss:$40 sps:$4 sm:$0xff]  }
 0x1e9   : > { %5470 = vmatpush1.bf16.msra.mxu0 %v14755_v17  ;;  %v14843_v17 = vld [vmem:[%s17242_s4 + $0x2e4] ss:$40 sps:$4 sm:$0xff]  }
 0x1ea   : > { %5675 = vmatpush1.bf16.msra.mxu1 %v14758_v18  ;;  %5471 = vmatprep.subr.bf16.mxu0 %v14763_v19  ;;  %v14846_v18 = vld [vmem:[%s17242_s4 + $0x2ec] ss:$40 sps:$4 sm:$0xff]   ;;  %v14841_v19 = vld [vmem:[%s17242_s4 + $0x2e0] ss:$40 sps:$4 sm:$0xff]  }
 0x1eb   : > { %5676 = vmatprep.subr.bf16.mxu1 %v14766_v20  ;;  %v14844_v20 = vld [vmem:[%s17242_s4 + $0x2e8] ss:$40 sps:$4 sm:$0xff]  }
 0x1ed   : > { %5472 = vmatpush1.bf16.msra.mxu0 %v14761_v23  ;;  %v14849_v23 = vld [vmem:[%s17242_s4 + $0x334] ss:$40 sps:$4 sm:$0xff]  }
 0x1ee   : > { %5677 = vmatpush1.bf16.msra.mxu1 %v14764_v24  ;;  %5473 = vmatprep.subr.bf16.mxu0 %v14769_v14  ;;  %v14852_v24 = vld [vmem:[%s17242_s4 + $0x33c] ss:$40 sps:$4 sm:$0xff]   ;;  %v14847_v14 = vld [vmem:[%s17242_s4 + $0x330] ss:$40 sps:$4 sm:$0xff]  }
 0x1ef   : > { %5678 = vmatprep.subr.bf16.mxu1 %v14772_v26  ;;  %v14850_v26 = vld [vmem:[%s17242_s4 + $0x338] ss:$40 sps:$4 sm:$0xff]  }
 0x1f1   : > { %5474 = vmatpush1.bf16.msra.mxu0 %v14767_v27  ;;  %v14855_v27 = vld [vmem:[%s17242_s4 + $0x384] ss:$40 sps:$4 sm:$0xff]  }
 0x1f2   : > { %5679 = vmatpush1.bf16.msra.mxu1 %v14770_v28  ;;  %5475 = vmatprep.subr.bf16.mxu0 %v14775_v29  ;;  %v14858_v28 = vld [vmem:[%s17242_s4 + $0x38c] ss:$40 sps:$4 sm:$0xff]   ;;  %v14853_v29 = vld [vmem:[%s17242_s4 + $0x380] ss:$40 sps:$4 sm:$0xff]  }
 0x1f3   : > { %5680 = vmatprep.subr.bf16.mxu1 %v14778_v33  ;;  %v14856_v33 = vld [vmem:[%s17242_s4 + $0x388] ss:$40 sps:$4 sm:$0xff]  }
 0x1f5   : > { %5476 = vmatpush1.bf16.msra.mxu0 %v14773_v34  ;;  %v14861_v34 = vld [vmem:[%s17242_s4 + $0x3d4] ss:$40 sps:$4 sm:$0xff]  }
 0x1f6   : > { %5681 = vmatpush1.bf16.msra.mxu1 %v14776_v35  ;;  %5477 = vmatprep.subr.bf16.mxu0 %v14781_v22  ;;  %v14864_v35 = vld [vmem:[%s17242_s4 + $0x3dc] ss:$40 sps:$4 sm:$0xff]   ;;  %v14859_v22 = vld [vmem:[%s17242_s4 + $0x3d0] ss:$40 sps:$4 sm:$0xff]  }
 0x1f7   : > { %5682 = vmatprep.subr.bf16.mxu1 %v14784_v37  ;;  %v14862_v37 = vld [vmem:[%s17242_s4 + $0x3d8] ss:$40 sps:$4 sm:$0xff]  }
 0x1f9   : > { %5478 = vmatpush1.bf16.msra.mxu0 %v14779_v38  ;;  %v14867_v38 = vld [vmem:[%s17242_s4 + $0x424] ss:$40 sps:$4 sm:$0xff]  }
 0x1fa   : > { %5683 = vmatpush1.bf16.msra.mxu1 %v14782_v39  ;;  %5693 = vmatprep.subr.bf16.mxu0 %v14789_v40  ;;  %v14870_v39 = vld [vmem:[%s17242_s4 + $0x42c] ss:$40 sps:$4 sm:$0xff]   ;;  %v14865_v40 = vld [vmem:[%s17242_s4 + $0x420] ss:$40 sps:$4 sm:$0xff]  }
 0x1fb   : > { %5898 = vmatprep.subr.bf16.mxu1 %v14792_v41  ;;  %v14868_v41 = vld [vmem:[%s17242_s4 + $0x428] ss:$40 sps:$4 sm:$0xff]  }
 0x1fc   : > { %5480 = vmatmul.mubr.bf16.vlgmr.msra.gmra.mrb[0].mxu0 %v17643_v42 }
 0x1fd   : > { %5685 = vmatmul.mubr.bf16.vlgmr.msra.gmra.mrb[0].mxu1 %v17643_v42  ;;  %5694 = vmatpush1.bf16.msra.mxu0 %v14787_v43  ;;  %v14873_v43 = vld [vmem:[%s17242_s4 + $0x474] ss:$40 sps:$4 sm:$0xff]  }
 0x1fe   : > { %5899 = vmatpush1.bf16.msra.mxu1 %v14790_v44  ;;  %5695 = vmatprep.subr.bf16.mxu0 %v14795_v45  ;;  %v14876_v44 = vld [vmem:[%s17242_s4 + $0x47c] ss:$40 sps:$4 sm:$0xff]   ;;  %v14871_v45 = vld [vmem:[%s17242_s4 + $0x470] ss:$40 sps:$4 sm:$0xff]  }
 0x1ff   : > { %5900 = vmatprep.subr.bf16.mxu1 %v14798_v46  ;;  %5725 = vmatprep.mubr.bf16.mxu0 %v17308_v49  ;;  %v14874_v46 = vld [vmem:[%s17242_s4 + $0x478] ss:$40 sps:$4 sm:$0xff]  }
 0x200   : > { %5930 = vmatprep.mubr.bf16.mxu1 %v17308_v49 }
 0x201   : > { %5696 = vmatpush1.bf16.msra.mxu0 %v14793_v32  ;;  %v14879_v32 = vld [vmem:[%s17242_s4 + $0x4c4] ss:$40 sps:$4 sm:$0xff]  }
 0x202   : > { %5901 = vmatpush1.bf16.msra.mxu1 %v14796_v47  ;;  %5697 = vmatprep.subr.bf16.mxu0 %v14801_v48  ;;  %v14882_v47 = vld [vmem:[%s17242_s4 + $0x4cc] ss:$40 sps:$4 sm:$0xff]   ;;  %v14877_v48 = vld [vmem:[%s17242_s4 + $0x4c0] ss:$40 sps:$4 sm:$0xff]  }
 0x203   : > { %5902 = vmatprep.subr.bf16.mxu1 %v14804_v50  ;;  %v14880_v50 = vld [vmem:[%s17242_s4 + $0x4c8] ss:$40 sps:$4 sm:$0xff]  }
 0x205   : > { %5698 = vmatpush1.bf16.msra.mxu0 %v14799_v51  ;;  %v14885_v51 = vld [vmem:[%s17242_s4 + $0x514] ss:$40 sps:$4 sm:$0xff]  }
 0x206   : > { %5903 = vmatpush1.bf16.msra.mxu1 %v14802_v52  ;;  %5699 = vmatprep.subr.bf16.mxu0 %v14807_v53  ;;  %v14888_v52 = vld [vmem:[%s17242_s4 + $0x51c] ss:$40 sps:$4 sm:$0xff]   ;;  %v14883_v53 = vld [vmem:[%s17242_s4 + $0x510] ss:$40 sps:$4 sm:$0xff]  }
 0x207   : > { %5904 = vmatprep.subr.bf16.mxu1 %v14810_v54  ;;  %v14886_v54 = vld [vmem:[%s17242_s4 + $0x518] ss:$40 sps:$4 sm:$0xff]  }
 0x209   : > { %5700 = vmatpush1.bf16.msra.mxu0 %v14805_v55  ;;  %v14891_v55 = vld [vmem:[%s17242_s4 + $0x564] ss:$40 sps:$4 sm:$0xff]  }
 0x20a   : > { %5905 = vmatpush1.bf16.msra.mxu1 %v14808_v56  ;;  %5701 = vmatprep.subr.bf16.mxu0 %v14813_v57  ;;  %v14894_v56 = vld [vmem:[%s17242_s4 + $0x56c] ss:$40 sps:$4 sm:$0xff]   ;;  %v14889_v57 = vld [vmem:[%s17242_s4 + $0x560] ss:$40 sps:$4 sm:$0xff]  }
 0x20b   : > { %5906 = vmatprep.subr.bf16.mxu1 %v14816_v58  ;;  %v14892_v58 = vld [vmem:[%s17242_s4 + $0x568] ss:$40 sps:$4 sm:$0xff]  }
 0x20d   : > { %5702 = vmatpush1.bf16.msra.mxu0 %v14811_v59  ;;  %v14897_v59 = vld [vmem:[%s17242_s4 + $0x5b4] ss:$40 sps:$4 sm:$0xff]  }
 0x20e   : > { %5907 = vmatpush1.bf16.msra.mxu1 %v14814_v60  ;;  %5703 = vmatprep.subr.bf16.mxu0 %v14819_v61  ;;  %v14900_v60 = vld [vmem:[%s17242_s4 + $0x5bc] ss:$40 sps:$4 sm:$0xff]   ;;  %v14895_v61 = vld [vmem:[%s17242_s4 + $0x5b0] ss:$40 sps:$4 sm:$0xff]  }
 0x20f   : > { %5908 = vmatprep.subr.bf16.mxu1 %v14822_v62  ;;  %v14898_v62 = vld [vmem:[%s17242_s4 + $0x5b8] ss:$40 sps:$4 sm:$0xff]  }
 0x211   : > { %5704 = vmatpush1.bf16.msra.mxu0 %v14817_v63  ;;  %v14903_v63 = vld [vmem:[%s17242_s4 + $0x604] ss:$40 sps:$4 sm:$0xff]  }
 0x212   : > { %5909 = vmatpush1.bf16.msra.mxu1 %v14820_v0  ;;  %5705 = vmatprep.subr.bf16.mxu0 %v14825_v1  ;;  %v14906_v0 = vld [vmem:[%s17242_s4 + $0x60c] ss:$40 sps:$4 sm:$0xff]   ;;  %v14901_v1 = vld [vmem:[%s17242_s4 + $0x600] ss:$40 sps:$4 sm:$0xff]  }
 0x213   : > { %5910 = vmatprep.subr.bf16.mxu1 %v14828_v2  ;;  %v14904_v2 = vld [vmem:[%s17242_s4 + $0x608] ss:$40 sps:$4 sm:$0xff]  }
 0x215   : > { %5706 = vmatpush1.bf16.msra.mxu0 %v14823_v3  ;;  %v14909_v3 = vld [vmem:[%s17242_s4 + $0x654] ss:$40 sps:$4 sm:$0xff]  }
 0x216   : > { %5911 = vmatpush1.bf16.msra.mxu1 %v14826_v4  ;;  %5707 = vmatprep.subr.bf16.mxu0 %v14831_v5  ;;  %v14912_v4 = vld [vmem:[%s17242_s4 + $0x65c] ss:$40 sps:$4 sm:$0xff]   ;;  %v14907_v5 = vld [vmem:[%s17242_s4 + $0x650] ss:$40 sps:$4 sm:$0xff]  }
 0x217   : > { %5912 = vmatprep.subr.bf16.mxu1 %v14834_v7  ;;  %v14910_v7 = vld [vmem:[%s17242_s4 + $0x658] ss:$40 sps:$4 sm:$0xff]  }
 0x219   : > { %5708 = vmatpush1.bf16.msra.mxu0 %v14829_v8  ;;  %v14915_v8 = vld [vmem:[%s17242_s4 + $0x6a4] ss:$40 sps:$4 sm:$0xff]  }
 0x21a   : > { %5913 = vmatpush1.bf16.msra.mxu1 %v14832_v9  ;;  %5709 = vmatprep.subr.bf16.mxu0 %v14837_v10  ;;  %v14918_v9 = vld [vmem:[%s17242_s4 + $0x6ac] ss:$40 sps:$4 sm:$0xff]   ;;  %v14913_v10 = vld [vmem:[%s17242_s4 + $0x6a0] ss:$40 sps:$4 sm:$0xff]  }
 0x21b   : > { %5914 = vmatprep.subr.bf16.mxu1 %v14840_v12  ;;  %v14916_v12 = vld [vmem:[%s17242_s4 + $0x6a8] ss:$40 sps:$4 sm:$0xff]  }
 0x21d   : > { %5710 = vmatpush1.bf16.msra.mxu0 %v14835_v13  ;;  %v14921_v13 = vld [vmem:[%s17242_s4 + $0x6f4] ss:$40 sps:$4 sm:$0xff]  }
 0x21e   : > { %5915 = vmatpush1.bf16.msra.mxu1 %v14838_v15  ;;  %5711 = vmatprep.subr.bf16.mxu0 %v14843_v17  ;;  %v14924_v15 = vld [vmem:[%s17242_s4 + $0x6fc] ss:$40 sps:$4 sm:$0xff]   ;;  %v14919_v17 = vld [vmem:[%s17242_s4 + $0x6f0] ss:$40 sps:$4 sm:$0xff]  }
 0x21f   : > { %5916 = vmatprep.subr.bf16.mxu1 %v14846_v18  ;;  %v14922_v18 = vld [vmem:[%s17242_s4 + $0x6f8] ss:$40 sps:$4 sm:$0xff]  }
 0x221   : > { %5712 = vmatpush1.bf16.msra.mxu0 %v14841_v19  ;;  %v14927_v19 = vld [vmem:[%s17242_s4 + $0x744] ss:$40 sps:$4 sm:$0xff]  }
 0x222   : > { %5917 = vmatpush1.bf16.msra.mxu1 %v14844_v20  ;;  %5713 = vmatprep.subr.bf16.mxu0 %v14849_v23  ;;  %v14930_v20 = vld [vmem:[%s17242_s4 + $0x74c] ss:$40 sps:$4 sm:$0xff]   ;;  %v14925_v23 = vld [vmem:[%s17242_s4 + $0x740] ss:$40 sps:$4 sm:$0xff]  }
 0x223   : > { %5918 = vmatprep.subr.bf16.mxu1 %v14852_v24  ;;  %v14928_v24 = vld [vmem:[%s17242_s4 + $0x748] ss:$40 sps:$4 sm:$0xff]  }
 0x225   : > { %5714 = vmatpush1.bf16.msra.mxu0 %v14847_v14  ;;  %v14933_v14 = vld [vmem:[%s17242_s4 + $0x794] ss:$40 sps:$4 sm:$0xff]  }
 0x226   : > { %5919 = vmatpush1.bf16.msra.mxu1 %v14850_v26  ;;  %5715 = vmatprep.subr.bf16.mxu0 %v14855_v27  ;;  %v14936_v26 = vld [vmem:[%s17242_s4 + $0x79c] ss:$40 sps:$4 sm:$0xff]   ;;  %v14931_v27 = vld [vmem:[%s17242_s4 + $0x790] ss:$40 sps:$4 sm:$0xff]  }
 0x227   : > { %5920 = vmatprep.subr.bf16.mxu1 %v14858_v28  ;;  %v14934_v28 = vld [vmem:[%s17242_s4 + $0x798] ss:$40 sps:$4 sm:$0xff]  }
 0x229   : > { %5716 = vmatpush1.bf16.msra.mxu0 %v14853_v29  ;;  %v14939_v29 = vld [vmem:[%s17242_s4 + $0x7e4] ss:$40 sps:$4 sm:$0xff]  }
 0x22a   : > { %5921 = vmatpush1.bf16.msra.mxu1 %v14856_v33  ;;  %5717 = vmatprep.subr.bf16.mxu0 %v14861_v34  ;;  %v14942_v33 = vld [vmem:[%s17242_s4 + $0x7ec] ss:$40 sps:$4 sm:$0xff]   ;;  %v14937_v34 = vld [vmem:[%s17242_s4 + $0x7e0] ss:$40 sps:$4 sm:$0xff]  }
 0x22b   : > { %5922 = vmatprep.subr.bf16.mxu1 %v14864_v35  ;;  %v14940_v35 = vld [vmem:[%s17242_s4 + $0x7e8] ss:$40 sps:$4 sm:$0xff]  }
 0x22d   : > { %5718 = vmatpush1.bf16.msra.mxu0 %v14859_v22  ;;  %v14945_v22 = vld [vmem:[%s17242_s4 + $0x834] ss:$40 sps:$4 sm:$0xff]  }
 0x22e   : > { %5923 = vmatpush1.bf16.msra.mxu1 %v14862_v37  ;;  %5719 = vmatprep.subr.bf16.mxu0 %v14867_v38  ;;  %v14948_v37 = vld [vmem:[%s17242_s4 + $0x83c] ss:$40 sps:$4 sm:$0xff]   ;;  %v14943_v38 = vld [vmem:[%s17242_s4 + $0x830] ss:$40 sps:$4 sm:$0xff]  }
 0x22f   : > { %5924 = vmatprep.subr.bf16.mxu1 %v14870_v39  ;;  %v14946_v39 = vld [vmem:[%s17242_s4 + $0x838] ss:$40 sps:$4 sm:$0xff]  }
 0x231   : > { %5720 = vmatpush1.bf16.msra.mxu0 %v14865_v40  ;;  %v14951_v40 = vld [vmem:[%s17242_s4 + $0x884] ss:$40 sps:$4 sm:$0xff]  }
 0x232   : > { %5925 = vmatpush1.bf16.msra.mxu1 %v14868_v41  ;;  %5721 = vmatprep.subr.bf16.mxu0 %v14873_v43  ;;  %v14954_v41 = vld [vmem:[%s17242_s4 + $0x88c] ss:$40 sps:$4 sm:$0xff]   ;;  %v14949_v43 = vld [vmem:[%s17242_s4 + $0x880] ss:$40 sps:$4 sm:$0xff]  }
 0x233   : > { %5926 = vmatprep.subr.bf16.mxu1 %v14876_v44  ;;  %v14952_v44 = vld [vmem:[%s17242_s4 + $0x888] ss:$40 sps:$4 sm:$0xff]  }
 0x235   : > { %5722 = vmatpush1.bf16.msra.mxu0 %v14871_v45  ;;  %v14957_v45 = vld [vmem:[%s17242_s4 + $0x8d4] ss:$40 sps:$4 sm:$0xff]  }
 0x236   : > { %5927 = vmatpush1.bf16.msra.mxu1 %v14874_v46  ;;  %5723 = vmatprep.subr.bf16.mxu0 %v14879_v32  ;;  %v14960_v46 = vld [vmem:[%s17242_s4 + $0x8dc] ss:$40 sps:$4 sm:$0xff]   ;;  %v14955_v32 = vld [vmem:[%s17242_s4 + $0x8d0] ss:$40 sps:$4 sm:$0xff]  }
 0x237   : > { %5928 = vmatprep.subr.bf16.mxu1 %v14882_v47  ;;  %v14958_v47 = vld [vmem:[%s17242_s4 + $0x8d8] ss:$40 sps:$4 sm:$0xff]  }
 0x239   : > { %5724 = vmatpush1.bf16.msra.mxu0 %v14877_v48  ;;  %v14963_v48 = vld [vmem:[%s17242_s4 + $0x924] ss:$40 sps:$4 sm:$0xff]  }
 0x23a   : > { %5929 = vmatpush1.bf16.msra.mxu1 %v14880_v50  ;;  %5734 = vmatprep.subr.bf16.mxu0 %v14885_v51  ;;  %v14966_v50 = vld [vmem:[%s17242_s4 + $0x92c] ss:$40 sps:$4 sm:$0xff]   ;;  %v14961_v51 = vld [vmem:[%s17242_s4 + $0x920] ss:$40 sps:$4 sm:$0xff]  }
 0x23b   : > { %5939 = vmatprep.subr.bf16.mxu1 %v14888_v52  ;;  %v14964_v52 = vld [vmem:[%s17242_s4 + $0x928] ss:$40 sps:$4 sm:$0xff]  }
 0x23c   : > { %5726 = vmatmul.mubr.bf16.vlgmr.msra.gmra.mrb[4].mxu0 %v17332_v6 }
 0x23d   : > { %5931 = vmatmul.mubr.bf16.vlgmr.msra.gmra.mrb[4].mxu1 %v17332_v6  ;;  %5735 = vmatpush1.bf16.msra.mxu0 %v14883_v53  ;;  %v14969_v53 = vld [vmem:[%s17242_s4 + $0x974] ss:$40 sps:$4 sm:$0xff]  }
 0x23e   : > { %5940 = vmatpush1.bf16.msra.mxu1 %v14886_v54  ;;  %5736 = vmatprep.subr.bf16.mxu0 %v14891_v55  ;;  %v14972_v54 = vld [vmem:[%s17242_s4 + $0x97c] ss:$40 sps:$4 sm:$0xff]   ;;  %v14967_v55 = vld [vmem:[%s17242_s4 + $0x970] ss:$40 sps:$4 sm:$0xff]  }
 0x23f   : > { %5941 = vmatprep.subr.bf16.mxu1 %v14894_v56  ;;  %5766 = vmatprep.mubr.bf16.mxu0 %v17363_v31  ;;  %v14970_v56 = vld [vmem:[%s17242_s4 + $0x978] ss:$40 sps:$4 sm:$0xff]  }
 0x240   : > { %5971 = vmatprep.mubr.bf16.mxu1 %v17363_v31 }
 0x241   : > { %5737 = vmatpush1.bf16.msra.mxu0 %v14889_v57  ;;  %v14975_v57 = vld [vmem:[%s17242_s4 + $0x9c4] ss:$40 sps:$4 sm:$0xff]  }
 0x242   : > { %5942 = vmatpush1.bf16.msra.mxu1 %v14892_v58  ;;  %5738 = vmatprep.subr.bf16.mxu0 %v14897_v59  ;;  %v14978_v58 = vld [vmem:[%s17242_s4 + $0x9cc] ss:$40 sps:$4 sm:$0xff]   ;;  %v14973_v59 = vld [vmem:[%s17242_s4 + $0x9c0] ss:$40 sps:$4 sm:$0xff]  }
 0x243   : > { %5943 = vmatprep.subr.bf16.mxu1 %v14900_v60  ;;  %v14976_v60 = vld [vmem:[%s17242_s4 + $0x9c8] ss:$40 sps:$4 sm:$0xff]  }
 0x245   : > { %5739 = vmatpush1.bf16.msra.mxu0 %v14895_v61  ;;  %v14981_v61 = vld [vmem:[%s17242_s4 + $0xa14] ss:$40 sps:$4 sm:$0xff]  }
 0x246   : > { %5944 = vmatpush1.bf16.msra.mxu1 %v14898_v62  ;;  %5740 = vmatprep.subr.bf16.mxu0 %v14903_v63  ;;  %v14984_v62 = vld [vmem:[%s17242_s4 + $0xa1c] ss:$40 sps:$4 sm:$0xff]   ;;  %v14979_v63 = vld [vmem:[%s17242_s4 + $0xa10] ss:$40 sps:$4 sm:$0xff]  }
 0x247   : > { %5945 = vmatprep.subr.bf16.mxu1 %v14906_v0  ;;  %v14982_v0 = vld [vmem:[%s17242_s4 + $0xa18] ss:$40 sps:$4 sm:$0xff]  }
 0x249   : > { %5741 = vmatpush1.bf16.msra.mxu0 %v14901_v1  ;;  %v14987_v1 = vld [vmem:[%s17242_s4 + $0xa64] ss:$40 sps:$4 sm:$0xff]  }
 0x24a   : > { %5946 = vmatpush1.bf16.msra.mxu1 %v14904_v2  ;;  %5742 = vmatprep.subr.bf16.mxu0 %v14909_v3  ;;  %v14990_v2 = vld [vmem:[%s17242_s4 + $0xa6c] ss:$40 sps:$4 sm:$0xff]   ;;  %v14985_v3 = vld [vmem:[%s17242_s4 + $0xa60] ss:$40 sps:$4 sm:$0xff]  }
 0x24b   : > { %5947 = vmatprep.subr.bf16.mxu1 %v14912_v4  ;;  %v14988_v4 = vld [vmem:[%s17242_s4 + $0xa68] ss:$40 sps:$4 sm:$0xff]  }
 0x24d   : > { %5743 = vmatpush1.bf16.msra.mxu0 %v14907_v5  ;;  %v14993_v5 = vld [vmem:[%s17242_s4 + $0xab4] ss:$40 sps:$4 sm:$0xff]  }
 0x24e   : > { %5948 = vmatpush1.bf16.msra.mxu1 %v14910_v7  ;;  %5744 = vmatprep.subr.bf16.mxu0 %v14915_v8  ;;  %v14996_v7 = vld [vmem:[%s17242_s4 + $0xabc] ss:$40 sps:$4 sm:$0xff]   ;;  %v14991_v8 = vld [vmem:[%s17242_s4 + $0xab0] ss:$40 sps:$4 sm:$0xff]  }
 0x24f   : > { %5949 = vmatprep.subr.bf16.mxu1 %v14918_v9  ;;  %v14994_v9 = vld [vmem:[%s17242_s4 + $0xab8] ss:$40 sps:$4 sm:$0xff]  }
 0x251   : > { %5745 = vmatpush1.bf16.msra.mxu0 %v14913_v10  ;;  %v14999_v10 = vld [vmem:[%s17242_s4 + $0xb04] ss:$40 sps:$4 sm:$0xff]  }
 0x252   : > { %5950 = vmatpush1.bf16.msra.mxu1 %v14916_v12  ;;  %5746 = vmatprep.subr.bf16.mxu0 %v14921_v13  ;;  %v15002_v12 = vld [vmem:[%s17242_s4 + $0xb0c] ss:$40 sps:$4 sm:$0xff]   ;;  %v14997_v13 = vld [vmem:[%s17242_s4 + $0xb00] ss:$40 sps:$4 sm:$0xff]  }
 0x253   : > { %5951 = vmatprep.subr.bf16.mxu1 %v14924_v15  ;;  %v15000_v15 = vld [vmem:[%s17242_s4 + $0xb08] ss:$40 sps:$4 sm:$0xff]  }
 0x255   : > { %5747 = vmatpush1.bf16.msra.mxu0 %v14919_v17  ;;  %v15005_v17 = vld [vmem:[%s17242_s4 + $0xb54] ss:$40 sps:$4 sm:$0xff]  }
 0x256   : > { %5952 = vmatpush1.bf16.msra.mxu1 %v14922_v18  ;;  %5748 = vmatprep.subr.bf16.mxu0 %v14927_v19  ;;  %v15008_v18 = vld [vmem:[%s17242_s4 + $0xb5c] ss:$40 sps:$4 sm:$0xff]   ;;  %v15003_v19 = vld [vmem:[%s17242_s4 + $0xb50] ss:$40 sps:$4 sm:$0xff]  }
 0x257   : > { %5953 = vmatprep.subr.bf16.mxu1 %v14930_v20  ;;  %v15006_v20 = vld [vmem:[%s17242_s4 + $0xb58] ss:$40 sps:$4 sm:$0xff]  }
 0x259   : > { %5749 = vmatpush1.bf16.msra.mxu0 %v14925_v23  ;;  %v15011_v23 = vld [vmem:[%s17242_s4 + $0xba4] ss:$40 sps:$4 sm:$0xff]  }
 0x25a   : > { %5954 = vmatpush1.bf16.msra.mxu1 %v14928_v24  ;;  %5750 = vmatprep.subr.bf16.mxu0 %v14933_v14  ;;  %v15014_v24 = vld [vmem:[%s17242_s4 + $0xbac] ss:$40 sps:$4 sm:$0xff]   ;;  %v15009_v14 = vld [vmem:[%s17242_s4 + $0xba0] ss:$40 sps:$4 sm:$0xff]  }
 0x25b   : > { %5955 = vmatprep.subr.bf16.mxu1 %v14936_v26  ;;  %v15012_v26 = vld [vmem:[%s17242_s4 + $0xba8] ss:$40 sps:$4 sm:$0xff]  }
 0x25d   : > { %5751 = vmatpush1.bf16.msra.mxu0 %v14931_v27  ;;  %v15017_v27 = vld [vmem:[%s17242_s4 + $0xbf4] ss:$40 sps:$4 sm:$0xff]  }
 0x25e   : > { %5956 = vmatpush1.bf16.msra.mxu1 %v14934_v28  ;;  %5752 = vmatprep.subr.bf16.mxu0 %v14939_v29  ;;  %v15020_v28 = vld [vmem:[%s17242_s4 + $0xbfc] ss:$40 sps:$4 sm:$0xff]   ;;  %v15015_v29 = vld [vmem:[%s17242_s4 + $0xbf0] ss:$40 sps:$4 sm:$0xff]  }
 0x25f   : > { %5957 = vmatprep.subr.bf16.mxu1 %v14942_v33  ;;  %v15018_v33 = vld [vmem:[%s17242_s4 + $0xbf8] ss:$40 sps:$4 sm:$0xff]  }
 0x261   : > { %5753 = vmatpush1.bf16.msra.mxu0 %v14937_v34  ;;  %v15023_v34 = vld [vmem:[%s17242_s4 + $0xc44] ss:$40 sps:$4 sm:$0xff]  }
 0x262   : > { %5958 = vmatpush1.bf16.msra.mxu1 %v14940_v35  ;;  %5754 = vmatprep.subr.bf16.mxu0 %v14945_v22  ;;  %v15026_v35 = vld [vmem:[%s17242_s4 + $0xc4c] ss:$40 sps:$4 sm:$0xff]   ;;  %v15021_v22 = vld [vmem:[%s17242_s4 + $0xc40] ss:$40 sps:$4 sm:$0xff]  }
 0x263   : > { %5959 = vmatprep.subr.bf16.mxu1 %v14948_v37  ;;  %v15024_v37 = vld [vmem:[%s17242_s4 + $0xc48] ss:$40 sps:$4 sm:$0xff]  }
 0x265   : > { %5755 = vmatpush1.bf16.msra.mxu0 %v14943_v38  ;;  %v15029_v38 = vld [vmem:[%s17242_s4 + $0xc94] ss:$40 sps:$4 sm:$0xff]  }
 0x266   : > { %5960 = vmatpush1.bf16.msra.mxu1 %v14946_v39  ;;  %5756 = vmatprep.subr.bf16.mxu0 %v14951_v40  ;;  %v15032_v39 = vld [vmem:[%s17242_s4 + $0xc9c] ss:$40 sps:$4 sm:$0xff]   ;;  %v15027_v40 = vld [vmem:[%s17242_s4 + $0xc90] ss:$40 sps:$4 sm:$0xff]  }
 0x267   : > { %5961 = vmatprep.subr.bf16.mxu1 %v14954_v41  ;;  %v15030_v41 = vld [vmem:[%s17242_s4 + $0xc98] ss:$40 sps:$4 sm:$0xff]  }
 0x269   : > { %5757 = vmatpush1.bf16.msra.mxu0 %v14949_v43  ;;  %v15035_v43 = vld [vmem:[%s17242_s4 + $0xce4] ss:$40 sps:$4 sm:$0xff]  }
 0x26a   : > { %5962 = vmatpush1.bf16.msra.mxu1 %v14952_v44  ;;  %5758 = vmatprep.subr.bf16.mxu0 %v14957_v45  ;;  %v15038_v44 = vld [vmem:[%s17242_s4 + $0xcec] ss:$40 sps:$4 sm:$0xff]   ;;  %v15033_v45 = vld [vmem:[%s17242_s4 + $0xce0] ss:$40 sps:$4 sm:$0xff]  }
 0x26b   : > { %5963 = vmatprep.subr.bf16.mxu1 %v14960_v46  ;;  %v15036_v46 = vld [vmem:[%s17242_s4 + $0xce8] ss:$40 sps:$4 sm:$0xff]  }
 0x26d   : > { %5759 = vmatpush1.bf16.msra.mxu0 %v14955_v32  ;;  %v15041_v32 = vld [vmem:[%s17242_s4 + $0xd34] ss:$40 sps:$4 sm:$0xff]  }
 0x26e   : > { %5964 = vmatpush1.bf16.msra.mxu1 %v14958_v47  ;;  %5760 = vmatprep.subr.bf16.mxu0 %v14963_v48  ;;  %v15044_v47 = vld [vmem:[%s17242_s4 + $0xd3c] ss:$40 sps:$4 sm:$0xff]   ;;  %v15039_v48 = vld [vmem:[%s17242_s4 + $0xd30] ss:$40 sps:$4 sm:$0xff]  }
 0x26f   : > { %5965 = vmatprep.subr.bf16.mxu1 %v14966_v50  ;;  %v15042_v50 = vld [vmem:[%s17242_s4 + $0xd38] ss:$40 sps:$4 sm:$0xff]  }
 0x271   : > { %5761 = vmatpush1.bf16.msra.mxu0 %v14961_v51  ;;  %v15047_v51 = vld [vmem:[%s17242_s4 + $0xd84] ss:$40 sps:$4 sm:$0xff]  }
 0x272   : > { %5966 = vmatpush1.bf16.msra.mxu1 %v14964_v52  ;;  %5762 = vmatprep.subr.bf16.mxu0 %v14969_v53  ;;  %v15050_v52 = vld [vmem:[%s17242_s4 + $0xd8c] ss:$40 sps:$4 sm:$0xff]   ;;  %v15045_v53 = vld [vmem:[%s17242_s4 + $0xd80] ss:$40 sps:$4 sm:$0xff]  }
 0x273   : > { %5967 = vmatprep.subr.bf16.mxu1 %v14972_v54  ;;  %v15048_v54 = vld [vmem:[%s17242_s4 + $0xd88] ss:$40 sps:$4 sm:$0xff]  }
 0x275   : > { %5763 = vmatpush1.bf16.msra.mxu0 %v14967_v55  ;;  %v15053_v55 = vld [vmem:[%s17242_s4 + $0xdd4] ss:$40 sps:$4 sm:$0xff]  }
 0x276   : > { %5968 = vmatpush1.bf16.msra.mxu1 %v14970_v56  ;;  %5764 = vmatprep.subr.bf16.mxu0 %v14975_v57  ;;  %v15056_v56 = vld [vmem:[%s17242_s4 + $0xddc] ss:$40 sps:$4 sm:$0xff]   ;;  %v15051_v57 = vld [vmem:[%s17242_s4 + $0xdd0] ss:$40 sps:$4 sm:$0xff]  }
 0x277   : > { %5969 = vmatprep.subr.bf16.mxu1 %v14978_v58  ;;  %v15054_v58 = vld [vmem:[%s17242_s4 + $0xdd8] ss:$40 sps:$4 sm:$0xff]  }
 0x279   : > { %5765 = vmatpush1.bf16.msra.mxu0 %v14973_v59  ;;  %v15059_v59 = vld [vmem:[%s17242_s4 + $0xe24] ss:$40 sps:$4 sm:$0xff]  }
 0x27a   : > { %5970 = vmatpush1.bf16.msra.mxu1 %v14976_v60  ;;  %5775 = vmatprep.subr.bf16.mxu0 %v14981_v61  ;;  %v15062_v60 = vld [vmem:[%s17242_s4 + $0xe2c] ss:$40 sps:$4 sm:$0xff]   ;;  %v15057_v61 = vld [vmem:[%s17242_s4 + $0xe20] ss:$40 sps:$4 sm:$0xff]  }
 0x27b   : > { %5980 = vmatprep.subr.bf16.mxu1 %v14984_v62  ;;  %v15060_v62 = vld [vmem:[%s17242_s4 + $0xe28] ss:$40 sps:$4 sm:$0xff]  }
 0x27c   : > { %5767 = vmatmul.mubr.bf16.vlgmr.msra.gmra.mrb[4].mxu0 %v17410_v11 }
 0x27d   : > { %5972 = vmatmul.mubr.bf16.vlgmr.msra.gmra.mrb[4].mxu1 %v17410_v11  ;;  %5776 = vmatpush1.bf16.msra.mxu0 %v14979_v63  ;;  %v15065_v63 = vld [vmem:[%s17242_s4 + $0xe74] ss:$40 sps:$4 sm:$0xff]  }
 0x27e   : > { %5981 = vmatpush1.bf16.msra.mxu1 %v14982_v0  ;;  %5777 = vmatprep.subr.bf16.mxu0 %v14987_v1  ;;  %v15068_v0 = vld [vmem:[%s17242_s4 + $0xe7c] ss:$40 sps:$4 sm:$0xff]   ;;  %v15063_v1 = vld [vmem:[%s17242_s4 + $0xe70] ss:$40 sps:$4 sm:$0xff]  }
 0x27f   : > { %5982 = vmatprep.subr.bf16.mxu1 %v14990_v2  ;;  %5807 = vmatprep.mubr.bf16.mxu0 %v17419_v16  ;;  %v15066_v2 = vld [vmem:[%s17242_s4 + $0xe78] ss:$40 sps:$4 sm:$0xff]  }
 0x280   : > { %6012 = vmatprep.mubr.bf16.mxu1 %v17419_v16 }
 0x281   : > { %5778 = vmatpush1.bf16.msra.mxu0 %v14985_v3  ;;  %v15071_v3 = vld [vmem:[%s17242_s4 + $0xec4] ss:$40 sps:$4 sm:$0xff]  }
 0x282   : > { %5983 = vmatpush1.bf16.msra.mxu1 %v14988_v4  ;;  %5779 = vmatprep.subr.bf16.mxu0 %v14993_v5  ;;  %v15074_v4 = vld [vmem:[%s17242_s4 + $0xecc] ss:$40 sps:$4 sm:$0xff]   ;;  %v15069_v5 = vld [vmem:[%s17242_s4 + $0xec0] ss:$40 sps:$4 sm:$0xff]  }
 0x283   : > { %5984 = vmatprep.subr.bf16.mxu1 %v14996_v7  ;;  %v15072_v7 = vld [vmem:[%s17242_s4 + $0xec8] ss:$40 sps:$4 sm:$0xff]  }
 0x285   : > { %5780 = vmatpush1.bf16.msra.mxu0 %v14991_v8  ;;  %v15077_v8 = vld [vmem:[%s17242_s4 + $0xf14] ss:$40 sps:$4 sm:$0xff]  }
 0x286   : > { %5985 = vmatpush1.bf16.msra.mxu1 %v14994_v9  ;;  %5781 = vmatprep.subr.bf16.mxu0 %v14999_v10  ;;  %v15080_v9 = vld [vmem:[%s17242_s4 + $0xf1c] ss:$40 sps:$4 sm:$0xff]   ;;  %v15075_v10 = vld [vmem:[%s17242_s4 + $0xf10] ss:$40 sps:$4 sm:$0xff]  }
 0x287   : > { %5986 = vmatprep.subr.bf16.mxu1 %v15002_v12  ;;  %v15078_v12 = vld [vmem:[%s17242_s4 + $0xf18] ss:$40 sps:$4 sm:$0xff]  }
 0x289   : > { %5782 = vmatpush1.bf16.msra.mxu0 %v14997_v13  ;;  %v15083_v13 = vld [vmem:[%s17242_s4 + $0xf64] ss:$40 sps:$4 sm:$0xff]  }
 0x28a   : > { %5987 = vmatpush1.bf16.msra.mxu1 %v15000_v15  ;;  %5783 = vmatprep.subr.bf16.mxu0 %v15005_v17  ;;  %v15086_v15 = vld [vmem:[%s17242_s4 + $0xf6c] ss:$40 sps:$4 sm:$0xff]   ;;  %v15081_v17 = vld [vmem:[%s17242_s4 + $0xf60] ss:$40 sps:$4 sm:$0xff]  }
 0x28b   : > { %5988 = vmatprep.subr.bf16.mxu1 %v15008_v18  ;;  %v15084_v18 = vld [vmem:[%s17242_s4 + $0xf68] ss:$40 sps:$4 sm:$0xff]  }
 0x28d   : > { %5784 = vmatpush1.bf16.msra.mxu0 %v15003_v19  ;;  %v15089_v19 = vld [vmem:[%s17242_s4 + $0xfb4] ss:$40 sps:$4 sm:$0xff]  }
 0x28e   : > { %5989 = vmatpush1.bf16.msra.mxu1 %v15006_v20  ;;  %5785 = vmatprep.subr.bf16.mxu0 %v15011_v23  ;;  %v15092_v20 = vld [vmem:[%s17242_s4 + $0xfbc] ss:$40 sps:$4 sm:$0xff]   ;;  %v15087_v23 = vld [vmem:[%s17242_s4 + $0xfb0] ss:$40 sps:$4 sm:$0xff]  }
 0x28f   : > { %5990 = vmatprep.subr.bf16.mxu1 %v15014_v24  ;;  %v15090_v24 = vld [vmem:[%s17242_s4 + $0xfb8] ss:$40 sps:$4 sm:$0xff]  }
 0x291   : > { %5786 = vmatpush1.bf16.msra.mxu0 %v15009_v14  ;;  %v15095_v14 = vld [vmem:[%s17242_s4 + $0x1004] ss:$40 sps:$4 sm:$0xff]  }
 0x292   : > { %5991 = vmatpush1.bf16.msra.mxu1 %v15012_v26  ;;  %5787 = vmatprep.subr.bf16.mxu0 %v15017_v27  ;;  %v15098_v26 = vld [vmem:[%s17242_s4 + $0x100c] ss:$40 sps:$4 sm:$0xff]   ;;  %v15093_v27 = vld [vmem:[%s17242_s4 + $0x1000] ss:$40 sps:$4 sm:$0xff]  }
 0x293   : > { %5992 = vmatprep.subr.bf16.mxu1 %v15020_v28  ;;  %v15096_v28 = vld [vmem:[%s17242_s4 + $0x1008] ss:$40 sps:$4 sm:$0xff]  }
 0x295   : > { %5788 = vmatpush1.bf16.msra.mxu0 %v15015_v29  ;;  %v15101_v29 = vld [vmem:[%s17242_s4 + $0x1054] ss:$40 sps:$4 sm:$0xff]  }
 0x296   : > { %5993 = vmatpush1.bf16.msra.mxu1 %v15018_v33  ;;  %5789 = vmatprep.subr.bf16.mxu0 %v15023_v34  ;;  %v15104_v33 = vld [vmem:[%s17242_s4 + $0x105c] ss:$40 sps:$4 sm:$0xff]   ;;  %v15099_v34 = vld [vmem:[%s17242_s4 + $0x1050] ss:$40 sps:$4 sm:$0xff]  }
 0x297   : > { %5994 = vmatprep.subr.bf16.mxu1 %v15026_v35  ;;  %v15102_v35 = vld [vmem:[%s17242_s4 + $0x1058] ss:$40 sps:$4 sm:$0xff]  }
 0x299   : > { %5790 = vmatpush1.bf16.msra.mxu0 %v15021_v22  ;;  %v15107_v22 = vld [vmem:[%s17242_s4 + $0x10a4] ss:$40 sps:$4 sm:$0xff]  }
 0x29a   : > { %5995 = vmatpush1.bf16.msra.mxu1 %v15024_v37  ;;  %5791 = vmatprep.subr.bf16.mxu0 %v15029_v38  ;;  %v15110_v37 = vld [vmem:[%s17242_s4 + $0x10ac] ss:$40 sps:$4 sm:$0xff]   ;;  %v15105_v38 = vld [vmem:[%s17242_s4 + $0x10a0] ss:$40 sps:$4 sm:$0xff]  }
 0x29b   : > { %5996 = vmatprep.subr.bf16.mxu1 %v15032_v39  ;;  %v15108_v39 = vld [vmem:[%s17242_s4 + $0x10a8] ss:$40 sps:$4 sm:$0xff]  }
 0x29d   : > { %5792 = vmatpush1.bf16.msra.mxu0 %v15027_v40  ;;  %v15113_v40 = vld [vmem:[%s17242_s4 + $0x10f4] ss:$40 sps:$4 sm:$0xff]  }
 0x29e   : > { %5997 = vmatpush1.bf16.msra.mxu1 %v15030_v41  ;;  %5793 = vmatprep.subr.bf16.mxu0 %v15035_v43  ;;  %v15116_v41 = vld [vmem:[%s17242_s4 + $0x10fc] ss:$40 sps:$4 sm:$0xff]  }
 0x29f   : > { %5998 = vmatprep.subr.bf16.mxu1 %v15038_v44 }
 0x2a1   : > { %5794 = vmatpush1.bf16.msra.mxu0 %v15033_v45 }
 0x2a2   : > { %5999 = vmatpush1.bf16.msra.mxu1 %v15036_v46  ;;  %5795 = vmatprep.subr.bf16.mxu0 %v15041_v32 }
 0x2a3   : > { %6000 = vmatprep.subr.bf16.mxu1 %v15044_v47 }
 0x2a5   : > { %5796 = vmatpush1.bf16.msra.mxu0 %v15039_v48  ;;  %v15111_v48 = vld [vmem:[%s17242_s4 + $0x10f0] ss:$40 sps:$4 sm:$0xff]  }
 0x2a6   : > { %6001 = vmatpush1.bf16.msra.mxu1 %v15042_v50  ;;  %5797 = vmatprep.subr.bf16.mxu0 %v15047_v51  ;;  %v15114_v50 = vld [vmem:[%s17242_s4 + $0x10f8] ss:$40 sps:$4 sm:$0xff]  }
 0x2a7   : > { %6002 = vmatprep.subr.bf16.mxu1 %v15050_v52 }
 0x2a9   : > { %5798 = vmatpush1.bf16.msra.mxu0 %v15045_v53  ;;  %v15119_v53 = vld [vmem:[%s17242_s4 + $0x1144] ss:$40 sps:$4 sm:$0xff]  }
 0x2aa   : > { %6003 = vmatpush1.bf16.msra.mxu1 %v15048_v54  ;;  %5799 = vmatprep.subr.bf16.mxu0 %v15053_v55  ;;  %v15122_v54 = vld [vmem:[%s17242_s4 + $0x114c] ss:$40 sps:$4 sm:$0xff]   ;;  %v15117_v55 = vld [vmem:[%s17242_s4 + $0x1140] ss:$40 sps:$4 sm:$0xff]  }
 0x2ab   : > { %6004 = vmatprep.subr.bf16.mxu1 %v15056_v56  ;;  %v15120_v56 = vld [vmem:[%s17242_s4 + $0x1148] ss:$40 sps:$4 sm:$0xff]  }
 0x2ad   : > { %5800 = vmatpush1.bf16.msra.mxu0 %v15051_v57  ;;  %v15125_v57 = vld [vmem:[%s17242_s4 + $0x1194] ss:$40 sps:$4 sm:$0xff]  }
 0x2ae   : > { %6005 = vmatpush1.bf16.msra.mxu1 %v15054_v58  ;;  %5801 = vmatprep.subr.bf16.mxu0 %v15059_v59  ;;  %v15128_v58 = vld [vmem:[%s17242_s4 + $0x119c] ss:$40 sps:$4 sm:$0xff]   ;;  %v15123_v59 = vld [vmem:[%s17242_s4 + $0x1190] ss:$40 sps:$4 sm:$0xff]  }
 0x2af   : > { %6006 = vmatprep.subr.bf16.mxu1 %v15062_v60  ;;  %v15126_v60 = vld [vmem:[%s17242_s4 + $0x1198] ss:$40 sps:$4 sm:$0xff]  }
 0x2b1   : > { %5802 = vmatpush1.bf16.msra.mxu0 %v15057_v61  ;;  %v15131_v61 = vld [vmem:[%s17242_s4 + $0x11e4] ss:$40 sps:$4 sm:$0xff]  }
 0x2b2   : > { %6007 = vmatpush1.bf16.msra.mxu1 %v15060_v62  ;;  %5803 = vmatprep.subr.bf16.mxu0 %v15065_v63  ;;  %v15134_v62 = vld [vmem:[%s17242_s4 + $0x11ec] ss:$40 sps:$4 sm:$0xff]   ;;  %v15129_v63 = vld [vmem:[%s17242_s4 + $0x11e0] ss:$40 sps:$4 sm:$0xff]  }
 0x2b3   : > { %6008 = vmatprep.subr.bf16.mxu1 %v15068_v0  ;;  %v15132_v0 = vld [vmem:[%s17242_s4 + $0x11e8] ss:$40 sps:$4 sm:$0xff]  }
 0x2b5   : > { %5804 = vmatpush1.bf16.msra.mxu0 %v15063_v1  ;;  %v15137_v1 = vld [vmem:[%s17242_s4 + $0x1234] ss:$40 sps:$4 sm:$0xff]  }
 0x2b6   : > { %6009 = vmatpush1.bf16.msra.mxu1 %v15066_v2  ;;  %5805 = vmatprep.subr.bf16.mxu0 %v15071_v3  ;;  %v15140_v2 = vld [vmem:[%s17242_s4 + $0x123c] ss:$40 sps:$4 sm:$0xff]   ;;  %v15135_v3 = vld [vmem:[%s17242_s4 + $0x1230] ss:$40 sps:$4 sm:$0xff]  }
 0x2b7   : > { %6010 = vmatprep.subr.bf16.mxu1 %v15074_v4  ;;  %v15138_v4 = vld [vmem:[%s17242_s4 + $0x1238] ss:$40 sps:$4 sm:$0xff]  }
 0x2b9   : > { %5806 = vmatpush1.bf16.msra.mxu0 %v15069_v5  ;;  %v15143_v5 = vld [vmem:[%s17242_s4 + $0x1284] ss:$40 sps:$4 sm:$0xff]  }
 0x2ba   : > { %6011 = vmatpush1.bf16.msra.mxu1 %v15072_v7  ;;  %5816 = vmatprep.subr.bf16.mxu0 %v15077_v8  ;;  %v15146_v7 = vld [vmem:[%s17242_s4 + $0x128c] ss:$40 sps:$4 sm:$0xff]   ;;  %v15141_v8 = vld [vmem:[%s17242_s4 + $0x1280] ss:$40 sps:$4 sm:$0xff]  }
 0x2bb   : > { %6021 = vmatprep.subr.bf16.mxu1 %v15080_v9  ;;  %v15144_v9 = vld [vmem:[%s17242_s4 + $0x1288] ss:$40 sps:$4 sm:$0xff]  }
 0x2bc   : > { %5808 = vmatmul.mubr.bf16.vlgmr.msra.gmra.mrb[4].mxu0 %v17489_v21 }
 0x2bd   : > { %6013 = vmatmul.mubr.bf16.vlgmr.msra.gmra.mrb[4].mxu1 %v17489_v21  ;;  %5817 = vmatpush1.bf16.msra.mxu0 %v15075_v10  ;;  %v15149_v10 = vld [vmem:[%s17242_s4 + $0x12d4] ss:$40 sps:$4 sm:$0xff]  }
 0x2be   : > { %6022 = vmatpush1.bf16.msra.mxu1 %v15078_v12  ;;  %5818 = vmatprep.subr.bf16.mxu0 %v15083_v13  ;;  %v15152_v12 = vld [vmem:[%s17242_s4 + $0x12dc] ss:$40 sps:$4 sm:$0xff]   ;;  %v15147_v13 = vld [vmem:[%s17242_s4 + $0x12d0] ss:$40 sps:$4 sm:$0xff]  }
 0x2bf   : > { %6023 = vmatprep.subr.bf16.mxu1 %v15086_v15  ;;  %5848 = vmatprep.mubr.bf16.mxu0 %v17497_v25  ;;  %v15150_v15 = vld [vmem:[%s17242_s4 + $0x12d8] ss:$40 sps:$4 sm:$0xff]  }
 0x2c0   : > { %6053 = vmatprep.mubr.bf16.mxu1 %v17497_v25 }
 0x2c1   : > { %5819 = vmatpush1.bf16.msra.mxu0 %v15081_v17  ;;  %v15155_v17 = vld [vmem:[%s17242_s4 + $0x1324] ss:$40 sps:$4 sm:$0xff]  }
 0x2c2   : > { %6024 = vmatpush1.bf16.msra.mxu1 %v15084_v18  ;;  %5820 = vmatprep.subr.bf16.mxu0 %v15089_v19  ;;  %v15158_v18 = vld [vmem:[%s17242_s4 + $0x132c] ss:$40 sps:$4 sm:$0xff]   ;;  %v15153_v19 = vld [vmem:[%s17242_s4 + $0x1320] ss:$40 sps:$4 sm:$0xff]  }
 0x2c3   : > { %6025 = vmatprep.subr.bf16.mxu1 %v15092_v20  ;;  %v15156_v20 = vld [vmem:[%s17242_s4 + $0x1328] ss:$40 sps:$4 sm:$0xff]  }
 0x2c5   : > { %5821 = vmatpush1.bf16.msra.mxu0 %v15087_v23  ;;  %v15161_v23 = vld [vmem:[%s17242_s4 + $0x1374] ss:$40 sps:$4 sm:$0xff]  }
 0x2c6   : > { %6026 = vmatpush1.bf16.msra.mxu1 %v15090_v24  ;;  %5822 = vmatprep.subr.bf16.mxu0 %v15095_v14  ;;  %v15164_v24 = vld [vmem:[%s17242_s4 + $0x137c] ss:$40 sps:$4 sm:$0xff]   ;;  %v15159_v14 = vld [vmem:[%s17242_s4 + $0x1370] ss:$40 sps:$4 sm:$0xff]  }
 0x2c7   : > { %6027 = vmatprep.subr.bf16.mxu1 %v15098_v26  ;;  %v15162_v26 = vld [vmem:[%s17242_s4 + $0x1378] ss:$40 sps:$4 sm:$0xff]  }
 0x2c9   : > { %5823 = vmatpush1.bf16.msra.mxu0 %v15093_v27  ;;  %v15167_v27 = vld [vmem:[%s17242_s4 + $0x13c4] ss:$40 sps:$4 sm:$0xff]  }
 0x2ca   : > { %6028 = vmatpush1.bf16.msra.mxu1 %v15096_v28  ;;  %5824 = vmatprep.subr.bf16.mxu0 %v15101_v29  ;;  %v15170_v28 = vld [vmem:[%s17242_s4 + $0x13cc] ss:$40 sps:$4 sm:$0xff]   ;;  %v15165_v29 = vld [vmem:[%s17242_s4 + $0x13c0] ss:$40 sps:$4 sm:$0xff]  }
 0x2cb   : > { %6029 = vmatprep.subr.bf16.mxu1 %v15104_v33  ;;  %v15168_v33 = vld [vmem:[%s17242_s4 + $0x13c8] ss:$40 sps:$4 sm:$0xff]  }
 0x2cd   : > { %5825 = vmatpush1.bf16.msra.mxu0 %v15099_v34  ;;  %v15173_v34 = vld [vmem:[%s17242_s4 + $0x1414] ss:$40 sps:$4 sm:$0xff]  }
 0x2ce   : > { %6030 = vmatpush1.bf16.msra.mxu1 %v15102_v35  ;;  %5826 = vmatprep.subr.bf16.mxu0 %v15107_v22  ;;  %v15176_v35 = vld [vmem:[%s17242_s4 + $0x141c] ss:$40 sps:$4 sm:$0xff]   ;;  %v15171_v22 = vld [vmem:[%s17242_s4 + $0x1410] ss:$40 sps:$4 sm:$0xff]  }
 0x2cf   : > { %6031 = vmatprep.subr.bf16.mxu1 %v15110_v37  ;;  %v17877_v43 = vpop.f32.mrb[0].mxu0  ;;  %v15174_v37 = vld [vmem:[%s17242_s4 + $0x1418] ss:$40 sps:$4 sm:$0xff]  }
 0x2d0   : > { %v17879_v44 = vpop.f32.mrb[0].mxu1  ;;  %v17881_v45 = vpop.f32.mrb[1].mxu0 }
 0x2d1   : > { %v17883_v46 = vpop.f32.mrb[1].mxu1  ;;  %v5485_v32 = vpop.f32.mrb[2].mxu0  ;;  %5827 = vmatpush1.bf16.msra.mxu0 %v15105_v38  ;;  %v15179_v38 = vld [vmem:[%s17242_s4 + $0x1464] ss:$40 sps:$4 sm:$0xff]  }
 0x2d2   : > { %v5690_v47 = vpop.f32.mrb[2].mxu1  ;;  %6032 = vmatpush1.bf16.msra.mxu1 %v15108_v39  ;;  %v5486_v51 = vpop.f32.mrb[3].mxu0  ;;  %5828 = vmatprep.subr.bf16.mxu0 %v15113_v40  ;;  %v15182_v39 = vld [vmem:[%s17242_s4 + $0x146c] ss:$40 sps:$4 sm:$0xff]   ;;  %v15177_v40 = vld [vmem:[%s17242_s4 + $0x1460] ss:$40 sps:$4 sm:$0xff]  }
 0x2d3   : > { %v5691_v52 = vpop.f32.mrb[3].mxu1  ;;  %6033 = vmatprep.subr.bf16.mxu1 %v15116_v41  ;;  %v15180_v41 = vld [vmem:[%s17242_s4 + $0x1468] ss:$40 sps:$4 sm:$0xff]   ;;  %v15185_v32 = vld [vmem:[%s17242_s4 + $0x14b4] ss:$40 sps:$4 sm:$0xff]  }
 0x2d4   : > { %v15188_v47 = vld [vmem:[%s17242_s4 + $0x14bc] ss:$40 sps:$4 sm:$0xff]   ;;  %v15194_v52 = vld [vmem:[%s17242_s4 + $0x150c] ss:$40 sps:$4 sm:$0xff]  }
 0x2d5   : > { %5829 = vmatpush1.bf16.msra.mxu0 %v15111_v48  ;;  %v15183_v48 = vld [vmem:[%s17242_s4 + $0x14b0] ss:$40 sps:$4 sm:$0xff]   ;;  %v15191_v51 = vld [vmem:[%s17242_s4 + $0x1504] ss:$40 sps:$4 sm:$0xff]  }
 0x2d6   : > { %6034 = vmatpush1.bf16.msra.mxu1 %v15114_v50  ;;  %5830 = vmatprep.subr.bf16.mxu0 %v15119_v53  ;;  %v15186_v50 = vld [vmem:[%s17242_s4 + $0x14b8] ss:$40 sps:$4 sm:$0xff]  }
 0x2d7   : > { %6035 = vmatprep.subr.bf16.mxu1 %v15122_v54  ;;  %v15189_v53 = vld [vmem:[%s17242_s4 + $0x1500] ss:$40 sps:$4 sm:$0xff]  }
 0x2d8   : > { %v15192_v54 = vld [vmem:[%s17242_s4 + $0x1508] ss:$40 sps:$4 sm:$0xff]  }
 0x2d9   : > { %5831 = vmatpush1.bf16.msra.mxu0 %v15117_v55  ;;  %v15197_v55 = vld [vmem:[%s17242_s4 + $0x1554] ss:$40 sps:$4 sm:$0xff]  }
 0x2da   : > { %6036 = vmatpush1.bf16.msra.mxu1 %v15120_v56  ;;  %5832 = vmatprep.subr.bf16.mxu0 %v15125_v57  ;;  %v15200_v56 = vld [vmem:[%s17242_s4 + $0x155c] ss:$40 sps:$4 sm:$0xff]   ;;  %v15195_v57 = vld [vmem:[%s17242_s4 + $0x1550] ss:$40 sps:$4 sm:$0xff]  }
 0x2db   : > { %6037 = vmatprep.subr.bf16.mxu1 %v15128_v58  ;;  %v15198_v58 = vld [vmem:[%s17242_s4 + $0x1558] ss:$40 sps:$4 sm:$0xff]  }
 0x2dd   : > { %5833 = vmatpush1.bf16.msra.mxu0 %v15123_v59  ;;  %v15203_v59 = vld [vmem:[%s17242_s4 + $0x15a4] ss:$40 sps:$4 sm:$0xff]  }
 0x2de   : > { %6038 = vmatpush1.bf16.msra.mxu1 %v15126_v60  ;;  %5834 = vmatprep.subr.bf16.mxu0 %v15131_v61  ;;  %v15206_v60 = vld [vmem:[%s17242_s4 + $0x15ac] ss:$40 sps:$4 sm:$0xff]   ;;  %v15201_v61 = vld [vmem:[%s17242_s4 + $0x15a0] ss:$40 sps:$4 sm:$0xff]  }
 0x2df   : > { %6039 = vmatprep.subr.bf16.mxu1 %v15134_v62  ;;  %v15204_v62 = vld [vmem:[%s17242_s4 + $0x15a8] ss:$40 sps:$4 sm:$0xff]  }
 0x2e1   : > { %5835 = vmatpush1.bf16.msra.mxu0 %v15129_v63  ;;  %v15209_v63 = vld [vmem:[%s17242_s4 + $0x15f4] ss:$40 sps:$4 sm:$0xff]  }
 0x2e2   : > { %6040 = vmatpush1.bf16.msra.mxu1 %v15132_v0  ;;  %5836 = vmatprep.subr.bf16.mxu0 %v15137_v1  ;;  %v15212_v0 = vld [vmem:[%s17242_s4 + $0x15fc] ss:$40 sps:$4 sm:$0xff]   ;;  %v15207_v1 = vld [vmem:[%s17242_s4 + $0x15f0] ss:$40 sps:$4 sm:$0xff]  }
 0x2e3   : > { %6041 = vmatprep.subr.bf16.mxu1 %v15140_v2  ;;  %v15210_v2 = vld [vmem:[%s17242_s4 + $0x15f8] ss:$40 sps:$4 sm:$0xff]  }
 0x2e5   : > { %5837 = vmatpush1.bf16.msra.mxu0 %v15135_v3  ;;  %v15215_v3 = vld [vmem:[%s17242_s4 + $0x1644] ss:$40 sps:$4 sm:$0xff]  }
 0x2e6   : > { %6042 = vmatpush1.bf16.msra.mxu1 %v15138_v4  ;;  %5838 = vmatprep.subr.bf16.mxu0 %v15143_v5  ;;  %v15218_v4 = vld [vmem:[%s17242_s4 + $0x164c] ss:$40 sps:$4 sm:$0xff]   ;;  %v15213_v5 = vld [vmem:[%s17242_s4 + $0x1640] ss:$40 sps:$4 sm:$0xff]  }
 0x2e7   : > { %6043 = vmatprep.subr.bf16.mxu1 %v15146_v7  ;;  %v15216_v7 = vld [vmem:[%s17242_s4 + $0x1648] ss:$40 sps:$4 sm:$0xff]  }
 0x2e9   : > { %5839 = vmatpush1.bf16.msra.mxu0 %v15141_v8  ;;  %v15221_v8 = vld [vmem:[%s17242_s4 + $0x1694] ss:$40 sps:$4 sm:$0xff]  }
 0x2ea   : > { %6044 = vmatpush1.bf16.msra.mxu1 %v15144_v9  ;;  %5840 = vmatprep.subr.bf16.mxu0 %v15149_v10  ;;  %v15224_v9 = vld [vmem:[%s17242_s4 + $0x169c] ss:$40 sps:$4 sm:$0xff]   ;;  %v15219_v10 = vld [vmem:[%s17242_s4 + $0x1690] ss:$40 sps:$4 sm:$0xff]  }
 0x2eb   : > { %6045 = vmatprep.subr.bf16.mxu1 %v15152_v12  ;;  %v15222_v12 = vld [vmem:[%s17242_s4 + $0x1698] ss:$40 sps:$4 sm:$0xff]  }
 0x2ed   : > { %5841 = vmatpush1.bf16.msra.mxu0 %v15147_v13  ;;  %v15227_v13 = vld [vmem:[%s17242_s4 + $0x16e4] ss:$40 sps:$4 sm:$0xff]  }
 0x2ee   : > { %6046 = vmatpush1.bf16.msra.mxu1 %v15150_v15  ;;  %5842 = vmatprep.subr.bf16.mxu0 %v15155_v17  ;;  %v15230_v15 = vld [vmem:[%s17242_s4 + $0x16ec] ss:$40 sps:$4 sm:$0xff]   ;;  %v15225_v17 = vld [vmem:[%s17242_s4 + $0x16e0] ss:$40 sps:$4 sm:$0xff]  }
 0x2ef   : > { %6047 = vmatprep.subr.bf16.mxu1 %v15158_v18  ;;  %v15228_v18 = vld [vmem:[%s17242_s4 + $0x16e8] ss:$40 sps:$4 sm:$0xff]  }
 0x2f1   : > { %5843 = vmatpush1.bf16.msra.mxu0 %v15153_v19  ;;  %v15233_v19 = vld [vmem:[%s17242_s4 + $0x1734] ss:$40 sps:$4 sm:$0xff]  }
 0x2f2   : > { %6048 = vmatpush1.bf16.msra.mxu1 %v15156_v20  ;;  %5844 = vmatprep.subr.bf16.mxu0 %v15161_v23  ;;  %v15236_v20 = vld [vmem:[%s17242_s4 + $0x173c] ss:$40 sps:$4 sm:$0xff]   ;;  %v15231_v23 = vld [vmem:[%s17242_s4 + $0x1730] ss:$40 sps:$4 sm:$0xff]  }
 0x2f3   : > { %6049 = vmatprep.subr.bf16.mxu1 %v15164_v24  ;;  %v15234_v24 = vld [vmem:[%s17242_s4 + $0x1738] ss:$40 sps:$4 sm:$0xff]  }
 0x2f5   : > { %5845 = vmatpush1.bf16.msra.mxu0 %v15159_v14  ;;  %v15239_v14 = vld [vmem:[%s17242_s4 + $0x1784] ss:$40 sps:$4 sm:$0xff]  }
 0x2f6   : > { %6050 = vmatpush1.bf16.msra.mxu1 %v15162_v26  ;;  %5846 = vmatprep.subr.bf16.mxu0 %v15167_v27  ;;  %v15242_v26 = vld [vmem:[%s17242_s4 + $0x178c] ss:$40 sps:$4 sm:$0xff]   ;;  %v1198_v27 = vlaneseq }
 0x2f7   : > { %6051 = vmatprep.subr.bf16.mxu1 %v15170_v28  ;;  %v15237_v28 = vld [vmem:[%s17242_s4 + $0x1780] ss:$40 sps:$4 sm:$0xff]  }
 0x2f9   : > { %5847 = vmatpush1.bf16.msra.mxu0 %v15165_v29  ;;  %v15240_v29 = vld [vmem:[%s17242_s4 + $0x1788] ss:$40 sps:$4 sm:$0xff]  }
 0x2fa   : > { %6052 = vmatpush1.bf16.msra.mxu1 %v15168_v33  ;;  %5857 = vmatprep.subr.bf16.mxu0 %v15173_v34  ;;  %v15245_v33 = vld [vmem:[%s17242_s4 + $0x17d4] ss:$40 sps:$4 sm:$0xff]  }
 0x2fb   : > { %6062 = vmatprep.subr.bf16.mxu1 %v15176_v35  ;;  %v15248_v34 = vld [vmem:[%s17242_s4 + $0x17dc] ss:$40 sps:$4 sm:$0xff]   ;;  %v17977_v35 = vshrl.u32 %v1198_v27, 7  ;;  %v15303_v27 = vld [vmem:[%s17242_s4 + $0x200] ss:$40 sps:$4 sm:$0xff]  }
 0x2fc   : > { %5849 = vmatmul.mubr.bf16.vlgmr.msra.gmra.mrb[4].mxu0 %v17566_v30 }
 0x2fd   : > { %6054 = vmatmul.mubr.bf16.vlgmr.msra.gmra.mrb[4].mxu1 %v17566_v30  ;;  %5858 = vmatpush1.bf16.msra.mxu0 %v15171_v22  ;;  %v15243_v22 = vld [vmem:[%s17242_s4 + $0x17d0] ss:$40 sps:$4 sm:$0xff]  }
 0x2fe   : > { %6063 = vmatpush1.bf16.msra.mxu1 %v15174_v37  ;;  %5859 = vmatprep.subr.bf16.mxu0 %v15179_v38  ;;  %v15246_v37 = vld [vmem:[%s17242_s4 + $0x17d8] ss:$40 sps:$4 sm:$0xff]   ;;  %v15251_v38 = vld [vmem:[%s17242_s4 + $0x1824] ss:$40 sps:$4 sm:$0xff]  }
 0x2ff   : > { %6064 = vmatprep.subr.bf16.mxu1 %v15182_v39  ;;  %5889 = vmatprep.mubr.bf16.mxu0 %v17575_v36  ;;  %v15254_v39 = vld [vmem:[%s17242_s4 + $0x182c] ss:$40 sps:$4 sm:$0xff]  }
 0x300   : > { %6094 = vmatprep.mubr.bf16.mxu1 %v17575_v36 }
 0x301   : > { %5860 = vmatpush1.bf16.msra.mxu0 %v15177_v40  ;;  %v17984_v40 = vld [vmem:[%s17248_s17] sm:$0xff] }
 0x302   : > { %6065 = vmatpush1.bf16.msra.mxu1 %v15180_v41  ;;  %5861 = vmatprep.subr.bf16.mxu0 %v15185_v32  ;;  %v17987_v41 = vsub.s32 1, %v17977_v35  ;;  %v15249_v32 = vld [vmem:[%s17242_s4 + $0x1820] ss:$40 sps:$4 sm:$0xff]  }
 0x303   : > { %6066 = vmatprep.subr.bf16.mxu1 %v15188_v47  ;;  %v15252_v47 = vld [vmem:[%s17242_s4 + $0x1828] ss:$40 sps:$4 sm:$0xff]  }
 0x305   : > { %5862 = vmatpush1.bf16.msra.mxu0 %v15183_v48  ;;  %v15257_v48 = vld [vmem:[%s17242_s4 + $0x1874] ss:$40 sps:$4 sm:$0xff]  }
 0x306   : > { %6067 = vmatpush1.bf16.msra.mxu1 %v15186_v50  ;;  %5863 = vmatprep.subr.bf16.mxu0 %v15191_v51  ;;  %v15260_v50 = vld [vmem:[%s17242_s4 + $0x187c] ss:$40 sps:$4 sm:$0xff]   ;;  %v1205_v51 = vrot.slane %v17984_v40, %v17987_v41 }
 0x307   : > { %6068 = vmatprep.subr.bf16.mxu1 %v15194_v52  ;;  %v15255_v52 = vld [vmem:[%s17242_s4 + $0x1870] ss:$40 sps:$4 sm:$0xff]  }
 0x309   : > { %5864 = vmatpush1.bf16.msra.mxu0 %v15189_v53  ;;  %v15258_v53 = vld [vmem:[%s17242_s4 + $0x1878] ss:$40 sps:$4 sm:$0xff]  }
 0x30a   : > { %6069 = vmatpush1.bf16.msra.mxu1 %v15192_v54  ;;  %5865 = vmatprep.subr.bf16.mxu0 %v15197_v55  ;;  %v15263_v54 = vld [vmem:[%s17242_s4 + $0x18c4] ss:$40 sps:$4 sm:$0xff]  }
 0x30b   : > { %6070 = vmatprep.subr.bf16.mxu1 %v15200_v56  ;;  %v15266_v55 = vld [vmem:[%s17242_s4 + $0x18cc] ss:$40 sps:$4 sm:$0xff]   ;;  %v14104_v56 = vadd.f32 %v17881_v45, %v1205_v51  ;;  %v15278_v45 = vld [vmem:[%s17250_s6 + $0x54] ss:$40 sps:$4 sm:$0xff]  }
 0x30c   : > { %v15324_v51 = vld [vmem:[%s17250_s6 + $0x2d0] ss:$40 sps:$4 sm:$0xff]  }
 0x30d   : > { %5866 = vmatpush1.bf16.msra.mxu0 %v15195_v57  ;;  %v15261_v57 = vld [vmem:[%s17242_s4 + $0x18c0] ss:$40 sps:$4 sm:$0xff]  }
 0x30e   : > { %6071 = vmatpush1.bf16.msra.mxu1 %v15198_v58  ;;  %5867 = vmatprep.subr.bf16.mxu0 %v15203_v59  ;;  %v15264_v58 = vld [vmem:[%s17242_s4 + $0x18c8] ss:$40 sps:$4 sm:$0xff]   ;;  %v15269_v59 = vld [vmem:[%s17242_s4 + $0x24] ss:$40 sps:$4 sm:$0xff]  }
 0x30f   : > { %6072 = vmatprep.subr.bf16.mxu1 %v15206_v60  ;;  %v15272_v60 = vld [vmem:[%s17250_s6 + $0x4] ss:$40 sps:$4 sm:$0xff]  }
 0x311   : > { %5868 = vmatpush1.bf16.msra.mxu0 %v15201_v61  ;;  %v15267_v61 = vld [vmem:[%s17242_s4 + $0x20] ss:$40 sps:$4 sm:$0xff]  }
 0x312   : > { %6073 = vmatpush1.bf16.msra.mxu1 %v15204_v62  ;;  %5869 = vmatprep.subr.bf16.mxu0 %v15209_v63  ;;  %v15270_v62 = vld [vmem:[%s17250_s6] ss:$40 sps:$4 sm:$0xff]   ;;  %v6309_v63 = vmax.f32 %v14104_v56, 0.0 }
 0x313   : > { %6074 = vmatprep.subr.bf16.mxu1 %v15212_v0  ;;  %v15275_v0 = vld [vmem:[%s17242_s4 + $0x74] ss:$40 sps:$4 sm:$0xff]  }
 0x314   : > { %v15335_v56 = vld [vmem:[%s17242_s4 + $0x394] ss:$40 sps:$4 sm:$0xff]  }
 0x315   : > { %5870 = vmatpush1.bf16.msra.mxu0 %v15207_v1  ;;  %v15273_v1 = vld [vmem:[%s17242_s4 + $0x70] ss:$40 sps:$4 sm:$0xff]  }
 0x316   : > { %6075 = vmatpush1.bf16.msra.mxu1 %v15210_v2  ;;  %5871 = vmatprep.subr.bf16.mxu0 %v15215_v3  ;;  %v15276_v2 = vld [vmem:[%s17250_s6 + $0x50] ss:$40 sps:$4 sm:$0xff]   ;;  %v18010_v3 = vpack.c.bf16 %v6309_v63, %v6309_v63  ;;  %v15342_v63 = vld [vmem:[%s17250_s6 + $0x3c0] ss:$40 sps:$4 sm:$0xff]  }
 0x317   : > { %6076 = vmatprep.subr.bf16.mxu1 %v15218_v4  ;;  %v15281_v4 = vld [vmem:[%s17242_s4 + $0xc4] ss:$40 sps:$4 sm:$0xff]  }
 0x319   : > { %5872 = vmatpush1.bf16.msra.mxu0 %v15213_v5  ;;  %v15284_v5 = vld [vmem:[%s17250_s6 + $0xa4] ss:$40 sps:$4 sm:$0xff]  }
 0x31a   : > { %6077 = vmatpush1.bf16.msra.mxu1 %v15216_v7  ;;  %5873 = vmatprep.subr.bf16.mxu0 %v15221_v8  ;;  %v15279_v7 = vld [vmem:[%s17242_s4 + $0xc0] ss:$40 sps:$4 sm:$0xff]   ;;  %v15282_v8 = vld [vmem:[%s17250_s6 + $0xa0] ss:$40 sps:$4 sm:$0xff]  }
 0x31b   : > { %6078 = vmatprep.subr.bf16.mxu1 %v15224_v9  ;;  %v15287_v9 = vld [vmem:[%s17242_s4 + $0x114] ss:$40 sps:$4 sm:$0xff]  }
 0x31d   : > { %5874 = vmatpush1.bf16.msra.mxu0 %v15219_v10  ;;  %v15290_v10 = vld [vmem:[%s17250_s6 + $0xf4] ss:$40 sps:$4 sm:$0xff]  }
 0x31e   : > { %6079 = vmatpush1.bf16.msra.mxu1 %v15222_v12  ;;  %5875 = vmatprep.subr.bf16.mxu0 %v15227_v13  ;;  %v15285_v12 = vld [vmem:[%s17242_s4 + $0x110] ss:$40 sps:$4 sm:$0xff]   ;;  %v15288_v13 = vld [vmem:[%s17250_s6 + $0xf0] ss:$40 sps:$4 sm:$0xff]  }
 0x31f   : > { %6080 = vmatprep.subr.bf16.mxu1 %v15230_v15  ;;  %v15293_v15 = vld [vmem:[%s17242_s4 + $0x164] ss:$40 sps:$4 sm:$0xff]  }
 0x321   : > { %5876 = vmatpush1.bf16.msra.mxu0 %v15225_v17  ;;  %v15296_v17 = vld [vmem:[%s17250_s6 + $0x144] ss:$40 sps:$4 sm:$0xff]  }
 0x322   : > { %6081 = vmatpush1.bf16.msra.mxu1 %v15228_v18  ;;  %5877 = vmatprep.subr.bf16.mxu0 %v15233_v19  ;;  %v15294_v18 = vld [vmem:[%s17250_s6 + $0x140] ss:$40 sps:$4 sm:$0xff]  }
 0x323   : > { %6082 = vmatprep.subr.bf16.mxu1 %v15236_v20  ;;  %v15299_v19 = vld [vmem:[%s17242_s4 + $0x1b4] ss:$40 sps:$4 sm:$0xff]   ;;  %v15302_v20 = vld [vmem:[%s17250_s6 + $0x194] ss:$40 sps:$4 sm:$0xff]  }
 0x325   : > { %5878 = vmatpush1.bf16.msra.mxu0 %v15231_v23  ;;  %v15297_v23 = vld [vmem:[%s17242_s4 + $0x1b0] ss:$40 sps:$4 sm:$0xff]  }
 0x326   : > { %6083 = vmatpush1.bf16.msra.mxu1 %v15234_v24  ;;  %5879 = vmatprep.subr.bf16.mxu0 %v15239_v14  ;;  %v15300_v24 = vld [vmem:[%s17250_s6 + $0x190] ss:$40 sps:$4 sm:$0xff]  }
 0x327   : > { %6084 = vmatprep.subr.bf16.mxu1 %v15242_v26  ;;  %v15305_v14 = vld [vmem:[%s17242_s4 + $0x204] ss:$40 sps:$4 sm:$0xff]   ;;  %v15308_v26 = vld [vmem:[%s17250_s6 + $0x1e4] ss:$40 sps:$4 sm:$0xff]  }
 0x329   : > { %5880 = vmatpush1.bf16.msra.mxu0 %v15237_v28  ;;  %v15306_v28 = vld [vmem:[%s17250_s6 + $0x1e0] ss:$40 sps:$4 sm:$0xff]  }
 0x32a   : > { %6085 = vmatpush1.bf16.msra.mxu1 %v15240_v29  ;;  %5881 = vmatprep.subr.bf16.mxu0 %v15245_v33  ;;  %v15311_v29 = vld [vmem:[%s17242_s4 + $0x254] ss:$40 sps:$4 sm:$0xff]   ;;  %v15314_v33 = vld [vmem:[%s17250_s6 + $0x234] ss:$40 sps:$4 sm:$0xff]  }
 0x32b   : > { %6086 = vmatprep.subr.bf16.mxu1 %v15248_v34  ;;  %v15309_v34 = vld [vmem:[%s17242_s4 + $0x250] ss:$40 sps:$4 sm:$0xff]  }
 0x32d   : > { %5882 = vmatpush1.bf16.msra.mxu0 %v15243_v22  ;;  %v15312_v22 = vld [vmem:[%s17250_s6 + $0x230] ss:$40 sps:$4 sm:$0xff]  }
 0x32e   : > { %6087 = vmatpush1.bf16.msra.mxu1 %v15246_v37  ;;  %5883 = vmatprep.subr.bf16.mxu0 %v15251_v38  ;;  %v15317_v37 = vld [vmem:[%s17242_s4 + $0x2a4] ss:$40 sps:$4 sm:$0xff]   ;;  %v15320_v38 = vld [vmem:[%s17250_s6 + $0x284] ss:$40 sps:$4 sm:$0xff]  }
 0x32f   : > { %6088 = vmatprep.subr.bf16.mxu1 %v15254_v39  ;;  %v15315_v39 = vld [vmem:[%s17242_s4 + $0x2a0] ss:$40 sps:$4 sm:$0xff]  }
 0x331   : > { %5884 = vmatpush1.bf16.msra.mxu0 %v15249_v32  ;;  %v15318_v32 = vld [vmem:[%s17250_s6 + $0x280] ss:$40 sps:$4 sm:$0xff]  }
 0x332   : > { %6089 = vmatpush1.bf16.msra.mxu1 %v15252_v47  ;;  %5885 = vmatprep.subr.bf16.mxu0 %v15257_v48  ;;  %v15323_v47 = vld [vmem:[%s17242_s4 + $0x2f4] ss:$40 sps:$4 sm:$0xff]   ;;  %v15326_v48 = vld [vmem:[%s17250_s6 + $0x2d4] ss:$40 sps:$4 sm:$0xff]  }
 0x333   : > { %6090 = vmatprep.subr.bf16.mxu1 %v15260_v50  ;;  %v15321_v50 = vld [vmem:[%s17242_s4 + $0x2f0] ss:$40 sps:$4 sm:$0xff]  }
 0x335   : > { %5886 = vmatpush1.bf16.msra.mxu0 %v15255_v52  ;;  %v15329_v52 = vld [vmem:[%s17242_s4 + $0x344] ss:$40 sps:$4 sm:$0xff]  }
 0x336   : > { %6091 = vmatpush1.bf16.msra.mxu1 %v15258_v53  ;;  %5887 = vmatprep.subr.bf16.mxu0 %v15263_v54  ;;  %v15332_v53 = vld [vmem:[%s17250_s6 + $0x324] ss:$40 sps:$4 sm:$0xff]  }
 0x337   : > { %6092 = vmatprep.subr.bf16.mxu1 %v15266_v55  ;;  %v15327_v54 = vld [vmem:[%s17242_s4 + $0x340] ss:$40 sps:$4 sm:$0xff]   ;;  %v15330_v55 = vld [vmem:[%s17250_s6 + $0x320] ss:$40 sps:$4 sm:$0xff]  }
 0x339   : > { %5888 = vmatpush1.bf16.msra.mxu0 %v15261_v57  ;;  %v15338_v57 = vld [vmem:[%s17250_s6 + $0x374] ss:$40 sps:$4 sm:$0xff]  }
 0x33a   : > { %6093 = vmatpush1.bf16.msra.mxu1 %v15264_v58  ;;  %6103 = vmatprep.subr.bf16.mxu0 %v15269_v59  ;;  %v15333_v58 = vld [vmem:[%s17242_s4 + $0x390] ss:$40 sps:$4 sm:$0xff]   ;;  %v15336_v59 = vld [vmem:[%s17250_s6 + $0x370] ss:$40 sps:$4 sm:$0xff]  }
 0x33b   : > { %11138 = vmatprep.subr.bf16.mxu1 %v15272_v60  ;;  %v15341_v60 = vld [vmem:[%s17242_s4 + $0x3e4] ss:$40 sps:$4 sm:$0xff]  }
 0x33c   : > { %5890 = vmatmul.mubr.bf16.vlgmr.msra.gmra.mrb[4].mxu0 %v17643_v42 }
 0x33d   : > { %6095 = vmatmul.mubr.bf16.vlgmr.msra.gmra.mrb[4].mxu1 %v17643_v42  ;;  %6104 = vmatpush1.bf16.msra.mxu0 %v15267_v61  ;;  %v15344_v61 = vld [vmem:[%s17250_s6 + $0x3c4] ss:$40 sps:$4 sm:$0xff]  }
 0x33e   : > { %11139 = vmatpush1.bf16.msra.mxu1 %v15270_v62  ;;  %11170 = vmatprep.mubr.bf16.mxu1 %v18010_v3  ;;  %v15339_v62 = vld [vmem:[%s17242_s4 + $0x3e0] ss:$40 sps:$4 sm:$0xff]  }
 0x33f   : > { %6105 = vmatprep.subr.bf16.mxu0 %v15275_v0  ;;  %11140 = vmatprep.subr.bf16.mxu1 %v15278_v45  ;;  %v15347_v0 = vld [vmem:[%s17242_s4 + $0x434] ss:$40 sps:$4 sm:$0xff]   ;;  %v18062_v45 = vsub.s32 0, %v17977_v35 }
 0x340   : > { %6135 = vmatprep.mubr.bf16.mxu0 %v17308_v49  ;;  %v15291_v49 = vld [vmem:[%s17242_s4 + $0x160] ss:$40 sps:$4 sm:$0xff]  }
 0x341   : > { %6106 = vmatpush1.bf16.msra.mxu0 %v15273_v1  ;;  %v15350_v1 = vld [vmem:[%s17250_s6 + $0x414] ss:$40 sps:$4 sm:$0xff]  }
 0x342   : > { %11141 = vmatpush1.bf16.msra.mxu1 %v15276_v2  ;;  %6107 = vmatprep.subr.bf16.mxu0 %v15281_v4  ;;  %v1212_v2 = vsub.s32 3, %v17977_v35  ;;  %v15345_v4 = vld [vmem:[%s17242_s4 + $0x430] ss:$40 sps:$4 sm:$0xff]  }
 0x343   : > { %11142 = vmatprep.subr.bf16.mxu1 %v15284_v5  ;;  %v15348_v5 = vld [vmem:[%s17250_s6 + $0x410] ss:$40 sps:$4 sm:$0xff]  }
 0x345   : > { %6108 = vmatpush1.bf16.msra.mxu0 %v15279_v7  ;;  %v15353_v7 = vld [vmem:[%s17242_s4 + $0x484] ss:$40 sps:$4 sm:$0xff]  }
 0x346   : > { %11143 = vmatpush1.bf16.msra.mxu1 %v15282_v8  ;;  %6109 = vmatprep.subr.bf16.mxu0 %v15287_v9  ;;  %v1201_v8 = vrot.slane %v17984_v40, %v18062_v45  ;;  %v15356_v9 = vld [vmem:[%s17250_s6 + $0x464] ss:$40 sps:$4 sm:$0xff]  }
 0x347   : > { %11144 = vmatprep.subr.bf16.mxu1 %v15290_v10  ;;  %v1213_v10 = vrot.slane %v17984_v40, %v1212_v2  ;;  %v15360_v40 = vld [vmem:[%s17250_s6 + $0x4b0] ss:$40 sps:$4 sm:$0xff]  }
 0x349   : > { %6110 = vmatpush1.bf16.msra.mxu0 %v15285_v12  ;;  %v15351_v12 = vld [vmem:[%s17242_s4 + $0x480] ss:$40 sps:$4 sm:$0xff]  }
 0x34a   : > { %11145 = vmatpush1.bf16.msra.mxu1 %v15288_v13  ;;  %6111 = vmatprep.subr.bf16.mxu0 %v15293_v15  ;;  %v15354_v13 = vld [vmem:[%s17250_s6 + $0x460] ss:$40 sps:$4 sm:$0xff]  }
 0x34b   : > { %11146 = vmatprep.subr.bf16.mxu1 %v15296_v17  ;;  %v15359_v15 = vld [vmem:[%s17242_s4 + $0x4d4] ss:$40 sps:$4 sm:$0xff]   ;;  %v14103_v17 = vadd.f32 %v17877_v43, %v1201_v8 }
 0x34c   : > { %v15419_v8 = vld [vmem:[%s17242_s4 + $0x7f4] ss:$40 sps:$4 sm:$0xff]  }
 0x34d   : > { %6112 = vmatpush1.bf16.msra.mxu0 %v15291_v49  ;;  %v15362_v49 = vld [vmem:[%s17250_s6 + $0x4b4] ss:$40 sps:$4 sm:$0xff]  }
 0x34e   : > { %11147 = vmatpush1.bf16.msra.mxu1 %v15294_v18  ;;  %6113 = vmatprep.subr.bf16.mxu0 %v15299_v19  ;;  %v14106_v18 = vadd.f32 %v17883_v46, %v1213_v10  ;;  %v15357_v19 = vld [vmem:[%s17242_s4 + $0x4d0] ss:$40 sps:$4 sm:$0xff]   ;;  %v15371_v46 = vld [vmem:[%s17242_s4 + $0x574] ss:$40 sps:$4 sm:$0xff]  }
 0x34f   : > { %11148 = vmatprep.subr.bf16.mxu1 %v15302_v20  ;;  %v15365_v20 = vld [vmem:[%s17242_s4 + $0x524] ss:$40 sps:$4 sm:$0xff]   ;;  %v15417_v10 = vld [vmem:[%s17242_s4 + $0x7f0] ss:$40 sps:$4 sm:$0xff]  }
 0x350   : > { %v6311_v43 = vmax.f32 %v14106_v18, 0.0  ;;  %v15431_v18 = vld [vmem:[%s17242_s4 + $0x894] ss:$40 sps:$4 sm:$0xff]  }
 0x351   : > { %6114 = vmatpush1.bf16.msra.mxu0 %v15297_v23  ;;  %v6308_v23 = vmax.f32 %v14103_v17, 0.0  ;;  %v15423_v17 = vld [vmem:[%s17242_s4 + $0x840] ss:$40 sps:$4 sm:$0xff]  }
 0x352   : > { %11149 = vmatpush1.bf16.msra.mxu1 %v15300_v24  ;;  %6115 = vmatprep.subr.bf16.mxu0 %v15305_v14  ;;  %v15368_v24 = vld [vmem:[%s17250_s6 + $0x504] ss:$40 sps:$4 sm:$0xff]  }
 0x353   : > { %11150 = vmatprep.subr.bf16.mxu1 %v15308_v26  ;;  %v15363_v14 = vld [vmem:[%s17242_s4 + $0x520] ss:$40 sps:$4 sm:$0xff]   ;;  %v15366_v26 = vld [vmem:[%s17250_s6 + $0x500] ss:$40 sps:$4 sm:$0xff]  }
 0x355   : > { %6116 = vmatpush1.bf16.msra.mxu0 %v15303_v27  ;;  %v18088_v27 = vpack.c.bf16 %v6308_v23, %v6308_v23  ;;  %v15437_v23 = vld [vmem:[%s17242_s4 + $0x8e4] ss:$40 sps:$4 sm:$0xff]  }
 0x356   : > { %11151 = vmatpush1.bf16.msra.mxu1 %v15306_v28  ;;  %6117 = vmatprep.subr.bf16.mxu0 %v15311_v29  ;;  %v15374_v28 = vld [vmem:[%s17250_s6 + $0x554] ss:$40 sps:$4 sm:$0xff]   ;;  %v18091_v29 = vpack.c.bf16 %v6311_v43, %v6311_v43 }
 0x357   : > { %11152 = vmatprep.subr.bf16.mxu1 %v15314_v33  ;;  %v15369_v33 = vld [vmem:[%s17242_s4 + $0x570] ss:$40 sps:$4 sm:$0xff]   ;;  %v15435_v43 = vld [vmem:[%s17242_s4 + $0x8e0] ss:$40 sps:$4 sm:$0xff]  }
 0x359   : > { %6118 = vmatpush1.bf16.msra.mxu0 %v15309_v34  ;;  %v15372_v34 = vld [vmem:[%s17250_s6 + $0x550] ss:$40 sps:$4 sm:$0xff]  }
 0x35a   : > { %11153 = vmatpush1.bf16.msra.mxu1 %v15312_v22  ;;  %6119 = vmatprep.subr.bf16.mxu0 %v15317_v37  ;;  %v15377_v22 = vld [vmem:[%s17242_s4 + $0x5c4] ss:$40 sps:$4 sm:$0xff]   ;;  %v15380_v37 = vld [vmem:[%s17250_s6 + $0x5a4] ss:$40 sps:$4 sm:$0xff]  }
 0x35b   : > { %11154 = vmatprep.subr.bf16.mxu1 %v15320_v38  ;;  %v15378_v38 = vld [vmem:[%s17250_s6 + $0x5a0] ss:$40 sps:$4 sm:$0xff]  }
 0x35d   : > { %6120 = vmatpush1.bf16.msra.mxu0 %v15315_v39  ;;  %v15383_v39 = vld [vmem:[%s17242_s4 + $0x614] ss:$40 sps:$4 sm:$0xff]  }
 0x35e   : > { %11155 = vmatpush1.bf16.msra.mxu1 %v15318_v32  ;;  %6121 = vmatprep.subr.bf16.mxu0 %v15323_v47  ;;  %v15386_v32 = vld [vmem:[%s17250_s6 + $0x5f4] ss:$40 sps:$4 sm:$0xff]  }
 0x35f   : > { %11156 = vmatprep.subr.bf16.mxu1 %v15326_v48  ;;  %v15381_v47 = vld [vmem:[%s17242_s4 + $0x610] ss:$40 sps:$4 sm:$0xff]   ;;  %v15389_v48 = vld [vmem:[%s17242_s4 + $0x664] ss:$40 sps:$4 sm:$0xff]  }
 0x361   : > { %6122 = vmatpush1.bf16.msra.mxu0 %v15321_v50  ;;  %v15392_v50 = vld [vmem:[%s17250_s6 + $0x644] ss:$40 sps:$4 sm:$0xff]  }
 0x362   : > { %11157 = vmatpush1.bf16.msra.mxu1 %v15324_v51  ;;  %6123 = vmatprep.subr.bf16.mxu0 %v15329_v52  ;;  %v15387_v51 = vld [vmem:[%s17242_s4 + $0x660] ss:$40 sps:$4 sm:$0xff]   ;;  %v15390_v52 = vld [vmem:[%s17250_s6 + $0x640] ss:$40 sps:$4 sm:$0xff]  }
 0x363   : > { %11158 = vmatprep.subr.bf16.mxu1 %v15332_v53  ;;  %v15395_v53 = vld [vmem:[%s17242_s4 + $0x6b4] ss:$40 sps:$4 sm:$0xff]  }
 0x365   : > { %6124 = vmatpush1.bf16.msra.mxu0 %v15327_v54  ;;  %v15398_v54 = vld [vmem:[%s17250_s6 + $0x694] ss:$40 sps:$4 sm:$0xff]  }
 0x366   : > { %11159 = vmatpush1.bf16.msra.mxu1 %v15330_v55  ;;  %6125 = vmatprep.subr.bf16.mxu0 %v15335_v56  ;;  %v15393_v55 = vld [vmem:[%s17242_s4 + $0x6b0] ss:$40 sps:$4 sm:$0xff]   ;;  %v15396_v56 = vld [vmem:[%s17250_s6 + $0x690] ss:$40 sps:$4 sm:$0xff]  }
 0x367   : > { %11160 = vmatprep.subr.bf16.mxu1 %v15338_v57  ;;  %v15401_v57 = vld [vmem:[%s17242_s4 + $0x704] ss:$40 sps:$4 sm:$0xff]  }
 0x369   : > { %6126 = vmatpush1.bf16.msra.mxu0 %v15333_v58  ;;  %v15404_v58 = vld [vmem:[%s17250_s6 + $0x6e4] ss:$40 sps:$4 sm:$0xff]  }
 0x36a   : > { %11161 = vmatpush1.bf16.msra.mxu1 %v15336_v59  ;;  %6127 = vmatprep.subr.bf16.mxu0 %v15341_v60  ;;  %v15399_v59 = vld [vmem:[%s17242_s4 + $0x700] ss:$40 sps:$4 sm:$0xff]   ;;  %v15402_v60 = vld [vmem:[%s17250_s6 + $0x6e0] ss:$40 sps:$4 sm:$0xff]  }
 0x36b   : > { %11162 = vmatprep.subr.bf16.mxu1 %v15344_v61  ;;  %v15407_v61 = vld [vmem:[%s17242_s4 + $0x754] ss:$40 sps:$4 sm:$0xff]  }
 0x36d   : > { %6128 = vmatpush1.bf16.msra.mxu0 %v15339_v62  ;;  %v15410_v62 = vld [vmem:[%s17250_s6 + $0x734] ss:$40 sps:$4 sm:$0xff]  }
 0x36e   : > { %11163 = vmatpush1.bf16.msra.mxu1 %v15342_v63  ;;  %6129 = vmatprep.subr.bf16.mxu0 %v15347_v0  ;;  %v15405_v63 = vld [vmem:[%s17242_s4 + $0x750] ss:$40 sps:$4 sm:$0xff]   ;;  %v15408_v0 = vld [vmem:[%s17250_s6 + $0x730] ss:$40 sps:$4 sm:$0xff]  }
 0x36f   : > { %11164 = vmatprep.subr.bf16.mxu1 %v15350_v1  ;;  %v15413_v1 = vld [vmem:[%s17242_s4 + $0x7a4] ss:$40 sps:$4 sm:$0xff]  }
 0x371   : > { %6130 = vmatpush1.bf16.msra.mxu0 %v15345_v4  ;;  %v15416_v4 = vld [vmem:[%s17250_s6 + $0x784] ss:$40 sps:$4 sm:$0xff]  }
 0x372   : > { %11165 = vmatpush1.bf16.msra.mxu1 %v15348_v5  ;;  %6131 = vmatprep.subr.bf16.mxu0 %v15353_v7  ;;  %v15411_v5 = vld [vmem:[%s17242_s4 + $0x7a0] ss:$40 sps:$4 sm:$0xff]   ;;  %v15414_v7 = vld [vmem:[%s17250_s6 + $0x780] ss:$40 sps:$4 sm:$0xff]  }
 0x373   : > { %11166 = vmatprep.subr.bf16.mxu1 %v15356_v9  ;;  %v15422_v9 = vld [vmem:[%s17250_s6 + $0x7d4] ss:$40 sps:$4 sm:$0xff]  }
 0x375   : > { %6132 = vmatpush1.bf16.msra.mxu0 %v15351_v12  ;;  %v15420_v12 = vld [vmem:[%s17250_s6 + $0x7d0] ss:$40 sps:$4 sm:$0xff]  }
 0x376   : > { %11167 = vmatpush1.bf16.msra.mxu1 %v15354_v13  ;;  %6133 = vmatprep.subr.bf16.mxu0 %v15359_v15  ;;  %v15425_v13 = vld [vmem:[%s17242_s4 + $0x844] ss:$40 sps:$4 sm:$0xff]   ;;  %v15428_v15 = vld [vmem:[%s17250_s6 + $0x824] ss:$40 sps:$4 sm:$0xff]  }
 0x377   : > { %11168 = vmatprep.subr.bf16.mxu1 %v15362_v49  ;;  %v15426_v49 = vld [vmem:[%s17250_s6 + $0x820] ss:$40 sps:$4 sm:$0xff]  }
 0x379   : > { %6134 = vmatpush1.bf16.msra.mxu0 %v15357_v19  ;;  %v15434_v19 = vld [vmem:[%s17250_s6 + $0x874] ss:$40 sps:$4 sm:$0xff]  }
 0x37a   : > { %11169 = vmatpush1.bf16.msra.mxu1 %v15360_v40  ;;  %6144 = vmatprep.subr.bf16.mxu0 %v15365_v20  ;;  %v15429_v40 = vld [vmem:[%s17242_s4 + $0x890] ss:$40 sps:$4 sm:$0xff]   ;;  %v15432_v20 = vld [vmem:[%s17250_s6 + $0x870] ss:$40 sps:$4 sm:$0xff]  }
 0x37b   : > { %11179 = vmatprep.subr.bf16.mxu1 %v15368_v24  ;;  %v15440_v24 = vld [vmem:[%s17250_s6 + $0x8c4] ss:$40 sps:$4 sm:$0xff]  }
 0x37c   : > { %6136 = vmatmul.mubr.bf16.vlgmr.msra.gmra.mrb[8].mxu0 %v17332_v6  ;;  %v15375_v6 = vld [vmem:[%s17242_s4 + $0x5c0] ss:$40 sps:$4 sm:$0xff]  }
 0x37d   : > { %11171 = vmatmul.mubr.bf16.vlgmr.msra.gmra.mrb[8].mxu1 %v18088_v27  ;;  %6145 = vmatpush1.bf16.msra.mxu0 %v15363_v14  ;;  %v15438_v14 = vld [vmem:[%s17250_s6 + $0x8c0] ss:$40 sps:$4 sm:$0xff]  }
 0x37e   : > { %11180 = vmatpush1.bf16.msra.mxu1 %v15366_v26  ;;  %11211 = vmatprep.mubr.bf16.mxu1 %v18091_v29  ;;  %v1208_v26 = vsub.s32 2, %v17977_v35 }
 0x37f   : > { %6146 = vmatprep.subr.bf16.mxu0 %v15371_v46  ;;  %11181 = vmatprep.subr.bf16.mxu1 %v15374_v28  ;;  %v15443_v46 = vld [vmem:[%s17242_s4 + $0x934] ss:$40 sps:$4 sm:$0xff]   ;;  %v15446_v28 = vld [vmem:[%s17250_s6 + $0x914] ss:$40 sps:$4 sm:$0xff]  }
 0x380   : > { %6176 = vmatprep.mubr.bf16.mxu0 %v17363_v31  ;;  %v15384_v31 = vld [vmem:[%s17250_s6 + $0x5f0] ss:$40 sps:$4 sm:$0xff]  }
 0x381   : > { %6147 = vmatpush1.bf16.msra.mxu0 %v15369_v33  ;;  %v15441_v33 = vld [vmem:[%s17242_s4 + $0x930] ss:$40 sps:$4 sm:$0xff]  }
 0x382   : > { %11182 = vmatpush1.bf16.msra.mxu1 %v15372_v34  ;;  %6148 = vmatprep.subr.bf16.mxu0 %v15377_v22  ;;  %v15444_v34 = vld [vmem:[%s17250_s6 + $0x910] ss:$40 sps:$4 sm:$0xff]  }
 0x383   : > { %11183 = vmatprep.subr.bf16.mxu1 %v15380_v37  ;;  %v18149_v22 = vld [vmem:[%s17248_s17] sm:$0xff] }
 0x384   : > { %v1209_v37 = vrot.slane %v18149_v22, %v1208_v26 }
 0x385   : > { %6149 = vmatpush1.bf16.msra.mxu0 %v15375_v6  ;;  %v15449_v6 = vld [vmem:[%s17242_s4 + $0x984] ss:$40 sps:$4 sm:$0xff]  }
 0x386   : > { %11184 = vmatpush1.bf16.msra.mxu1 %v15378_v38  ;;  %6150 = vmatprep.subr.bf16.mxu0 %v15383_v39  ;;  %v15452_v38 = vld [vmem:[%s17250_s6 + $0x964] ss:$40 sps:$4 sm:$0xff]  }
 0x387   : > { %11185 = vmatprep.subr.bf16.mxu1 %v15386_v32  ;;  %v15447_v39 = vld [vmem:[%s17242_s4 + $0x980] ss:$40 sps:$4 sm:$0xff]   ;;  %v15450_v32 = vld [vmem:[%s17250_s6 + $0x960] ss:$40 sps:$4 sm:$0xff]  }
 0x389   : > { %6151 = vmatpush1.bf16.msra.mxu0 %v15381_v47  ;;  %v14105_v47 = vadd.f32 %v17879_v44, %v1209_v37  ;;  %v15459_v44 = vld [vmem:[%s17242_s4 + $0xa20] ss:$40 sps:$4 sm:$0xff]   ;;  %v15495_v37 = vld [vmem:[%s17242_s4 + $0xcf0] ss:$40 sps:$4 sm:$0xff]  }
 0x38a   : > { %11186 = vmatpush1.bf16.msra.mxu1 %v15384_v31  ;;  %6152 = vmatprep.subr.bf16.mxu0 %v15389_v48  ;;  %v15455_v31 = vld [vmem:[%s17242_s4 + $0x9d4] ss:$40 sps:$4 sm:$0xff]   ;;  %v15458_v48 = vld [vmem:[%s17250_s6 + $0x9b4] ss:$40 sps:$4 sm:$0xff]  }
 0x38b   : > { %11187 = vmatprep.subr.bf16.mxu1 %v15392_v50  ;;  %v15453_v50 = vld [vmem:[%s17242_s4 + $0x9d0] ss:$40 sps:$4 sm:$0xff]  }
 0x38d   : > { %6153 = vmatpush1.bf16.msra.mxu0 %v15387_v51  ;;  %v15456_v51 = vld [vmem:[%s17250_s6 + $0x9b0] ss:$40 sps:$4 sm:$0xff]  }
 0x38e   : > { %11188 = vmatpush1.bf16.msra.mxu1 %v15390_v52  ;;  %6154 = vmatprep.subr.bf16.mxu0 %v15395_v53  ;;  %v6310_v52 = vmax.f32 %v14105_v47, 0.0  ;;  %v15461_v53 = vld [vmem:[%s17242_s4 + $0xa24] ss:$40 sps:$4 sm:$0xff]   ;;  %v15509_v47 = vld [vmem:[%s17242_s4 + $0xd94] ss:$40 sps:$4 sm:$0xff]  }
 0x38f   : > { %11189 = vmatprep.subr.bf16.mxu1 %v15398_v54  ;;  %v15482_v54 = vld [vmem:[%s17250_s6 + $0xa04] ss:$40 sps:$4 sm:$0xff]  }
 0x391   : > { %6155 = vmatpush1.bf16.msra.mxu0 %v15393_v55  ;;  %v15480_v55 = vld [vmem:[%s17250_s6 + $0xa00] ss:$40 sps:$4 sm:$0xff]  }
 0x392   : > { %11190 = vmatpush1.bf16.msra.mxu1 %v15396_v56  ;;  %6156 = vmatprep.subr.bf16.mxu0 %v15401_v57  ;;  %v18167_v56 = vpack.c.bf16 %v6310_v52, %v6310_v52  ;;  %v15464_v57 = vld [vmem:[%s17242_s4 + $0xa74] ss:$40 sps:$4 sm:$0xff]   ;;  %v15546_v52 = vld [vmem:[%s17250_s6 + $0xd70] ss:$40 sps:$4 sm:$0xff]  }
 0x393   : > { %11191 = vmatprep.subr.bf16.mxu1 %v15404_v58  ;;  %v15488_v58 = vld [vmem:[%s17250_s6 + $0xa54] ss:$40 sps:$4 sm:$0xff]  }
 0x395   : > { %6157 = vmatpush1.bf16.msra.mxu0 %v15399_v59  ;;  %v15462_v59 = vld [vmem:[%s17242_s4 + $0xa70] ss:$40 sps:$4 sm:$0xff]  }
 0x396   : > { %11192 = vmatpush1.bf16.msra.mxu1 %v15402_v60  ;;  %6158 = vmatprep.subr.bf16.mxu0 %v15407_v61  ;;  %v15486_v60 = vld [vmem:[%s17250_s6 + $0xa50] ss:$40 sps:$4 sm:$0xff]  }
 0x397   : > { %11193 = vmatprep.subr.bf16.mxu1 %v15410_v62  ;;  %v15467_v61 = vld [vmem:[%s17242_s4 + $0xac4] ss:$40 sps:$4 sm:$0xff]   ;;  %v15494_v62 = vld [vmem:[%s17250_s6 + $0xaa4] ss:$40 sps:$4 sm:$0xff]  }
 0x399   : > { %6159 = vmatpush1.bf16.msra.mxu0 %v15405_v63  ;;  %v15465_v63 = vld [vmem:[%s17242_s4 + $0xac0] ss:$40 sps:$4 sm:$0xff]  }
 0x39a   : > { %11194 = vmatpush1.bf16.msra.mxu1 %v15408_v0  ;;  %6160 = vmatprep.subr.bf16.mxu0 %v15413_v1  ;;  %v15470_v0 = vld [vmem:[%s17242_s4 + $0xb14] ss:$40 sps:$4 sm:$0xff]   ;;  %v15500_v1 = vld [vmem:[%s17250_s6 + $0xaf4] ss:$40 sps:$4 sm:$0xff]  }
 0x39b   : > { %11195 = vmatprep.subr.bf16.mxu1 %v15416_v4  ;;  %v15468_v4 = vld [vmem:[%s17242_s4 + $0xb10] ss:$40 sps:$4 sm:$0xff]  }
 0x39d   : > { %6161 = vmatpush1.bf16.msra.mxu0 %v15411_v5  ;;  %v15473_v5 = vld [vmem:[%s17242_s4 + $0xb64] ss:$40 sps:$4 sm:$0xff]  }
 0x39e   : > { %11196 = vmatpush1.bf16.msra.mxu1 %v15414_v7  ;;  %6162 = vmatprep.subr.bf16.mxu0 %v15419_v8  ;;  %v15506_v7 = vld [vmem:[%s17250_s6 + $0xb44] ss:$40 sps:$4 sm:$0xff]  }
 0x39f   : > { %11197 = vmatprep.subr.bf16.mxu1 %v15422_v9  ;;  %v15471_v8 = vld [vmem:[%s17242_s4 + $0xb60] ss:$40 sps:$4 sm:$0xff]   ;;  %v15504_v9 = vld [vmem:[%s17250_s6 + $0xb40] ss:$40 sps:$4 sm:$0xff]  }
 0x3a1   : > { %6163 = vmatpush1.bf16.msra.mxu0 %v15417_v10  ;;  %v15476_v10 = vld [vmem:[%s17242_s4 + $0xbb4] ss:$40 sps:$4 sm:$0xff]  }
 0x3a2   : > { %11198 = vmatpush1.bf16.msra.mxu1 %v15420_v12  ;;  %6164 = vmatprep.subr.bf16.mxu0 %v15425_v13  ;;  %v15512_v12 = vld [vmem:[%s17250_s6 + $0xb94] ss:$40 sps:$4 sm:$0xff]  }
 0x3a3   : > { %11199 = vmatprep.subr.bf16.mxu1 %v15428_v15  ;;  %v15474_v13 = vld [vmem:[%s17242_s4 + $0xbb0] ss:$40 sps:$4 sm:$0xff]   ;;  %v15510_v15 = vld [vmem:[%s17250_s6 + $0xb90] ss:$40 sps:$4 sm:$0xff]  }
 0x3a5   : > { %6165 = vmatpush1.bf16.msra.mxu0 %v15423_v17  ;;  %v15479_v17 = vld [vmem:[%s17242_s4 + $0xc04] ss:$40 sps:$4 sm:$0xff]  }
 0x3a6   : > { %11200 = vmatpush1.bf16.msra.mxu1 %v15426_v49  ;;  %6166 = vmatprep.subr.bf16.mxu0 %v15431_v18  ;;  %v15518_v49 = vld [vmem:[%s17250_s6 + $0xbe4] ss:$40 sps:$4 sm:$0xff]  }
 0x3a7   : > { %11201 = vmatprep.subr.bf16.mxu1 %v15434_v19  ;;  %v15477_v18 = vld [vmem:[%s17242_s4 + $0xc00] ss:$40 sps:$4 sm:$0xff]   ;;  %v15516_v19 = vld [vmem:[%s17250_s6 + $0xbe0] ss:$40 sps:$4 sm:$0xff]  }
 0x3a9   : > { %6167 = vmatpush1.bf16.msra.mxu0 %v15429_v40  ;;  %v15485_v40 = vld [vmem:[%s17242_s4 + $0xc54] ss:$40 sps:$4 sm:$0xff]  }
 0x3aa   : > { %11202 = vmatpush1.bf16.msra.mxu1 %v15432_v20  ;;  %6168 = vmatprep.subr.bf16.mxu0 %v15437_v23  ;;  %v15524_v20 = vld [vmem:[%s17250_s6 + $0xc34] ss:$40 sps:$4 sm:$0xff]  }
 0x3ab   : > { %11203 = vmatprep.subr.bf16.mxu1 %v15440_v24  ;;  %v15483_v23 = vld [vmem:[%s17242_s4 + $0xc50] ss:$40 sps:$4 sm:$0xff]   ;;  %v15522_v24 = vld [vmem:[%s17250_s6 + $0xc30] ss:$40 sps:$4 sm:$0xff]  }
 0x3ad   : > { %6169 = vmatpush1.bf16.msra.mxu0 %v15435_v43  ;;  %v15491_v43 = vld [vmem:[%s17242_s4 + $0xca4] ss:$40 sps:$4 sm:$0xff]  }
 0x3ae   : > { %11204 = vmatpush1.bf16.msra.mxu1 %v15438_v14  ;;  %6170 = vmatprep.subr.bf16.mxu0 %v15443_v46  ;;  %v15530_v14 = vld [vmem:[%s17250_s6 + $0xc84] ss:$40 sps:$4 sm:$0xff]  }
 0x3af   : > { %11205 = vmatprep.subr.bf16.mxu1 %v15446_v28  ;;  %v15489_v46 = vld [vmem:[%s17242_s4 + $0xca0] ss:$40 sps:$4 sm:$0xff]   ;;  %v15497_v28 = vld [vmem:[%s17242_s4 + $0xcf4] ss:$40 sps:$4 sm:$0xff]  }
 0x3b1   : > { %6171 = vmatpush1.bf16.msra.mxu0 %v15441_v33  ;;  %v15528_v33 = vld [vmem:[%s17250_s6 + $0xc80] ss:$40 sps:$4 sm:$0xff]  }
 0x3b2   : > { %11206 = vmatpush1.bf16.msra.mxu1 %v15444_v34  ;;  %6172 = vmatprep.subr.bf16.mxu0 %v15449_v6  ;;  %v15536_v34 = vld [vmem:[%s17250_s6 + $0xcd4] ss:$40 sps:$4 sm:$0xff]   ;;  %v15503_v6 = vld [vmem:[%s17242_s4 + $0xd44] ss:$40 sps:$4 sm:$0xff]  }
 0x3b3   : > { %11207 = vmatprep.subr.bf16.mxu1 %v15452_v38  ;;  %v15534_v38 = vld [vmem:[%s17250_s6 + $0xcd0] ss:$40 sps:$4 sm:$0xff]  }
 0x3b5   : > { %6173 = vmatpush1.bf16.msra.mxu0 %v15447_v39  ;;  %v15542_v39 = vld [vmem:[%s17250_s6 + $0xd24] ss:$40 sps:$4 sm:$0xff]  }
 0x3b6   : > { %11208 = vmatpush1.bf16.msra.mxu1 %v15450_v32  ;;  %6174 = vmatprep.subr.bf16.mxu0 %v15455_v31  ;;  %v15501_v32 = vld [vmem:[%s17242_s4 + $0xd40] ss:$40 sps:$4 sm:$0xff]   ;;  %v15540_v31 = vld [vmem:[%s17250_s6 + $0xd20] ss:$40 sps:$4 sm:$0xff]  }
 0x3b7   : > { %11209 = vmatprep.subr.bf16.mxu1 %v15458_v48  ;;  %v15548_v48 = vld [vmem:[%s17250_s6 + $0xd74] ss:$40 sps:$4 sm:$0xff]  }
 0x3b9   : > { %6175 = vmatpush1.bf16.msra.mxu0 %v15453_v50  ;;  %v15507_v50 = vld [vmem:[%s17242_s4 + $0xd90] ss:$40 sps:$4 sm:$0xff]  }
 0x3ba   : > { %11210 = vmatpush1.bf16.msra.mxu1 %v15456_v51  ;;  %6185 = vmatprep.subr.bf16.mxu0 %v15461_v53  ;;  %v15515_v51 = vld [vmem:[%s17242_s4 + $0xde4] ss:$40 sps:$4 sm:$0xff]   ;;  %v15554_v53 = vld [vmem:[%s17250_s6 + $0xdc4] ss:$40 sps:$4 sm:$0xff]  }
 0x3bb   : > { %11220 = vmatprep.subr.bf16.mxu1 %v15482_v54  ;;  %v15513_v54 = vld [vmem:[%s17242_s4 + $0xde0] ss:$40 sps:$4 sm:$0xff]  }
 0x3bc   : > { %6177 = vmatmul.mubr.bf16.vlgmr.msra.gmra.mrb[8].mxu0 %v17410_v11  ;;  %v15492_v11 = vld [vmem:[%s17250_s6 + $0xaa0] ss:$40 sps:$4 sm:$0xff]  }
 0x3bd   : > { %11212 = vmatmul.mubr.bf16.vlgmr.msra.gmra.mrb[12].mxu1 %v18167_v56  ;;  %6186 = vmatpush1.bf16.msra.mxu0 %v15459_v44  ;;  %v15521_v44 = vld [vmem:[%s17242_s4 + $0xe34] ss:$40 sps:$4 sm:$0xff]  }
 0x3be   : > { %11221 = vmatpush1.bf16.msra.mxu1 %v15480_v55  ;;  %6187 = vmatprep.subr.bf16.mxu0 %v15464_v57  ;;  %v15552_v55 = vld [vmem:[%s17250_s6 + $0xdc0] ss:$40 sps:$4 sm:$0xff]   ;;  %v15560_v57 = vld [vmem:[%s17250_s6 + $0xe14] ss:$40 sps:$4 sm:$0xff]  }
 0x3bf   : > { %11222 = vmatprep.subr.bf16.mxu1 %v15488_v58  ;;  %6217 = vmatprep.mubr.bf16.mxu0 %v17419_v16  ;;  %v15498_v16 = vld [vmem:[%s17250_s6 + $0xaf0] ss:$40 sps:$4 sm:$0xff]   ;;  %v15519_v58 = vld [vmem:[%s17242_s4 + $0xe30] ss:$40 sps:$4 sm:$0xff]  }
 0x3c1   : > { %6188 = vmatpush1.bf16.msra.mxu0 %v15462_v59  ;;  %v15527_v59 = vld [vmem:[%s17242_s4 + $0xe84] ss:$40 sps:$4 sm:$0xff]  }
 0x3c2   : > { %11223 = vmatpush1.bf16.msra.mxu1 %v15486_v60  ;;  %6189 = vmatprep.subr.bf16.mxu0 %v15467_v61  ;;  %v15558_v60 = vld [vmem:[%s17250_s6 + $0xe10] ss:$40 sps:$4 sm:$0xff]   ;;  %v15566_v61 = vld [vmem:[%s17250_s6 + $0xe64] ss:$40 sps:$4 sm:$0xff]  }
 0x3c3   : > { %11224 = vmatprep.subr.bf16.mxu1 %v15494_v62  ;;  %v15525_v62 = vld [vmem:[%s17242_s4 + $0xe80] ss:$40 sps:$4 sm:$0xff]  }
 0x3c5   : > { %6190 = vmatpush1.bf16.msra.mxu0 %v15465_v63  ;;  %v15533_v63 = vld [vmem:[%s17242_s4 + $0xed4] ss:$40 sps:$4 sm:$0xff]  }
 0x3c6   : > { %11225 = vmatpush1.bf16.msra.mxu1 %v15492_v11  ;;  %6191 = vmatprep.subr.bf16.mxu0 %v15470_v0  ;;  %v15564_v11 = vld [vmem:[%s17250_s6 + $0xe60] ss:$40 sps:$4 sm:$0xff]   ;;  %v15572_v0 = vld [vmem:[%s17250_s6 + $0xeb4] ss:$40 sps:$4 sm:$0xff]  }
 0x3c7   : > { %11226 = vmatprep.subr.bf16.mxu1 %v15500_v1  ;;  %v15531_v1 = vld [vmem:[%s17242_s4 + $0xed0] ss:$40 sps:$4 sm:$0xff]  }
 0x3c9   : > { %6192 = vmatpush1.bf16.msra.mxu0 %v15468_v4  ;;  %v15539_v4 = vld [vmem:[%s17242_s4 + $0xf24] ss:$40 sps:$4 sm:$0xff]  }
 0x3ca   : > { %11227 = vmatpush1.bf16.msra.mxu1 %v15498_v16  ;;  %6193 = vmatprep.subr.bf16.mxu0 %v15473_v5  ;;  %v15570_v16 = vld [vmem:[%s17250_s6 + $0xeb0] ss:$40 sps:$4 sm:$0xff]   ;;  %v15578_v5 = vld [vmem:[%s17250_s6 + $0xf04] ss:$40 sps:$4 sm:$0xff]  }
 0x3cb   : > { %11228 = vmatprep.subr.bf16.mxu1 %v15506_v7  ;;  %v15537_v7 = vld [vmem:[%s17242_s4 + $0xf20] ss:$40 sps:$4 sm:$0xff]  }
 0x3cd   : > { %6194 = vmatpush1.bf16.msra.mxu0 %v15471_v8  ;;  %v15545_v8 = vld [vmem:[%s17242_s4 + $0xf74] ss:$40 sps:$4 sm:$0xff]  }
 0x3ce   : > { %11229 = vmatpush1.bf16.msra.mxu1 %v15504_v9  ;;  %6195 = vmatprep.subr.bf16.mxu0 %v15476_v10  ;;  %v15543_v9 = vld [vmem:[%s17242_s4 + $0xf70] ss:$40 sps:$4 sm:$0xff]   ;;  %v15551_v10 = vld [vmem:[%s17242_s4 + $0xfc4] ss:$40 sps:$4 sm:$0xff]  }
 0x3cf   : > { %11230 = vmatprep.subr.bf16.mxu1 %v15512_v12  ;;  %v15549_v12 = vld [vmem:[%s17242_s4 + $0xfc0] ss:$40 sps:$4 sm:$0xff]  }
 0x3d1   : > { %6196 = vmatpush1.bf16.msra.mxu0 %v15474_v13  ;;  %v15557_v13 = vld [vmem:[%s17242_s4 + $0x1014] ss:$40 sps:$4 sm:$0xff]  }
 0x3d2   : > { %11231 = vmatpush1.bf16.msra.mxu1 %v15510_v15  ;;  %6197 = vmatprep.subr.bf16.mxu0 %v15479_v17  ;;  %v15555_v15 = vld [vmem:[%s17242_s4 + $0x1010] ss:$40 sps:$4 sm:$0xff]   ;;  %v15563_v17 = vld [vmem:[%s17242_s4 + $0x1064] ss:$40 sps:$4 sm:$0xff]  }
 0x3d3   : > { %11232 = vmatprep.subr.bf16.mxu1 %v15518_v49  ;;  %v15561_v49 = vld [vmem:[%s17242_s4 + $0x1060] ss:$40 sps:$4 sm:$0xff]  }
 0x3d5   : > { %6198 = vmatpush1.bf16.msra.mxu0 %v15477_v18  ;;  %v1220_v18 = vsub.s32 5, %v17977_v35 }
 0x3d6   : > { %11233 = vmatpush1.bf16.msra.mxu1 %v15516_v19  ;;  %6199 = vmatprep.subr.bf16.mxu0 %v15485_v40  ;;  %v15569_v19 = vld [vmem:[%s17242_s4 + $0x10b4] ss:$40 sps:$4 sm:$0xff]  }
 0x3d7   : > { %11234 = vmatprep.subr.bf16.mxu1 %v15524_v20  ;;  %v1221_v20 = vrot.slane %v18149_v22, %v1220_v18 }
 0x3d9   : > { %6200 = vmatpush1.bf16.msra.mxu0 %v15483_v23 }
 0x3da   : > { %11235 = vmatpush1.bf16.msra.mxu1 %v15522_v24  ;;  %6201 = vmatprep.subr.bf16.mxu0 %v15491_v43  ;;  %v15567_v24 = vld [vmem:[%s17242_s4 + $0x10b0] ss:$40 sps:$4 sm:$0xff]   ;;  %v15575_v43 = vld [vmem:[%s17242_s4 + $0x1104] ss:$40 sps:$4 sm:$0xff]  }
 0x3db   : > { %11236 = vmatprep.subr.bf16.mxu1 %v15530_v14 }
 0x3dd   : > { %6202 = vmatpush1.bf16.msra.mxu0 %v15489_v46 }
 0x3de   : > { %11237 = vmatpush1.bf16.msra.mxu1 %v15528_v33  ;;  %6203 = vmatprep.subr.bf16.mxu0 %v15497_v28 }
 0x3df   : > { %11238 = vmatprep.subr.bf16.mxu1 %v15536_v34 }
 0x3e1   : > { %6204 = vmatpush1.bf16.msra.mxu0 %v15495_v37 }
 0x3e2   : > { %11239 = vmatpush1.bf16.msra.mxu1 %v15534_v38  ;;  %6205 = vmatprep.subr.bf16.mxu0 %v15503_v6 }
 0x3e3   : > { %11240 = vmatprep.subr.bf16.mxu1 %v15542_v39 }
 0x3e5   : > { %6206 = vmatpush1.bf16.msra.mxu0 %v15501_v32  ;;  %v15573_v32 = vld [vmem:[%s17242_s4 + $0x1100] ss:$40 sps:$4 sm:$0xff]  }
 0x3e6   : > { %11241 = vmatpush1.bf16.msra.mxu1 %v15540_v31  ;;  %6207 = vmatprep.subr.bf16.mxu0 %v15509_v47 }
 0x3e7   : > { %11242 = vmatprep.subr.bf16.mxu1 %v15548_v48  ;;  %v15581_v48 = vld [vmem:[%s17242_s4 + $0x1154] ss:$40 sps:$4 sm:$0xff]  }
 0x3e9   : > { %6208 = vmatpush1.bf16.msra.mxu0 %v15507_v50 }
 0x3ea   : > { %11243 = vmatpush1.bf16.msra.mxu1 %v15546_v52  ;;  %6209 = vmatprep.subr.bf16.mxu0 %v15515_v51 }
 0x3eb   : > { %11244 = vmatprep.subr.bf16.mxu1 %v15554_v53  ;;  %v15576_v53 = vld [vmem:[%s17250_s6 + $0xf00] ss:$40 sps:$4 sm:$0xff]  }
 0x3ed   : > { %6210 = vmatpush1.bf16.msra.mxu0 %v15513_v54  ;;  %v15579_v54 = vld [vmem:[%s17242_s4 + $0x1150] ss:$40 sps:$4 sm:$0xff]  }
 0x3ee   : > { %11245 = vmatpush1.bf16.msra.mxu1 %v15552_v55  ;;  %6211 = vmatprep.subr.bf16.mxu0 %v15521_v44  ;;  %v15584_v55 = vld [vmem:[%s17250_s6 + $0xf54] ss:$40 sps:$4 sm:$0xff]  }
 0x3ef   : > { %11246 = vmatprep.subr.bf16.mxu1 %v15560_v57  ;;  %v15587_v57 = vld [vmem:[%s17242_s4 + $0x11a4] ss:$40 sps:$4 sm:$0xff]  }
 0x3f1   : > { %6212 = vmatpush1.bf16.msra.mxu0 %v15519_v58 }
 0x3f2   : > { %11247 = vmatpush1.bf16.msra.mxu1 %v15558_v60  ;;  %6213 = vmatprep.subr.bf16.mxu0 %v15527_v59  ;;  %v15582_v59 = vld [vmem:[%s17250_s6 + $0xf50] ss:$40 sps:$4 sm:$0xff]   ;;  %v15585_v60 = vld [vmem:[%s17242_s4 + $0x11a0] ss:$40 sps:$4 sm:$0xff]  }
 0x3f3   : > { %11248 = vmatprep.subr.bf16.mxu1 %v15566_v61  ;;  %v15590_v61 = vld [vmem:[%s17250_s6 + $0xfa4] ss:$40 sps:$4 sm:$0xff]  }
 0x3f5   : > { %6214 = vmatpush1.bf16.msra.mxu0 %v15525_v62  ;;  %v15593_v62 = vld [vmem:[%s17242_s4 + $0x11f4] ss:$40 sps:$4 sm:$0xff]  }
 0x3f6   : > { %11249 = vmatpush1.bf16.msra.mxu1 %v15564_v11  ;;  %6215 = vmatprep.subr.bf16.mxu0 %v15533_v63  ;;  %v15588_v63 = vld [vmem:[%s17250_s6 + $0xfa0] ss:$40 sps:$4 sm:$0xff]   ;;  %v15591_v11 = vld [vmem:[%s17242_s4 + $0x11f0] ss:$40 sps:$4 sm:$0xff]  }
 0x3f7   : > { %11250 = vmatprep.subr.bf16.mxu1 %v15572_v0  ;;  %v15596_v0 = vld [vmem:[%s17250_s6 + $0xff4] ss:$40 sps:$4 sm:$0xff]  }
 0x3f9   : > { %6216 = vmatpush1.bf16.msra.mxu0 %v15531_v1  ;;  %v15599_v1 = vld [vmem:[%s17242_s4 + $0x1244] ss:$40 sps:$4 sm:$0xff]  }
 0x3fa   : > { %11251 = vmatpush1.bf16.msra.mxu1 %v15570_v16  ;;  %6226 = vmatprep.subr.bf16.mxu0 %v15539_v4  ;;  %v15594_v4 = vld [vmem:[%s17250_s6 + $0xff0] ss:$40 sps:$4 sm:$0xff]   ;;  %v15597_v16 = vld [vmem:[%s17242_s4 + $0x1240] ss:$40 sps:$4 sm:$0xff]  }
 0x3fb   : > { %11261 = vmatprep.subr.bf16.mxu1 %v15578_v5  ;;  %v15602_v5 = vld [vmem:[%s17250_s6 + $0x1044] ss:$40 sps:$4 sm:$0xff]  }
 0x3fc   : > { %6218 = vmatmul.mubr.bf16.vlgmr.msra.gmra.mrb[8].mxu0 %v17489_v21  ;;  %v1216_v21 = vsub.s32 4, %v17977_v35 }
 0x3fd   : > { %6227 = vmatpush1.bf16.msra.mxu0 %v15537_v7  ;;  %6258 = vmatprep.mubr.bf16.mxu0 %v17497_v25  ;;  %v1228_v25 = vsub.s32 7, %v17977_v35  ;;  %v15605_v7 = vld [vmem:[%s17242_s4 + $0x1294] ss:$40 sps:$4 sm:$0xff]  }
 0x3fe   : > { %6228 = vmatprep.subr.bf16.mxu0 %v15545_v8  ;;  %v1217_v40 = vrot.slane %v18149_v22, %v1216_v21  ;;  %v15600_v8 = vld [vmem:[%s17250_s6 + $0x1040] ss:$40 sps:$4 sm:$0xff]  }
 0x3ff   : > { %v1229_v23 = vrot.slane %v18149_v22, %v1228_v25 }
 0x401   : > { %6229 = vmatpush1.bf16.msra.mxu0 %v15543_v9  ;;  %v15603_v9 = vld [vmem:[%s17242_s4 + $0x1290] ss:$40 sps:$4 sm:$0xff]  }
 0x402   : > { %6230 = vmatprep.subr.bf16.mxu0 %v15551_v10  ;;  %v15608_v10 = vld [vmem:[%s17250_s6 + $0x1094] ss:$40 sps:$4 sm:$0xff]  }
 0x405   : > { %6231 = vmatpush1.bf16.msra.mxu0 %v15549_v12  ;;  %v15611_v12 = vld [vmem:[%s17242_s4 + $0x12e4] ss:$40 sps:$4 sm:$0xff]  }
 0x406   : > { %6232 = vmatprep.subr.bf16.mxu0 %v15557_v13  ;;  %v15606_v13 = vld [vmem:[%s17250_s6 + $0x1090] ss:$40 sps:$4 sm:$0xff]  }
 0x409   : > { %6233 = vmatpush1.bf16.msra.mxu0 %v15555_v15  ;;  %v15609_v15 = vld [vmem:[%s17242_s4 + $0x12e0] ss:$40 sps:$4 sm:$0xff]  }
 0x40a   : > { %6234 = vmatprep.subr.bf16.mxu0 %v15563_v17  ;;  %v15614_v17 = vld [vmem:[%s17250_s6 + $0x10e4] ss:$40 sps:$4 sm:$0xff]  }
 0x40d   : > { %6235 = vmatpush1.bf16.msra.mxu0 %v15561_v49  ;;  %v15617_v49 = vld [vmem:[%s17242_s4 + $0x1334] ss:$40 sps:$4 sm:$0xff]  }
 0x40e   : > { %6236 = vmatprep.subr.bf16.mxu0 %v15569_v19  ;;  %v15612_v19 = vld [vmem:[%s17250_s6 + $0x10e0] ss:$40 sps:$4 sm:$0xff]  }
 0x40f   : > { %v5891_v14 = vpop.f32.mrb[4].mxu0 }
 0x410   : > { %v18260_v46 = vpop.f32.mrb[4].mxu1  ;;  %v14107_v28 = vadd.f32 %v5891_v14, %v1217_v40  ;;  %v5893_v33 = vpop.f32.mrb[5].mxu0  ;;  %v15615_v40 = vld [vmem:[%s17242_s4 + $0x1330] ss:$40 sps:$4 sm:$0xff]  }
 0x411   : > { %v6098_v34 = vpop.f32.mrb[5].mxu1  ;;  %v14108_v37 = vadd.f32 %v5893_v33, %v1221_v20  ;;  %v5895_v38 = vpop.f32.mrb[6].mxu0  ;;  %6237 = vmatpush1.bf16.msra.mxu0 %v15567_v24  ;;  %v15620_v20 = vld [vmem:[%s17250_s6 + $0x1134] ss:$40 sps:$4 sm:$0xff]   ;;  %v15618_v24 = vld [vmem:[%s17250_s6 + $0x1130] ss:$40 sps:$4 sm:$0xff]  }
 0x412   : > { %v14110_v6 = vadd.f32 %v6098_v34, %v1229_v23  ;;  %v6100_v39 = vpop.f32.mrb[6].mxu1  ;;  %v6312_v22 = vmax.f32 %v14107_v28, 0.0  ;;  %v5896_v47 = vpop.f32.mrb[7].mxu0  ;;  %6238 = vmatprep.subr.bf16.mxu0 %v15575_v43  ;;  %v15623_v23 = vld [vmem:[%s17242_s4 + $0x1384] ss:$40 sps:$4 sm:$0xff]  }
 0x413   : > { %v6101_v31 = vpop.f32.mrb[7].mxu1  ;;  %v6313_v50 = vmax.f32 %v14108_v37, 0.0  ;;  %v15621_v43 = vld [vmem:[%s17242_s4 + $0x1380] ss:$40 sps:$4 sm:$0xff]   ;;  %v15629_v28 = vld [vmem:[%s17242_s4 + $0x13d4] ss:$40 sps:$4 sm:$0xff]  }
 0x414   : > { %v6315_v51 = vmax.f32 %v14110_v6, 0.0  ;;  %v18268_v44 = vpack.c.bf16 %v6312_v22, %v6312_v22  ;;  %v15626_v14 = vld [vmem:[%s17250_s6 + $0x1184] ss:$40 sps:$4 sm:$0xff]   ;;  %v15624_v33 = vld [vmem:[%s17250_s6 + $0x1180] ss:$40 sps:$4 sm:$0xff]  }
 0x415   : > { %v18264_v52 = vpack.c.bf16 %v6313_v50, %v6313_v50  ;;  %6239 = vmatpush1.bf16.msra.mxu0 %v15573_v32  ;;  %v15627_v34 = vld [vmem:[%s17242_s4 + $0x13d0] ss:$40 sps:$4 sm:$0xff]   ;;  %v15635_v6 = vld [vmem:[%s17242_s4 + $0x1424] ss:$40 sps:$4 sm:$0xff]   ;;  %v15633_v39 = vld [vmem:[%s17242_s4 + $0x1420] ss:$40 sps:$4 sm:$0xff]  }
 0x416   : > { %6240 = vmatprep.subr.bf16.mxu0 %v15581_v48  ;;  %v18273_v58 = vpack.c.bf16 %v6315_v51, %v6315_v51  ;;  %v15632_v37 = vld [vmem:[%s17250_s6 + $0x11d4] ss:$40 sps:$4 sm:$0xff]   ;;  %v15630_v38 = vld [vmem:[%s17250_s6 + $0x11d0] ss:$40 sps:$4 sm:$0xff]   ;;  %v15638_v32 = vld [vmem:[%s17250_s6 + $0x1224] ss:$40 sps:$4 sm:$0xff]  }
 0x417   : > { %11252 = vmatprep.mubr.bf16.mxu1 %v18264_v52  ;;  %v15641_v22 = vld [vmem:[%s17242_s4 + $0x1474] ss:$40 sps:$4 sm:$0xff]   ;;  %v15639_v31 = vld [vmem:[%s17242_s4 + $0x1470] ss:$40 sps:$4 sm:$0xff]   ;;  %v15647_v50 = vld [vmem:[%s17242_s4 + $0x14c4] ss:$40 sps:$4 sm:$0xff]  }
 0x418   : > { %11253 = vmatmul.mubr.bf16.vlgmr.msra.gmra.mrb[16].mxu1 %v18268_v44  ;;  %v15636_v47 = vld [vmem:[%s17250_s6 + $0x1220] ss:$40 sps:$4 sm:$0xff]   ;;  %v15644_v48 = vld [vmem:[%s17250_s6 + $0x1274] ss:$40 sps:$4 sm:$0xff]   ;;  %v15642_v51 = vld [vmem:[%s17250_s6 + $0x1270] ss:$40 sps:$4 sm:$0xff]  }
 0x419   : > { %11262 = vmatpush1.bf16.msra.mxu1 %v15576_v53  ;;  %6241 = vmatpush1.bf16.msra.mxu0 %v15579_v54  ;;  %v15650_v53 = vld [vmem:[%s17250_s6 + $0x12c4] ss:$40 sps:$4 sm:$0xff]   ;;  %v15653_v54 = vld [vmem:[%s17242_s4 + $0x1514] ss:$40 sps:$4 sm:$0xff]  }
 0x41a   : > { %11293 = vmatprep.mubr.bf16.mxu1 %v18273_v58  ;;  %11263 = vmatprep.subr.bf16.mxu1 %v15584_v55  ;;  %v15648_v55 = vld [vmem:[%s17250_s6 + $0x12c0] ss:$40 sps:$4 sm:$0xff]  }
 0x41b   : > { %6242 = vmatprep.subr.bf16.mxu0 %v15587_v57  ;;  %v15651_v57 = vld [vmem:[%s17242_s4 + $0x1510] ss:$40 sps:$4 sm:$0xff]  }
 0x41d   : > { %11264 = vmatpush1.bf16.msra.mxu1 %v15582_v59  ;;  %6243 = vmatpush1.bf16.msra.mxu0 %v15585_v60  ;;  %v15656_v59 = vld [vmem:[%s17250_s6 + $0x1314] ss:$40 sps:$4 sm:$0xff]   ;;  %v15659_v60 = vld [vmem:[%s17242_s4 + $0x1564] ss:$40 sps:$4 sm:$0xff]  }
 0x41e   : > { %11265 = vmatprep.subr.bf16.mxu1 %v15590_v61  ;;  %6244 = vmatprep.subr.bf16.mxu0 %v15593_v62  ;;  %v15654_v61 = vld [vmem:[%s17250_s6 + $0x1310] ss:$40 sps:$4 sm:$0xff]   ;;  %v15657_v62 = vld [vmem:[%s17242_s4 + $0x1560] ss:$40 sps:$4 sm:$0xff]  }
 0x421   : > { %11266 = vmatpush1.bf16.msra.mxu1 %v15588_v63  ;;  %6245 = vmatpush1.bf16.msra.mxu0 %v15591_v11  ;;  %v16708_v63 = vld [vmem:[%s17248_s17] sm:$0xff] }
 0x422   : > { %11267 = vmatprep.subr.bf16.mxu1 %v15596_v0  ;;  %6246 = vmatprep.subr.bf16.mxu0 %v15599_v1  ;;  %v15662_v0 = vld [vmem:[%s17250_s6 + $0x1364] ss:$40 sps:$4 sm:$0xff]   ;;  %v15665_v1 = vld [vmem:[%s17242_s4 + $0x15b4] ss:$40 sps:$4 sm:$0xff]  }
 0x425   : > { %11268 = vmatpush1.bf16.msra.mxu1 %v15594_v4  ;;  %6247 = vmatpush1.bf16.msra.mxu0 %v15597_v16  ;;  %v15660_v4 = vld [vmem:[%s17250_s6 + $0x1360] ss:$40 sps:$4 sm:$0xff]   ;;  %v15663_v16 = vld [vmem:[%s17242_s4 + $0x15b0] ss:$40 sps:$4 sm:$0xff]  }
 0x426   : > { %11269 = vmatprep.subr.bf16.mxu1 %v15602_v5  ;;  %6248 = vmatprep.subr.bf16.mxu0 %v15605_v7  ;;  %v15668_v7 = vld [vmem:[%s17250_s6 + $0x13b4] ss:$40 sps:$4 sm:$0xff]  }
 0x429   : > { %11270 = vmatpush1.bf16.msra.mxu1 %v15600_v8  ;;  %6249 = vmatpush1.bf16.msra.mxu0 %v15603_v9  ;;  %v15671_v8 = vld [vmem:[%s17242_s4 + $0x1604] ss:$40 sps:$4 sm:$0xff]  }
 0x42a   : > { %11271 = vmatprep.subr.bf16.mxu1 %v15608_v10  ;;  %6250 = vmatprep.subr.bf16.mxu0 %v15611_v12 }
 0x42d   : > { %11272 = vmatpush1.bf16.msra.mxu1 %v15606_v13  ;;  %6251 = vmatpush1.bf16.msra.mxu0 %v15609_v15  ;;  %v15666_v13 = vld [vmem:[%s17250_s6 + $0x13b0] ss:$40 sps:$4 sm:$0xff]   ;;  %v15669_v15 = vld [vmem:[%s17242_s4 + $0x1600] ss:$40 sps:$4 sm:$0xff]  }
 0x42e   : > { %11273 = vmatprep.subr.bf16.mxu1 %v15614_v17  ;;  %6252 = vmatprep.subr.bf16.mxu0 %v15617_v49  ;;  %v15674_v49 = vld [vmem:[%s17242_s4 + $0x1654] ss:$40 sps:$4 sm:$0xff]  }
 0x431   : > { %11274 = vmatpush1.bf16.msra.mxu1 %v15612_v19  ;;  %6253 = vmatpush1.bf16.msra.mxu0 %v15615_v40  ;;  %v15672_v19 = vld [vmem:[%s17242_s4 + $0x1650] ss:$40 sps:$4 sm:$0xff]  }
 0x432   : > { %11275 = vmatprep.subr.bf16.mxu1 %v15620_v20  ;;  %6254 = vmatprep.subr.bf16.mxu0 %v15623_v23  ;;  %v15677_v20 = vld [vmem:[%s17242_s4 + $0x16a4] ss:$40 sps:$4 sm:$0xff]   ;;  %v15675_v23 = vld [vmem:[%s17242_s4 + $0x16a0] ss:$40 sps:$4 sm:$0xff]  }
 0x435   : > { %11276 = vmatpush1.bf16.msra.mxu1 %v15618_v24  ;;  %6255 = vmatpush1.bf16.msra.mxu0 %v15621_v43  ;;  %v15680_v24 = vld [vmem:[%s17242_s4 + $0x16f4] ss:$40 sps:$4 sm:$0xff]   ;;  %v15678_v43 = vld [vmem:[%s17242_s4 + $0x16f0] ss:$40 sps:$4 sm:$0xff]  }
 0x436   : > { %11277 = vmatprep.subr.bf16.mxu1 %v15626_v14  ;;  %6256 = vmatprep.subr.bf16.mxu0 %v15629_v28  ;;  %v15683_v14 = vld [vmem:[%s17242_s4 + $0x1744] ss:$40 sps:$4 sm:$0xff]   ;;  %v15681_v28 = vld [vmem:[%s17242_s4 + $0x1740] ss:$40 sps:$4 sm:$0xff]  }
 0x439   : > { %11278 = vmatpush1.bf16.msra.mxu1 %v15624_v33  ;;  %6257 = vmatpush1.bf16.msra.mxu0 %v15627_v34  ;;  %v15686_v33 = vld [vmem:[%s17242_s4 + $0x1794] ss:$40 sps:$4 sm:$0xff]   ;;  %v15684_v34 = vld [vmem:[%s17242_s4 + $0x1790] ss:$40 sps:$4 sm:$0xff]  }
 0x43a   : > { %11279 = vmatprep.subr.bf16.mxu1 %v15632_v37  ;;  %6267 = vmatprep.subr.bf16.mxu0 %v15635_v6  ;;  %v15689_v37 = vld [vmem:[%s17242_s4 + $0x17e4] ss:$40 sps:$4 sm:$0xff]   ;;  %v15687_v6 = vld [vmem:[%s17242_s4 + $0x17e0] ss:$40 sps:$4 sm:$0xff]  }
 0x43c   : > { %6259 = vmatmul.mubr.bf16.vlgmr.msra.gmra.mrb[8].mxu0 %v17566_v30  ;;  %v15645_v30 = vld [vmem:[%s17242_s4 + $0x14c0] ss:$40 sps:$4 sm:$0xff]  }
 0x43d   : > { %11280 = vmatpush1.bf16.msra.mxu1 %v15630_v38  ;;  %6268 = vmatpush1.bf16.msra.mxu0 %v15633_v39  ;;  %v15692_v38 = vld [vmem:[%s17242_s4 + $0x1834] ss:$40 sps:$4 sm:$0xff]   ;;  %v15690_v39 = vld [vmem:[%s17242_s4 + $0x1830] ss:$40 sps:$4 sm:$0xff]  }
 0x43e   : > { %11281 = vmatprep.subr.bf16.mxu1 %v15638_v32  ;;  %6269 = vmatprep.subr.bf16.mxu0 %v15641_v22  ;;  %v15695_v32 = vld [vmem:[%s17242_s4 + $0x1884] ss:$40 sps:$4 sm:$0xff]   ;;  %v15693_v22 = vld [vmem:[%s17242_s4 + $0x1880] ss:$40 sps:$4 sm:$0xff]  }
 0x43f   : > { %6299 = vmatprep.mubr.bf16.mxu0 %v17575_v36  ;;  %v1224_v36 = vsub.s32 6, %v17977_v35 }
 0x441   : > { %11282 = vmatpush1.bf16.msra.mxu1 %v15636_v47  ;;  %6270 = vmatpush1.bf16.msra.mxu0 %v15639_v31  ;;  %v1225_v11 = vrot.slane %v16708_v63, %v1224_v36  ;;  %v15698_v47 = vld [vmem:[%s17242_s4 + $0x18d4] ss:$40 sps:$4 sm:$0xff]   ;;  %v15696_v31 = vld [vmem:[%s17242_s4 + $0x18d0] ss:$40 sps:$4 sm:$0xff]  }
 0x442   : > { %11283 = vmatprep.subr.bf16.mxu1 %v15644_v48  ;;  %6271 = vmatprep.subr.bf16.mxu0 %v15647_v50  ;;  %v15701_v48 = vld [vmem:[%s17250_s6 + $0xc] ss:$40 sps:$4 sm:$0xff]   ;;  %v15699_v50 = vld [vmem:[%s17250_s6 + $0x8] ss:$40 sps:$4 sm:$0xff]   ;;  %v15708_v63 = vld [vmem:[%s17250_s6 + $0xf8] ss:$40 sps:$4 sm:$0xff]  }
 0x443   : > { %v14109_v5 = vadd.f32 %v18260_v46, %v1225_v11  ;;  %v15815_v11 = vld [vmem:[%s17250_s6 + $0x14f4] ss:$40 sps:$4 sm:$0xff]  }
 0x445   : > { %11284 = vmatpush1.bf16.msra.mxu1 %v15642_v51  ;;  %6272 = vmatpush1.bf16.msra.mxu0 %v15645_v30  ;;  %v6314_v17 = vmax.f32 %v14109_v5, 0.0  ;;  %v15704_v51 = vld [vmem:[%s17250_s6 + $0x5c] ss:$40 sps:$4 sm:$0xff]   ;;  %v15795_v30 = vld [vmem:[%s17250_s6 + $0x1400] ss:$40 sps:$4 sm:$0xff]  }
 0x446   : > { %11285 = vmatprep.subr.bf16.mxu1 %v15650_v53  ;;  %6273 = vmatprep.subr.bf16.mxu0 %v15653_v54  ;;  %v15797_v53 = vld [vmem:[%s17250_s6 + $0x1404] ss:$40 sps:$4 sm:$0xff]   ;;  %v15702_v54 = vld [vmem:[%s17250_s6 + $0x58] ss:$40 sps:$4 sm:$0xff]  }
 0x447   : > { %v18348_v40 = vpack.c.bf16 %v6314_v17, %v6314_v17  ;;  %v15716_v5 = vld [vmem:[%s17250_s6 + $0x19c] ss:$40 sps:$4 sm:$0xff]  }
 0x449   : > { %11286 = vmatpush1.bf16.msra.mxu1 %v15648_v55  ;;  %6274 = vmatpush1.bf16.msra.mxu0 %v15651_v57  ;;  %v15803_v55 = vld [vmem:[%s17250_s6 + $0x1454] ss:$40 sps:$4 sm:$0xff]  }
 0x44a   : > { %11287 = vmatprep.subr.bf16.mxu1 %v15656_v59  ;;  %6275 = vmatprep.subr.bf16.mxu0 %v15659_v60  ;;  %v15707_v57 = vld [vmem:[%s17250_s6 + $0xac] ss:$40 sps:$4 sm:$0xff]   ;;  %v15801_v59 = vld [vmem:[%s17250_s6 + $0x1450] ss:$40 sps:$4 sm:$0xff]  }
 0x44b   : > { %v15809_v60 = vld [vmem:[%s17250_s6 + $0x14a4] ss:$40 sps:$4 sm:$0xff]  }
 0x44d   : > { %11288 = vmatpush1.bf16.msra.mxu1 %v15654_v61  ;;  %6276 = vmatpush1.bf16.msra.mxu0 %v15657_v62  ;;  %v15710_v61 = vld [vmem:[%s17250_s6 + $0xfc] ss:$40 sps:$4 sm:$0xff]   ;;  %v15807_v62 = vld [vmem:[%s17250_s6 + $0x14a0] ss:$40 sps:$4 sm:$0xff]  }
 0x44e   : > { %11289 = vmatprep.subr.bf16.mxu1 %v15662_v0  ;;  %6277 = vmatprep.subr.bf16.mxu0 %v15665_v1  ;;  %v15713_v0 = vld [vmem:[%s17250_s6 + $0x14c] ss:$40 sps:$4 sm:$0xff]   ;;  %v15813_v1 = vld [vmem:[%s17250_s6 + $0x14f0] ss:$40 sps:$4 sm:$0xff]  }
 0x450   : > { %v18340_v9 = vpop.f32.mrb[8].mxu1 }
 0x451   : > { %v18342_v10 = vpop.f32.mrb[9].mxu1  ;;  %11290 = vmatpush1.bf16.msra.mxu1 %v15660_v4  ;;  %6278 = vmatpush1.bf16.msra.mxu0 %v15663_v16  ;;  %v15711_v4 = vld [vmem:[%s17250_s6 + $0x148] ss:$40 sps:$4 sm:$0xff]   ;;  %v15821_v16 = vld [vmem:[%s17250_s6 + $0x1544] ss:$40 sps:$4 sm:$0xff]  }
 0x452   : > { %v11176_v12 = vpop.f32.mrb[10].mxu1  ;;  %11291 = vmatprep.subr.bf16.mxu1 %v15668_v7  ;;  %6279 = vmatprep.subr.bf16.mxu0 %v15671_v8  ;;  %v15819_v7 = vld [vmem:[%s17250_s6 + $0x1540] ss:$40 sps:$4 sm:$0xff]  }
 0x453   : > { %v11177_v46 = vpop.f32.mrb[11].mxu1  ;;  %v15714_v8 = vld [vmem:[%s17250_s6 + $0x198] ss:$40 sps:$4 sm:$0xff]   ;;  %v15719_v12 = vld [vmem:[%s17250_s6 + $0x1ec] ss:$40 sps:$4 sm:$0xff]  }
 0x455   : > { %11292 = vmatpush1.bf16.msra.mxu1 %v15666_v13  ;;  %6280 = vmatpush1.bf16.msra.mxu0 %v15669_v15 }
 0x456   : > { %6281 = vmatprep.subr.bf16.mxu0 %v15674_v49  ;;  %11302 = vmatprep.subr.bf16.mxu1 %v15797_v53  ;;  %v15837_v53 = vld [vmem:[%s17250_s6 + $0x1630] ss:$40 sps:$4 sm:$0xff]  }
 0x458   : > { %11294 = vmatmul.mubr.bf16.vlgmr.msra.gmra.mrb[20].mxu1 %v18348_v40 }
 0x459   : > { %6282 = vmatpush1.bf16.msra.mxu0 %v15672_v19  ;;  %11303 = vmatpush1.bf16.msra.mxu1 %v15795_v30  ;;  %v15717_v19 = vld [vmem:[%s17250_s6 + $0x1e8] ss:$40 sps:$4 sm:$0xff]  }
 0x45a   : > { %6283 = vmatprep.subr.bf16.mxu0 %v15677_v20  ;;  %11304 = vmatprep.subr.bf16.mxu1 %v15803_v55  ;;  %v15741_v30 = vld [vmem:[%s17250_s6 + $0x468] ss:$40 sps:$4 sm:$0xff]   ;;  %v15845_v55 = vld [vmem:[%s17250_s6 + $0x1684] ss:$40 sps:$4 sm:$0xff]  }
 0x45d   : > { %6284 = vmatpush1.bf16.msra.mxu0 %v15675_v23  ;;  %11305 = vmatpush1.bf16.msra.mxu1 %v15801_v59  ;;  %v15722_v23 = vld [vmem:[%s17250_s6 + $0x23c] ss:$40 sps:$4 sm:$0xff]   ;;  %v15843_v59 = vld [vmem:[%s17250_s6 + $0x1680] ss:$40 sps:$4 sm:$0xff]  }
 0x45e   : > { %6285 = vmatprep.subr.bf16.mxu0 %v15680_v24  ;;  %11306 = vmatprep.subr.bf16.mxu1 %v15809_v60  ;;  %v15720_v24 = vld [vmem:[%s17250_s6 + $0x238] ss:$40 sps:$4 sm:$0xff]   ;;  %v15851_v60 = vld [vmem:[%s17250_s6 + $0x16d4] ss:$40 sps:$4 sm:$0xff]  }
 0x461   : > { %6286 = vmatpush1.bf16.msra.mxu0 %v15678_v43  ;;  %11307 = vmatpush1.bf16.msra.mxu1 %v15807_v62  ;;  %v15723_v43 = vld [vmem:[%s17250_s6 + $0x288] ss:$40 sps:$4 sm:$0xff]   ;;  %v15752_v62 = vld [vmem:[%s17250_s6 + $0xa5c] ss:$40 sps:$4 sm:$0xff]  }
 0x462   : > { %6287 = vmatprep.subr.bf16.mxu0 %v15683_v14  ;;  %11308 = vmatprep.subr.bf16.mxu1 %v15815_v11  ;;  %v15726_v14 = vld [vmem:[%s17250_s6 + $0x2d8] ss:$40 sps:$4 sm:$0xff]   ;;  %v15857_v11 = vld [vmem:[%s17250_s6 + $0x1724] ss:$40 sps:$4 sm:$0xff]  }
 0x465   : > { %6288 = vmatpush1.bf16.msra.mxu0 %v15681_v28  ;;  %11309 = vmatpush1.bf16.msra.mxu1 %v15813_v1  ;;  %v15731_v28 = vld [vmem:[%s17250_s6 + $0x32c] ss:$40 sps:$4 sm:$0xff]  }
 0x466   : > { %6289 = vmatprep.subr.bf16.mxu0 %v15686_v33  ;;  %11310 = vmatprep.subr.bf16.mxu1 %v15821_v16  ;;  %v15729_v33 = vld [vmem:[%s17250_s6 + $0x328] ss:$40 sps:$4 sm:$0xff]   ;;  %v15755_v1 = vld [vmem:[%s17250_s6 + $0xaac] ss:$40 sps:$4 sm:$0xff]  }
 0x467   : > { %v15863_v16 = vld [vmem:[%s17250_s6 + $0x1774] ss:$40 sps:$4 sm:$0xff]  }
 0x469   : > { %6290 = vmatpush1.bf16.msra.mxu0 %v15684_v34  ;;  %11311 = vmatpush1.bf16.msra.mxu1 %v15819_v7  ;;  %v15734_v34 = vld [vmem:[%s17250_s6 + $0x37c] ss:$40 sps:$4 sm:$0xff]  }
 0x46a   : > { %6291 = vmatprep.subr.bf16.mxu0 %v15689_v37  ;;  %v15732_v37 = vld [vmem:[%s17250_s6 + $0x378] ss:$40 sps:$4 sm:$0xff]   ;;  %v15758_v7 = vld [vmem:[%s17250_s6 + $0xafc] ss:$40 sps:$4 sm:$0xff]  }
 0x46d   : > { %6292 = vmatpush1.bf16.msra.mxu0 %v15687_v6  ;;  %v15737_v6 = vld [vmem:[%s17250_s6 + $0x3cc] ss:$40 sps:$4 sm:$0xff]  }
 0x46e   : > { %6293 = vmatprep.subr.bf16.mxu0 %v15692_v38  ;;  %v15735_v38 = vld [vmem:[%s17250_s6 + $0x3c8] ss:$40 sps:$4 sm:$0xff]  }
 0x471   : > { %6294 = vmatpush1.bf16.msra.mxu0 %v15690_v39  ;;  %v15740_v39 = vld [vmem:[%s17250_s6 + $0x41c] ss:$40 sps:$4 sm:$0xff]  }
 0x472   : > { %6295 = vmatprep.subr.bf16.mxu0 %v15695_v32  ;;  %v15827_v32 = vld [vmem:[%s17250_s6 + $0x1594] ss:$40 sps:$4 sm:$0xff]  }
 0x473   : > { %11312 = vmatprep.subr.bf16.mxu1 %v15827_v32  ;;  %v15771_v32 = vld [vmem:[%s17250_s6 + $0xc88] ss:$40 sps:$4 sm:$0xff]  }
 0x475   : > { %6296 = vmatpush1.bf16.msra.mxu0 %v15693_v22  ;;  %v15825_v22 = vld [vmem:[%s17250_s6 + $0x1590] ss:$40 sps:$4 sm:$0xff]  }
 0x476   : > { %6297 = vmatprep.subr.bf16.mxu0 %v15698_v47  ;;  %v15738_v47 = vld [vmem:[%s17250_s6 + $0x418] ss:$40 sps:$4 sm:$0xff]   ;;  %11313 = vmatpush1.bf16.msra.mxu1 %v15825_v22  ;;  %v15776_v22 = vld [vmem:[%s17250_s6 + $0xcdc] ss:$40 sps:$4 sm:$0xff]  }
 0x479   : > { %6298 = vmatpush1.bf16.msra.mxu0 %v15696_v31  ;;  %v15743_v31 = vld [vmem:[%s17250_s6 + $0x46c] ss:$40 sps:$4 sm:$0xff]  }
 0x47a   : > { %11343 = vmatprep.subr.bf16.mxu0 %v15701_v48  ;;  %v15831_v48 = vld [vmem:[%s17250_s6 + $0x15e0] ss:$40 sps:$4 sm:$0xff]  }
 0x47c   : > { %6300 = vmatmul.mubr.bf16.vlgmr.msra.gmra.mrb[8].mxu0 %v17643_v42  ;;  %v15705_v42 = vld [vmem:[%s17250_s6 + $0xa8] ss:$40 sps:$4 sm:$0xff]  }
 0x47d   : > { %11344 = vmatpush1.bf16.msra.mxu0 %v15699_v50  ;;  %11375 = vmatprep.mubr.bf16.mxu0 %v18010_v3  ;;  %v15833_v50 = vld [vmem:[%s17250_s6 + $0x15e4] ss:$40 sps:$4 sm:$0xff]  }
 0x47e   : > { %11345 = vmatprep.subr.bf16.mxu0 %v15704_v51  ;;  %v15839_v51 = vld [vmem:[%s17250_s6 + $0x1634] ss:$40 sps:$4 sm:$0xff]   ;;  %11314 = vmatprep.subr.bf16.mxu1 %v15833_v50 }
 0x47f   : > { %11315 = vmatpush1.bf16.msra.mxu1 %v15831_v48  ;;  %v15777_v48 = vld [vmem:[%s17250_s6 + $0xd28] ss:$40 sps:$4 sm:$0xff]   ;;  %v15782_v50 = vld [vmem:[%s17250_s6 + $0xd7c] ss:$40 sps:$4 sm:$0xff]  }
 0x480   : > { %11316 = vmatprep.subr.bf16.mxu1 %v15839_v51  ;;  %v15780_v51 = vld [vmem:[%s17250_s6 + $0xd78] ss:$40 sps:$4 sm:$0xff]  }
 0x481   : > { %11346 = vmatpush1.bf16.msra.mxu0 %v15702_v54  ;;  %v15746_v54 = vld [vmem:[%s17250_s6 + $0x4bc] ss:$40 sps:$4 sm:$0xff]  }
 0x482   : > { %11347 = vmatprep.subr.bf16.mxu0 %v15707_v57  ;;  %v15744_v57 = vld [vmem:[%s17250_s6 + $0x4b8] ss:$40 sps:$4 sm:$0xff]  }
 0x483   : > { %11317 = vmatpush1.bf16.msra.mxu1 %v15837_v53  ;;  %v15783_v53 = vld [vmem:[%s17250_s6 + $0xdc8] ss:$40 sps:$4 sm:$0xff]  }
 0x484   : > { %11318 = vmatprep.subr.bf16.mxu1 %v15845_v55 }
 0x485   : > { %11348 = vmatpush1.bf16.msra.mxu0 %v15705_v42  ;;  %v15749_v42 = vld [vmem:[%s17250_s6 + $0xa0c] ss:$40 sps:$4 sm:$0xff]  }
 0x486   : > { %11349 = vmatprep.subr.bf16.mxu0 %v15710_v61  ;;  %v15747_v61 = vld [vmem:[%s17250_s6 + $0xa08] ss:$40 sps:$4 sm:$0xff]  }
 0x487   : > { %11319 = vmatpush1.bf16.msra.mxu1 %v15843_v59 }
 0x488   : > { %11320 = vmatprep.subr.bf16.mxu1 %v15851_v60 }
 0x489   : > { %11350 = vmatpush1.bf16.msra.mxu0 %v15708_v63  ;;  %v15849_v63 = vld [vmem:[%s17250_s6 + $0x16d0] ss:$40 sps:$4 sm:$0xff]  }
 0x48a   : > { %11351 = vmatprep.subr.bf16.mxu0 %v15713_v0  ;;  %v15750_v0 = vld [vmem:[%s17250_s6 + $0xa58] ss:$40 sps:$4 sm:$0xff]  }
 0x48b   : > { %11321 = vmatpush1.bf16.msra.mxu1 %v15849_v63  ;;  %v15791_v63 = vld [vmem:[%s17250_s6 + $0xe6c] ss:$40 sps:$4 sm:$0xff]  }
 0x48c   : > { %11322 = vmatprep.subr.bf16.mxu1 %v15857_v11  ;;  %v15789_v11 = vld [vmem:[%s17250_s6 + $0xe68] ss:$40 sps:$4 sm:$0xff]  }
 0x48d   : > { %11352 = vmatpush1.bf16.msra.mxu0 %v15711_v4  ;;  %v15855_v4 = vld [vmem:[%s17250_s6 + $0x1720] ss:$40 sps:$4 sm:$0xff]  }
 0x48e   : > { %11353 = vmatprep.subr.bf16.mxu0 %v15716_v5  ;;  %v15753_v5 = vld [vmem:[%s17250_s6 + $0xaa8] ss:$40 sps:$4 sm:$0xff]  }
 0x48f   : > { %11323 = vmatpush1.bf16.msra.mxu1 %v15855_v4  ;;  %v15806_v4 = vld [vmem:[%s17250_s6 + $0x145c] ss:$40 sps:$4 sm:$0xff]  }
 0x490   : > { %v11213_v13 = vpop.f32.mrb[12].mxu1  ;;  %11324 = vmatprep.subr.bf16.mxu1 %v15863_v16  ;;  %v15804_v16 = vld [vmem:[%s17250_s6 + $0x1458] ss:$40 sps:$4 sm:$0xff]  }
 0x491   : > { %v18393_v15 = vadd.f32 %v11213_v13, %v18340_v9  ;;  %v11215_v17 = vpop.f32.mrb[13].mxu1  ;;  %11354 = vmatpush1.bf16.msra.mxu0 %v15714_v8  ;;  %v15725_v9 = vld [vmem:[%s17250_s6 + $0x28c] ss:$40 sps:$4 sm:$0xff]   ;;  %v15861_v8 = vld [vmem:[%s17250_s6 + $0x1770] ss:$40 sps:$4 sm:$0xff]  }
 0x492   : > { %v18396_v46 = vadd.f32 %v11215_v17, %v18342_v10  ;;  %v11217_v49 = vpop.f32.mrb[14].mxu1  ;;  %11355 = vmatprep.subr.bf16.mxu0 %v15719_v12  ;;  %v15728_v10 = vld [vmem:[%s17250_s6 + $0x2dc] ss:$40 sps:$4 sm:$0xff]   ;;  %v15756_v13 = vld [vmem:[%s17250_s6 + $0xaf8] ss:$40 sps:$4 sm:$0xff]  }
 0x493   : > { %v11218_v20 = vpop.f32.mrb[15].mxu1  ;;  %v15869_v12 = vld [vmem:[%s17250_s6 + $0x17c4] ss:$40 sps:$4 sm:$0xff]   ;;  %11325 = vmatpush1.bf16.msra.mxu1 %v15861_v8  ;;  %v15867_v49 = vld [vmem:[%s17250_s6 + $0x17c0] ss:$40 sps:$4 sm:$0xff]  }
 0x494   : > { %v15761_v17 = vld [vmem:[%s17250_s6 + $0xb4c] ss:$40 sps:$4 sm:$0xff]   ;;  %11326 = vmatprep.subr.bf16.mxu1 %v15869_v12  ;;  %v15759_v20 = vld [vmem:[%s17250_s6 + $0xb48] ss:$40 sps:$4 sm:$0xff]   ;;  %v15818_v8 = vld [vmem:[%s17250_s6 + $0x14fc] ss:$40 sps:$4 sm:$0xff]  }
 0x495   : > { %11356 = vmatpush1.bf16.msra.mxu0 %v15717_v19  ;;  %v15875_v19 = vld [vmem:[%s17250_s6 + $0x1814] ss:$40 sps:$4 sm:$0xff]   ;;  %v15816_v12 = vld [vmem:[%s17250_s6 + $0x14f8] ss:$40 sps:$4 sm:$0xff]  }
 0x496   : > { %11357 = vmatprep.subr.bf16.mxu0 %v15722_v23  ;;  %v15764_v23 = vld [vmem:[%s17250_s6 + $0xb9c] ss:$40 sps:$4 sm:$0xff]  }
 0x497   : > { %11327 = vmatpush1.bf16.msra.mxu1 %v15867_v49  ;;  %v15830_v49 = vld [vmem:[%s17250_s6 + $0x159c] ss:$40 sps:$4 sm:$0xff]  }
 0x498   : > { %11328 = vmatprep.subr.bf16.mxu1 %v15875_v19  ;;  %v15828_v19 = vld [vmem:[%s17250_s6 + $0x1598] ss:$40 sps:$4 sm:$0xff]  }
 0x499   : > { %11358 = vmatpush1.bf16.msra.mxu0 %v15720_v24  ;;  %v15873_v24 = vld [vmem:[%s17250_s6 + $0x1810] ss:$40 sps:$4 sm:$0xff]  }
 0x49a   : > { %11359 = vmatprep.subr.bf16.mxu0 %v15725_v9  ;;  %v15762_v9 = vld [vmem:[%s17250_s6 + $0xb98] ss:$40 sps:$4 sm:$0xff]  }
 0x49b   : > { %11329 = vmatpush1.bf16.msra.mxu1 %v15873_v24  ;;  %v15842_v24 = vld [vmem:[%s17250_s6 + $0x163c] ss:$40 sps:$4 sm:$0xff]  }
 0x49d   : > { %11360 = vmatpush1.bf16.msra.mxu0 %v15723_v43  ;;  %v15767_v43 = vld [vmem:[%s17250_s6 + $0xbec] ss:$40 sps:$4 sm:$0xff]  }
 0x49e   : > { %11361 = vmatprep.subr.bf16.mxu0 %v15728_v10  ;;  %v15881_v10 = vld [vmem:[%s17250_s6 + $0x1864] ss:$40 sps:$4 sm:$0xff]  }
 0x49f   : > { %11330 = vmatprep.subr.bf16.mxu1 %v15881_v10  ;;  %v15846_v10 = vld [vmem:[%s17250_s6 + $0x1688] ss:$40 sps:$4 sm:$0xff]  }
 0x4a1   : > { %11362 = vmatpush1.bf16.msra.mxu0 %v15726_v14  ;;  %v15879_v14 = vld [vmem:[%s17250_s6 + $0x1860] ss:$40 sps:$4 sm:$0xff]  }
 0x4a2   : > { %11363 = vmatprep.subr.bf16.mxu0 %v15731_v28  ;;  %v15765_v28 = vld [vmem:[%s17250_s6 + $0xbe8] ss:$40 sps:$4 sm:$0xff]   ;;  %11331 = vmatpush1.bf16.msra.mxu1 %v15879_v14  ;;  %v15854_v14 = vld [vmem:[%s17250_s6 + $0x16dc] ss:$40 sps:$4 sm:$0xff]  }
 0x4a5   : > { %11364 = vmatpush1.bf16.msra.mxu0 %v15729_v33  ;;  %v15770_v33 = vld [vmem:[%s17250_s6 + $0xc3c] ss:$40 sps:$4 sm:$0xff]  }
 0x4a6   : > { %11365 = vmatprep.subr.bf16.mxu0 %v15734_v34  ;;  %v15887_v34 = vld [vmem:[%s17250_s6 + $0x18b4] ss:$40 sps:$4 sm:$0xff]  }
 0x4a7   : > { %11332 = vmatprep.subr.bf16.mxu1 %v15887_v34  ;;  %v15858_v34 = vld [vmem:[%s17250_s6 + $0x1728] ss:$40 sps:$4 sm:$0xff]  }
 0x4a9   : > { %11366 = vmatpush1.bf16.msra.mxu0 %v15732_v37  ;;  %v15885_v37 = vld [vmem:[%s17250_s6 + $0x18b0] ss:$40 sps:$4 sm:$0xff]  }
 0x4aa   : > { %11367 = vmatprep.subr.bf16.mxu0 %v15737_v6  ;;  %v15768_v6 = vld [vmem:[%s17250_s6 + $0xc38] ss:$40 sps:$4 sm:$0xff]   ;;  %11333 = vmatpush1.bf16.msra.mxu1 %v15885_v37  ;;  %v15866_v37 = vld [vmem:[%s17250_s6 + $0x177c] ss:$40 sps:$4 sm:$0xff]  }
 0x4ad   : > { %11368 = vmatpush1.bf16.msra.mxu0 %v15735_v38  ;;  %v15773_v38 = vld [vmem:[%s17250_s6 + $0xc8c] ss:$40 sps:$4 sm:$0xff]  }
 0x4ae   : > { %11369 = vmatprep.subr.bf16.mxu0 %v15740_v39  ;;  %v15893_v39 = vld [vmem:[%s17250_s6 + $0x50c] ss:$40 sps:$4 sm:$0xff]  }
 0x4af   : > { %11384 = vmatprep.subr.bf16.mxu1 %v15893_v39  ;;  %v15870_v39 = vld [vmem:[%s17250_s6 + $0x17c8] ss:$40 sps:$4 sm:$0xff]  }
 0x4b1   : > { %11370 = vmatpush1.bf16.msra.mxu0 %v15738_v47  ;;  %v15774_v47 = vld [vmem:[%s17250_s6 + $0xcd8] ss:$40 sps:$4 sm:$0xff]  }
 0x4b2   : > { %11371 = vmatprep.subr.bf16.mxu0 %v15743_v31  ;;  %v15779_v31 = vld [vmem:[%s17250_s6 + $0xd2c] ss:$40 sps:$4 sm:$0xff]  }
 0x4b5   : > { %11372 = vmatpush1.bf16.msra.mxu0 %v15741_v30  ;;  %v15785_v30 = vld [vmem:[%s17250_s6 + $0xdcc] ss:$40 sps:$4 sm:$0xff]  }
 0x4b6   : > { %11373 = vmatprep.subr.bf16.mxu0 %v15746_v54  ;;  %v15788_v54 = vld [vmem:[%s17250_s6 + $0xe1c] ss:$40 sps:$4 sm:$0xff]  }
 0x4b9   : > { %11374 = vmatpush1.bf16.msra.mxu0 %v15744_v57 }
 0x4ba   : > { %11425 = vmatprep.subr.bf16.mxu0 %v15749_v42 }
 0x4bc   : > { %11376 = vmatmul.mubr.bf16.vlgmr.msra.gmra.mrb[12].mxu0 %v18088_v27 }
 0x4bd   : > { %11426 = vmatpush1.bf16.msra.mxu0 %v15747_v61  ;;  %11457 = vmatprep.mubr.bf16.mxu0 %v18264_v52  ;;  %v15786_v61 = vld [vmem:[%s17250_s6 + $0xe18] ss:$40 sps:$4 sm:$0xff]  }
 0x4be   : > { %11427 = vmatprep.subr.bf16.mxu0 %v15752_v62 }
 0x4c1   : > { %11428 = vmatpush1.bf16.msra.mxu0 %v15750_v0  ;;  %v15792_v0 = vld [vmem:[%s17250_s6 + $0xeb8] ss:$40 sps:$4 sm:$0xff]  }
 0x4c2   : > { %11429 = vmatprep.subr.bf16.mxu0 %v15755_v1  ;;  %v15798_v1 = vld [vmem:[%s17250_s6 + $0x1408] ss:$40 sps:$4 sm:$0xff]  }
 0x4c5   : > { %11430 = vmatpush1.bf16.msra.mxu0 %v15753_v5  ;;  %v15812_v5 = vld [vmem:[%s17250_s6 + $0x14ac] ss:$40 sps:$4 sm:$0xff]  }
 0x4c6   : > { %11431 = vmatprep.subr.bf16.mxu0 %v15758_v7  ;;  %v15810_v7 = vld [vmem:[%s17250_s6 + $0x14a8] ss:$40 sps:$4 sm:$0xff]  }
 0x4c9   : > { %11432 = vmatpush1.bf16.msra.mxu0 %v15756_v13  ;;  %v15824_v13 = vld [vmem:[%s17250_s6 + $0x154c] ss:$40 sps:$4 sm:$0xff]  }
 0x4ca   : > { %11433 = vmatprep.subr.bf16.mxu0 %v15761_v17  ;;  %v15822_v17 = vld [vmem:[%s17250_s6 + $0x1548] ss:$40 sps:$4 sm:$0xff]  }
 0x4cd   : > { %11434 = vmatpush1.bf16.msra.mxu0 %v15759_v20  ;;  %v15836_v20 = vld [vmem:[%s17250_s6 + $0x15ec] ss:$40 sps:$4 sm:$0xff]  }
 0x4ce   : > { %11435 = vmatprep.subr.bf16.mxu0 %v15764_v23  ;;  %v15834_v23 = vld [vmem:[%s17250_s6 + $0x15e8] ss:$40 sps:$4 sm:$0xff]  }
 0x4d1   : > { %11436 = vmatpush1.bf16.msra.mxu0 %v15762_v9  ;;  %v15840_v9 = vld [vmem:[%s17250_s6 + $0x1638] ss:$40 sps:$4 sm:$0xff]  }
 0x4d2   : > { %11437 = vmatprep.subr.bf16.mxu0 %v15767_v43  ;;  %v15848_v43 = vld [vmem:[%s17250_s6 + $0x168c] ss:$40 sps:$4 sm:$0xff]  }
 0x4d5   : > { %11438 = vmatpush1.bf16.msra.mxu0 %v15765_v28  ;;  %v15852_v28 = vld [vmem:[%s17250_s6 + $0x16d8] ss:$40 sps:$4 sm:$0xff]  }
 0x4d6   : > { %11439 = vmatprep.subr.bf16.mxu0 %v15770_v33  ;;  %v15860_v33 = vld [vmem:[%s17250_s6 + $0x172c] ss:$40 sps:$4 sm:$0xff]  }
 0x4d9   : > { %11440 = vmatpush1.bf16.msra.mxu0 %v15768_v6  ;;  %v15864_v6 = vld [vmem:[%s17250_s6 + $0x1778] ss:$40 sps:$4 sm:$0xff]  }
 0x4da   : > { %11441 = vmatprep.subr.bf16.mxu0 %v15773_v38  ;;  %v15872_v38 = vld [vmem:[%s17250_s6 + $0x17cc] ss:$40 sps:$4 sm:$0xff]  }
 0x4dd   : > { %11442 = vmatpush1.bf16.msra.mxu0 %v15771_v32  ;;  %v15878_v32 = vld [vmem:[%s17250_s6 + $0x181c] ss:$40 sps:$4 sm:$0xff]  }
 0x4de   : > { %11443 = vmatprep.subr.bf16.mxu0 %v15776_v22 }
 0x4e1   : > { %11444 = vmatpush1.bf16.msra.mxu0 %v15774_v47 }
 0x4e2   : > { %11445 = vmatprep.subr.bf16.mxu0 %v15779_v31 }
 0x4e5   : > { %11446 = vmatpush1.bf16.msra.mxu0 %v15777_v48 }
 0x4e6   : > { %11447 = vmatprep.subr.bf16.mxu0 %v15782_v50 }
 0x4e9   : > { %11448 = vmatpush1.bf16.msra.mxu0 %v15780_v51  ;;  %v15876_v51 = vld [vmem:[%s17250_s6 + $0x1818] ss:$40 sps:$4 sm:$0xff]  }
 0x4ea   : > { %11449 = vmatprep.subr.bf16.mxu0 %v15785_v30 }
 0x4eb   : > { %v11254_v55 = vpop.f32.mrb[16].mxu1 }
 0x4ec   : > { %v18470_v57 = vadd.f32 %v11254_v55, %v18393_v15  ;;  %v11256_v59 = vpop.f32.mrb[17].mxu1  ;;  %v15794_v15 = vld [vmem:[%s17250_s6 + $0xebc] ss:$40 sps:$4 sm:$0xff]  }
 0x4ed   : > { %v18473_v42 = vadd.f32 %v11256_v59, %v18396_v46  ;;  %v11258_v60 = vpop.f32.mrb[18].mxu1  ;;  %11450 = vmatpush1.bf16.msra.mxu0 %v15783_v53  ;;  %v15800_v46 = vld [vmem:[%s17250_s6 + $0x140c] ss:$40 sps:$4 sm:$0xff]   ;;  %v15890_v55 = vld [vmem:[%s17250_s6 + $0x18bc] ss:$40 sps:$4 sm:$0xff]  }
 0x4ee   : > { %v11259_v62 = vpop.f32.mrb[19].mxu1  ;;  %11451 = vmatprep.subr.bf16.mxu0 %v15788_v54  ;;  %v15884_v53 = vld [vmem:[%s17250_s6 + $0x186c] ss:$40 sps:$4 sm:$0xff]   ;;  %v15882_v54 = vld [vmem:[%s17250_s6 + $0x1868] ss:$40 sps:$4 sm:$0xff]  }
 0x4ef   : > { %v15888_v59 = vld [vmem:[%s17250_s6 + $0x18b8] ss:$40 sps:$4 sm:$0xff]  }
 0x4f1   : > { %11452 = vmatpush1.bf16.msra.mxu0 %v15786_v61 }
 0x4f2   : > { %11453 = vmatprep.subr.bf16.mxu0 %v15791_v63 }
 0x4f5   : > { %11454 = vmatpush1.bf16.msra.mxu0 %v15789_v11 }
 0x4f6   : > { %11455 = vmatprep.subr.bf16.mxu0 %v15794_v15 }
 0x4f9   : > { %11456 = vmatpush1.bf16.msra.mxu0 %v15792_v0 }
 0x4fa   : > { %11507 = vmatprep.subr.bf16.mxu0 %v15800_v46 }
 0x4fc   : > { %11458 = vmatmul.mubr.bf16.vlgmr.msra.gmra.mrb[16].mxu0 %v18268_v44 }
 0x4fd   : > { %11508 = vmatpush1.bf16.msra.mxu0 %v15798_v1 }
 0x4fe   : > { %11509 = vmatprep.subr.bf16.mxu0 %v15806_v4 }
 0x501   : > { %11510 = vmatpush1.bf16.msra.mxu0 %v15804_v16 }
 0x502   : > { %11511 = vmatprep.subr.bf16.mxu0 %v15812_v5  ;;  %v15891_v5 = vld [vmem:[%s17250_s6 + $0x508] ss:$40 sps:$4 sm:$0xff]  }
 0x505   : > { %11512 = vmatpush1.bf16.msra.mxu0 %v15810_v7  ;;  %v15894_v7 = vld [vmem:[%s17250_s6 + $0x510] ss:$40 sps:$4 sm:$0xff]  }
 0x506   : > { %11513 = vmatprep.subr.bf16.mxu0 %v15818_v8 }
 0x509   : > { %11514 = vmatpush1.bf16.msra.mxu0 %v15816_v12  ;;  %v15899_v12 = vld [vmem:[%s17250_s6 + $0x55c] ss:$40 sps:$4 sm:$0xff]  }
 0x50a   : > { %11515 = vmatprep.subr.bf16.mxu0 %v15824_v13  ;;  %v15902_v13 = vld [vmem:[%s17250_s6 + $0x564] ss:$40 sps:$4 sm:$0xff]  }
 0x50d   : > { %11516 = vmatpush1.bf16.msra.mxu0 %v15822_v17  ;;  %v15897_v17 = vld [vmem:[%s17250_s6 + $0x558] ss:$40 sps:$4 sm:$0xff]  }
 0x50e   : > { %11517 = vmatprep.subr.bf16.mxu0 %v15830_v49  ;;  %v15900_v49 = vld [vmem:[%s17250_s6 + $0x560] ss:$40 sps:$4 sm:$0xff]  }
 0x511   : > { %11518 = vmatpush1.bf16.msra.mxu0 %v15828_v19  ;;  %v15905_v19 = vld [vmem:[%s17250_s6 + $0x5ac] ss:$40 sps:$4 sm:$0xff]  }
 0x512   : > { %11519 = vmatprep.subr.bf16.mxu0 %v15836_v20  ;;  %v15908_v20 = vld [vmem:[%s17250_s6 + $0x5b4] ss:$40 sps:$4 sm:$0xff]  }
 0x515   : > { %11520 = vmatpush1.bf16.msra.mxu0 %v15834_v23  ;;  %v15903_v23 = vld [vmem:[%s17250_s6 + $0x5a8] ss:$40 sps:$4 sm:$0xff]  }
 0x516   : > { %11521 = vmatprep.subr.bf16.mxu0 %v15842_v24  ;;  %v15906_v24 = vld [vmem:[%s17250_s6 + $0x5b0] ss:$40 sps:$4 sm:$0xff]  }
 0x519   : > { %11522 = vmatpush1.bf16.msra.mxu0 %v15840_v9  ;;  %v15911_v9 = vld [vmem:[%s17250_s6 + $0x5fc] ss:$40 sps:$4 sm:$0xff]  }
 0x51a   : > { %11523 = vmatprep.subr.bf16.mxu0 %v15848_v43  ;;  %v15914_v43 = vld [vmem:[%s17250_s6 + $0x604] ss:$40 sps:$4 sm:$0xff]  }
 0x51d   : > { %11524 = vmatpush1.bf16.msra.mxu0 %v15846_v10  ;;  %v15909_v10 = vld [vmem:[%s17250_s6 + $0x5f8] ss:$40 sps:$4 sm:$0xff]  }
 0x51e   : > { %11525 = vmatprep.subr.bf16.mxu0 %v15854_v14  ;;  %v15912_v14 = vld [vmem:[%s17250_s6 + $0x600] ss:$40 sps:$4 sm:$0xff]  }
 0x521   : > { %11526 = vmatpush1.bf16.msra.mxu0 %v15852_v28  ;;  %v15917_v28 = vld [vmem:[%s17250_s6 + $0x64c] ss:$40 sps:$4 sm:$0xff]  }
 0x522   : > { %11527 = vmatprep.subr.bf16.mxu0 %v15860_v33  ;;  %v15920_v33 = vld [vmem:[%s17250_s6 + $0x654] ss:$40 sps:$4 sm:$0xff]  }
 0x525   : > { %11528 = vmatpush1.bf16.msra.mxu0 %v15858_v34  ;;  %v15915_v34 = vld [vmem:[%s17250_s6 + $0x648] ss:$40 sps:$4 sm:$0xff]  }
 0x526   : > { %11529 = vmatprep.subr.bf16.mxu0 %v15866_v37  ;;  %v15918_v37 = vld [vmem:[%s17250_s6 + $0x650] ss:$40 sps:$4 sm:$0xff]  }
 0x529   : > { %11530 = vmatpush1.bf16.msra.mxu0 %v15864_v6  ;;  %v15923_v6 = vld [vmem:[%s17250_s6 + $0x69c] ss:$40 sps:$4 sm:$0xff]  }
 0x52a   : > { %11531 = vmatprep.subr.bf16.mxu0 %v15872_v38  ;;  %v15926_v38 = vld [vmem:[%s17250_s6 + $0x6a4] ss:$40 sps:$4 sm:$0xff]  }
 0x52b   : > { %v11295_v22 = vpop.f32.mrb[20].mxu1 }
 0x52c   : > { %v18509_v47 = vadd.f32 %v11295_v22, %v18470_v57  ;;  %v11297_v31 = vpop.f32.mrb[21].mxu1  ;;  %v15896_v57 = vld [vmem:[%s17250_s6 + $0x514] ss:$40 sps:$4 sm:$0xff]  }
 0x52d   : > { %v18512_v48 = vadd.f32 %v11297_v31, %v18473_v42  ;;  %v11299_v50 = vpop.f32.mrb[22].mxu1  ;;  %11532 = vmatpush1.bf16.msra.mxu0 %v15870_v39  ;;  %v1195_v42 = vld [vmem:[%s17248_s17 + $0x8] sm:$0x3]  ;;  %v15921_v39 = vld [vmem:[%s17250_s6 + $0x698] ss:$40 sps:$4 sm:$0xff]  }
 0x52e   : > { %v11300_v30 = vpop.f32.mrb[23].mxu1  ;;  %11533 = vmatprep.subr.bf16.mxu0 %v15878_v32  ;;  %v1233_v60 = vrot.slane %v1195_v42, %v18062_v45  ;;  %v1237_v61 = vrot.slane %v1195_v42, %v17987_v41  ;;  %v15924_v32 = vld [vmem:[%s17250_s6 + $0x6a0] ss:$40 sps:$4 sm:$0xff]   ;;  %v15929_v22 = vld [vmem:[%s17250_s6 + $0x6ec] ss:$40 sps:$4 sm:$0xff]  }
 0x52f   : > { %v15932_v31 = vld [vmem:[%s17250_s6 + $0x6f4] ss:$40 sps:$4 sm:$0xff]   ;;  %v15927_v50 = vld [vmem:[%s17250_s6 + $0x6e8] ss:$40 sps:$4 sm:$0xff]  }
 0x530   : > { %v15935_v30 = vld [vmem:[%s17250_s6 + $0x73c] ss:$40 sps:$4 sm:$0xff]   ;;  %v15939_v42 = vld [vmem:[%s17250_s6 + $0x788] ss:$40 sps:$4 sm:$0xff]  }
 0x531   : > { %11534 = vmatpush1.bf16.msra.mxu0 %v15876_v51  ;;  %v15930_v51 = vld [vmem:[%s17250_s6 + $0x6f0] ss:$40 sps:$4 sm:$0xff]  }
 0x532   : > { %11535 = vmatprep.subr.bf16.mxu0 %v15884_v53  ;;  %v15938_v53 = vld [vmem:[%s17250_s6 + $0x744] ss:$40 sps:$4 sm:$0xff]  }
 0x535   : > { %11536 = vmatpush1.bf16.msra.mxu0 %v15882_v54  ;;  %v15933_v54 = vld [vmem:[%s17250_s6 + $0x738] ss:$40 sps:$4 sm:$0xff]  }
 0x536   : > { %11537 = vmatprep.subr.bf16.mxu0 %v15890_v55  ;;  %v15936_v55 = vld [vmem:[%s17250_s6 + $0x740] ss:$40 sps:$4 sm:$0xff]  }
 0x539   : > { %11538 = vmatpush1.bf16.msra.mxu0 %v15888_v59  ;;  %v15941_v59 = vld [vmem:[%s17250_s6 + $0x78c] ss:$40 sps:$4 sm:$0xff]  }
 0x53a   : > { %11589 = vmatprep.subr.bf16.mxu0 %v15896_v57  ;;  %v15944_v57 = vld [vmem:[%s17250_s6 + $0x794] ss:$40 sps:$4 sm:$0xff]  }
 0x54f   : > { %v6301_v62 = vpop.f32.mrb[8].mxu0 }
 0x550   : > { %v14111_v63 = vadd.f32 %v6301_v62, %v1233_v60  ;;  %v6303_v11 = vpop.f32.mrb[9].mxu0  ;;  %v15942_v60 = vld [vmem:[%s17250_s6 + $0x790] ss:$40 sps:$4 sm:$0xff]   ;;  %v15950_v62 = vld [vmem:[%s17250_s6 + $0x7e4] ss:$40 sps:$4 sm:$0xff]  }
 0x551   : > { %v14112_v15 = vadd.f32 %v6303_v11, %v1237_v61  ;;  %v6305_v0 = vpop.f32.mrb[10].mxu0  ;;  %v15947_v61 = vld [vmem:[%s17250_s6 + $0x7dc] ss:$40 sps:$4 sm:$0xff]   ;;  %v15948_v11 = vld [vmem:[%s17250_s6 + $0x7e0] ss:$40 sps:$4 sm:$0xff]  }
 0x552   : > { %v6316_v46 = vmax.f32 %v14111_v63, 0.0  ;;  %v6306_v1 = vpop.f32.mrb[11].mxu0  ;;  %v15945_v63 = vld [vmem:[%s17250_s6 + $0x7d8] ss:$40 sps:$4 sm:$0xff]   ;;  %v15956_v0 = vld [vmem:[%s17250_s6 + $0x834] ss:$40 sps:$4 sm:$0xff]  }
 0x553   : > { %v6317_v4 = vmax.f32 %v14112_v15, 0.0  ;;  %v15953_v15 = vld [vmem:[%s17250_s6 + $0x82c] ss:$40 sps:$4 sm:$0xff]   ;;  %v15954_v1 = vld [vmem:[%s17250_s6 + $0x830] ss:$40 sps:$4 sm:$0xff]  }
 0x554   : > { %v18527_v8 = vpack.c.bf16 %v6316_v46, %v6316_v46  ;;  %v15951_v46 = vld [vmem:[%s17250_s6 + $0x828] ss:$40 sps:$4 sm:$0xff]  }
 0x555   : > { %v18523_v16 = vpack.c.bf16 %v6317_v4, %v6317_v4  ;;  %v15959_v4 = vld [vmem:[%s17250_s6 + $0x87c] ss:$40 sps:$4 sm:$0xff]  }
 0x557   : > { %11334 = vmatprep.mubr.bf16.mxu1 %v18523_v16  ;;  %11539 = vmatprep.mubr.bf16.mxu0 %v18523_v16 }
 0x558   : > { %11335 = vmatmul.mubr.bf16.vlgmr.msra.gmra.mrb[24].mxu1 %v18527_v8  ;;  %11540 = vmatmul.mubr.bf16.vlgmr.msra.gmra.mrb[20].mxu0 %v18527_v8 }
 0x559   : > { %11385 = vmatpush1.bf16.msra.mxu1 %v15891_v5  ;;  %11590 = vmatpush1.bf16.msra.mxu0 %v15894_v7  ;;  %v15962_v5 = vld [vmem:[%s17250_s6 + $0x884] ss:$40 sps:$4 sm:$0xff]   ;;  %v15957_v7 = vld [vmem:[%s17250_s6 + $0x878] ss:$40 sps:$4 sm:$0xff]  }
 0x55a   : > { %11416 = vmatprep.mubr.bf16.mxu1 %v18091_v29  ;;  %11621 = vmatprep.mubr.bf16.mxu0 %v18091_v29 }
 0x55b   : > { %11386 = vmatprep.subr.bf16.mxu1 %v15899_v12  ;;  %11591 = vmatprep.subr.bf16.mxu0 %v15902_v13  ;;  %v15960_v12 = vld [vmem:[%s17250_s6 + $0x880] ss:$40 sps:$4 sm:$0xff]   ;;  %v15965_v13 = vld [vmem:[%s17250_s6 + $0x8cc] ss:$40 sps:$4 sm:$0xff]  }
 0x55d   : > { %11387 = vmatpush1.bf16.msra.mxu1 %v15897_v17  ;;  %11592 = vmatpush1.bf16.msra.mxu0 %v15900_v49  ;;  %v15968_v17 = vld [vmem:[%s17250_s6 + $0x8d4] ss:$40 sps:$4 sm:$0xff]   ;;  %v15963_v49 = vld [vmem:[%s17250_s6 + $0x8c8] ss:$40 sps:$4 sm:$0xff]  }
 0x55e   : > { %11388 = vmatprep.subr.bf16.mxu1 %v15905_v19  ;;  %11593 = vmatprep.subr.bf16.mxu0 %v15908_v20  ;;  %v15966_v19 = vld [vmem:[%s17250_s6 + $0x8d0] ss:$40 sps:$4 sm:$0xff]   ;;  %v15971_v20 = vld [vmem:[%s17250_s6 + $0x91c] ss:$40 sps:$4 sm:$0xff]  }
 0x561   : > { %11389 = vmatpush1.bf16.msra.mxu1 %v15903_v23  ;;  %11594 = vmatpush1.bf16.msra.mxu0 %v15906_v24  ;;  %v15974_v23 = vld [vmem:[%s17250_s6 + $0x924] ss:$40 sps:$4 sm:$0xff]   ;;  %v15969_v24 = vld [vmem:[%s17250_s6 + $0x918] ss:$40 sps:$4 sm:$0xff]  }
 0x562   : > { %11390 = vmatprep.subr.bf16.mxu1 %v15911_v9  ;;  %11595 = vmatprep.subr.bf16.mxu0 %v15914_v43  ;;  %v15972_v9 = vld [vmem:[%s17250_s6 + $0x920] ss:$40 sps:$4 sm:$0xff]   ;;  %v15977_v43 = vld [vmem:[%s17250_s6 + $0x96c] ss:$40 sps:$4 sm:$0xff]  }
 0x565   : > { %11391 = vmatpush1.bf16.msra.mxu1 %v15909_v10  ;;  %11596 = vmatpush1.bf16.msra.mxu0 %v15912_v14  ;;  %v15980_v10 = vld [vmem:[%s17250_s6 + $0x974] ss:$40 sps:$4 sm:$0xff]   ;;  %v15975_v14 = vld [vmem:[%s17250_s6 + $0x968] ss:$40 sps:$4 sm:$0xff]  }
 0x566   : > { %11392 = vmatprep.subr.bf16.mxu1 %v15917_v28  ;;  %11597 = vmatprep.subr.bf16.mxu0 %v15920_v33  ;;  %v15978_v28 = vld [vmem:[%s17250_s6 + $0x970] ss:$40 sps:$4 sm:$0xff]   ;;  %v15983_v33 = vld [vmem:[%s17250_s6 + $0x9bc] ss:$40 sps:$4 sm:$0xff]  }
 0x569   : > { %11393 = vmatpush1.bf16.msra.mxu1 %v15915_v34  ;;  %11598 = vmatpush1.bf16.msra.mxu0 %v15918_v37  ;;  %v15986_v34 = vld [vmem:[%s17250_s6 + $0x9c4] ss:$40 sps:$4 sm:$0xff]  }
 0x56a   : > { %11394 = vmatprep.subr.bf16.mxu1 %v15923_v6  ;;  %11599 = vmatprep.subr.bf16.mxu0 %v15926_v38 }
 0x56d   : > { %11395 = vmatpush1.bf16.msra.mxu1 %v15921_v39  ;;  %11600 = vmatpush1.bf16.msra.mxu0 %v15924_v32  ;;  %v15981_v39 = vld [vmem:[%s17250_s6 + $0x9b8] ss:$40 sps:$4 sm:$0xff]  }
 0x56e   : > { %11396 = vmatprep.subr.bf16.mxu1 %v15929_v22  ;;  %11601 = vmatprep.subr.bf16.mxu0 %v15932_v31  ;;  %v15984_v32 = vld [vmem:[%s17250_s6 + $0x9c0] ss:$40 sps:$4 sm:$0xff]   ;;  %v15989_v31 = vld [vmem:[%s17250_s6 + $0xf0c] ss:$40 sps:$4 sm:$0xff]  }
 0x571   : > { %11397 = vmatpush1.bf16.msra.mxu1 %v15927_v50  ;;  %11602 = vmatpush1.bf16.msra.mxu0 %v15930_v51  ;;  %v15992_v50 = vld [vmem:[%s17250_s6 + $0xf14] ss:$40 sps:$4 sm:$0xff]   ;;  %v15987_v51 = vld [vmem:[%s17250_s6 + $0xf08] ss:$40 sps:$4 sm:$0xff]  }
 0x572   : > { %11398 = vmatprep.subr.bf16.mxu1 %v15935_v30  ;;  %11603 = vmatprep.subr.bf16.mxu0 %v15938_v53  ;;  %v15990_v30 = vld [vmem:[%s17250_s6 + $0xf10] ss:$40 sps:$4 sm:$0xff]   ;;  %v15995_v53 = vld [vmem:[%s17250_s6 + $0xf5c] ss:$40 sps:$4 sm:$0xff]  }
 0x575   : > { %11399 = vmatpush1.bf16.msra.mxu1 %v15933_v54  ;;  %11604 = vmatpush1.bf16.msra.mxu0 %v15936_v55  ;;  %v15998_v54 = vld [vmem:[%s17250_s6 + $0xf64] ss:$40 sps:$4 sm:$0xff]   ;;  %v15993_v55 = vld [vmem:[%s17250_s6 + $0xf58] ss:$40 sps:$4 sm:$0xff]  }
 0x576   : > { %11400 = vmatprep.subr.bf16.mxu1 %v15941_v59  ;;  %11605 = vmatprep.subr.bf16.mxu0 %v15944_v57  ;;  %v15996_v59 = vld [vmem:[%s17250_s6 + $0xf60] ss:$40 sps:$4 sm:$0xff]   ;;  %v16001_v57 = vld [vmem:[%s17250_s6 + $0xfac] ss:$40 sps:$4 sm:$0xff]  }
 0x579   : > { %11401 = vmatpush1.bf16.msra.mxu1 %v15939_v42  ;;  %11606 = vmatpush1.bf16.msra.mxu0 %v15942_v60  ;;  %v16004_v42 = vld [vmem:[%s17250_s6 + $0xfb4] ss:$40 sps:$4 sm:$0xff]   ;;  %v15999_v60 = vld [vmem:[%s17250_s6 + $0xfa8] ss:$40 sps:$4 sm:$0xff]  }
 0x57a   : > { %11402 = vmatprep.subr.bf16.mxu1 %v15947_v61  ;;  %11607 = vmatprep.subr.bf16.mxu0 %v15950_v62  ;;  %v16002_v61 = vld [vmem:[%s17250_s6 + $0xfb0] ss:$40 sps:$4 sm:$0xff]   ;;  %v16007_v62 = vld [vmem:[%s17250_s6 + $0xffc] ss:$40 sps:$4 sm:$0xff]  }
 0x57d   : > { %11403 = vmatpush1.bf16.msra.mxu1 %v15945_v63  ;;  %11608 = vmatpush1.bf16.msra.mxu0 %v15948_v11  ;;  %v16010_v63 = vld [vmem:[%s17250_s6 + $0x1004] ss:$40 sps:$4 sm:$0xff]   ;;  %v16005_v11 = vld [vmem:[%s17250_s6 + $0xff8] ss:$40 sps:$4 sm:$0xff]  }
 0x57e   : > { %11404 = vmatprep.subr.bf16.mxu1 %v15953_v15  ;;  %11609 = vmatprep.subr.bf16.mxu0 %v15956_v0  ;;  %v16008_v15 = vld [vmem:[%s17250_s6 + $0x1000] ss:$40 sps:$4 sm:$0xff]   ;;  %v16013_v0 = vld [vmem:[%s17250_s6 + $0x104c] ss:$40 sps:$4 sm:$0xff]  }
 0x581   : > { %11405 = vmatpush1.bf16.msra.mxu1 %v15951_v46  ;;  %11610 = vmatpush1.bf16.msra.mxu0 %v15954_v1  ;;  %v16016_v46 = vld [vmem:[%s17250_s6 + $0x1054] ss:$40 sps:$4 sm:$0xff]   ;;  %v16011_v1 = vld [vmem:[%s17250_s6 + $0x1048] ss:$40 sps:$4 sm:$0xff]  }
 0x582   : > { %11406 = vmatprep.subr.bf16.mxu1 %v15959_v4  ;;  %11611 = vmatprep.subr.bf16.mxu0 %v15962_v5  ;;  %v16014_v4 = vld [vmem:[%s17250_s6 + $0x1050] ss:$40 sps:$4 sm:$0xff]   ;;  %v16019_v5 = vld [vmem:[%s17250_s6 + $0x109c] ss:$40 sps:$4 sm:$0xff]  }
 0x585   : > { %11407 = vmatpush1.bf16.msra.mxu1 %v15957_v7  ;;  %11612 = vmatpush1.bf16.msra.mxu0 %v15960_v12  ;;  %v16022_v7 = vld [vmem:[%s17250_s6 + $0x10a4] ss:$40 sps:$4 sm:$0xff]   ;;  %v16017_v12 = vld [vmem:[%s17250_s6 + $0x1098] ss:$40 sps:$4 sm:$0xff]  }
 0x586   : > { %11408 = vmatprep.subr.bf16.mxu1 %v15965_v13  ;;  %11613 = vmatprep.subr.bf16.mxu0 %v15968_v17  ;;  %v16020_v13 = vld [vmem:[%s17250_s6 + $0x10a0] ss:$40 sps:$4 sm:$0xff]   ;;  %v16025_v17 = vld [vmem:[%s17250_s6 + $0x10ec] ss:$40 sps:$4 sm:$0xff]  }
 0x589   : > { %11409 = vmatpush1.bf16.msra.mxu1 %v15963_v49  ;;  %11614 = vmatpush1.bf16.msra.mxu0 %v15966_v19  ;;  %v16028_v49 = vld [vmem:[%s17250_s6 + $0x10f4] ss:$40 sps:$4 sm:$0xff]   ;;  %v16023_v19 = vld [vmem:[%s17250_s6 + $0x10e8] ss:$40 sps:$4 sm:$0xff]  }
 0x58a   : > { %11410 = vmatprep.subr.bf16.mxu1 %v15971_v20  ;;  %11615 = vmatprep.subr.bf16.mxu0 %v15974_v23  ;;  %v16026_v20 = vld [vmem:[%s17250_s6 + $0x10f0] ss:$40 sps:$4 sm:$0xff]   ;;  %v16031_v23 = vld [vmem:[%s17250_s6 + $0x113c] ss:$40 sps:$4 sm:$0xff]  }
 0x58d   : > { %11411 = vmatpush1.bf16.msra.mxu1 %v15969_v24  ;;  %11616 = vmatpush1.bf16.msra.mxu0 %v15972_v9  ;;  %v16034_v24 = vld [vmem:[%s17250_s6 + $0x1144] ss:$40 sps:$4 sm:$0xff]   ;;  %v16029_v9 = vld [vmem:[%s17250_s6 + $0x1138] ss:$40 sps:$4 sm:$0xff]  }
 0x58e   : > { %11412 = vmatprep.subr.bf16.mxu1 %v15977_v43  ;;  %11617 = vmatprep.subr.bf16.mxu0 %v15980_v10  ;;  %v16032_v43 = vld [vmem:[%s17250_s6 + $0x1140] ss:$40 sps:$4 sm:$0xff]   ;;  %v16037_v10 = vld [vmem:[%s17250_s6 + $0x118c] ss:$40 sps:$4 sm:$0xff]  }
 0x58f   : > { %v18593_v37 = vpop.f32.mrb[12].mxu0 }
 0x590   : > { %v18595_v6 = vpop.f32.mrb[13].mxu0 }
 0x591   : > { %11413 = vmatpush1.bf16.msra.mxu1 %v15975_v14  ;;  %11618 = vmatpush1.bf16.msra.mxu0 %v15978_v28  ;;  %v11381_v38 = vpop.f32.mrb[14].mxu0  ;;  %v16040_v14 = vld [vmem:[%s17250_s6 + $0x1194] ss:$40 sps:$4 sm:$0xff]   ;;  %v16035_v28 = vld [vmem:[%s17250_s6 + $0x1188] ss:$40 sps:$4 sm:$0xff]  }
 0x592   : > { %v11382_v22 = vpop.f32.mrb[15].mxu0  ;;  %11414 = vmatprep.subr.bf16.mxu1 %v15983_v33  ;;  %11619 = vmatprep.subr.bf16.mxu0 %v15986_v34  ;;  %v16038_v33 = vld [vmem:[%s17250_s6 + $0x1190] ss:$40 sps:$4 sm:$0xff]   ;;  %v16043_v34 = vld [vmem:[%s17250_s6 + $0x11dc] ss:$40 sps:$4 sm:$0xff]  }
 0x593   : > { %v16046_v38 = vld [vmem:[%s17250_s6 + $0x11e4] ss:$40 sps:$4 sm:$0xff]  }
 0x594   : > { %v16049_v22 = vld [vmem:[%s17250_s6 + $0x122c] ss:$40 sps:$4 sm:$0xff]  }
 0x595   : > { %11415 = vmatpush1.bf16.msra.mxu1 %v15981_v39  ;;  %11620 = vmatpush1.bf16.msra.mxu0 %v15984_v32  ;;  %v16041_v39 = vld [vmem:[%s17250_s6 + $0x11d8] ss:$40 sps:$4 sm:$0xff]  }
 0x596   : > { %11466 = vmatprep.subr.bf16.mxu1 %v15989_v31  ;;  %11671 = vmatprep.subr.bf16.mxu0 %v15992_v50  ;;  %v16044_v32 = vld [vmem:[%s17250_s6 + $0x11e0] ss:$40 sps:$4 sm:$0xff]   ;;  %v16052_v31 = vld [vmem:[%s17250_s6 + $0x1234] ss:$40 sps:$4 sm:$0xff]  }
 0x597   : > { %v16047_v50 = vld [vmem:[%s17250_s6 + $0x1228] ss:$40 sps:$4 sm:$0xff]  }
 0x598   : > { %11417 = vmatmul.mubr.bf16.vlgmr.msra.gmra.mrb[28].mxu1 %v18167_v56  ;;  %11622 = vmatmul.mubr.bf16.vlgmr.msra.gmra.mrb[24].mxu0 %v18167_v56 }
 0x599   : > { %11467 = vmatpush1.bf16.msra.mxu1 %v15987_v51  ;;  %11498 = vmatprep.mubr.bf16.mxu1 %v18273_v58  ;;  %v16050_v51 = vld [vmem:[%s17250_s6 + $0x1230] ss:$40 sps:$4 sm:$0xff]  }
 0x59a   : > { %11672 = vmatpush1.bf16.msra.mxu0 %v15990_v30  ;;  %11703 = vmatprep.mubr.bf16.mxu0 %v18273_v58  ;;  %v16055_v30 = vld [vmem:[%s17250_s6 + $0x127c] ss:$40 sps:$4 sm:$0xff]  }
 0x59b   : > { %11468 = vmatprep.subr.bf16.mxu1 %v15995_v53  ;;  %11673 = vmatprep.subr.bf16.mxu0 %v15998_v54  ;;  %v16058_v53 = vld [vmem:[%s17250_s6 + $0x1284] ss:$40 sps:$4 sm:$0xff]   ;;  %v16053_v54 = vld [vmem:[%s17250_s6 + $0x1278] ss:$40 sps:$4 sm:$0xff]  }
 0x59d   : > { %11469 = vmatpush1.bf16.msra.mxu1 %v15993_v55  ;;  %v16056_v55 = vld [vmem:[%s17250_s6 + $0x1280] ss:$40 sps:$4 sm:$0xff]  }
 0x59e   : > { %11674 = vmatpush1.bf16.msra.mxu0 %v15996_v59  ;;  %11470 = vmatprep.subr.bf16.mxu1 %v16001_v57  ;;  %v16061_v59 = vld [vmem:[%s17250_s6 + $0x12cc] ss:$40 sps:$4 sm:$0xff]  }
 0x59f   : > { %11675 = vmatprep.subr.bf16.mxu0 %v16004_v42  ;;  %v16064_v57 = vld [vmem:[%s17250_s6 + $0x12d4] ss:$40 sps:$4 sm:$0xff]   ;;  %v16059_v42 = vld [vmem:[%s17250_s6 + $0x12c8] ss:$40 sps:$4 sm:$0xff]  }
 0x5a1   : > { %11471 = vmatpush1.bf16.msra.mxu1 %v15999_v60  ;;  %v16062_v60 = vld [vmem:[%s17250_s6 + $0x12d0] ss:$40 sps:$4 sm:$0xff]  }
 0x5a2   : > { %11676 = vmatpush1.bf16.msra.mxu0 %v16002_v61  ;;  %11472 = vmatprep.subr.bf16.mxu1 %v16007_v62  ;;  %v16067_v61 = vld [vmem:[%s17250_s6 + $0x131c] ss:$40 sps:$4 sm:$0xff]  }
 0x5a3   : > { %11677 = vmatprep.subr.bf16.mxu0 %v16010_v63  ;;  %v16070_v62 = vld [vmem:[%s17250_s6 + $0x1324] ss:$40 sps:$4 sm:$0xff]   ;;  %v16065_v63 = vld [vmem:[%s17250_s6 + $0x1318] ss:$40 sps:$4 sm:$0xff]  }
 0x5a5   : > { %11473 = vmatpush1.bf16.msra.mxu1 %v16005_v11  ;;  %v16068_v11 = vld [vmem:[%s17250_s6 + $0x1320] ss:$40 sps:$4 sm:$0xff]  }
 0x5a6   : > { %11678 = vmatpush1.bf16.msra.mxu0 %v16008_v15  ;;  %11474 = vmatprep.subr.bf16.mxu1 %v16013_v0  ;;  %v16073_v15 = vld [vmem:[%s17250_s6 + $0x136c] ss:$40 sps:$4 sm:$0xff]  }
 0x5a7   : > { %11679 = vmatprep.subr.bf16.mxu0 %v16016_v46  ;;  %v16076_v0 = vld [vmem:[%s17250_s6 + $0x1374] ss:$40 sps:$4 sm:$0xff]   ;;  %v16071_v46 = vld [vmem:[%s17250_s6 + $0x1368] ss:$40 sps:$4 sm:$0xff]  }
 0x5a9   : > { %11475 = vmatpush1.bf16.msra.mxu1 %v16011_v1  ;;  %v16074_v1 = vld [vmem:[%s17250_s6 + $0x1370] ss:$40 sps:$4 sm:$0xff]  }
 0x5aa   : > { %11680 = vmatpush1.bf16.msra.mxu0 %v16014_v4  ;;  %11476 = vmatprep.subr.bf16.mxu1 %v16019_v5  ;;  %v16079_v4 = vld [vmem:[%s17250_s6 + $0x13bc] ss:$40 sps:$4 sm:$0xff]  }
 0x5ab   : > { %11681 = vmatprep.subr.bf16.mxu0 %v16022_v7  ;;  %v16082_v7 = vld [vmem:[%s17250_s6 + $0x13c4] ss:$40 sps:$4 sm:$0xff]  }
 0x5ad   : > { %11477 = vmatpush1.bf16.msra.mxu1 %v16017_v12 }
 0x5ae   : > { %11682 = vmatpush1.bf16.msra.mxu0 %v16020_v13  ;;  %11478 = vmatprep.subr.bf16.mxu1 %v16025_v17  ;;  %v16077_v17 = vld [vmem:[%s17250_s6 + $0x13b8] ss:$40 sps:$4 sm:$0xff]  }
 0x5af   : > { %11683 = vmatprep.subr.bf16.mxu0 %v16028_v49 }
 0x5b1   : > { %11479 = vmatpush1.bf16.msra.mxu1 %v16023_v19  ;;  %v16080_v19 = vld [vmem:[%s17250_s6 + $0x13c0] ss:$40 sps:$4 sm:$0xff]  }
 0x5b2   : > { %11684 = vmatpush1.bf16.msra.mxu0 %v16026_v20  ;;  %11480 = vmatprep.subr.bf16.mxu1 %v16031_v23  ;;  %v16085_v20 = vld [vmem:[%s17250_s6 + $0x14] ss:$40 sps:$4 sm:$0xff]  }
 0x5b3   : > { %11685 = vmatprep.subr.bf16.mxu0 %v16034_v24  ;;  %v16088_v23 = vld [vmem:[%s17250_s6 + $0x1c] ss:$40 sps:$4 sm:$0xff]   ;;  %v16083_v24 = vld [vmem:[%s17250_s6 + $0x10] ss:$40 sps:$4 sm:$0xff]  }
 0x5b5   : > { %11481 = vmatpush1.bf16.msra.mxu1 %v16029_v9  ;;  %v16086_v9 = vld [vmem:[%s17250_s6 + $0x18] ss:$40 sps:$4 sm:$0xff]  }
 0x5b6   : > { %11686 = vmatpush1.bf16.msra.mxu0 %v16032_v43  ;;  %11482 = vmatprep.subr.bf16.mxu1 %v16037_v10  ;;  %v16091_v43 = vld [vmem:[%s17250_s6 + $0x64] ss:$40 sps:$4 sm:$0xff]  }
 0x5b7   : > { %11687 = vmatprep.subr.bf16.mxu0 %v16040_v14  ;;  %v16094_v10 = vld [vmem:[%s17250_s6 + $0x6c] ss:$40 sps:$4 sm:$0xff]   ;;  %v16089_v14 = vld [vmem:[%s17250_s6 + $0x60] ss:$40 sps:$4 sm:$0xff]  }
 0x5b9   : > { %11483 = vmatpush1.bf16.msra.mxu1 %v16035_v28  ;;  %v16092_v28 = vld [vmem:[%s17250_s6 + $0x68] ss:$40 sps:$4 sm:$0xff]  }
 0x5ba   : > { %11688 = vmatpush1.bf16.msra.mxu0 %v16038_v33  ;;  %11484 = vmatprep.subr.bf16.mxu1 %v16043_v34  ;;  %v16097_v33 = vld [vmem:[%s17250_s6 + $0xb4] ss:$40 sps:$4 sm:$0xff]  }
 0x5bb   : > { %11689 = vmatprep.subr.bf16.mxu0 %v16046_v38  ;;  %v16100_v34 = vld [vmem:[%s17250_s6 + $0xbc] ss:$40 sps:$4 sm:$0xff]   ;;  %v16095_v38 = vld [vmem:[%s17250_s6 + $0xb0] ss:$40 sps:$4 sm:$0xff]  }
 0x5bd   : > { %11485 = vmatpush1.bf16.msra.mxu1 %v16041_v39  ;;  %v16098_v39 = vld [vmem:[%s17250_s6 + $0xb8] ss:$40 sps:$4 sm:$0xff]  }
 0x5be   : > { %11690 = vmatpush1.bf16.msra.mxu0 %v16044_v32  ;;  %11486 = vmatprep.subr.bf16.mxu1 %v16049_v22  ;;  %v16103_v32 = vld [vmem:[%s17250_s6 + $0x104] ss:$40 sps:$4 sm:$0xff]  }
 0x5bf   : > { %11691 = vmatprep.subr.bf16.mxu0 %v16052_v31  ;;  %v16106_v22 = vld [vmem:[%s17250_s6 + $0x10c] ss:$40 sps:$4 sm:$0xff]   ;;  %v16101_v31 = vld [vmem:[%s17250_s6 + $0x100] ss:$40 sps:$4 sm:$0xff]  }
 0x5c1   : > { %11487 = vmatpush1.bf16.msra.mxu1 %v16047_v50  ;;  %v16104_v50 = vld [vmem:[%s17250_s6 + $0x108] ss:$40 sps:$4 sm:$0xff]  }
 0x5c2   : > { %11692 = vmatpush1.bf16.msra.mxu0 %v16050_v51  ;;  %11488 = vmatprep.subr.bf16.mxu1 %v16055_v30  ;;  %v16109_v51 = vld [vmem:[%s17250_s6 + $0x154] ss:$40 sps:$4 sm:$0xff]  }
 0x5c3   : > { %11693 = vmatprep.subr.bf16.mxu0 %v16058_v53  ;;  %v16112_v30 = vld [vmem:[%s17250_s6 + $0x15c] ss:$40 sps:$4 sm:$0xff]   ;;  %v16107_v53 = vld [vmem:[%s17250_s6 + $0x150] ss:$40 sps:$4 sm:$0xff]  }
 0x5c5   : > { %11489 = vmatpush1.bf16.msra.mxu1 %v16053_v54  ;;  %v16110_v54 = vld [vmem:[%s17250_s6 + $0x158] ss:$40 sps:$4 sm:$0xff]  }
 0x5c6   : > { %11694 = vmatpush1.bf16.msra.mxu0 %v16056_v55  ;;  %11490 = vmatprep.subr.bf16.mxu1 %v16061_v59  ;;  %v16115_v55 = vld [vmem:[%s17250_s6 + $0x1a4] ss:$40 sps:$4 sm:$0xff]  }
 0x5c7   : > { %11695 = vmatprep.subr.bf16.mxu0 %v16064_v57  ;;  %v16118_v59 = vld [vmem:[%s17250_s6 + $0x1ac] ss:$40 sps:$4 sm:$0xff]   ;;  %v16113_v57 = vld [vmem:[%s17250_s6 + $0x1a0] ss:$40 sps:$4 sm:$0xff]  }
 0x5c9   : > { %11491 = vmatpush1.bf16.msra.mxu1 %v16059_v42  ;;  %v16116_v42 = vld [vmem:[%s17250_s6 + $0x1a8] ss:$40 sps:$4 sm:$0xff]  }
 0x5ca   : > { %11696 = vmatpush1.bf16.msra.mxu0 %v16062_v60  ;;  %11492 = vmatprep.subr.bf16.mxu1 %v16067_v61  ;;  %v16121_v60 = vld [vmem:[%s17250_s6 + $0x1f4] ss:$40 sps:$4 sm:$0xff]  }
 0x5cb   : > { %11697 = vmatprep.subr.bf16.mxu0 %v16070_v62  ;;  %v16124_v61 = vld [vmem:[%s17250_s6 + $0x1fc] ss:$40 sps:$4 sm:$0xff]   ;;  %v16119_v62 = vld [vmem:[%s17250_s6 + $0x1f0] ss:$40 sps:$4 sm:$0xff]  }
 0x5cd   : > { %11493 = vmatpush1.bf16.msra.mxu1 %v16065_v63  ;;  %v16122_v63 = vld [vmem:[%s17250_s6 + $0x1f8] ss:$40 sps:$4 sm:$0xff]  }
 0x5ce   : > { %11698 = vmatpush1.bf16.msra.mxu0 %v16068_v11  ;;  %11494 = vmatprep.subr.bf16.mxu1 %v16073_v15  ;;  %v16127_v11 = vld [vmem:[%s17250_s6 + $0x244] ss:$40 sps:$4 sm:$0xff]  }
 0x5cf   : > { %v18664_v5 = vpop.f32.mrb[16].mxu0  ;;  %11699 = vmatprep.subr.bf16.mxu0 %v16076_v0  ;;  %v16130_v15 = vld [vmem:[%s17250_s6 + $0x24c] ss:$40 sps:$4 sm:$0xff]   ;;  %v16125_v0 = vld [vmem:[%s17250_s6 + $0x240] ss:$40 sps:$4 sm:$0xff]  }
 0x5d0   : > { %v18667_v12 = vpop.f32.mrb[17].mxu0 }
 0x5d1   : > { %11495 = vmatpush1.bf16.msra.mxu1 %v16071_v46  ;;  %v11463_v13 = vpop.f32.mrb[18].mxu0  ;;  %v16128_v46 = vld [vmem:[%s17250_s6 + $0x248] ss:$40 sps:$4 sm:$0xff]  }
 0x5d2   : > { %11700 = vmatpush1.bf16.msra.mxu0 %v16074_v1  ;;  %v11464_v49 = vpop.f32.mrb[19].mxu0  ;;  %11496 = vmatprep.subr.bf16.mxu1 %v16079_v4  ;;  %v16133_v1 = vld [vmem:[%s17250_s6 + $0x294] ss:$40 sps:$4 sm:$0xff]   ;;  %v16134_v13 = vld [vmem:[%s17250_s6 + $0x298] ss:$40 sps:$4 sm:$0xff]  }
 0x5d3   : > { %11701 = vmatprep.subr.bf16.mxu0 %v16082_v7  ;;  %v16136_v4 = vld [vmem:[%s17250_s6 + $0x29c] ss:$40 sps:$4 sm:$0xff]   ;;  %v16131_v7 = vld [vmem:[%s17250_s6 + $0x290] ss:$40 sps:$4 sm:$0xff]   ;;  %v16142_v49 = vld [vmem:[%s17250_s6 + $0x2ec] ss:$40 sps:$4 sm:$0xff]  }
 0x5d5   : > { %11497 = vmatpush1.bf16.msra.mxu1 %v16077_v17  ;;  %v16139_v17 = vld [vmem:[%s17250_s6 + $0x2e4] ss:$40 sps:$4 sm:$0xff]  }
 0x5d6   : > { %11702 = vmatpush1.bf16.msra.mxu0 %v16080_v19  ;;  %11548 = vmatprep.subr.bf16.mxu1 %v16085_v20  ;;  %v16137_v19 = vld [vmem:[%s17250_s6 + $0x2e0] ss:$40 sps:$4 sm:$0xff]  }
 0x5d7   : > { %11753 = vmatprep.subr.bf16.mxu0 %v16088_v23  ;;  %v16140_v20 = vld [vmem:[%s17250_s6 + $0x2e8] ss:$40 sps:$4 sm:$0xff]   ;;  %v16145_v23 = vld [vmem:[%s17250_s6 + $0x334] ss:$40 sps:$4 sm:$0xff]  }
 0x5d8   : > { %11499 = vmatmul.mubr.bf16.vlgmr.msra.gmra.mrb[32].mxu1 %v18348_v40 }
 0x5d9   : > { %11704 = vmatmul.mubr.bf16.vlgmr.msra.gmra.mrb[28].mxu0 %v18348_v40  ;;  %11549 = vmatpush1.bf16.msra.mxu1 %v16083_v24  ;;  %v16148_v24 = vld [vmem:[%s17250_s6 + $0x33c] ss:$40 sps:$4 sm:$0xff]  }
 0x5da   : > { %11580 = vmatprep.mubr.bf16.mxu1 %v18010_v3  ;;  %11754 = vmatpush1.bf16.msra.mxu0 %v16086_v9  ;;  %v16143_v9 = vld [vmem:[%s17250_s6 + $0x330] ss:$40 sps:$4 sm:$0xff]  }
 0x5db   : > { %11785 = vmatprep.mubr.bf16.mxu0 %v18010_v3  ;;  %11550 = vmatprep.subr.bf16.mxu1 %v16091_v43  ;;  %v16146_v43 = vld [vmem:[%s17250_s6 + $0x338] ss:$40 sps:$4 sm:$0xff]  }
 0x5dc   : > { %11755 = vmatprep.subr.bf16.mxu0 %v16094_v10  ;;  %v16151_v10 = vld [vmem:[%s17250_s6 + $0x384] ss:$40 sps:$4 sm:$0xff]  }
 0x5dd   : > { %11551 = vmatpush1.bf16.msra.mxu1 %v16089_v14  ;;  %v16154_v14 = vld [vmem:[%s17250_s6 + $0x38c] ss:$40 sps:$4 sm:$0xff]  }
 0x5de   : > { %11756 = vmatpush1.bf16.msra.mxu0 %v16092_v28  ;;  %11552 = vmatprep.subr.bf16.mxu1 %v16097_v33  ;;  %v16149_v28 = vld [vmem:[%s17250_s6 + $0x380] ss:$40 sps:$4 sm:$0xff]  }
 0x5df   : > { %11757 = vmatprep.subr.bf16.mxu0 %v16100_v34  ;;  %v16152_v33 = vld [vmem:[%s17250_s6 + $0x388] ss:$40 sps:$4 sm:$0xff]   ;;  %v16157_v34 = vld [vmem:[%s17250_s6 + $0x3d4] ss:$40 sps:$4 sm:$0xff]  }
 0x5e1   : > { %11553 = vmatpush1.bf16.msra.mxu1 %v16095_v38  ;;  %v16160_v38 = vld [vmem:[%s17250_s6 + $0x3dc] ss:$40 sps:$4 sm:$0xff]  }
 0x5e2   : > { %11758 = vmatpush1.bf16.msra.mxu0 %v16098_v39  ;;  %11554 = vmatprep.subr.bf16.mxu1 %v16103_v32  ;;  %v16155_v39 = vld [vmem:[%s17250_s6 + $0x3d0] ss:$40 sps:$4 sm:$0xff]  }
 0x5e3   : > { %11759 = vmatprep.subr.bf16.mxu0 %v16106_v22  ;;  %v16158_v32 = vld [vmem:[%s17250_s6 + $0x3d8] ss:$40 sps:$4 sm:$0xff]   ;;  %v16163_v22 = vld [vmem:[%s17250_s6 + $0x424] ss:$40 sps:$4 sm:$0xff]  }
 0x5e5   : > { %11555 = vmatpush1.bf16.msra.mxu1 %v16101_v31  ;;  %v16166_v31 = vld [vmem:[%s17250_s6 + $0x42c] ss:$40 sps:$4 sm:$0xff]  }
 0x5e6   : > { %11760 = vmatpush1.bf16.msra.mxu0 %v16104_v50  ;;  %11556 = vmatprep.subr.bf16.mxu1 %v16109_v51  ;;  %v16161_v50 = vld [vmem:[%s17250_s6 + $0x420] ss:$40 sps:$4 sm:$0xff]  }
 0x5e7   : > { %11761 = vmatprep.subr.bf16.mxu0 %v16112_v30  ;;  %v16164_v51 = vld [vmem:[%s17250_s6 + $0x428] ss:$40 sps:$4 sm:$0xff]   ;;  %v16169_v30 = vld [vmem:[%s17250_s6 + $0x474] ss:$40 sps:$4 sm:$0xff]  }
 0x5e9   : > { %11557 = vmatpush1.bf16.msra.mxu1 %v16107_v53  ;;  %v16172_v53 = vld [vmem:[%s17250_s6 + $0x47c] ss:$40 sps:$4 sm:$0xff]  }
 0x5ea   : > { %11762 = vmatpush1.bf16.msra.mxu0 %v16110_v54  ;;  %11558 = vmatprep.subr.bf16.mxu1 %v16115_v55  ;;  %v16167_v54 = vld [vmem:[%s17250_s6 + $0x470] ss:$40 sps:$4 sm:$0xff]  }
 0x5eb   : > { %11763 = vmatprep.subr.bf16.mxu0 %v16118_v59  ;;  %v16170_v55 = vld [vmem:[%s17250_s6 + $0x478] ss:$40 sps:$4 sm:$0xff]   ;;  %v16175_v59 = vld [vmem:[%s17250_s6 + $0x4c4] ss:$40 sps:$4 sm:$0xff]  }
 0x5ed   : > { %11559 = vmatpush1.bf16.msra.mxu1 %v16113_v57  ;;  %v16178_v57 = vld [vmem:[%s17250_s6 + $0x4cc] ss:$40 sps:$4 sm:$0xff]  }
 0x5ee   : > { %11764 = vmatpush1.bf16.msra.mxu0 %v16116_v42  ;;  %11560 = vmatprep.subr.bf16.mxu1 %v16121_v60  ;;  %v16173_v42 = vld [vmem:[%s17250_s6 + $0x4c0] ss:$40 sps:$4 sm:$0xff]  }
 0x5ef   : > { %11765 = vmatprep.subr.bf16.mxu0 %v16124_v61  ;;  %v16176_v60 = vld [vmem:[%s17250_s6 + $0x4c8] ss:$40 sps:$4 sm:$0xff]   ;;  %v16181_v61 = vld [vmem:[%s17250_s6 + $0xa14] ss:$40 sps:$4 sm:$0xff]  }
 0x5f1   : > { %11561 = vmatpush1.bf16.msra.mxu1 %v16119_v62  ;;  %v16184_v62 = vld [vmem:[%s17250_s6 + $0xa1c] ss:$40 sps:$4 sm:$0xff]  }
 0x5f2   : > { %11766 = vmatpush1.bf16.msra.mxu0 %v16122_v63  ;;  %11562 = vmatprep.subr.bf16.mxu1 %v16127_v11  ;;  %v16179_v63 = vld [vmem:[%s17250_s6 + $0xa10] ss:$40 sps:$4 sm:$0xff]  }
 0x5f3   : > { %11767 = vmatprep.subr.bf16.mxu0 %v16130_v15  ;;  %v16182_v11 = vld [vmem:[%s17250_s6 + $0xa18] ss:$40 sps:$4 sm:$0xff]   ;;  %v16187_v15 = vld [vmem:[%s17250_s6 + $0xa64] ss:$40 sps:$4 sm:$0xff]  }
 0x5f5   : > { %11563 = vmatpush1.bf16.msra.mxu1 %v16125_v0  ;;  %v16190_v0 = vld [vmem:[%s17250_s6 + $0xa6c] ss:$40 sps:$4 sm:$0xff]  }
 0x5f6   : > { %11768 = vmatpush1.bf16.msra.mxu0 %v16128_v46  ;;  %11564 = vmatprep.subr.bf16.mxu1 %v16133_v1  ;;  %v16185_v46 = vld [vmem:[%s17250_s6 + $0xa60] ss:$40 sps:$4 sm:$0xff]  }
 0x5f7   : > { %11769 = vmatprep.subr.bf16.mxu0 %v16136_v4  ;;  %v16188_v1 = vld [vmem:[%s17250_s6 + $0xa68] ss:$40 sps:$4 sm:$0xff]   ;;  %v16193_v4 = vld [vmem:[%s17250_s6 + $0xab4] ss:$40 sps:$4 sm:$0xff]  }
 0x5f9   : > { %11565 = vmatpush1.bf16.msra.mxu1 %v16131_v7  ;;  %v16196_v7 = vld [vmem:[%s17250_s6 + $0xabc] ss:$40 sps:$4 sm:$0xff]  }
 0x5fa   : > { %11770 = vmatpush1.bf16.msra.mxu0 %v16134_v13  ;;  %11566 = vmatprep.subr.bf16.mxu1 %v16139_v17  ;;  %v16191_v13 = vld [vmem:[%s17250_s6 + $0xab0] ss:$40 sps:$4 sm:$0xff]  }
 0x5fb   : > { %11771 = vmatprep.subr.bf16.mxu0 %v16142_v49  ;;  %v16194_v17 = vld [vmem:[%s17250_s6 + $0xab8] ss:$40 sps:$4 sm:$0xff]   ;;  %v16199_v49 = vld [vmem:[%s17250_s6 + $0xb04] ss:$40 sps:$4 sm:$0xff]  }
 0x5fd   : > { %11567 = vmatpush1.bf16.msra.mxu1 %v16137_v19  ;;  %v16202_v19 = vld [vmem:[%s17250_s6 + $0xb0c] ss:$40 sps:$4 sm:$0xff]  }
 0x5fe   : > { %11772 = vmatpush1.bf16.msra.mxu0 %v16140_v20  ;;  %11568 = vmatprep.subr.bf16.mxu1 %v16145_v23  ;;  %v16197_v20 = vld [vmem:[%s17250_s6 + $0xb00] ss:$40 sps:$4 sm:$0xff]  }
 0x5ff   : > { %11773 = vmatprep.subr.bf16.mxu0 %v16148_v24  ;;  %v16200_v23 = vld [vmem:[%s17250_s6 + $0xb08] ss:$40 sps:$4 sm:$0xff]   ;;  %v16205_v24 = vld [vmem:[%s17250_s6 + $0xb54] ss:$40 sps:$4 sm:$0xff]  }
 0x601   : > { %11569 = vmatpush1.bf16.msra.mxu1 %v16143_v9  ;;  %v16208_v9 = vld [vmem:[%s17250_s6 + $0xb5c] ss:$40 sps:$4 sm:$0xff]  }
 0x602   : > { %11774 = vmatpush1.bf16.msra.mxu0 %v16146_v43  ;;  %11570 = vmatprep.subr.bf16.mxu1 %v16151_v10  ;;  %v16203_v43 = vld [vmem:[%s17250_s6 + $0xb50] ss:$40 sps:$4 sm:$0xff]  }
 0x603   : > { %11775 = vmatprep.subr.bf16.mxu0 %v16154_v14  ;;  %v16206_v10 = vld [vmem:[%s17250_s6 + $0xb58] ss:$40 sps:$4 sm:$0xff]   ;;  %v16211_v14 = vld [vmem:[%s17250_s6 + $0xba4] ss:$40 sps:$4 sm:$0xff]  }
 0x605   : > { %11571 = vmatpush1.bf16.msra.mxu1 %v16149_v28  ;;  %v16214_v28 = vld [vmem:[%s17250_s6 + $0xbac] ss:$40 sps:$4 sm:$0xff]  }
 0x606   : > { %11776 = vmatpush1.bf16.msra.mxu0 %v16152_v33  ;;  %11572 = vmatprep.subr.bf16.mxu1 %v16157_v34  ;;  %v16209_v33 = vld [vmem:[%s17250_s6 + $0xba0] ss:$40 sps:$4 sm:$0xff]  }
 0x607   : > { %11777 = vmatprep.subr.bf16.mxu0 %v16160_v38  ;;  %v16212_v34 = vld [vmem:[%s17250_s6 + $0xba8] ss:$40 sps:$4 sm:$0xff]   ;;  %v16217_v38 = vld [vmem:[%s17250_s6 + $0xbf4] ss:$40 sps:$4 sm:$0xff]  }
 0x609   : > { %11573 = vmatpush1.bf16.msra.mxu1 %v16155_v39  ;;  %v6318_v39 = vld [vmem:[#allocation11] sm:$0xff] }
 0x60a   : > { %11778 = vmatpush1.bf16.msra.mxu0 %v16158_v32  ;;  %11574 = vmatprep.subr.bf16.mxu1 %v16163_v22 }
 0x60b   : > { %11779 = vmatprep.subr.bf16.mxu0 %v16166_v31  ;;  %v16220_v31 = vld [vmem:[%s17250_s6 + $0xbfc] ss:$40 sps:$4 sm:$0xff]  }
 0x60d   : > { %11575 = vmatpush1.bf16.msra.mxu1 %v16161_v50 }
 0x60e   : > { %11780 = vmatpush1.bf16.msra.mxu0 %v16164_v51  ;;  %11576 = vmatprep.subr.bf16.mxu1 %v16169_v30  ;;  %v6319_v51 = vld [vmem:[#allocation11 + $0x8] sm:$0xff] }
 0x60f   : > { %11781 = vmatprep.subr.bf16.mxu0 %v16172_v53 }
 0x611   : > { %11577 = vmatpush1.bf16.msra.mxu1 %v16167_v54 }
 0x612   : > { %11782 = vmatpush1.bf16.msra.mxu0 %v16170_v55  ;;  %11578 = vmatprep.subr.bf16.mxu1 %v16175_v59 }
 0x613   : > { %11783 = vmatprep.subr.bf16.mxu0 %v16178_v57  ;;  %v16215_v57 = vld [vmem:[%s17250_s6 + $0xbf0] ss:$40 sps:$4 sm:$0xff]  }
 0x615   : > { %11579 = vmatpush1.bf16.msra.mxu1 %v16173_v42 }
 0x616   : > { %11784 = vmatpush1.bf16.msra.mxu0 %v16176_v60  ;;  %11630 = vmatprep.subr.bf16.mxu1 %v16181_v61 }
 0x617   : > { %11835 = vmatprep.subr.bf16.mxu0 %v16184_v62  ;;  %v16223_v62 = vld [vmem:[%s17250_s6 + $0xc44] ss:$40 sps:$4 sm:$0xff]  }
 0x618   : > { %11581 = vmatmul.mubr.bf16.vlgmr.msra.gmra.mrb[36].mxu1 %v18088_v27 }
 0x619   : > { %11786 = vmatmul.mubr.bf16.vlgmr.msra.gmra.mrb[32].mxu0 %v18088_v27  ;;  %11631 = vmatpush1.bf16.msra.mxu1 %v16179_v63 }
 0x61a   : > { %11662 = vmatprep.mubr.bf16.mxu1 %v18264_v52  ;;  %11836 = vmatpush1.bf16.msra.mxu0 %v16182_v11  ;;  %v16221_v11 = vld [vmem:[%s17250_s6 + $0xc40] ss:$40 sps:$4 sm:$0xff]  }
 0x61b   : > { %11867 = vmatprep.mubr.bf16.mxu0 %v18264_v52  ;;  %11632 = vmatprep.subr.bf16.mxu1 %v16187_v15  ;;  %v16224_v15 = vld [vmem:[%s17250_s6 + $0xc48] ss:$40 sps:$4 sm:$0xff]  }
 0x61c   : > { %11837 = vmatprep.subr.bf16.mxu0 %v16190_v0  ;;  %v16229_v0 = vld [vmem:[%s17250_s6 + $0xc94] ss:$40 sps:$4 sm:$0xff]  }
 0x61d   : > { %11633 = vmatpush1.bf16.msra.mxu1 %v16185_v46  ;;  %v16232_v46 = vld [vmem:[%s17250_s6 + $0xc9c] ss:$40 sps:$4 sm:$0xff]  }
 0x61e   : > { %11838 = vmatpush1.bf16.msra.mxu0 %v16188_v1  ;;  %11634 = vmatprep.subr.bf16.mxu1 %v16193_v4  ;;  %v16227_v1 = vld [vmem:[%s17250_s6 + $0xc90] ss:$40 sps:$4 sm:$0xff]  }
 0x61f   : > { %11839 = vmatprep.subr.bf16.mxu0 %v16196_v7  ;;  %v16230_v4 = vld [vmem:[%s17250_s6 + $0xc98] ss:$40 sps:$4 sm:$0xff]   ;;  %v16235_v7 = vld [vmem:[%s17250_s6 + $0xce4] ss:$40 sps:$4 sm:$0xff]  }
 0x621   : > { %11635 = vmatpush1.bf16.msra.mxu1 %v16191_v13  ;;  %v16238_v13 = vld [vmem:[%s17250_s6 + $0xcec] ss:$40 sps:$4 sm:$0xff]  }
 0x622   : > { %11840 = vmatpush1.bf16.msra.mxu0 %v16194_v17  ;;  %11636 = vmatprep.subr.bf16.mxu1 %v16199_v49  ;;  %v16233_v17 = vld [vmem:[%s17250_s6 + $0xce0] ss:$40 sps:$4 sm:$0xff]  }
 0x623   : > { %11841 = vmatprep.subr.bf16.mxu0 %v16202_v19  ;;  %v16236_v49 = vld [vmem:[%s17250_s6 + $0xce8] ss:$40 sps:$4 sm:$0xff]   ;;  %v16241_v19 = vld [vmem:[%s17250_s6 + $0xd34] ss:$40 sps:$4 sm:$0xff]  }
 0x625   : > { %11637 = vmatpush1.bf16.msra.mxu1 %v16197_v20  ;;  %v16244_v20 = vld [vmem:[%s17250_s6 + $0xd3c] ss:$40 sps:$4 sm:$0xff]  }
 0x626   : > { %11842 = vmatpush1.bf16.msra.mxu0 %v16200_v23  ;;  %11638 = vmatprep.subr.bf16.mxu1 %v16205_v24  ;;  %v16239_v23 = vld [vmem:[%s17250_s6 + $0xd30] ss:$40 sps:$4 sm:$0xff]  }
 0x627   : > { %11843 = vmatprep.subr.bf16.mxu0 %v16208_v9  ;;  %v16242_v24 = vld [vmem:[%s17250_s6 + $0xd38] ss:$40 sps:$4 sm:$0xff]   ;;  %v16247_v9 = vld [vmem:[%s17250_s6 + $0xd84] ss:$40 sps:$4 sm:$0xff]  }
 0x629   : > { %11639 = vmatpush1.bf16.msra.mxu1 %v16203_v43  ;;  %v16250_v43 = vld [vmem:[%s17250_s6 + $0xd8c] ss:$40 sps:$4 sm:$0xff]  }
 0x62a   : > { %11844 = vmatpush1.bf16.msra.mxu0 %v16206_v10  ;;  %11640 = vmatprep.subr.bf16.mxu1 %v16211_v14  ;;  %v16245_v10 = vld [vmem:[%s17250_s6 + $0xd80] ss:$40 sps:$4 sm:$0xff]  }
 0x62b   : > { %v11336_v32 = vpop.f32.mrb[24].mxu1  ;;  %v18768_v22 = vpop.f32.mrb[20].mxu0  ;;  %11845 = vmatprep.subr.bf16.mxu0 %v16214_v28  ;;  %v16248_v14 = vld [vmem:[%s17250_s6 + $0xd88] ss:$40 sps:$4 sm:$0xff]   ;;  %v16253_v28 = vld [vmem:[%s17250_s6 + $0xdd4] ss:$40 sps:$4 sm:$0xff]  }
 0x62c   : > { %v11337_v50 = vadd.f32 %v11336_v32, %v18509_v47  ;;  %v11338_v30 = vpop.f32.mrb[25].mxu1  ;;  %v18772_v53 = vpop.f32.mrb[21].mxu0  ;;  %v16218_v47 = vld [vmem:[%s17250_s6 + $0xbf8] ss:$40 sps:$4 sm:$0xff]   ;;  %v16262_v32 = vld [vmem:[%s17250_s6 + $0xe2c] ss:$40 sps:$4 sm:$0xff]  }
 0x62d   : > { %v11339_v54 = vadd.f32 %v11338_v30, %v18512_v48  ;;  %11641 = vmatpush1.bf16.msra.mxu1 %v16209_v33  ;;  %v11340_v55 = vpop.f32.mrb[26].mxu1  ;;  %v11545_v59 = vpop.f32.mrb[22].mxu0  ;;  %v16226_v48 = vld [vmem:[%s17250_s6 + $0xc4c] ss:$40 sps:$4 sm:$0xff]   ;;  %v16256_v33 = vld [vmem:[%s17250_s6 + $0xddc] ss:$40 sps:$4 sm:$0xff]  }
 0x62e   : > { %v12163_v42 = vadd.f32 %v11337_v50, %v6318_v39  ;;  %11846 = vmatpush1.bf16.msra.mxu0 %v16212_v34  ;;  %v11341_v60 = vpop.f32.mrb[27].mxu1  ;;  %v11546_v61 = vpop.f32.mrb[23].mxu0  ;;  %11642 = vmatprep.subr.bf16.mxu1 %v16217_v38  ;;  %v16251_v34 = vld [vmem:[%s17250_s6 + $0xdd0] ss:$40 sps:$4 sm:$0xff]   ;;  %v16259_v39 = vld [vmem:[%s17250_s6 + $0xe24] ss:$40 sps:$4 sm:$0xff]  }
 0x62f   : > { %v12164_v63 = vadd.f32 %v11339_v54, %v6319_v51  ;;  %11847 = vmatprep.subr.bf16.mxu0 %v16220_v31  ;;  %v16254_v38 = vld [vmem:[%s17250_s6 + $0xdd8] ss:$40 sps:$4 sm:$0xff]   ;;  %v16260_v50 = vld [vmem:[%s17250_s6 + $0xe28] ss:$40 sps:$4 sm:$0xff]   ;;  %v16265_v51 = vld [vmem:[%s17250_s6 + $0xe74] ss:$40 sps:$4 sm:$0xff]  }
 0x630   : > { %12173 = vst [vmem:[#allocation11] sm:$0xff] %v12163_v42  ;;  %v16257_v31 = vld [vmem:[%s17250_s6 + $0xe20] ss:$40 sps:$4 sm:$0xff]   ;;  %v16268_v30 = vld [vmem:[%s17250_s6 + $0xe7c] ss:$40 sps:$4 sm:$0xff]  }
 0x631   : > { %12174 = vst [vmem:[#allocation11 + $0x8] sm:$0xff] %v12164_v63  ;;  %11643 = vmatpush1.bf16.msra.mxu1 %v16215_v57  ;;  %v16263_v54 = vld [vmem:[%s17250_s6 + $0xe70] ss:$40 sps:$4 sm:$0xff]   ;;  %v16271_v59 = vld [vmem:[%s17250_s6 + $0xec4] ss:$40 sps:$4 sm:$0xff]  }
 0x632   : > { %11848 = vmatpush1.bf16.msra.mxu0 %v16218_v47  ;;  %11644 = vmatprep.subr.bf16.mxu1 %v16223_v62  ;;  %v16266_v55 = vld [vmem:[%s17250_s6 + $0xe78] ss:$40 sps:$4 sm:$0xff]   ;;  %v16274_v57 = vld [vmem:[%s17250_s6 + $0xecc] ss:$40 sps:$4 sm:$0xff]   ;;  %v16272_v60 = vld [vmem:[%s17250_s6 + $0xec8] ss:$40 sps:$4 sm:$0xff]  }
 0x633   : > { %11849 = vmatprep.subr.bf16.mxu0 %v16226_v48  ;;  %v16269_v42 = vld [vmem:[%s17250_s6 + $0xec0] ss:$40 sps:$4 sm:$0xff]   ;;  %v16277_v61 = vld [vmem:[%s17250_s6 + $0x1414] ss:$40 sps:$4 sm:$0xff]   ;;  %v16275_v62 = vld [vmem:[%s17250_s6 + $0x1410] ss:$40 sps:$4 sm:$0xff]  }
 0x634   : > { %v16280_v47 = vld [vmem:[%s17250_s6 + $0x141c] ss:$40 sps:$4 sm:$0xff]   ;;  %v16278_v63 = vld [vmem:[%s17250_s6 + $0x1418] ss:$40 sps:$4 sm:$0xff]  }
 0x635   : > { %11645 = vmatpush1.bf16.msra.mxu1 %v16221_v11  ;;  %v16283_v48 = vld [vmem:[%s17250_s6 + $0x1464] ss:$40 sps:$4 sm:$0xff]  }
 0x636   : > { %11850 = vmatpush1.bf16.msra.mxu0 %v16224_v15  ;;  %11646 = vmatprep.subr.bf16.mxu1 %v16229_v0  ;;  %v16286_v11 = vld [vmem:[%s17250_s6 + $0x146c] ss:$40 sps:$4 sm:$0xff]   ;;  %v16281_v15 = vld [vmem:[%s17250_s6 + $0x1460] ss:$40 sps:$4 sm:$0xff]  }
 0x637   : > { %11851 = vmatprep.subr.bf16.mxu0 %v16232_v46  ;;  %v16284_v0 = vld [vmem:[%s17250_s6 + $0x1468] ss:$40 sps:$4 sm:$0xff]   ;;  %v16289_v46 = vld [vmem:[%s17250_s6 + $0x14b4] ss:$40 sps:$4 sm:$0xff]  }
 0x639   : > { %11647 = vmatpush1.bf16.msra.mxu1 %v16227_v1  ;;  %v16292_v1 = vld [vmem:[%s17250_s6 + $0x14bc] ss:$40 sps:$4 sm:$0xff]  }
 0x63a   : > { %11852 = vmatpush1.bf16.msra.mxu0 %v16230_v4  ;;  %11648 = vmatprep.subr.bf16.mxu1 %v16235_v7  ;;  %v16287_v4 = vld [vmem:[%s17250_s6 + $0x14b0] ss:$40 sps:$4 sm:$0xff]  }
 0x63b   : > { %11853 = vmatprep.subr.bf16.mxu0 %v16238_v13  ;;  %v16290_v7 = vld [vmem:[%s17250_s6 + $0x14b8] ss:$40 sps:$4 sm:$0xff]   ;;  %v16295_v13 = vld [vmem:[%s17250_s6 + $0x1504] ss:$40 sps:$4 sm:$0xff]  }
 0x63d   : > { %11649 = vmatpush1.bf16.msra.mxu1 %v16233_v17  ;;  %v16298_v17 = vld [vmem:[%s17250_s6 + $0x150c] ss:$40 sps:$4 sm:$0xff]  }
 0x63e   : > { %11854 = vmatpush1.bf16.msra.mxu0 %v16236_v49  ;;  %11650 = vmatprep.subr.bf16.mxu1 %v16241_v19  ;;  %v16293_v49 = vld [vmem:[%s17250_s6 + $0x1500] ss:$40 sps:$4 sm:$0xff]  }
 0x63f   : > { %11855 = vmatprep.subr.bf16.mxu0 %v16244_v20  ;;  %v16296_v19 = vld [vmem:[%s17250_s6 + $0x1508] ss:$40 sps:$4 sm:$0xff]   ;;  %v16301_v20 = vld [vmem:[%s17250_s6 + $0x1554] ss:$40 sps:$4 sm:$0xff]  }
 0x641   : > { %11651 = vmatpush1.bf16.msra.mxu1 %v16239_v23  ;;  %v16304_v23 = vld [vmem:[%s17250_s6 + $0x155c] ss:$40 sps:$4 sm:$0xff]  }
 0x642   : > { %11856 = vmatpush1.bf16.msra.mxu0 %v16242_v24  ;;  %11652 = vmatprep.subr.bf16.mxu1 %v16247_v9  ;;  %v16299_v24 = vld [vmem:[%s17250_s6 + $0x1550] ss:$40 sps:$4 sm:$0xff]  }
 0x643   : > { %11857 = vmatprep.subr.bf16.mxu0 %v16250_v43  ;;  %v16302_v9 = vld [vmem:[%s17250_s6 + $0x1558] ss:$40 sps:$4 sm:$0xff]   ;;  %v16307_v43 = vld [vmem:[%s17250_s6 + $0x15a4] ss:$40 sps:$4 sm:$0xff]  }
 0x645   : > { %11653 = vmatpush1.bf16.msra.mxu1 %v16245_v10  ;;  %v16310_v10 = vld [vmem:[%s17250_s6 + $0x15ac] ss:$40 sps:$4 sm:$0xff]  }
 0x646   : > { %11858 = vmatpush1.bf16.msra.mxu0 %v16248_v14  ;;  %11654 = vmatprep.subr.bf16.mxu1 %v16253_v28  ;;  %v16305_v14 = vld [vmem:[%s17250_s6 + $0x15a0] ss:$40 sps:$4 sm:$0xff]  }
 0x647   : > { %11859 = vmatprep.subr.bf16.mxu0 %v16256_v33  ;;  %v16308_v28 = vld [vmem:[%s17250_s6 + $0x15a8] ss:$40 sps:$4 sm:$0xff]   ;;  %v16313_v33 = vld [vmem:[%s17250_s6 + $0x15f4] ss:$40 sps:$4 sm:$0xff]  }
 0x649   : > { %11655 = vmatpush1.bf16.msra.mxu1 %v16251_v34 }
 0x64a   : > { %11860 = vmatpush1.bf16.msra.mxu0 %v16254_v38  ;;  %11656 = vmatprep.subr.bf16.mxu1 %v16259_v39  ;;  %v16316_v39 = vld [vmem:[%s17250_s6 + $0x15fc] ss:$40 sps:$4 sm:$0xff]  }
 0x64b   : > { %11861 = vmatprep.subr.bf16.mxu0 %v16262_v32 }
 0x64d   : > { %11657 = vmatpush1.bf16.msra.mxu1 %v16257_v31 }
 0x64e   : > { %11862 = vmatpush1.bf16.msra.mxu0 %v16260_v50  ;;  %11658 = vmatprep.subr.bf16.mxu1 %v16265_v51 }
 0x64f   : > { %11863 = vmatprep.subr.bf16.mxu0 %v16268_v30 }
 0x651   : > { %11659 = vmatpush1.bf16.msra.mxu1 %v16263_v54 }
 0x652   : > { %11864 = vmatpush1.bf16.msra.mxu0 %v16266_v55  ;;  %11660 = vmatprep.subr.bf16.mxu1 %v16271_v59  ;;  %v16311_v55 = vld [vmem:[%s17250_s6 + $0x15f0] ss:$40 sps:$4 sm:$0xff]  }
 0x653   : > { %11865 = vmatprep.subr.bf16.mxu0 %v16274_v57 }
 0x655   : > { %11661 = vmatpush1.bf16.msra.mxu1 %v16269_v42  ;;  %v16319_v42 = vld [vmem:[%s17250_s6 + $0x1644] ss:$40 sps:$4 sm:$0xff]  }
 0x656   : > { %11866 = vmatpush1.bf16.msra.mxu0 %v16272_v60  ;;  %11712 = vmatprep.subr.bf16.mxu1 %v16277_v61 }
 0x657   : > { %11917 = vmatprep.subr.bf16.mxu0 %v16280_v47  ;;  %v16317_v47 = vld [vmem:[%s17250_s6 + $0x1640] ss:$40 sps:$4 sm:$0xff]  }
 0x658   : > { %11663 = vmatmul.mubr.bf16.vlgmr.msra.gmra.mrb[40].mxu1 %v18268_v44 }
 0x659   : > { %11868 = vmatmul.mubr.bf16.vlgmr.msra.gmra.mrb[36].mxu0 %v18268_v44  ;;  %11713 = vmatpush1.bf16.msra.mxu1 %v16275_v62  ;;  %v16320_v62 = vld [vmem:[%s17250_s6 + $0x1648] ss:$40 sps:$4 sm:$0xff]  }
 0x65a   : > { %11744 = vmatprep.mubr.bf16.mxu1 %v18523_v16  ;;  %11918 = vmatpush1.bf16.msra.mxu0 %v16278_v63  ;;  %v16325_v63 = vld [vmem:[%s17250_s6 + $0x1694] ss:$40 sps:$4 sm:$0xff]  }
 0x65b   : > { %11949 = vmatprep.mubr.bf16.mxu0 %v18523_v16  ;;  %11714 = vmatprep.subr.bf16.mxu1 %v16283_v48  ;;  %v16323_v48 = vld [vmem:[%s17250_s6 + $0x1690] ss:$40 sps:$4 sm:$0xff]  }
 0x65c   : > { %11919 = vmatprep.subr.bf16.mxu0 %v16286_v11  ;;  %v16331_v11 = vld [vmem:[%s17250_s6 + $0x16e4] ss:$40 sps:$4 sm:$0xff]  }
 0x65d   : > { %11715 = vmatpush1.bf16.msra.mxu1 %v16281_v15  ;;  %v16334_v15 = vld [vmem:[%s17250_s6 + $0x16ec] ss:$40 sps:$4 sm:$0xff]  }
 0x65e   : > { %11920 = vmatpush1.bf16.msra.mxu0 %v16284_v0  ;;  %11716 = vmatprep.subr.bf16.mxu1 %v16289_v46  ;;  %v16329_v0 = vld [vmem:[%s17250_s6 + $0x16e0] ss:$40 sps:$4 sm:$0xff]  }
 0x65f   : > { %11921 = vmatprep.subr.bf16.mxu0 %v16292_v1  ;;  %v16332_v46 = vld [vmem:[%s17250_s6 + $0x16e8] ss:$40 sps:$4 sm:$0xff]   ;;  %v16337_v1 = vld [vmem:[%s17250_s6 + $0x1734] ss:$40 sps:$4 sm:$0xff]  }
 0x661   : > { %11717 = vmatpush1.bf16.msra.mxu1 %v16287_v4  ;;  %v16340_v4 = vld [vmem:[%s17250_s6 + $0x173c] ss:$40 sps:$4 sm:$0xff]  }
 0x662   : > { %11922 = vmatpush1.bf16.msra.mxu0 %v16290_v7  ;;  %11718 = vmatprep.subr.bf16.mxu1 %v16295_v13  ;;  %v16335_v7 = vld [vmem:[%s17250_s6 + $0x1730] ss:$40 sps:$4 sm:$0xff]  }
 0x663   : > { %11923 = vmatprep.subr.bf16.mxu0 %v16298_v17  ;;  %v16338_v13 = vld [vmem:[%s17250_s6 + $0x1738] ss:$40 sps:$4 sm:$0xff]   ;;  %v16343_v17 = vld [vmem:[%s17250_s6 + $0x1784] ss:$40 sps:$4 sm:$0xff]  }
 0x665   : > { %11719 = vmatpush1.bf16.msra.mxu1 %v16293_v49  ;;  %v16346_v49 = vld [vmem:[%s17250_s6 + $0x178c] ss:$40 sps:$4 sm:$0xff]  }
 0x666   : > { %11924 = vmatpush1.bf16.msra.mxu0 %v16296_v19  ;;  %11720 = vmatprep.subr.bf16.mxu1 %v16301_v20  ;;  %v16341_v19 = vld [vmem:[%s17250_s6 + $0x1780] ss:$40 sps:$4 sm:$0xff]  }
 0x667   : > { %11925 = vmatprep.subr.bf16.mxu0 %v16304_v23  ;;  %v16344_v20 = vld [vmem:[%s17250_s6 + $0x1788] ss:$40 sps:$4 sm:$0xff]   ;;  %v16349_v23 = vld [vmem:[%s17250_s6 + $0x17d4] ss:$40 sps:$4 sm:$0xff]  }
 0x669   : > { %11721 = vmatpush1.bf16.msra.mxu1 %v16299_v24  ;;  %v16352_v24 = vld [vmem:[%s17250_s6 + $0x17dc] ss:$40 sps:$4 sm:$0xff]  }
 0x66a   : > { %11926 = vmatpush1.bf16.msra.mxu0 %v16302_v9  ;;  %11722 = vmatprep.subr.bf16.mxu1 %v16307_v43  ;;  %v16347_v9 = vld [vmem:[%s17250_s6 + $0x17d0] ss:$40 sps:$4 sm:$0xff]  }
 0x66b   : > { %v11418_v34 = vpop.f32.mrb[28].mxu1  ;;  %v18842_v38 = vpop.f32.mrb[24].mxu0  ;;  %11927 = vmatprep.subr.bf16.mxu0 %v16310_v10  ;;  %v16350_v43 = vld [vmem:[%s17250_s6 + $0x17d8] ss:$40 sps:$4 sm:$0xff]   ;;  %v16355_v10 = vld [vmem:[%s17250_s6 + $0x1824] ss:$40 sps:$4 sm:$0xff]  }
 0x66c   : > { %v11419_v32 = vadd.f32 %v11418_v34, %v18593_v37  ;;  %v11420_v31 = vpop.f32.mrb[29].mxu1  ;;  %v18846_v50 = vpop.f32.mrb[25].mxu0  ;;  %v16314_v37 = vld [vmem:[%s17250_s6 + $0x15f8] ss:$40 sps:$4 sm:$0xff]   ;;  %v16361_v34 = vld [vmem:[%s17250_s6 + $0x1874] ss:$40 sps:$4 sm:$0xff]  }
 0x66d   : > { %v11421_v51 = vadd.f32 %v11420_v31, %v18595_v6  ;;  %v11422_v30 = vpop.f32.mrb[30].mxu1  ;;  %v11627_v54 = vpop.f32.mrb[26].mxu0  ;;  %11723 = vmatpush1.bf16.msra.mxu1 %v16305_v14  ;;  %v16322_v6 = vld [vmem:[%s17250_s6 + $0x164c] ss:$40 sps:$4 sm:$0xff]   ;;  %v16362_v31 = vld [vmem:[%s17250_s6 + $0x1878] ss:$40 sps:$4 sm:$0xff]  }
 0x66e   : > { %11928 = vmatpush1.bf16.msra.mxu0 %v16308_v28  ;;  %v11423_v59 = vpop.f32.mrb[31].mxu1  ;;  %v11628_v57 = vpop.f32.mrb[27].mxu0  ;;  %11724 = vmatprep.subr.bf16.mxu1 %v16313_v33  ;;  %v18853_v60 = vadd.f32 %v18664_v5, %v11419_v32  ;;  %v16328_v5 = vld [vmem:[%s17250_s6 + $0x169c] ss:$40 sps:$4 sm:$0xff]   ;;  %v16358_v14 = vld [vmem:[%s17250_s6 + $0x182c] ss:$40 sps:$4 sm:$0xff]  }
 0x66f   : > { %11929 = vmatprep.subr.bf16.mxu0 %v16316_v39  ;;  %v18857_v61 = vadd.f32 %v18667_v12, %v11421_v51  ;;  %v16326_v12 = vld [vmem:[%s17250_s6 + $0x1698] ss:$40 sps:$4 sm:$0xff]   ;;  %v16356_v33 = vld [vmem:[%s17250_s6 + $0x1828] ss:$40 sps:$4 sm:$0xff]   ;;  %v16364_v39 = vld [vmem:[%s17250_s6 + $0x187c] ss:$40 sps:$4 sm:$0xff]  }
 0x670   : > { %v16353_v28 = vld [vmem:[%s17250_s6 + $0x1820] ss:$40 sps:$4 sm:$0xff]   ;;  %v16359_v32 = vld [vmem:[%s17250_s6 + $0x1870] ss:$40 sps:$4 sm:$0xff]   ;;  %v16367_v51 = vld [vmem:[%s17250_s6 + $0x18c4] ss:$40 sps:$4 sm:$0xff]  }
 0x671   : > { %11725 = vmatpush1.bf16.msra.mxu1 %v16311_v55  ;;  %v16370_v30 = vld [vmem:[%s17250_s6 + $0x18cc] ss:$40 sps:$4 sm:$0xff]   ;;  %v16365_v54 = vld [vmem:[%s17250_s6 + $0x18c0] ss:$40 sps:$4 sm:$0xff]   ;;  %v16373_v59 = vld [vmem:[%s17250_s6 + $0x51c] ss:$40 sps:$4 sm:$0xff]  }
 0x672   : > { %11930 = vmatpush1.bf16.msra.mxu0 %v16314_v37  ;;  %11726 = vmatprep.subr.bf16.mxu1 %v16319_v42  ;;  %v16368_v55 = vld [vmem:[%s17250_s6 + $0x18c8] ss:$40 sps:$4 sm:$0xff]   ;;  %v16376_v57 = vld [vmem:[%s17250_s6 + $0x524] ss:$40 sps:$4 sm:$0xff]   ;;  %v16371_v37 = vld [vmem:[%s17250_s6 + $0x518] ss:$40 sps:$4 sm:$0xff]  }
 0x673   : > { %11931 = vmatprep.subr.bf16.mxu0 %v16322_v6  ;;  %v16374_v42 = vld [vmem:[%s17250_s6 + $0x520] ss:$40 sps:$4 sm:$0xff]   ;;  %v16379_v6 = vld [vmem:[%s17250_s6 + $0x56c] ss:$40 sps:$4 sm:$0xff]  }
 0x675   : > { %11727 = vmatpush1.bf16.msra.mxu1 %v16317_v47  ;;  %v16382_v47 = vld [vmem:[%s17250_s6 + $0x574] ss:$40 sps:$4 sm:$0xff]  }
 0x676   : > { %11932 = vmatpush1.bf16.msra.mxu0 %v16320_v62  ;;  %11728 = vmatprep.subr.bf16.mxu1 %v16325_v63  ;;  %v16377_v62 = vld [vmem:[%s17250_s6 + $0x568] ss:$40 sps:$4 sm:$0xff]  }
 0x677   : > { %11933 = vmatprep.subr.bf16.mxu0 %v16328_v5  ;;  %v16380_v63 = vld [vmem:[%s17250_s6 + $0x570] ss:$40 sps:$4 sm:$0xff]   ;;  %v16385_v5 = vld [vmem:[%s17250_s6 + $0x5bc] ss:$40 sps:$4 sm:$0xff]  }
 0x679   : > { %11729 = vmatpush1.bf16.msra.mxu1 %v16323_v48  ;;  %v16388_v48 = vld [vmem:[%s17250_s6 + $0x5c4] ss:$40 sps:$4 sm:$0xff]  }
 0x67a   : > { %11934 = vmatpush1.bf16.msra.mxu0 %v16326_v12  ;;  %11730 = vmatprep.subr.bf16.mxu1 %v16331_v11  ;;  %v16383_v12 = vld [vmem:[%s17250_s6 + $0x5b8] ss:$40 sps:$4 sm:$0xff]  }
 0x67b   : > { %11935 = vmatprep.subr.bf16.mxu0 %v16334_v15  ;;  %v16386_v11 = vld [vmem:[%s17250_s6 + $0x5c0] ss:$40 sps:$4 sm:$0xff]   ;;  %v16391_v15 = vld [vmem:[%s17250_s6 + $0x60c] ss:$40 sps:$4 sm:$0xff]  }
 0x67d   : > { %11731 = vmatpush1.bf16.msra.mxu1 %v16329_v0  ;;  %v16394_v0 = vld [vmem:[%s17250_s6 + $0x614] ss:$40 sps:$4 sm:$0xff]  }
 0x67e   : > { %11936 = vmatpush1.bf16.msra.mxu0 %v16332_v46  ;;  %11732 = vmatprep.subr.bf16.mxu1 %v16337_v1  ;;  %v16392_v46 = vld [vmem:[%s17250_s6 + $0x610] ss:$40 sps:$4 sm:$0xff]   ;;  %v16397_v1 = vld [vmem:[%s17250_s6 + $0x65c] ss:$40 sps:$4 sm:$0xff]  }
 0x67f   : > { %11937 = vmatprep.subr.bf16.mxu0 %v16340_v4  ;;  %v16400_v4 = vld [vmem:[%s17250_s6 + $0x664] ss:$40 sps:$4 sm:$0xff]  }
 0x681   : > { %11733 = vmatpush1.bf16.msra.mxu1 %v16335_v7  ;;  %v16395_v7 = vld [vmem:[%s17250_s6 + $0x658] ss:$40 sps:$4 sm:$0xff]  }
 0x682   : > { %11938 = vmatpush1.bf16.msra.mxu0 %v16338_v13  ;;  %11734 = vmatprep.subr.bf16.mxu1 %v16343_v17  ;;  %v16398_v13 = vld [vmem:[%s17250_s6 + $0x660] ss:$40 sps:$4 sm:$0xff]   ;;  %v16403_v17 = vld [vmem:[%s17250_s6 + $0x6ac] ss:$40 sps:$4 sm:$0xff]  }
 0x683   : > { %11939 = vmatprep.subr.bf16.mxu0 %v16346_v49  ;;  %v16406_v49 = vld [vmem:[%s17250_s6 + $0x6b4] ss:$40 sps:$4 sm:$0xff]  }
 0x685   : > { %11735 = vmatpush1.bf16.msra.mxu1 %v16341_v19  ;;  %v16401_v19 = vld [vmem:[%s17250_s6 + $0x6a8] ss:$40 sps:$4 sm:$0xff]  }
 0x686   : > { %11940 = vmatpush1.bf16.msra.mxu0 %v16344_v20  ;;  %11736 = vmatprep.subr.bf16.mxu1 %v16349_v23  ;;  %v16404_v20 = vld [vmem:[%s17250_s6 + $0x6b0] ss:$40 sps:$4 sm:$0xff]   ;;  %v16409_v23 = vld [vmem:[%s17250_s6 + $0x6fc] ss:$40 sps:$4 sm:$0xff]  }
 0x687   : > { %11941 = vmatprep.subr.bf16.mxu0 %v16352_v24 }
 0x689   : > { %11737 = vmatpush1.bf16.msra.mxu1 %v16347_v9  ;;  %v16412_v9 = vld [vmem:[%s17250_s6 + $0x704] ss:$40 sps:$4 sm:$0xff]  }
 0x68a   : > { %11942 = vmatpush1.bf16.msra.mxu0 %v16350_v43  ;;  %11738 = vmatprep.subr.bf16.mxu1 %v16355_v10  ;;  %v6320_v43 = vld [vmem:[#allocation11 + $0x10] sm:$0xff] }
 0x68b   : > { %11943 = vmatprep.subr.bf16.mxu0 %v16358_v14 }
 0x68d   : > { %11739 = vmatpush1.bf16.msra.mxu1 %v16353_v28 }
 0x68e   : > { %11944 = vmatpush1.bf16.msra.mxu0 %v16356_v33  ;;  %11740 = vmatprep.subr.bf16.mxu1 %v16361_v34 }
 0x68f   : > { %11945 = vmatprep.subr.bf16.mxu0 %v16364_v39 }
 0x691   : > { %11741 = vmatpush1.bf16.msra.mxu1 %v16359_v32  ;;  %v16407_v32 = vld [vmem:[%s17250_s6 + $0x6f8] ss:$40 sps:$4 sm:$0xff]  }
 0x692   : > { %11946 = vmatpush1.bf16.msra.mxu0 %v16362_v31  ;;  %11742 = vmatprep.subr.bf16.mxu1 %v16367_v51  ;;  %v16410_v31 = vld [vmem:[%s17250_s6 + $0x700] ss:$40 sps:$4 sm:$0xff]  }
 0x693   : > { %11947 = vmatprep.subr.bf16.mxu0 %v16370_v30  ;;  %v6321_v30 = vld [vmem:[#allocation11 + $0x18] sm:$0xff] }
 0x695   : > { %11743 = vmatpush1.bf16.msra.mxu1 %v16365_v54 }
 0x696   : > { %11948 = vmatpush1.bf16.msra.mxu0 %v16368_v55  ;;  %11794 = vmatprep.subr.bf16.mxu1 %v16373_v59  ;;  %v16415_v55 = vld [vmem:[%s17250_s6 + $0x74c] ss:$40 sps:$4 sm:$0xff]  }
 0x697   : > { %11999 = vmatprep.subr.bf16.mxu0 %v16376_v57  ;;  %v16418_v57 = vld [vmem:[%s17250_s6 + $0x754] ss:$40 sps:$4 sm:$0xff]  }
 0x698   : > { %11745 = vmatmul.mubr.bf16.vlgmr.msra.gmra.mrb[44].mxu1 %v18527_v8 }
 0x699   : > { %11950 = vmatmul.mubr.bf16.vlgmr.msra.gmra.mrb[40].mxu0 %v18527_v8  ;;  %11795 = vmatpush1.bf16.msra.mxu1 %v16371_v37 }
 0x69a   : > { %11826 = vmatprep.mubr.bf16.mxu1 %v18091_v29  ;;  %12000 = vmatpush1.bf16.msra.mxu0 %v16374_v42 }
 0x69b   : > { %12031 = vmatprep.mubr.bf16.mxu0 %v18091_v29  ;;  %11796 = vmatprep.subr.bf16.mxu1 %v16379_v6  ;;  %v16389_v29 = vld [vmem:[%s17250_s6 + $0x608] ss:$40 sps:$4 sm:$0xff]  }
 0x69c   : > { %12001 = vmatprep.subr.bf16.mxu0 %v16382_v47  ;;  %v16416_v6 = vld [vmem:[%s17250_s6 + $0x750] ss:$40 sps:$4 sm:$0xff]   ;;  %v16421_v47 = vld [vmem:[%s17250_s6 + $0x79c] ss:$40 sps:$4 sm:$0xff]  }
 0x69d   : > { %11797 = vmatpush1.bf16.msra.mxu1 %v16377_v62  ;;  %v16419_v62 = vld [vmem:[%s17250_s6 + $0x798] ss:$40 sps:$4 sm:$0xff]  }
 0x69e   : > { %12002 = vmatpush1.bf16.msra.mxu0 %v16380_v63  ;;  %11798 = vmatprep.subr.bf16.mxu1 %v16385_v5  ;;  %v16422_v63 = vld [vmem:[%s17250_s6 + $0x7a0] ss:$40 sps:$4 sm:$0xff]   ;;  %v16427_v5 = vld [vmem:[%s17250_s6 + $0x7ec] ss:$40 sps:$4 sm:$0xff]  }
 0x69f   : > { %12003 = vmatprep.subr.bf16.mxu0 %v16388_v48  ;;  %v16430_v48 = vld [vmem:[%s17250_s6 + $0x7f4] ss:$40 sps:$4 sm:$0xff]  }
 0x6a1   : > { %11799 = vmatpush1.bf16.msra.mxu1 %v16383_v12  ;;  %v16425_v12 = vld [vmem:[%s17250_s6 + $0x7e8] ss:$40 sps:$4 sm:$0xff]  }
 0x6a2   : > { %12004 = vmatpush1.bf16.msra.mxu0 %v16386_v11  ;;  %11800 = vmatprep.subr.bf16.mxu1 %v16391_v15  ;;  %v16428_v11 = vld [vmem:[%s17250_s6 + $0x7f0] ss:$40 sps:$4 sm:$0xff]   ;;  %v16433_v15 = vld [vmem:[%s17250_s6 + $0x83c] ss:$40 sps:$4 sm:$0xff]  }
 0x6a3   : > { %12005 = vmatprep.subr.bf16.mxu0 %v16394_v0  ;;  %v16436_v0 = vld [vmem:[%s17250_s6 + $0x844] ss:$40 sps:$4 sm:$0xff]  }
 0x6a5   : > { %11801 = vmatpush1.bf16.msra.mxu1 %v16389_v29  ;;  %v16431_v29 = vld [vmem:[%s17250_s6 + $0x838] ss:$40 sps:$4 sm:$0xff]  }
 0x6a6   : > { %12006 = vmatpush1.bf16.msra.mxu0 %v16392_v46  ;;  %11802 = vmatprep.subr.bf16.mxu1 %v16397_v1  ;;  %v16434_v46 = vld [vmem:[%s17250_s6 + $0x840] ss:$40 sps:$4 sm:$0xff]   ;;  %v16439_v1 = vld [vmem:[%s17250_s6 + $0x88c] ss:$40 sps:$4 sm:$0xff]  }
 0x6a7   : > { %12007 = vmatprep.subr.bf16.mxu0 %v16400_v4  ;;  %v16442_v4 = vld [vmem:[%s17250_s6 + $0x894] ss:$40 sps:$4 sm:$0xff]  }
 0x6a9   : > { %11803 = vmatpush1.bf16.msra.mxu1 %v16395_v7  ;;  %v16437_v7 = vld [vmem:[%s17250_s6 + $0x888] ss:$40 sps:$4 sm:$0xff]  }
 0x6aa   : > { %12008 = vmatpush1.bf16.msra.mxu0 %v16398_v13  ;;  %11804 = vmatprep.subr.bf16.mxu1 %v16403_v17  ;;  %v16440_v13 = vld [vmem:[%s17250_s6 + $0x890] ss:$40 sps:$4 sm:$0xff]   ;;  %v16445_v17 = vld [vmem:[%s17250_s6 + $0x8dc] ss:$40 sps:$4 sm:$0xff]  }
 0x6ab   : > { %v11500_v24 = vpop.f32.mrb[32].mxu1  ;;  %12009 = vmatprep.subr.bf16.mxu0 %v16406_v49  ;;  %v16448_v49 = vld [vmem:[%s17250_s6 + $0x8e4] ss:$40 sps:$4 sm:$0xff]  }
 0x6ac   : > { %v11501_v10 = vadd.f32 %v11500_v24, %v18853_v60  ;;  %v18924_v14 = vpop.f32.mrb[28].mxu0  ;;  %v11502_v28 = vpop.f32.mrb[33].mxu1  ;;  %v16454_v24 = vld [vmem:[%s17250_s6 + $0x934] ss:$40 sps:$4 sm:$0xff]  }
 0x6ad   : > { %v11503_v33 = vadd.f32 %v11502_v28, %v18857_v61  ;;  %v18927_v34 = vpop.f32.mrb[29].mxu0  ;;  %v11504_v39 = vpop.f32.mrb[34].mxu1  ;;  %11805 = vmatpush1.bf16.msra.mxu1 %v16401_v19  ;;  %v16443_v19 = vld [vmem:[%s17250_s6 + $0x8d8] ss:$40 sps:$4 sm:$0xff]   ;;  %v16460_v28 = vld [vmem:[%s17250_s6 + $0x984] ss:$40 sps:$4 sm:$0xff]  }
 0x6ae   : > { %v11542_v51 = vadd.f32 %v18768_v22, %v11501_v10  ;;  %v11709_v54 = vpop.f32.mrb[30].mxu0  ;;  %12010 = vmatpush1.bf16.msra.mxu0 %v16404_v20  ;;  %v11505_v60 = vpop.f32.mrb[35].mxu1  ;;  %11806 = vmatprep.subr.bf16.mxu1 %v16409_v23  ;;  %v16413_v22 = vld [vmem:[%s17250_s6 + $0x748] ss:$40 sps:$4 sm:$0xff]   ;;  %v16451_v23 = vld [vmem:[%s17250_s6 + $0x92c] ss:$40 sps:$4 sm:$0xff]  }
 0x6af   : > { %v11544_v61 = vadd.f32 %v18772_v53, %v11503_v33  ;;  %v11710_v59 = vpop.f32.mrb[31].mxu0  ;;  %12011 = vmatprep.subr.bf16.mxu0 %v16412_v9  ;;  %v16424_v53 = vld [vmem:[%s17250_s6 + $0x7a4] ss:$40 sps:$4 sm:$0xff]   ;;  %v16446_v20 = vld [vmem:[%s17250_s6 + $0x8e0] ss:$40 sps:$4 sm:$0xff]  }
 0x6b0   : > { %v12165_v37 = vadd.f32 %v11542_v51, %v6320_v43  ;;  %v16449_v9 = vld [vmem:[%s17250_s6 + $0x928] ss:$40 sps:$4 sm:$0xff]   ;;  %v16457_v10 = vld [vmem:[%s17250_s6 + $0x97c] ss:$40 sps:$4 sm:$0xff]   ;;  %v16455_v33 = vld [vmem:[%s17250_s6 + $0x978] ss:$40 sps:$4 sm:$0xff]  }
 0x6b1   : > { %v12166_v42 = vadd.f32 %v11544_v61, %v6321_v30  ;;  %11807 = vmatpush1.bf16.msra.mxu1 %v16407_v32  ;;  %v16452_v43 = vld [vmem:[%s17250_s6 + $0x930] ss:$40 sps:$4 sm:$0xff]   ;;  %v16458_v39 = vld [vmem:[%s17250_s6 + $0x980] ss:$40 sps:$4 sm:$0xff]   ;;  %v16463_v32 = vld [vmem:[%s17250_s6 + $0x9cc] ss:$40 sps:$4 sm:$0xff]  }
 0x6b2   : > { %12175 = vst [vmem:[#allocation11 + $0x10] sm:$0xff] %v12165_v37  ;;  %12012 = vmatpush1.bf16.msra.mxu0 %v16410_v31  ;;  %11808 = vmatprep.subr.bf16.mxu1 %v16415_v55  ;;  %v16466_v31 = vld [vmem:[%s17250_s6 + $0x9d4] ss:$40 sps:$4 sm:$0xff]   ;;  %v16461_v51 = vld [vmem:[%s17250_s6 + $0x9c8] ss:$40 sps:$4 sm:$0xff]  }
 0x6b3   : > { %12176 = vst [vmem:[#allocation11 + $0x18] sm:$0xff] %v12166_v42  ;;  %12013 = vmatprep.subr.bf16.mxu0 %v16418_v57  ;;  %v16464_v30 = vld [vmem:[%s17250_s6 + $0x9d0] ss:$40 sps:$4 sm:$0xff]   ;;  %v16469_v54 = vld [vmem:[%s17250_s6 + $0xf1c] ss:$40 sps:$4 sm:$0xff]  }
 0x6b4   : > { %v16472_v60 = vld [vmem:[%s17250_s6 + $0xf24] ss:$40 sps:$4 sm:$0xff]   ;;  %v16467_v55 = vld [vmem:[%s17250_s6 + $0xf18] ss:$40 sps:$4 sm:$0xff]   ;;  %v16478_v57 = vld [vmem:[%s17250_s6 + $0xf74] ss:$40 sps:$4 sm:$0xff]  }
 0x6b5   : > { %11809 = vmatpush1.bf16.msra.mxu1 %v16413_v22  ;;  %v16470_v61 = vld [vmem:[%s17250_s6 + $0xf20] ss:$40 sps:$4 sm:$0xff]   ;;  %v16475_v59 = vld [vmem:[%s17250_s6 + $0xf6c] ss:$40 sps:$4 sm:$0xff]   ;;  %v16476_v42 = vld [vmem:[%s17250_s6 + $0xf70] ss:$40 sps:$4 sm:$0xff]  }
 0x6b6   : > { %12014 = vmatpush1.bf16.msra.mxu0 %v16416_v6  ;;  %11810 = vmatprep.subr.bf16.mxu1 %v16421_v47  ;;  %v16473_v37 = vld [vmem:[%s17250_s6 + $0xf68] ss:$40 sps:$4 sm:$0xff]   ;;  %v16481_v22 = vld [vmem:[%s17250_s6 + $0xfbc] ss:$40 sps:$4 sm:$0xff]  }
 0x6b7   : > { %12015 = vmatprep.subr.bf16.mxu0 %v16424_v53  ;;  %v16484_v6 = vld [vmem:[%s17250_s6 + $0xfc4] ss:$40 sps:$4 sm:$0xff]   ;;  %v16482_v47 = vld [vmem:[%s17250_s6 + $0xfc0] ss:$40 sps:$4 sm:$0xff]  }
 0x6b8   : > { %v16487_v53 = vld [vmem:[%s17250_s6 + $0x100c] ss:$40 sps:$4 sm:$0xff]  }
 0x6b9   : > { %11811 = vmatpush1.bf16.msra.mxu1 %v16419_v62  ;;  %v16490_v62 = vld [vmem:[%s17250_s6 + $0x1014] ss:$40 sps:$4 sm:$0xff]  }
 0x6ba   : > { %12016 = vmatpush1.bf16.msra.mxu0 %v16422_v63  ;;  %11812 = vmatprep.subr.bf16.mxu1 %v16427_v5  ;;  %v16488_v63 = vld [vmem:[%s17250_s6 + $0x1010] ss:$40 sps:$4 sm:$0xff]   ;;  %v16493_v5 = vld [vmem:[%s17250_s6 + $0x105c] ss:$40 sps:$4 sm:$0xff]  }
 0x6bb   : > { %12017 = vmatprep.subr.bf16.mxu0 %v16430_v48  ;;  %v16496_v48 = vld [vmem:[%s17250_s6 + $0x1064] ss:$40 sps:$4 sm:$0xff]  }
 0x6bd   : > { %11813 = vmatpush1.bf16.msra.mxu1 %v16425_v12  ;;  %v16491_v12 = vld [vmem:[%s17250_s6 + $0x1058] ss:$40 sps:$4 sm:$0xff]  }
 0x6be   : > { %12018 = vmatpush1.bf16.msra.mxu0 %v16428_v11  ;;  %11814 = vmatprep.subr.bf16.mxu1 %v16433_v15  ;;  %v16494_v11 = vld [vmem:[%s17250_s6 + $0x1060] ss:$40 sps:$4 sm:$0xff]   ;;  %v16499_v15 = vld [vmem:[%s17250_s6 + $0x10ac] ss:$40 sps:$4 sm:$0xff]  }
 0x6bf   : > { %12019 = vmatprep.subr.bf16.mxu0 %v16436_v0  ;;  %v16502_v0 = vld [vmem:[%s17250_s6 + $0x10b4] ss:$40 sps:$4 sm:$0xff]  }
 0x6c1   : > { %11815 = vmatpush1.bf16.msra.mxu1 %v16431_v29  ;;  %v16497_v29 = vld [vmem:[%s17250_s6 + $0x10a8] ss:$40 sps:$4 sm:$0xff]  }
 0x6c2   : > { %12020 = vmatpush1.bf16.msra.mxu0 %v16434_v46  ;;  %11816 = vmatprep.subr.bf16.mxu1 %v16439_v1  ;;  %v16500_v46 = vld [vmem:[%s17250_s6 + $0x10b0] ss:$40 sps:$4 sm:$0xff]   ;;  %v16505_v1 = vld [vmem:[%s17250_s6 + $0x10fc] ss:$40 sps:$4 sm:$0xff]  }
 0x6c3   : > { %12021 = vmatprep.subr.bf16.mxu0 %v16442_v4 }
 0x6c5   : > { %11817 = vmatpush1.bf16.msra.mxu1 %v16437_v7  ;;  %v16508_v7 = vld [vmem:[%s17250_s6 + $0x1104] ss:$40 sps:$4 sm:$0xff]  }
 0x6c6   : > { %12022 = vmatpush1.bf16.msra.mxu0 %v16440_v13  ;;  %11818 = vmatprep.subr.bf16.mxu1 %v16445_v17 }
 0x6c7   : > { %12023 = vmatprep.subr.bf16.mxu0 %v16448_v49 }
 0x6c9   : > { %11819 = vmatpush1.bf16.msra.mxu1 %v16443_v19 }
 0x6ca   : > { %12024 = vmatpush1.bf16.msra.mxu0 %v16446_v20  ;;  %11820 = vmatprep.subr.bf16.mxu1 %v16451_v23 }
 0x6cb   : > { %12025 = vmatprep.subr.bf16.mxu0 %v16454_v24  ;;  %v16503_v24 = vld [vmem:[%s17250_s6 + $0x10f8] ss:$40 sps:$4 sm:$0xff]  }
 0x6cd   : > { %11821 = vmatpush1.bf16.msra.mxu1 %v16449_v9 }
 0x6ce   : > { %12026 = vmatpush1.bf16.msra.mxu0 %v16452_v43  ;;  %11822 = vmatprep.subr.bf16.mxu1 %v16457_v10  ;;  %v16506_v43 = vld [vmem:[%s17250_s6 + $0x1100] ss:$40 sps:$4 sm:$0xff]   ;;  %v16511_v10 = vld [vmem:[%s17250_s6 + $0x114c] ss:$40 sps:$4 sm:$0xff]  }
 0x6cf   : > { %12027 = vmatprep.subr.bf16.mxu0 %v16460_v28 }
 0x6d1   : > { %11823 = vmatpush1.bf16.msra.mxu1 %v16455_v33  ;;  %v16509_v33 = vld [vmem:[%s17250_s6 + $0x1148] ss:$40 sps:$4 sm:$0xff]  }
 0x6d2   : > { %12028 = vmatpush1.bf16.msra.mxu0 %v16458_v39  ;;  %11824 = vmatprep.subr.bf16.mxu1 %v16463_v32  ;;  %v16512_v39 = vld [vmem:[%s17250_s6 + $0x1150] ss:$40 sps:$4 sm:$0xff]   ;;  %v16517_v32 = vld [vmem:[%s17250_s6 + $0x119c] ss:$40 sps:$4 sm:$0xff]  }
 0x6d3   : > { %12029 = vmatprep.subr.bf16.mxu0 %v16466_v31  ;;  %v16520_v31 = vld [vmem:[%s17250_s6 + $0x11a4] ss:$40 sps:$4 sm:$0xff]  }
 0x6d5   : > { %11825 = vmatpush1.bf16.msra.mxu1 %v16461_v51  ;;  %v16515_v51 = vld [vmem:[%s17250_s6 + $0x1198] ss:$40 sps:$4 sm:$0xff]  }
 0x6d6   : > { %12030 = vmatpush1.bf16.msra.mxu0 %v16464_v30  ;;  %11876 = vmatprep.subr.bf16.mxu1 %v16469_v54  ;;  %v16518_v30 = vld [vmem:[%s17250_s6 + $0x11a0] ss:$40 sps:$4 sm:$0xff]   ;;  %v16523_v54 = vld [vmem:[%s17250_s6 + $0x11ec] ss:$40 sps:$4 sm:$0xff]  }
 0x6d7   : > { %12081 = vmatprep.subr.bf16.mxu0 %v16472_v60  ;;  %v16526_v60 = vld [vmem:[%s17250_s6 + $0x11f4] ss:$40 sps:$4 sm:$0xff]  }
 0x6d8   : > { %11827 = vmatmul.mubr.bf16.vlgmr.msra.gmra.mrb[48].mxu1 %v18167_v56 }
 0x6d9   : > { %12032 = vmatmul.mubr.bf16.vlgmr.msra.gmra.mrb[44].mxu0 %v18167_v56  ;;  %11877 = vmatpush1.bf16.msra.mxu1 %v16467_v55  ;;  %v16479_v56 = vld [vmem:[%s17250_s6 + $0xfb8] ss:$40 sps:$4 sm:$0xff]   ;;  %v16521_v55 = vld [vmem:[%s17250_s6 + $0x11e8] ss:$40 sps:$4 sm:$0xff]  }
 0x6da   : > { %11908 = vmatprep.mubr.bf16.mxu1 %v18273_v58  ;;  %12082 = vmatpush1.bf16.msra.mxu0 %v16470_v61  ;;  %v16524_v61 = vld [vmem:[%s17250_s6 + $0x11f0] ss:$40 sps:$4 sm:$0xff]  }
 0x6db   : > { %12113 = vmatprep.mubr.bf16.mxu0 %v18273_v58  ;;  %11878 = vmatprep.subr.bf16.mxu1 %v16475_v59  ;;  %v16485_v58 = vld [vmem:[%s17250_s6 + $0x1008] ss:$40 sps:$4 sm:$0xff]   ;;  %v16529_v59 = vld [vmem:[%s17250_s6 + $0x123c] ss:$40 sps:$4 sm:$0xff]  }
 0x6dc   : > { %12083 = vmatprep.subr.bf16.mxu0 %v16478_v57  ;;  %v16532_v57 = vld [vmem:[%s17250_s6 + $0x1244] ss:$40 sps:$4 sm:$0xff]  }
 0x6dd   : > { %11879 = vmatpush1.bf16.msra.mxu1 %v16473_v37  ;;  %v16527_v37 = vld [vmem:[%s17250_s6 + $0x1238] ss:$40 sps:$4 sm:$0xff]  }
 0x6de   : > { %12084 = vmatpush1.bf16.msra.mxu0 %v16476_v42  ;;  %11880 = vmatprep.subr.bf16.mxu1 %v16481_v22  ;;  %v16530_v42 = vld [vmem:[%s17250_s6 + $0x1240] ss:$40 sps:$4 sm:$0xff]   ;;  %v16535_v22 = vld [vmem:[%s17250_s6 + $0x128c] ss:$40 sps:$4 sm:$0xff]  }
 0x6df   : > { %12085 = vmatprep.subr.bf16.mxu0 %v16484_v6  ;;  %v16538_v6 = vld [vmem:[%s17250_s6 + $0x1294] ss:$40 sps:$4 sm:$0xff]  }
 0x6e1   : > { %11881 = vmatpush1.bf16.msra.mxu1 %v16479_v56  ;;  %v16533_v56 = vld [vmem:[%s17250_s6 + $0x1288] ss:$40 sps:$4 sm:$0xff]  }
 0x6e2   : > { %12086 = vmatpush1.bf16.msra.mxu0 %v16482_v47  ;;  %11882 = vmatprep.subr.bf16.mxu1 %v16487_v53  ;;  %v16536_v47 = vld [vmem:[%s17250_s6 + $0x1290] ss:$40 sps:$4 sm:$0xff]   ;;  %v16541_v53 = vld [vmem:[%s17250_s6 + $0x12dc] ss:$40 sps:$4 sm:$0xff]  }
 0x6e3   : > { %12087 = vmatprep.subr.bf16.mxu0 %v16490_v62  ;;  %v16544_v62 = vld [vmem:[%s17250_s6 + $0x12e4] ss:$40 sps:$4 sm:$0xff]  }
 0x6e5   : > { %11883 = vmatpush1.bf16.msra.mxu1 %v16485_v58  ;;  %v16539_v58 = vld [vmem:[%s17250_s6 + $0x12d8] ss:$40 sps:$4 sm:$0xff]  }
 0x6e6   : > { %12088 = vmatpush1.bf16.msra.mxu0 %v16488_v63  ;;  %11884 = vmatprep.subr.bf16.mxu1 %v16493_v5  ;;  %v16542_v63 = vld [vmem:[%s17250_s6 + $0x12e0] ss:$40 sps:$4 sm:$0xff]   ;;  %v16547_v5 = vld [vmem:[%s17250_s6 + $0x132c] ss:$40 sps:$4 sm:$0xff]  }
 0x6e7   : > { %12089 = vmatprep.subr.bf16.mxu0 %v16496_v48  ;;  %v16550_v48 = vld [vmem:[%s17250_s6 + $0x1334] ss:$40 sps:$4 sm:$0xff]  }
 0x6e9   : > { %11885 = vmatpush1.bf16.msra.mxu1 %v16491_v12  ;;  %v16545_v12 = vld [vmem:[%s17250_s6 + $0x1328] ss:$40 sps:$4 sm:$0xff]  }
 0x6ea   : > { %12090 = vmatpush1.bf16.msra.mxu0 %v16494_v11  ;;  %11886 = vmatprep.subr.bf16.mxu1 %v16499_v15  ;;  %v16548_v11 = vld [vmem:[%s17250_s6 + $0x1330] ss:$40 sps:$4 sm:$0xff]   ;;  %v16553_v15 = vld [vmem:[%s17250_s6 + $0x137c] ss:$40 sps:$4 sm:$0xff]  }
 0x6eb   : > { %v11582_v4 = vpop.f32.mrb[36].mxu1  ;;  %12091 = vmatprep.subr.bf16.mxu0 %v16502_v0  ;;  %v16556_v0 = vld [vmem:[%s17250_s6 + $0x1384] ss:$40 sps:$4 sm:$0xff]  }
 0x6ec   : > { %v19000_v13 = vadd.f32 %v18842_v38, %v11582_v4  ;;  %v19002_v17 = vpop.f32.mrb[32].mxu0  ;;  %v11584_v49 = vpop.f32.mrb[37].mxu1  ;;  %v16562_v4 = vld [vmem:[%s17250_s6 + $0x13d4] ss:$40 sps:$4 sm:$0xff]  }
 0x6ed   : > { %v19005_v19 = vadd.f32 %v18846_v50, %v11584_v49  ;;  %v19007_v20 = vpop.f32.mrb[33].mxu0  ;;  %v11586_v23 = vpop.f32.mrb[38].mxu1  ;;  %11887 = vmatpush1.bf16.msra.mxu1 %v16497_v29  ;;  %v16514_v50 = vld [vmem:[%s17250_s6 + $0x1154] ss:$40 sps:$4 sm:$0xff]   ;;  %v16551_v29 = vld [vmem:[%s17250_s6 + $0x1378] ss:$40 sps:$4 sm:$0xff]  }
 0x6ee   : > { %v11791_v9 = vpop.f32.mrb[34].mxu0  ;;  %12092 = vmatpush1.bf16.msra.mxu0 %v16500_v46  ;;  %v11587_v38 = vpop.f32.mrb[39].mxu1  ;;  %11888 = vmatprep.subr.bf16.mxu1 %v16505_v1  ;;  %v16554_v46 = vld [vmem:[%s17250_s6 + $0x1380] ss:$40 sps:$4 sm:$0xff]   ;;  %v16559_v1 = vld [vmem:[%s17250_s6 + $0x13cc] ss:$40 sps:$4 sm:$0xff]  }
 0x6ef   : > { %v11792_v28 = vpop.f32.mrb[35].mxu0  ;;  %12093 = vmatprep.subr.bf16.mxu0 %v16508_v7  ;;  %v16557_v7 = vld [vmem:[%s17250_s6 + $0x13c8] ss:$40 sps:$4 sm:$0xff]   ;;  %v16565_v23 = vld [vmem:[%s17250_s6 + $0x24] ss:$40 sps:$4 sm:$0xff]  }
 0x6f0   : > { %v16560_v49 = vld [vmem:[%s17250_s6 + $0x13d0] ss:$40 sps:$4 sm:$0xff]   ;;  %v16568_v9 = vld [vmem:[%s17250_s6 + $0x74] ss:$40 sps:$4 sm:$0xff]  }
 0x6f1   : > { %11889 = vmatpush1.bf16.msra.mxu1 %v16503_v24  ;;  %v16563_v24 = vld [vmem:[%s17250_s6 + $0x20] ss:$40 sps:$4 sm:$0xff]   ;;  %v16566_v38 = vld [vmem:[%s17250_s6 + $0x70] ss:$40 sps:$4 sm:$0xff]   ;;  %v16574_v28 = vld [vmem:[%s17250_s6 + $0x114] ss:$40 sps:$4 sm:$0xff]  }
 0x6f2   : > { %12094 = vmatpush1.bf16.msra.mxu0 %v16506_v43  ;;  %11890 = vmatprep.subr.bf16.mxu1 %v16511_v10  ;;  %v16571_v43 = vld [vmem:[%s17250_s6 + $0xc4] ss:$40 sps:$4 sm:$0xff]   ;;  %v16569_v10 = vld [vmem:[%s17250_s6 + $0xc0] ss:$40 sps:$4 sm:$0xff]  }
 0x6f3   : > { %12095 = vmatprep.subr.bf16.mxu0 %v16514_v50  ;;  %v16572_v50 = vld [vmem:[%s17250_s6 + $0x110] ss:$40 sps:$4 sm:$0xff]  }
 0x6f5   : > { %11891 = vmatpush1.bf16.msra.mxu1 %v16509_v33  ;;  %v16577_v33 = vld [vmem:[%s17250_s6 + $0x164] ss:$40 sps:$4 sm:$0xff]  }
 0x6f6   : > { %12096 = vmatpush1.bf16.msra.mxu0 %v16512_v39  ;;  %11892 = vmatprep.subr.bf16.mxu1 %v16517_v32  ;;  %v16580_v39 = vld [vmem:[%s17250_s6 + $0x1b4] ss:$40 sps:$4 sm:$0xff]   ;;  %v16583_v32 = vld [vmem:[%s17250_s6 + $0x204] ss:$40 sps:$4 sm:$0xff]  }
 0x6f7   : > { %12097 = vmatprep.subr.bf16.mxu0 %v16520_v31 }
 0x6f9   : > { %11893 = vmatpush1.bf16.msra.mxu1 %v16515_v51 }
 0x6fa   : > { %12098 = vmatpush1.bf16.msra.mxu0 %v16518_v30  ;;  %11894 = vmatprep.subr.bf16.mxu1 %v16523_v54 }
 0x6fb   : > { %12099 = vmatprep.subr.bf16.mxu0 %v16526_v60 }
 0x6fd   : > { %11895 = vmatpush1.bf16.msra.mxu1 %v16521_v55 }
 0x6fe   : > { %12100 = vmatpush1.bf16.msra.mxu0 %v16524_v61  ;;  %11896 = vmatprep.subr.bf16.mxu1 %v16529_v59  ;;  %v16581_v59 = vld [vmem:[%s17250_s6 + $0x200] ss:$40 sps:$4 sm:$0xff]  }
 0x6ff   : > { %12101 = vmatprep.subr.bf16.mxu0 %v16532_v57 }
 0x701   : > { %11897 = vmatpush1.bf16.msra.mxu1 %v16527_v37 }
 0x702   : > { %12102 = vmatpush1.bf16.msra.mxu0 %v16530_v42  ;;  %11898 = vmatprep.subr.bf16.mxu1 %v16535_v22 }
 0x703   : > { %12103 = vmatprep.subr.bf16.mxu0 %v16538_v6  ;;  %v16584_v6 = vld [vmem:[%s17250_s6 + $0x250] ss:$40 sps:$4 sm:$0xff]  }
 0x705   : > { %11899 = vmatpush1.bf16.msra.mxu1 %v16533_v56  ;;  %v16589_v56 = vld [vmem:[%s17250_s6 + $0x2a4] ss:$40 sps:$4 sm:$0xff]  }
 0x706   : > { %12104 = vmatpush1.bf16.msra.mxu0 %v16536_v47  ;;  %11900 = vmatprep.subr.bf16.mxu1 %v16541_v53  ;;  %v16587_v47 = vld [vmem:[%s17250_s6 + $0x2a0] ss:$40 sps:$4 sm:$0xff]   ;;  %v16592_v53 = vld [vmem:[%s17250_s6 + $0x2f4] ss:$40 sps:$4 sm:$0xff]  }
 0x707   : > { %12105 = vmatprep.subr.bf16.mxu0 %v16544_v62  ;;  %v16595_v62 = vld [vmem:[%s17250_s6 + $0x344] ss:$40 sps:$4 sm:$0xff]  }
 0x709   : > { %11901 = vmatpush1.bf16.msra.mxu1 %v16539_v58  ;;  %v16598_v58 = vld [vmem:[%s17250_s6 + $0x394] ss:$40 sps:$4 sm:$0xff]  }
 0x70a   : > { %12106 = vmatpush1.bf16.msra.mxu0 %v16542_v63  ;;  %11902 = vmatprep.subr.bf16.mxu1 %v16547_v5  ;;  %v16596_v63 = vld [vmem:[%s17250_s6 + $0x390] ss:$40 sps:$4 sm:$0xff]   ;;  %v16601_v5 = vld [vmem:[%s17250_s6 + $0x3e4] ss:$40 sps:$4 sm:$0xff]  }
 0x70b   : > { %12107 = vmatprep.subr.bf16.mxu0 %v16550_v48  ;;  %v16599_v48 = vld [vmem:[%s17250_s6 + $0x3e0] ss:$40 sps:$4 sm:$0xff]  }
 0x70d   : > { %11903 = vmatpush1.bf16.msra.mxu1 %v16545_v12  ;;  %v16604_v12 = vld [vmem:[%s17250_s6 + $0x434] ss:$40 sps:$4 sm:$0xff]  }
 0x70e   : > { %12108 = vmatpush1.bf16.msra.mxu0 %v16548_v11  ;;  %11904 = vmatprep.subr.bf16.mxu1 %v16553_v15  ;;  %v16602_v11 = vld [vmem:[%s17250_s6 + $0x430] ss:$40 sps:$4 sm:$0xff]   ;;  %v16607_v15 = vld [vmem:[%s17250_s6 + $0x484] ss:$40 sps:$4 sm:$0xff]  }
 0x70f   : > { %12109 = vmatprep.subr.bf16.mxu0 %v16556_v0  ;;  %v16605_v0 = vld [vmem:[%s17250_s6 + $0x480] ss:$40 sps:$4 sm:$0xff]  }
 0x711   : > { %11905 = vmatpush1.bf16.msra.mxu1 %v16551_v29  ;;  %v16610_v29 = vld [vmem:[%s17250_s6 + $0x4d4] ss:$40 sps:$4 sm:$0xff]  }
 0x712   : > { %12110 = vmatpush1.bf16.msra.mxu0 %v16554_v46  ;;  %11906 = vmatprep.subr.bf16.mxu1 %v16559_v1  ;;  %v16608_v46 = vld [vmem:[%s17250_s6 + $0x4d0] ss:$40 sps:$4 sm:$0xff]   ;;  %v16613_v1 = vld [vmem:[%s17250_s6 + $0xa24] ss:$40 sps:$4 sm:$0xff]  }
 0x713   : > { %12111 = vmatprep.subr.bf16.mxu0 %v16562_v4  ;;  %v16611_v4 = vld [vmem:[%s17250_s6 + $0xa20] ss:$40 sps:$4 sm:$0xff]  }
 0x715   : > { %11907 = vmatpush1.bf16.msra.mxu1 %v16557_v7  ;;  %v16616_v7 = vld [vmem:[%s17250_s6 + $0xa74] ss:$40 sps:$4 sm:$0xff]  }
 0x716   : > { %12112 = vmatpush1.bf16.msra.mxu0 %v16560_v49  ;;  %11958 = vmatprep.subr.bf16.mxu1 %v16565_v23  ;;  %v16614_v49 = vld [vmem:[%s17250_s6 + $0xa70] ss:$40 sps:$4 sm:$0xff]   ;;  %v16619_v23 = vld [vmem:[%s17250_s6 + $0xac4] ss:$40 sps:$4 sm:$0xff]  }
 0x718   : > { %11909 = vmatmul.mubr.bf16.vlgmr.msra.gmra.mrb[52].mxu1 %v18348_v40 }
 0x719   : > { %12114 = vmatmul.mubr.bf16.vlgmr.msra.gmra.mrb[48].mxu0 %v18348_v40  ;;  %11959 = vmatpush1.bf16.msra.mxu1 %v16563_v24  ;;  %v16575_v40 = vld [vmem:[%s17250_s6 + $0x160] ss:$40 sps:$4 sm:$0xff]  }
 0x71a   : > { %11990 = vmatprep.mubr.bf16.mxu1 %v18010_v3  ;;  %11960 = vmatprep.subr.bf16.mxu1 %v16568_v9  ;;  %v16578_v3 = vld [vmem:[%s17250_s6 + $0x1b0] ss:$40 sps:$4 sm:$0xff]   ;;  %v16617_v24 = vld [vmem:[%s17250_s6 + $0xac0] ss:$40 sps:$4 sm:$0xff]   ;;  %v16622_v9 = vld [vmem:[%s17250_s6 + $0xb14] ss:$40 sps:$4 sm:$0xff]  }
 0x71d   : > { %11961 = vmatpush1.bf16.msra.mxu1 %v16566_v38  ;;  %v16620_v38 = vld [vmem:[%s17250_s6 + $0xb10] ss:$40 sps:$4 sm:$0xff]  }
 0x71e   : > { %11962 = vmatprep.subr.bf16.mxu1 %v16571_v43  ;;  %v16625_v43 = vld [vmem:[%s17250_s6 + $0xb64] ss:$40 sps:$4 sm:$0xff]  }
 0x721   : > { %11963 = vmatpush1.bf16.msra.mxu1 %v16569_v10  ;;  %v16623_v10 = vld [vmem:[%s17250_s6 + $0xb60] ss:$40 sps:$4 sm:$0xff]  }
 0x722   : > { %11964 = vmatprep.subr.bf16.mxu1 %v16574_v28  ;;  %v16631_v28 = vld [vmem:[%s17250_s6 + $0xc04] ss:$40 sps:$4 sm:$0xff]  }
 0x725   : > { %11965 = vmatpush1.bf16.msra.mxu1 %v16572_v50  ;;  %v6322_v50 = vld [vmem:[#allocation11 + $0x20] sm:$0xff] }
 0x726   : > { %11966 = vmatprep.subr.bf16.mxu1 %v16577_v33 }
 0x729   : > { %11967 = vmatpush1.bf16.msra.mxu1 %v16575_v40 }
 0x72a   : > { %11968 = vmatprep.subr.bf16.mxu1 %v16580_v39 }
 0x72b   : > { %v11664_v31 = vpop.f32.mrb[40].mxu1 }
 0x72c   : > { %v11665_v51 = vadd.f32 %v11664_v31, %v19000_v13  ;;  %v19064_v30 = vpop.f32.mrb[36].mxu0  ;;  %v11666_v54 = vpop.f32.mrb[41].mxu1  ;;  %v16586_v13 = vld [vmem:[%s17250_s6 + $0x254] ss:$40 sps:$4 sm:$0xff]  }
 0x72d   : > { %v11667_v60 = vadd.f32 %v11666_v54, %v19005_v19  ;;  %v19067_v55 = vpop.f32.mrb[37].mxu0  ;;  %v11668_v61 = vpop.f32.mrb[42].mxu1  ;;  %11969 = vmatpush1.bf16.msra.mxu1 %v16578_v3  ;;  %v6323_v3 = vld [vmem:[#allocation11 + $0x28] sm:$0xff] }
 0x72e   : > { %v11873_v57 = vpop.f32.mrb[38].mxu0  ;;  %v11669_v37 = vpop.f32.mrb[43].mxu1  ;;  %11970 = vmatprep.subr.bf16.mxu1 %v16583_v32  ;;  %v19072_v42 = vadd.f32 %v18924_v14, %v11665_v51  ;;  %v16590_v14 = vld [vmem:[%s17250_s6 + $0x2f0] ss:$40 sps:$4 sm:$0xff]  }
 0x72f   : > { %v11874_v22 = vpop.f32.mrb[39].mxu0  ;;  %v19075_v19 = vadd.f32 %v18927_v34, %v11667_v60  ;;  %v16593_v34 = vld [vmem:[%s17250_s6 + $0x340] ss:$40 sps:$4 sm:$0xff]   ;;  %v16634_v37 = vld [vmem:[%s17250_s6 + $0xc54] ss:$40 sps:$4 sm:$0xff]  }
 0x730   : > { %v16629_v60 = vld [vmem:[%s17250_s6 + $0xc00] ss:$40 sps:$4 sm:$0xff]   ;;  %v16632_v22 = vld [vmem:[%s17250_s6 + $0xc50] ss:$40 sps:$4 sm:$0xff]  }
 0x731   : > { %11971 = vmatpush1.bf16.msra.mxu1 %v16581_v59 }
 0x732   : > { %11972 = vmatprep.subr.bf16.mxu1 %v16586_v13 }
 0x735   : > { %11973 = vmatpush1.bf16.msra.mxu1 %v16584_v6  ;;  %v16635_v6 = vld [vmem:[%s17250_s6 + $0xca0] ss:$40 sps:$4 sm:$0xff]  }
 0x736   : > { %11974 = vmatprep.subr.bf16.mxu1 %v16589_v56  ;;  %v16640_v56 = vld [vmem:[%s17250_s6 + $0xcf4] ss:$40 sps:$4 sm:$0xff]  }
 0x739   : > { %11975 = vmatpush1.bf16.msra.mxu1 %v16587_v47  ;;  %v16638_v47 = vld [vmem:[%s17250_s6 + $0xcf0] ss:$40 sps:$4 sm:$0xff]  }
 0x73a   : > { %11976 = vmatprep.subr.bf16.mxu1 %v16592_v53  ;;  %v16643_v53 = vld [vmem:[%s17250_s6 + $0xd44] ss:$40 sps:$4 sm:$0xff]  }
 0x73d   : > { %11977 = vmatpush1.bf16.msra.mxu1 %v16590_v14  ;;  %v16641_v14 = vld [vmem:[%s17250_s6 + $0xd40] ss:$40 sps:$4 sm:$0xff]  }
 0x73e   : > { %11978 = vmatprep.subr.bf16.mxu1 %v16595_v62  ;;  %v16646_v62 = vld [vmem:[%s17250_s6 + $0xd94] ss:$40 sps:$4 sm:$0xff]  }
 0x741   : > { %11979 = vmatpush1.bf16.msra.mxu1 %v16593_v34  ;;  %v16644_v34 = vld [vmem:[%s17250_s6 + $0xd90] ss:$40 sps:$4 sm:$0xff]  }
 0x742   : > { %11980 = vmatprep.subr.bf16.mxu1 %v16598_v58  ;;  %v16649_v58 = vld [vmem:[%s17250_s6 + $0xde4] ss:$40 sps:$4 sm:$0xff]  }
 0x745   : > { %11981 = vmatpush1.bf16.msra.mxu1 %v16596_v63  ;;  %v16647_v63 = vld [vmem:[%s17250_s6 + $0xde0] ss:$40 sps:$4 sm:$0xff]  }
 0x746   : > { %11982 = vmatprep.subr.bf16.mxu1 %v16601_v5  ;;  %v16652_v5 = vld [vmem:[%s17250_s6 + $0xe34] ss:$40 sps:$4 sm:$0xff]  }
 0x749   : > { %11983 = vmatpush1.bf16.msra.mxu1 %v16599_v48  ;;  %v16650_v48 = vld [vmem:[%s17250_s6 + $0xe30] ss:$40 sps:$4 sm:$0xff]  }
 0x74a   : > { %11984 = vmatprep.subr.bf16.mxu1 %v16604_v12  ;;  %v16655_v12 = vld [vmem:[%s17250_s6 + $0xe84] ss:$40 sps:$4 sm:$0xff]  }
 0x74d   : > { %11985 = vmatpush1.bf16.msra.mxu1 %v16602_v11  ;;  %v16653_v11 = vld [vmem:[%s17250_s6 + $0xe80] ss:$40 sps:$4 sm:$0xff]  }
 0x74e   : > { %11986 = vmatprep.subr.bf16.mxu1 %v16607_v15  ;;  %v16658_v15 = vld [vmem:[%s17250_s6 + $0xed4] ss:$40 sps:$4 sm:$0xff]  }
 0x751   : > { %11987 = vmatpush1.bf16.msra.mxu1 %v16605_v0  ;;  %v16656_v0 = vld [vmem:[%s17250_s6 + $0xed0] ss:$40 sps:$4 sm:$0xff]  }
 0x752   : > { %11988 = vmatprep.subr.bf16.mxu1 %v16610_v29  ;;  %v16661_v29 = vld [vmem:[%s17250_s6 + $0x1424] ss:$40 sps:$4 sm:$0xff]  }
 0x755   : > { %11989 = vmatpush1.bf16.msra.mxu1 %v16608_v46  ;;  %v16659_v46 = vld [vmem:[%s17250_s6 + $0x1420] ss:$40 sps:$4 sm:$0xff]  }
 0x756   : > { %12040 = vmatprep.subr.bf16.mxu1 %v16613_v1  ;;  %v16664_v1 = vld [vmem:[%s17250_s6 + $0x1474] ss:$40 sps:$4 sm:$0xff]  }
 0x758   : > { %11991 = vmatmul.mubr.bf16.vlgmr.msra.gmra.mrb[56].mxu1 %v18088_v27  ;;  %v16628_v27 = vld [vmem:[%s17250_s6 + $0xbb4] ss:$40 sps:$4 sm:$0xff]  }
 0x759   : > { %12041 = vmatpush1.bf16.msra.mxu1 %v16611_v4  ;;  %12072 = vmatprep.mubr.bf16.mxu1 %v18264_v52  ;;  %v16626_v52 = vld [vmem:[%s17250_s6 + $0xbb0] ss:$40 sps:$4 sm:$0xff]  }
 0x75a   : > { %12042 = vmatprep.subr.bf16.mxu1 %v16616_v7  ;;  %v16662_v4 = vld [vmem:[%s17250_s6 + $0x1470] ss:$40 sps:$4 sm:$0xff]   ;;  %v16667_v7 = vld [vmem:[%s17250_s6 + $0x14c4] ss:$40 sps:$4 sm:$0xff]  }
 0x75d   : > { %12043 = vmatpush1.bf16.msra.mxu1 %v16614_v49  ;;  %v16665_v49 = vld [vmem:[%s17250_s6 + $0x14c0] ss:$40 sps:$4 sm:$0xff]  }
 0x75e   : > { %12044 = vmatprep.subr.bf16.mxu1 %v16619_v23  ;;  %v16670_v23 = vld [vmem:[%s17250_s6 + $0x1514] ss:$40 sps:$4 sm:$0xff]  }
 0x761   : > { %12045 = vmatpush1.bf16.msra.mxu1 %v16617_v24  ;;  %v16668_v24 = vld [vmem:[%s17250_s6 + $0x1510] ss:$40 sps:$4 sm:$0xff]  }
 0x762   : > { %12046 = vmatprep.subr.bf16.mxu1 %v16622_v9  ;;  %v16673_v9 = vld [vmem:[%s17250_s6 + $0x1564] ss:$40 sps:$4 sm:$0xff]  }
 0x765   : > { %12047 = vmatpush1.bf16.msra.mxu1 %v16620_v38  ;;  %v16676_v38 = vld [vmem:[%s17250_s6 + $0x15b4] ss:$40 sps:$4 sm:$0xff]  }
 0x766   : > { %12048 = vmatprep.subr.bf16.mxu1 %v16625_v43  ;;  %v16679_v43 = vld [vmem:[%s17250_s6 + $0x1604] ss:$40 sps:$4 sm:$0xff]  }
 0x769   : > { %12049 = vmatpush1.bf16.msra.mxu1 %v16623_v10 }
 0x76a   : > { %12050 = vmatprep.subr.bf16.mxu1 %v16628_v27 }
 0x76b   : > { %v11746_v33 = vpop.f32.mrb[44].mxu1 }
 0x76c   : > { %v11747_v40 = vadd.f32 %v11746_v33, %v19072_v42  ;;  %v19110_v39 = vpop.f32.mrb[40].mxu0  ;;  %v11748_v32 = vpop.f32.mrb[45].mxu1 }
 0x76d   : > { %v11749_v31 = vadd.f32 %v11748_v32, %v19075_v19  ;;  %v19113_v51 = vpop.f32.mrb[41].mxu0  ;;  %v11750_v54 = vpop.f32.mrb[46].mxu1  ;;  %12051 = vmatpush1.bf16.msra.mxu1 %v16626_v52  ;;  %v16637_v19 = vld [vmem:[%s17250_s6 + $0xca4] ss:$40 sps:$4 sm:$0xff]  }
 0x76e   : > { %v12167_v61 = vadd.f32 %v11747_v40, %v6322_v50  ;;  %v11955_v59 = vpop.f32.mrb[42].mxu0  ;;  %v11751_v57 = vpop.f32.mrb[47].mxu1  ;;  %12052 = vmatprep.subr.bf16.mxu1 %v16631_v28 }
 0x76f   : > { %v12168_v13 = vadd.f32 %v11749_v31, %v6323_v3  ;;  %v11956_v42 = vpop.f32.mrb[43].mxu0  ;;  %v16677_v3 = vld [vmem:[%s17250_s6 + $0x1600] ss:$40 sps:$4 sm:$0xff]   ;;  %v16685_v59 = vld [vmem:[%s17250_s6 + $0x16a4] ss:$40 sps:$4 sm:$0xff]  }
 0x770   : > { %12177 = vst [vmem:[#allocation11 + $0x20] sm:$0xff] %v12167_v61  ;;  %v16683_v57 = vld [vmem:[%s17250_s6 + $0x16a0] ss:$40 sps:$4 sm:$0xff]   ;;  %v16694_v42 = vld [vmem:[%s17250_s6 + $0x1794] ss:$40 sps:$4 sm:$0xff]  }
 0x771   : > { %12178 = vst [vmem:[#allocation11 + $0x28] sm:$0xff] %v12168_v13  ;;  %12053 = vmatpush1.bf16.msra.mxu1 %v16629_v60  ;;  %v16686_v13 = vld [vmem:[%s17250_s6 + $0x16f0] ss:$40 sps:$4 sm:$0xff]  }
 0x772   : > { %12054 = vmatprep.subr.bf16.mxu1 %v16634_v37  ;;  %v16688_v37 = vld [vmem:[%s17250_s6 + $0x16f4] ss:$40 sps:$4 sm:$0xff]  }
 0x775   : > { %12055 = vmatpush1.bf16.msra.mxu1 %v16632_v22  ;;  %v16692_v22 = vld [vmem:[%s17250_s6 + $0x1790] ss:$40 sps:$4 sm:$0xff]  }
 0x776   : > { %12056 = vmatprep.subr.bf16.mxu1 %v16637_v19  ;;  %v16697_v19 = vld [vmem:[%s17250_s6 + $0x17e4] ss:$40 sps:$4 sm:$0xff]  }
 0x779   : > { %12057 = vmatpush1.bf16.msra.mxu1 %v16635_v6  ;;  %v16695_v6 = vld [vmem:[%s17250_s6 + $0x17e0] ss:$40 sps:$4 sm:$0xff]  }
 0x77a   : > { %12058 = vmatprep.subr.bf16.mxu1 %v16640_v56  ;;  %v16700_v56 = vld [vmem:[%s17250_s6 + $0x1834] ss:$40 sps:$4 sm:$0xff]  }
 0x77d   : > { %12059 = vmatpush1.bf16.msra.mxu1 %v16638_v47  ;;  %v16698_v47 = vld [vmem:[%s17250_s6 + $0x1830] ss:$40 sps:$4 sm:$0xff]  }
 0x77e   : > { %12060 = vmatprep.subr.bf16.mxu1 %v16643_v53  ;;  %v16703_v53 = vld [vmem:[%s17250_s6 + $0x1884] ss:$40 sps:$4 sm:$0xff]  }
 0x781   : > { %12061 = vmatpush1.bf16.msra.mxu1 %v16641_v14  ;;  %v16701_v14 = vld [vmem:[%s17250_s6 + $0x1880] ss:$40 sps:$4 sm:$0xff]  }
 0x782   : > { %12062 = vmatprep.subr.bf16.mxu1 %v16646_v62  ;;  %v16706_v62 = vld [vmem:[%s17250_s6 + $0x18d4] ss:$40 sps:$4 sm:$0xff]  }
 0x785   : > { %12063 = vmatpush1.bf16.msra.mxu1 %v16644_v34  ;;  %v16704_v34 = vld [vmem:[%s17250_s6 + $0x18d0] ss:$40 sps:$4 sm:$0xff]  }
 0x786   : > { %12064 = vmatprep.subr.bf16.mxu1 %v16649_v58 }
 0x789   : > { %12065 = vmatpush1.bf16.msra.mxu1 %v16647_v63 }
 0x78a   : > { %12066 = vmatprep.subr.bf16.mxu1 %v16652_v5 }
 0x78d   : > { %12067 = vmatpush1.bf16.msra.mxu1 %v16650_v48 }
 0x78e   : > { %12068 = vmatprep.subr.bf16.mxu1 %v16655_v12  ;;  %v6324_v12 = vld [vmem:[#allocation11 + $0x30] sm:$0xff] }
 0x791   : > { %12069 = vmatpush1.bf16.msra.mxu1 %v16653_v11 }
 0x792   : > { %12070 = vmatprep.subr.bf16.mxu1 %v16658_v15 }
 0x795   : > { %12071 = vmatpush1.bf16.msra.mxu1 %v16656_v0 }
 0x796   : > { %12122 = vmatprep.subr.bf16.mxu1 %v16661_v29 }
 0x798   : > { %12073 = vmatmul.mubr.bf16.vlgmr.msra.gmra.mrb[60].mxu1 %v18268_v44  ;;  %v16671_v44 = vld [vmem:[%s17250_s6 + $0x1560] ss:$40 sps:$4 sm:$0xff]  }
 0x799   : > { %12123 = vmatpush1.bf16.msra.mxu1 %v16659_v46  ;;  %12154 = vmatprep.mubr.bf16.mxu1 %v18523_v16  ;;  %v16674_v16 = vld [vmem:[%s17250_s6 + $0x15b0] ss:$40 sps:$4 sm:$0xff]   ;;  %v6325_v46 = vld [vmem:[#allocation11 + $0x38] sm:$0xff] }
 0x79a   : > { %12124 = vmatprep.subr.bf16.mxu1 %v16664_v1 }
 0x79d   : > { %12125 = vmatpush1.bf16.msra.mxu1 %v16662_v4 }
 0x79e   : > { %12126 = vmatprep.subr.bf16.mxu1 %v16667_v7 }
 0x7a1   : > { %12127 = vmatpush1.bf16.msra.mxu1 %v16665_v49 }
 0x7a2   : > { %12128 = vmatprep.subr.bf16.mxu1 %v16670_v23 }
 0x7a5   : > { %12129 = vmatpush1.bf16.msra.mxu1 %v16668_v24 }
 0x7a6   : > { %12130 = vmatprep.subr.bf16.mxu1 %v16673_v9 }
 0x7a9   : > { %12131 = vmatpush1.bf16.msra.mxu1 %v16671_v44 }
 0x7aa   : > { %12132 = vmatprep.subr.bf16.mxu1 %v16676_v38 }
 0x7ab   : > { %v11828_v10 = vpop.f32.mrb[48].mxu1 }
 0x7ac   : > { %v11829_v27 = vadd.f32 %v11828_v10, %v19002_v17  ;;  %v19150_v52 = vpop.f32.mrb[44].mxu0  ;;  %v11830_v28 = vpop.f32.mrb[49].mxu1  ;;  %v16682_v17 = vld [vmem:[%s17250_s6 + $0x1654] ss:$40 sps:$4 sm:$0xff]  }
 0x7ad   : > { %v11831_v50 = vadd.f32 %v11830_v28, %v19007_v20  ;;  %v19153_v33 = vpop.f32.mrb[45].mxu0  ;;  %v11832_v40 = vpop.f32.mrb[50].mxu1  ;;  %12133 = vmatpush1.bf16.msra.mxu1 %v16674_v16  ;;  %v16680_v20 = vld [vmem:[%s17250_s6 + $0x1650] ss:$40 sps:$4 sm:$0xff]  }
 0x7ae   : > { %v12037_v32 = vpop.f32.mrb[46].mxu0  ;;  %v11833_v31 = vpop.f32.mrb[51].mxu1  ;;  %12134 = vmatprep.subr.bf16.mxu1 %v16679_v43  ;;  %v11870_v54 = vadd.f32 %v19064_v30, %v11829_v27  ;;  %v16691_v30 = vld [vmem:[%s17250_s6 + $0x1744] ss:$40 sps:$4 sm:$0xff]  }
 0x7af   : > { %v12038_v60 = vpop.f32.mrb[47].mxu0  ;;  %v11872_v61 = vadd.f32 %v19067_v55, %v11831_v50  ;;  %v16689_v55 = vld [vmem:[%s17250_s6 + $0x1740] ss:$40 sps:$4 sm:$0xff]  }
 0x7b0   : > { %v6326_v32 = vld [vmem:[#allocation11 + $0x40] sm:$0xff] }
 0x7b1   : > { %12135 = vmatpush1.bf16.msra.mxu1 %v16677_v3 }
 0x7b2   : > { %12136 = vmatprep.subr.bf16.mxu1 %v16682_v17 }
 0x7b5   : > { %12137 = vmatpush1.bf16.msra.mxu1 %v16680_v20 }
 0x7b6   : > { %12138 = vmatprep.subr.bf16.mxu1 %v16685_v59 }
 0x7b9   : > { %12139 = vmatpush1.bf16.msra.mxu1 %v16683_v57  ;;  %v12187_v57 = vld [vmem:[#allocation11] sm:$0xff] (!%p14097_p12) }
 0x7ba   : > { %12140 = vmatprep.subr.bf16.mxu1 %v16688_v37  ;;  %v12188_v37 = vld [vmem:[#allocation11 + $0x8] sm:$0xff] (!%p14097_p12) }
 0x7bd   : > { %12141 = vmatpush1.bf16.msra.mxu1 %v16686_v13  ;;  %v12189_v13 = vld [vmem:[#allocation11 + $0x10] sm:$0xff] (!%p14097_p12) }
 0x7be   : > { %12142 = vmatprep.subr.bf16.mxu1 %v16691_v30  ;;  %v12190_v30 = vld [vmem:[#allocation11 + $0x18] sm:$0xff] (!%p14097_p12) }
 0x7c1   : > { %12143 = vmatpush1.bf16.msra.mxu1 %v16689_v55  ;;  %v12197_v55 = vld [vmem:[#allocation10] sm:$0xff] (!%p14097_p12) }
 0x7c2   : > { %12144 = vmatprep.subr.bf16.mxu1 %v16694_v42  ;;  %v12198_v42 = vld [vmem:[#allocation10 + $0x8] sm:$0x3] (!%p14097_p12) }
 0x7c5   : > { %12145 = vmatpush1.bf16.msra.mxu1 %v16692_v22  ;;  %v12191_v22 = vld [vmem:[#allocation11 + $0x20] sm:$0xff] (!%p14097_p12) }
 0x7c6   : > { %12146 = vmatprep.subr.bf16.mxu1 %v16697_v19  ;;  %v12192_v19 = vld [vmem:[#allocation11 + $0x28] sm:$0xff] (!%p14097_p12) }
 0x7c9   : > { %12147 = vmatpush1.bf16.msra.mxu1 %v16695_v6 }
 0x7ca   : > { %12148 = vmatprep.subr.bf16.mxu1 %v16700_v56  ;;  %v12204_v56 = vrot.slane (!%p14097_p12), %v12197_v55, %v18062_v45 }
 0x7cd   : > { %12149 = vmatpush1.bf16.msra.mxu1 %v16698_v47  ;;  %v12208_v47 = vrot.slane (!%p14097_p12), %v12197_v55, %v17987_v41 }
 0x7ce   : > { %12150 = vmatprep.subr.bf16.mxu1 %v16703_v53  ;;  %v12212_v53 = vrot.slane (!%p14097_p12), %v12197_v55, %v1208_v26  ;;  %v12236_v26 = vrot.slane (!%p14097_p12), %v12198_v42, %v18062_v45 }
 0x7d1   : > { %12151 = vmatpush1.bf16.msra.mxu1 %v16701_v14  ;;  %v12216_v14 = vrot.slane (!%p14097_p12), %v12197_v55, %v1212_v2  ;;  %v12251_v2 = vadd.f32 (!%p14097_p12), %v12204_v56, %v12187_v57 }
 0x7d2   : > { %12152 = vmatprep.subr.bf16.mxu1 %v16706_v62 }
 0x7d5   : > { %12153 = vmatpush1.bf16.msra.mxu1 %v16704_v34 }
 0x7d8   : > { %12155 = vmatmul.mubr.bf16.vlgmr.msra.gmra.mrb[64].mxu1 %v18527_v8 }
 0x7eb   : > { %v11910_v58 = vpop.f32.mrb[52].mxu1 }
 0x7ec   : > { %v11911_v63 = vadd.f32 %v11910_v58, %v11870_v54  ;;  %v12115_v5 = vpop.f32.mrb[48].mxu0  ;;  %v11912_v48 = vpop.f32.mrb[53].mxu1  ;;  %v6327_v54 = vld [vmem:[#allocation11 + $0x48] sm:$0xff] }
 0x7ed   : > { %v11913_v11 = vadd.f32 %v11912_v48, %v11872_v61  ;;  %v12117_v15 = vpop.f32.mrb[49].mxu0  ;;  %v11914_v0 = vpop.f32.mrb[54].mxu1  ;;  %v12228_v48 = vrot.slane (!%p14097_p12), %v12197_v55, %v1224_v36 }
 0x7ee   : > { %v11952_v29 = vadd.f32 %v19110_v39, %v11911_v63  ;;  %v12119_v1 = vpop.f32.mrb[50].mxu0  ;;  %v11915_v4 = vpop.f32.mrb[55].mxu1  ;;  %v12220_v63 = vrot.slane (!%p14097_p12), %v12197_v55, %v1216_v21  ;;  %v12253_v0 = vadd.f32 (!%p14097_p12), %v12212_v53, %v12189_v13 }
 0x7ef   : > { %v11954_v7 = vadd.f32 %v19113_v51, %v11913_v11  ;;  %v12120_v49 = vpop.f32.mrb[51].mxu0  ;;  %v12240_v11 = vrot.slane (!%p14097_p12), %v12198_v42, %v17987_v41 }
 0x7f0   : > { %v12169_v23 = vadd.f32 %v11952_v29, %v6324_v12  ;;  %v12232_v12 = vrot.slane (!%p14097_p12), %v12197_v55, %v1228_v25  ;;  %v12254_v29 = vadd.f32 (!%p14097_p12), %v12216_v14, %v12190_v30 }
 0x7f1   : > { %v12170_v24 = vadd.f32 %v11954_v7, %v6325_v46  ;;  %v12255_v46 = vadd.f32 (!%p14097_p12), %v12220_v63, %v12191_v22 }
 0x7f2   : > { %12179 = vst [vmem:[#allocation11 + $0x30] sm:$0xff] %v12169_v23 }
 0x7f3   : > { %12180 = vst [vmem:[#allocation11 + $0x38] sm:$0xff] %v12170_v24  ;;  %v12261_v49 = vmax.f32 (!%p14097_p12), %v12251_v2, %v12255_v46 }
 0x7f9   : > { %v12193_v6 = vld [vmem:[#allocation11 + $0x30] sm:$0xff] (!%p14097_p12) }
 0x7fa   : > { %v12194_v62 = vld [vmem:[#allocation11 + $0x38] sm:$0xff] (!%p14097_p12)  ;;  %v12257_v21 = vadd.f32 (!%p14097_p12), %v12228_v48, %v12193_v6 }
 0x7fb   : > { %v12258_v4 = vadd.f32 (!%p14097_p12), %v12232_v12, %v12194_v62 }
 0x7fc   : > { %v12263_v36 = vmax.f32 (!%p14097_p12), %v12253_v0, %v12257_v21 }
 0x7fd   : > { %v12264_v24 = vmax.f32 (!%p14097_p12), %v12254_v29, %v12258_v4 }
 0x82b   : > { %v11992_v8 = vpop.f32.mrb[56].mxu1 }
 0x82c   : > { %v12034_v9 = vadd.f32 %v19150_v52, %v11992_v8  ;;  %v11994_v44 = vpop.f32.mrb[57].mxu1  ;;  %v12268_v8 = vmax.f32 (!%p14097_p12), %v12263_v36, %v12264_v24 }
 0x82d   : > { %v12036_v38 = vadd.f32 %v19153_v33, %v11994_v44  ;;  %v11996_v16 = vpop.f32.mrb[58].mxu1 }
 0x82e   : > { %v11997_v43 = vpop.f32.mrb[59].mxu1 }
 0x86b   : > { %v12074_v10 = vpop.f32.mrb[60].mxu1 }
 0x86c   : > { %v12075_v39 = vadd.f32 %v12074_v10, %v12034_v9  ;;  %v12076_v27 = vpop.f32.mrb[61].mxu1 }
 0x86d   : > { %v12077_v28 = vadd.f32 %v12076_v27, %v12036_v38  ;;  %v12078_v50 = vpop.f32.mrb[62].mxu1 }
 0x86e   : > { %v12079_v40 = vpop.f32.mrb[63].mxu1  ;;  %v12116_v51 = vadd.f32 %v12115_v5, %v12075_v39  ;;  %v12224_v5 = vrot.slane (!%p14097_p12), %v12197_v55, %v1220_v18 }
 0x86f   : > { %v12118_v3 = vadd.f32 %v12117_v15, %v12077_v28  ;;  %v12252_v15 = vadd.f32 (!%p14097_p12), %v12208_v47, %v12188_v37 }
 0x870   : > { %v12256_v1 = vadd.f32 (!%p14097_p12), %v12224_v5, %v12192_v19 }
 0x872   : > { %v12262_v23 = vmax.f32 (!%p14097_p12), %v12252_v15, %v12256_v1 }
 0x8ab   : > { %v12156_v31 = vpop.f32.mrb[64].mxu1  ;;  %12186 = sbr.rel (%p14097_p12) target bundleno = 2577 (0xa11), region = 68 }
 0x8ac   : > { %v12157_v17 = vadd.f32 %v12156_v31, %v12116_v51  ;;  %v12158_v60 = vpop.f32.mrb[65].mxu1 }
 0x8ad   : > { %v12159_v61 = vadd.f32 %v12158_v60, %v12118_v3  ;;  %v12160_v52 = vpop.f32.mrb[66].mxu1 }
 0x8ae   : > { %v12171_v20 = vadd.f32 %v12157_v17, %v6326_v32  ;;  %v12161_v59 = vpop.f32.mrb[67].mxu1 }
 0x8af   : > { %v12172_v33 = vadd.f32 %v12159_v61, %v6327_v54 }
 0x8b0   : > { %12181 = vst [vmem:[#allocation11 + $0x40] sm:$0xff] %v12171_v20 }
 0x8b1   : > { %12182 = vst [vmem:[#allocation11 + $0x48] sm:$0xff] %v12172_v33 }
 0x8b7   : > { %v12195_v34 = vld [vmem:[#allocation11 + $0x40] sm:$0xff] }
 0x8b8   : > { %v12196_v58 = vld [vmem:[#allocation11 + $0x48] sm:$0xff]  ;;  %v12259_v7 = vadd.f32 %v12236_v26, %v12195_v34 }
 0x8b9   : > { %v12260_v18 = vadd.f32 %v12240_v11, %v12196_v58 }
 0x8ba   : > { %v12265_v35 = vmax.f32 %v12261_v49, %v12259_v7 }
 0x8bb   : > { %v12266_v25 = vmax.f32 %v12262_v23, %v12260_v18 }
 0x8bd   : > { %v12267_v45 = vmax.f32 %v12265_v35, %v12266_v25 }
 0x8bf   : > { %v12269_v9 = vmax.f32 %v12267_v45, %v12268_v8 }
 0x8c1   : > { %12270 = vmax.xlane.f32.xlu0 %v12269_v9 }
 0x94e   : > { %v12271_v41 = vpop.xlane.xlu0 %12270 }
 0x94f   : > { %v12272_v44 = vsub.f32 %v12251_v2, %v12271_v41  ;;  %v12273_v38 = vsub.f32 %v12252_v15, %v12271_v41  ;;  %v12274_v16 = vsub.f32 %v12253_v0, %v12271_v41  ;;  %v12275_v43 = vsub.f32 %v12254_v29, %v12271_v41 }
 0x950   : > { %v12276_v27 = vsub.f32 %v12255_v46, %v12271_v41  ;;  %v12277_v50 = vsub.f32 %v12256_v1, %v12271_v41  ;;  %v12278_v51 = vsub.f32 %v12257_v21, %v12271_v41  ;;  %v12279_v32 = vsub.f32 %v12258_v4, %v12271_v41 }
 0x951   : > { %v12282_v10 = vmul.f32 1.442695, %v12272_v44  ;;  %v12284_v39 = vmul.f32 1.442695, %v12273_v38  ;;  %v12286_v28 = vmul.f32 1.442695, %v12274_v16  ;;  %v12280_v17 = vsub.f32 %v12259_v7, %v12271_v41 }
 0x952   : > { %v12288_v40 = vmul.f32 1.442695, %v12275_v43  ;;  %v12290_v3 = vmul.f32 1.442695, %v12276_v27  ;;  %v12292_v31 = vmul.f32 1.442695, %v12277_v50  ;;  %v12281_v60 = vsub.f32 %v12260_v18, %v12271_v41 }
 0x953   : > { %16709 = vpow2.f32 %v12282_v10  ;;  %v12294_v54 = vmul.f32 1.442695, %v12278_v51  ;;  %v12296_v61 = vmul.f32 1.442695, %v12279_v32  ;;  %v12298_v59 = vmul.f32 1.442695, %v12280_v17 }
 0x954   : > { %16711 = vpow2.f32 %v12284_v39  ;;  %v12300_v37 = vmul.f32 1.442695, %v12281_v60 }
 0x955   : > { %16713 = vpow2.f32 %v12286_v28 }
 0x956   : > { %16715 = vpow2.f32 %v12288_v40 }
 0x957   : > { %16717 = vpow2.f32 %v12290_v3 }
 0x958   : > { %16719 = vpow2.f32 %v12292_v31 }
 0x959   : > { %16721 = vpow2.f32 %v12294_v54 }
 0x95a   : > { %16723 = vpow2.f32 %v12296_v61 }
 0x95b   : > { %16725 = vpow2.f32 %v12298_v59 }
 0x95c   : > { %16727 = vpow2.f32 %v12300_v37 }
 0x95d   : > { %v16710_v52 = vpop.eup %16709 }
 0x95e   : > { %v16712_v20 = vpop.eup %16711 }
 0x95f   : > { %v12302_v33 = vadd.f32 %v16712_v20, %v16710_v52  ;;  %v16714_v57 = vpop.eup %16713 }
 0x960   : > { %v16716_v30 = vpop.eup %16715 }
 0x961   : > { %v12303_v13 = vadd.f32 %v16714_v57, %v12302_v33  ;;  %v16718_v42 = vpop.eup %16717 }
 0x962   : > { %v16720_v19 = vpop.eup %16719 }
 0x963   : > { %v12304_v55 = vadd.f32 %v16716_v30, %v12303_v13  ;;  %v16722_v56 = vpop.eup %16721 }
 0x964   : > { %v16724_v53 = vpop.eup %16723 }
 0x965   : > { %v12305_v22 = vadd.f32 %v16718_v42, %v12304_v55  ;;  %v16726_v62 = vpop.eup %16725 }
 0x966   : > { %v16728_v58 = vpop.eup %16727 }
 0x967   : > { %v12306_v6 = vadd.f32 %v16720_v19, %v12305_v22 }
 0x969   : > { %v12307_v47 = vadd.f32 %v16722_v56, %v12306_v6 }
 0x96b   : > { %v12308_v14 = vadd.f32 %v16724_v53, %v12307_v47 }
 0x96d   : > { %v12309_v34 = vadd.f32 %v16726_v62, %v12308_v14 }
 0x96f   : > { %v12310_v63 = vadd.f32 %v16728_v58, %v12309_v34 }
 0x971   : > { %12311 = vadd.xlane.f32.xlu0 %v12310_v63 }
 0x9fe   : > { %v12312_v5 = vpop.xlane.xlu0 %12311 }
 0x9ff   : > { %16729 = vrcp.f32 %v12312_v5 }
 0xa09   : > { %v16730_v48 = vpop.eup %16729 }
 0xa0a   : > { %v12314_v12 = vmul.f32 %v16730_v48, %v16710_v52  ;;  %v12315_v26 = vmul.f32 %v16730_v48, %v16712_v20  ;;  %v12316_v11 = vmul.f32 %v16730_v48, %v16714_v57  ;;  %v12317_v2 = vmul.f32 %v16730_v48, %v16716_v30 }
 0xa0b   : > { %v12318_v15 = vmul.f32 %v16730_v48, %v16718_v42  ;;  %v12319_v0 = vmul.f32 %v16730_v48, %v16720_v19  ;;  %v12320_v29 = vmul.f32 %v16730_v48, %v16722_v56  ;;  %v12321_v46 = vmul.f32 %v16730_v48, %v16724_v53 }
 0xa0c   : > { %v12322_v1 = vmul.f32 %v16730_v48, %v16726_v62  ;;  %v12323_v21 = vmul.f32 %v16730_v48, %v16728_v58  ;;  %12324 = vst [vmem:[#allocation11] sm:$0xff] %v12314_v12  ;;  %12325 = vst [vmem:[#allocation11 + $0x8] sm:$0xff] %v12315_v26 }
 0xa0d   : > { %12326 = vst [vmem:[#allocation11 + $0x10] sm:$0xff] %v12316_v11  ;;  %12327 = vst [vmem:[#allocation11 + $0x18] sm:$0xff] %v12317_v2 }
 0xa0e   : > { %12328 = vst [vmem:[#allocation11 + $0x20] sm:$0xff] %v12318_v15  ;;  %12329 = vst [vmem:[#allocation11 + $0x28] sm:$0xff] %v12319_v0 }
 0xa0f   : > { %12330 = vst [vmem:[#allocation11 + $0x30] sm:$0xff] %v12320_v29  ;;  %12331 = vst [vmem:[#allocation11 + $0x38] sm:$0xff] %v12321_v46 }
 0xa10   : > { %12332 = vst [vmem:[#allocation11 + $0x40] sm:$0xff] %v12322_v1  ;;  %12333 = vst [vmem:[#allocation11 + $0x48] sm:$0xff] %v12323_v21 }
 0xa11 PF: > { %p14241_p11 = scmp.eq.s32.totalorder %s17039_s24, 3  ;;  %s16979_s21 = smov [#allocation11]  }
 0xa12   : > { %s12344_s26 = sshll.u32 %s16979_s21, 4  ;;  %s12345_s26 = int_to_ptr.vmem [resolvable:$true] %s12344_s26 }
 0xa13   : > { %s16877_s12 = scalar_lea.vmem %s12345_s26, 1280  ;;  %p16884_p6 = scmp.lt.s32.totalorder %s12345_s26, %s12345_s26 }
 0xa14   : > { %p16878_p0 = scmp.ne.s32.totalorder %s12345_s26, %s16877_s12  ;;  %p16885_p8 = scmp.lt.s32.totalorder %s16877_s12, %s16877_s12 }
 0xa16   : > { %p16879_p7 = pnand %p16878_p0, %p14241_p11  ;;  %p16886_p13 = por %p16885_p8, %p16884_p6 }
 0xa18   : > { %p16880_p10 = pneg %p16879_p7 }
 0xa1a   : > { %p16887_p3 = pnand %p16886_p13, %p16880_p10 }
 0xa1c   : > { %16890 = shalt.err (!%p16887_p3)
}
 0xa1d   : > { %s19285_s16 = sld [smem:[#allocation21_spill]] }
 0xa23   : > { %s16891_s28 = scalar_lea.hbm %s19285_s16, 1280 }
 0xa24   : > { %p16892_p1 = scmp.ne.s32.totalorder %s19285_s16, %s16891_s28  ;;  %p16897_p5 = scmp.lt.u32.totalorder %s16891_s28, %s19285_s16 }
 0xa26   : > { %p16893_p4 = pnand %p16892_p1, %p14241_p11 }
 0xa28   : > { %p16894_p9 = pneg %p16893_p4 }
 0xa2a   : > { %p16899_p2 = pnand %p16897_p5, %p16894_p9 }
 0xa2c   : > { %16902 = shalt.err (!%p16899_p2)
}
 0xa2d   : > { %14215 = dma.vmem_to_hbm [thread:$0]  (%p14241_p11), %s12345_s26, 1280, %s19285_s16, [#allocation4]  }
 0xa2e   : > { %16944 = dma.done.wait (%p14241_p11), [#allocation4], 1280  }
 0xa2f   : > { %16946 = vsyncadd (%p14241_p11), [#allocation4], 4294966016 }
 0xa30 PF: > { %s23_s23 = sadd.s32 1, %s16969_s23   ;;  %s19286_s15 = sld [smem:[#allocation18_spill]] }
 0xa31   : > { %p20_p12 = scmp.ge.s32.totalorder %s23_s23, 6   ;;  %s19287_s7 = sld [smem:[#allocation17_spill]] }
 0xa32   : > { %s19288_s18 = smov %s16953_s19  ;;  %s19289_s19 = smov %s16957_s20 }
 0xa33   : > { %s19291_s21 = smov %s16965_s22  ;;  %22 = sbr.rel (!%p20_p12) target bundleno = 12 (0xc), region = 119 }
 0xa36   : > { %s19290_s20 = smov %s19286_s15 }
 0xa37   : > { %s19292_s22 = smov %s19287_s7 }
 0xa3a   :  { %12357 = vsyncpa [#allocation3], 1 }
 0xa3b   :  { %12359 = vsyncpa [#allocation3 + $0x1], 1 }
 0xa3c   :  { %12360 = vsyncpa [#allocation6], 1 }
 0xa3d   :  { %12362 = vsyncpa [#allocation6 + $0x1], 1 }
 0xa3e   :  { %12363 = vsyncpa [#allocation9], 1 }
 0xa3f   :  { %12365 = vsyncpa [#allocation9 + $0x1], 1 }
 0xa40   :  { %12366 = vsyncpa [#allocation4], 1 }
 0xa41   :  { %12368 = vsyncpa [#allocation4 + $0x1], 1 }

</bundles_post_ra>
